<compile_context>
chip_gen: v6e
topology: v6e:2x2x1
jax: 0.10.0
libtpu: 0.0.40
codegen_flags: <defaults>
</compile_context>

<pallas_src>
import functools

import numpy as np
import jax
import jax.numpy as jnp
from jax.experimental import pallas as pl
from jax.experimental.pallas import tpu as pltpu


# dtype fed to the MXU (accumulation is always fp32).
_MXU_DTYPE = jnp.bfloat16


# ----------------------------------------------------------------------------
# Host-side (numpy, trace-time) constant builders: resize + conv tap selectors.
# ----------------------------------------------------------------------------
def _round8(v):
    return ((v + 7) // 8) * 8


def _bilinear_matrix(in_size, out_size):
    # 1-D weights of F.interpolate(mode='bilinear', align_corners=False).
    scale = in_size / out_size
    i = np.arange(out_size, dtype=np.float64)
    src = np.maximum((i + 0.5) * scale - 0.5, 0.0)
    i0 = np.minimum(np.floor(src).astype(np.int64), in_size - 1)
    i1 = np.minimum(i0 + 1, in_size - 1)
    frac = src - i0
    A = np.zeros((out_size, in_size), dtype=np.float64)
    A[np.arange(out_size), i0] += 1.0 - frac
    A[np.arange(out_size), i1] += frac
    return A


def _conv_s2_selectors(hi, wi):
    # 0/1 tap-selection matrices for Conv2d(k=3, stride=2, padding=1):
    #   S[t, oh*wo+ow, ih*wi+iw] = 1 with ih = 2*oh+kh-1, iw = 2*ow+kw-1,
    #   out-of-bounds taps stay all-zero (zero padding).
    ho = (hi - 1) // 2 + 1
    wo = (wi - 1) // 2 + 1
    S = np.zeros((9, ho * wo, hi * wi), dtype=np.float64)
    for kh in range(3):
        for kw in range(3):
            t = kh * 3 + kw
            for oh in range(ho):
                ih = 2 * oh + kh - 1
                if ih < 0 or ih >= hi:
                    continue
                for ow in range(wo):
                    iw = 2 * ow + kw - 1
                    if iw < 0 or iw >= wi:
                        continue
                    S[t, oh * wo + ow, ih * wi + iw] = 1.0
    return S, (ho, wo)


@functools.lru_cache(maxsize=None)
def _layer0_taps(shuf_hw, target_hw):
    # Fused (bilinear resize -> first-conv tap selection), K-stacked along columns:
    #   sel[m, t*K + k] = (S_t @ kron(Ah, Aw))[m, k],   K = h2*w2 (shuffled raster).
    h2, w2 = shuf_hw
    th, tw = target_hw
    A = np.kron(_bilinear_matrix(h2, th), _bilinear_matrix(w2, tw))   # (th*tw, h2*w2)
    S, out_hw = _conv_s2_selectors(th, tw)
    G = S @ A                                                         # (9, ho*wo, h2*w2)
    m_true = out_hw[0] * out_hw[1]
    m_pad = _round8(m_true)
    k = h2 * w2
    sel = np.zeros((m_pad, 9 * k), np.float32)
    for t in range(9):
        sel[:m_true, t * k:(t + 1) * k] = G[t]
    return sel, out_hw, m_pad


@functools.lru_cache(maxsize=None)
def _conv_taps(in_hw, k_pad):
    # Tap selection for an inner conv, K-stacked against the PADDED previous rows:
    #   sel[m, t*k_pad + k] = S_t[m, k];  columns for padded rows (k >= hi*wi) stay 0.
    S, out_hw = _conv_s2_selectors(*in_hw)
    m_true = out_hw[0] * out_hw[1]
    m_pad = _round8(m_true)
    k_true = in_hw[0] * in_hw[1]
    sel = np.zeros((m_pad, 9 * k_pad), np.float32)
    for t in range(9):
        sel[:m_true, t * k_pad:t * k_pad + k_true] = S[t]
    return sel, out_hw, m_pad


def _build_branch_constants(shuf_hw, target_hw, num_layers):
    sel, out_hw, m_pad = _layer0_taps(shuf_hw, target_hw)
    layers = [(sel, out_hw)]
    for _ in range(1, num_layers):
        sel, out_hw, m_pad = _conv_taps(out_hw, m_pad)
        layers.append((sel, out_hw))
    return layers


# ----------------------------------------------------------------------------
# Pallas kernel: all three branches fused (resize + conv chains + bias + ReLU).
# ----------------------------------------------------------------------------
def _fused_kernel(*refs, branch_layers):
    # refs = (x1_rows, x2_rows, x3_rows, [sel, w, b] per layer per branch..., o1, o2, o3)
    nb = len(branch_layers)
    x_refs = refs[:nb]
    out_refs = refs[len(refs) - nb:]
    c_refs = refs[nb:len(refs) - nb]

    ci = 0
    for br, n_layers in enumerate(branch_layers):
        cur = x_refs[br][0]                                  # (K0, Cin0), bf16
        for l in range(n_layers):
            sel_ref = c_refs[ci]                             # (Mp, 9*K)     bf16
            w_ref = c_refs[ci + 1]                           # (Cin, 9*Cout) bf16
            b_ref = c_refs[ci + 2]                           # (1, Cout)     fp32
            ci += 3
            cout = b_ref.shape[1]

            # (1) Single wide weight GEMM, fp32 accumulation, N = 9*Cout lane-dense.
            y = jnp.dot(cur, w_ref[...], preferred_element_type=jnp.float32)
            y = y.astype(_MXU_DTYPE)                         # (K, 9*Cout)

            # (2) K-stack the 9 taps (free 128-lane slices + sublane concatenate),
            #     then one selection GEMM does the tap accumulation on the MXU.
            y_stk = jnp.concatenate(
                [y[:, t * cout:(t + 1) * cout] for t in range(9)], axis=0)  # (9K, Cout)
            acc = jnp.dot(sel_ref[...], y_stk, preferred_element_type=jnp.float32)
            acc = acc + b_ref[...]                           # fp32 bias add

            if l + 1 == n_layers:
                out_refs[br][0] = jnp.maximum(acc, 0.0).astype(out_refs[br].dtype)
            else:
                cur = acc.astype(_MXU_DTYPE)                 # no activation between convs


# ----------------------------------------------------------------------------
# Wrappers (layout glue + pallas_call construction).
# ----------------------------------------------------------------------------
def _prep_weight(w):
    # torch layout (Cout, Cin, 3, 3) -> (Cin, 9*Cout), column index = t*Cout + co.
    cout, cin = w.shape[0], w.shape[1]
    wm = jnp.transpose(jnp.reshape(w, (cout, cin, 9)), (1, 2, 0))
    return jnp.reshape(wm, (cin, 9 * cout)).astype(_MXU_DTYPE)


def _shuffle_to_rows(x, r=2):
    # PixelShuffle(r) + NHWC flatten: (N, C*r*r, H, W) -> (N, (H*r)*(W*r), C).
    # bf16 cast happens BEFORE the permutation to halve the transpose bytes.
    n, c, h, w = x.shape
    co = c // (r * r)
    x = x.astype(_MXU_DTYPE).reshape(n, co, r, r, h, w).transpose(0, 4, 2, 5, 3, 1)
    return x.reshape(n, h * r * w * r, co)


def pixel_shuffle_converter(params, x1, x2, x3):
    chains = [
        [params["conv1"]],
        [params["conv2_0"], params["conv2_1"]],
        [params["conv3_0"], params["conv3_1"], params["conv3_2"]],
    ]
    xs = [x1, x2, x3]
    n = x1.shape[0]
    shuf_hws = [(2 * x.shape[2], 2 * x.shape[3]) for x in xs]
    # target size derives from x1, exactly as in the torch forward.
    target_hw = (7 * (shuf_hws[0][0] // 2), 7 * (shuf_hws[0][1] // 2))

    inputs, in_specs = [], []
    for x in xs:
        rows = _shuffle_to_rows(x)
        _, s, c = rows.shape
        inputs.append(rows)
        in_specs.append(pl.BlockSpec((1, s, c), lambda i: (i, 0, 0)))

    branch_layers, out_meta = [], []
    for hw, chain in zip(shuf_hws, chains):
        consts = _build_branch_constants(hw, target_hw, len(chain))
        branch_layers.append(len(chain))
        for (sel, _), (w, b) in zip(consts, chain):
            sel_j = jnp.asarray(sel, dtype=_MXU_DTYPE)
            w_j = _prep_weight(w)
            b_j = jnp.reshape(b, (1, -1)).astype(jnp.float32)
            inputs += [sel_j, w_j, b_j]
            # Grid-invariant constant blocks: fetched once, reused every grid step.
            in_specs += [pl.BlockSpec(sel_j.shape, lambda i: (0, 0)),
                         pl.BlockSpec(w_j.shape, lambda i: (0, 0)),
                         pl.BlockSpec(b_j.shape, lambda i: (0, 0))]
        m_pad = consts[-1][0].shape[0]
        ho, wo = consts[-1][1]
        cout = chain[-1][1].shape[0]
        out_meta.append((m_pad, ho, wo, cout))

    out_shape = tuple(jax.ShapeDtypeStruct((n, mp, co), jnp.float32)
                      for mp, _, _, co in out_meta)
    out_specs = [pl.BlockSpec((1, mp, co), lambda i: (i, 0, 0))
                 for mp, _, _, co in out_meta]

    outs = pl.pallas_call(
        functools.partial(_fused_kernel, branch_layers=tuple(branch_layers)),
        grid=(n,),
        in_specs=in_specs,
        out_specs=out_specs,
        out_shape=out_shape,
        compiler_params=pltpu.CompilerParams(dimension_semantics=("parallel",)),
    )(*inputs)

    # Crop row padding and convert lane-dense NHWC slabs to NCHW once per branch.
    results = []
    for o, (mp, ho, wo, co) in zip(outs, out_meta):
        results.append(o[:, :ho * wo, :].reshape(n, ho, wo, co).transpose(0, 3, 1, 2))
    return results


# ----------------------------------------------------------------------------
# Parameters + pure-JAX fp32 reference (for the built-in sanity check).
# ----------------------------------------------------------------------------
def init_params(key):
    def conv_params(k, cout, cin, ksz=3):
        k1, k2 = jax.random.split(k)
        bound = 1.0 / np.sqrt(cin * ksz * ksz)
        w = jax.random.uniform(k1, (cout, cin, ksz, ksz), jnp.float32, -bound, bound)
        b = jax.random.uniform(k2, (cout,), jnp.float32, -bound, bound)
        return w, b

    ks = jax.random.split(key, 6)
    return {
        "conv1":   conv_params(ks[0], 128, 256),
        "conv2_0": conv_params(ks[1], 128, 256),
        "conv2_1": conv_params(ks[2], 128, 128),
        "conv3_0": conv_params(ks[3], 128, 256),
        "conv3_1": conv_params(ks[4], 128, 128),
        "conv3_2": conv_params(ks[5], 128, 128),
    }


def _reference(params, x1, x2, x3):
    def shuffle(x):
        n, c, h, w = x.shape
        co = c // 4
        return (x.reshape(n, co, 2, 2, h, w).transpose(0, 1, 4, 2, 5, 3)
                 .reshape(n, co, 2 * h, 2 * w))

    def resize(x, th, tw):
        Ah = jnp.asarray(_bilinear_matrix(x.shape[2], th), jnp.float32)
        Aw = jnp.asarray(_bilinear_matrix(x.shape[3], tw), jnp.float32)
        return jnp.einsum('ph,nchw,qw->ncpq', Ah, x, Aw)

    def conv(x, wb):
        w, b = wb
        y = jax.lax.conv_general_dilated(
            x, w, window_strides=(2, 2), padding=((1, 1), (1, 1)),
            dimension_numbers=('NCHW', 'OIHW', 'NCHW'))
        return y + b.reshape(1, -1, 1, 1)

    chains = [
        [params["conv1"]],
        [params["conv2_0"], params["conv2_1"]],
        [params["conv3_0"], params["conv3_1"], params["conv3_2"]],
    ]
    xs = [shuffle(x1), shuffle(x2), shuffle(x3)]
    th, tw = 7 * (xs[0].shape[2] // 2), 7 * (xs[0].shape[3] // 2)
    outs = []
    for x, chain in zip(xs, chains):
        x = resize(x, th, tw)
        for wb in chain:
            x = conv(x, wb)
        outs.append(jax.nn.relu(x))
    return outs


if __name__ == "__main__":
    key = jax.random.PRNGKey(0)
    kp, k1, k2, k3 = jax.random.split(key, 4)
    params = init_params(kp)

    # 1024 input channels are required by the module (256 after PixelShuffle(2)).
    x1 = jax.random.normal(k1, (2, 1024, 4, 4), jnp.float32)
    x2 = jax.random.normal(k2, (2, 1024, 4, 4), jnp.float32)
    x3 = jax.random.normal(k3, (2, 1024, 4, 4), jnp.float32)

    outs = jax.jit(pixel_shuffle_converter)(params, x1, x2, x3)
    outs = jax.block_until_ready(outs)

    assert outs[0].shape == (2, 128, 14, 14), outs[0].shape
    assert outs[1].shape == (2, 128, 7, 7), outs[1].shape
    assert outs[2].shape == (2, 128, 4, 4), outs[2].shape
    assert all(bool(jnp.all(o >= 0.0)) for o in outs)            # ReLU applied
    assert all(bool(jnp.all(jnp.isfinite(o))) for o in outs)

    # Loose numerical check vs an fp32 XLA reference (kernel uses bf16 MXU operands).
    refs = jax.block_until_ready(jax.jit(_reference)(params, x1, x2, x3))
    for o, r in zip(outs, refs):
        rel = float(jnp.linalg.norm(o - r) / (jnp.linalg.norm(r) + 1e-6))
        assert rel < 5e-2, rel

    print("KERNEL_OK")
</pallas_src>

<mosaic_0001>
module attributes {stable_mosaic.version = 11 : i64} {
  func.func @_fused_kernel(%arg0: i32, %arg1: memref<1x64x256xbf16, #tpu.memory_space<vmem>>, %arg2: memref<1x64x256xbf16, #tpu.memory_space<vmem>>, %arg3: memref<1x64x256xbf16, #tpu.memory_space<vmem>>, %arg4: memref<200x576xbf16, #tpu.memory_space<vmem>>, %arg5: memref<256x1152xbf16, #tpu.memory_space<vmem>>, %arg6: memref<1x128xf32, #tpu.memory_space<vmem>>, %arg7: memref<200x576xbf16, #tpu.memory_space<vmem>>, %arg8: memref<256x1152xbf16, #tpu.memory_space<vmem>>, %arg9: memref<1x128xf32, #tpu.memory_space<vmem>>, %arg10: memref<56x1800xbf16, #tpu.memory_space<vmem>>, %arg11: memref<128x1152xbf16, #tpu.memory_space<vmem>>, %arg12: memref<1x128xf32, #tpu.memory_space<vmem>>, %arg13: memref<200x576xbf16, #tpu.memory_space<vmem>>, %arg14: memref<256x1152xbf16, #tpu.memory_space<vmem>>, %arg15: memref<1x128xf32, #tpu.memory_space<vmem>>, %arg16: memref<56x1800xbf16, #tpu.memory_space<vmem>>, %arg17: memref<128x1152xbf16, #tpu.memory_space<vmem>>, %arg18: memref<1x128xf32, #tpu.memory_space<vmem>>, %arg19: memref<16x504xbf16, #tpu.memory_space<vmem>>, %arg20: memref<128x1152xbf16, #tpu.memory_space<vmem>>, %arg21: memref<1x128xf32, #tpu.memory_space<vmem>>, %arg22: memref<1x200x128xf32, #tpu.memory_space<vmem>>, %arg23: memref<1x56x128xf32, #tpu.memory_space<vmem>>, %arg24: memref<1x16x128xf32, #tpu.memory_space<vmem>>) attributes {dimension_semantics = [#tpu.dimension_semantics<parallel>], iteration_bounds = array<i64: 2>, scalar_prefetch = 0 : i64, scratch_operands = 0 : i64, tpu.core_type = #tpu.core_type<tc>, window_params = [{transform_indices = @transform_0, window_bounds = array<i64: 1, 64, 256>}, {transform_indices = @transform_1, window_bounds = array<i64: 1, 64, 256>}, {transform_indices = @transform_2, window_bounds = array<i64: 1, 64, 256>}, {pipeline_mode = #tpu.pipeline_mode<synchronous>, transform_indices = @transform_3, window_bounds = array<i64: 200, 576>}, {pipeline_mode = #tpu.pipeline_mode<synchronous>, transform_indices = @transform_4, window_bounds = array<i64: 256, 1152>}, {pipeline_mode = #tpu.pipeline_mode<synchronous>, transform_indices = @transform_5, window_bounds = array<i64: 1, 128>}, {pipeline_mode = #tpu.pipeline_mode<synchronous>, transform_indices = @transform_6, window_bounds = array<i64: 200, 576>}, {pipeline_mode = #tpu.pipeline_mode<synchronous>, transform_indices = @transform_7, window_bounds = array<i64: 256, 1152>}, {pipeline_mode = #tpu.pipeline_mode<synchronous>, transform_indices = @transform_8, window_bounds = array<i64: 1, 128>}, {pipeline_mode = #tpu.pipeline_mode<synchronous>, transform_indices = @transform_9, window_bounds = array<i64: 56, 1800>}, {pipeline_mode = #tpu.pipeline_mode<synchronous>, transform_indices = @transform_10, window_bounds = array<i64: 128, 1152>}, {pipeline_mode = #tpu.pipeline_mode<synchronous>, transform_indices = @transform_11, window_bounds = array<i64: 1, 128>}, {pipeline_mode = #tpu.pipeline_mode<synchronous>, transform_indices = @transform_12, window_bounds = array<i64: 200, 576>}, {pipeline_mode = #tpu.pipeline_mode<synchronous>, transform_indices = @transform_13, window_bounds = array<i64: 256, 1152>}, {pipeline_mode = #tpu.pipeline_mode<synchronous>, transform_indices = @transform_14, window_bounds = array<i64: 1, 128>}, {pipeline_mode = #tpu.pipeline_mode<synchronous>, transform_indices = @transform_15, window_bounds = array<i64: 56, 1800>}, {pipeline_mode = #tpu.pipeline_mode<synchronous>, transform_indices = @transform_16, window_bounds = array<i64: 128, 1152>}, {pipeline_mode = #tpu.pipeline_mode<synchronous>, transform_indices = @transform_17, window_bounds = array<i64: 1, 128>}, {pipeline_mode = #tpu.pipeline_mode<synchronous>, transform_indices = @transform_18, window_bounds = array<i64: 16, 504>}, {pipeline_mode = #tpu.pipeline_mode<synchronous>, transform_indices = @transform_19, window_bounds = array<i64: 128, 1152>}, {pipeline_mode = #tpu.pipeline_mode<synchronous>, transform_indices = @transform_20, window_bounds = array<i64: 1, 128>}, {transform_indices = @transform_21, window_bounds = array<i64: 1, 200, 128>}, {transform_indices = @transform_22, window_bounds = array<i64: 1, 56, 128>}, {transform_indices = @transform_23, window_bounds = array<i64: 1, 16, 128>}]} {
    %c0 = arith.constant 0 : index
    %c0_0 = arith.constant 0 : index
    %c0_1 = arith.constant 0 : index
    %0 = vector.load %arg1[%c0, %c0_0, %c0_1] : memref<1x64x256xbf16, #tpu.memory_space<vmem>>, vector<1x64x256xbf16>
    %1 = vector.shape_cast %0 : vector<1x64x256xbf16> to vector<64x256xbf16>
    %c0_2 = arith.constant 0 : index
    %c0_3 = arith.constant 0 : index
    %2 = vector.load %arg5[%c0_2, %c0_3] : memref<256x1152xbf16, #tpu.memory_space<vmem>>, vector<256x1152xbf16>
    %cst = arith.constant dense<0.000000e+00> : vector<64x1152xf32>
    %3 = tpu.matmul %1, %2, %cst {dimension_numbers = #tpu.dot_dimension_numbers<[1], [0], [0], [1], [0, 0, 1, 1], [], []>} : vector<64x256xbf16>, vector<256x1152xbf16>, vector<64x1152xf32> -> vector<64x1152xf32>
    %4 = arith.truncf %3 : vector<64x1152xf32> to vector<64x1152xbf16>
    %5 = vector.extract_strided_slice %4 {offsets = [0, 0], sizes = [64, 128], strides = [1, 1]} : vector<64x1152xbf16> to vector<64x128xbf16>
    %6 = vector.extract_strided_slice %4 {offsets = [0, 128], sizes = [64, 128], strides = [1, 1]} : vector<64x1152xbf16> to vector<64x128xbf16>
    %7 = vector.extract_strided_slice %4 {offsets = [0, 256], sizes = [64, 128], strides = [1, 1]} : vector<64x1152xbf16> to vector<64x128xbf16>
    %8 = vector.extract_strided_slice %4 {offsets = [0, 384], sizes = [64, 128], strides = [1, 1]} : vector<64x1152xbf16> to vector<64x128xbf16>
    %9 = vector.extract_strided_slice %4 {offsets = [0, 512], sizes = [64, 128], strides = [1, 1]} : vector<64x1152xbf16> to vector<64x128xbf16>
    %10 = vector.extract_strided_slice %4 {offsets = [0, 640], sizes = [64, 128], strides = [1, 1]} : vector<64x1152xbf16> to vector<64x128xbf16>
    %11 = vector.extract_strided_slice %4 {offsets = [0, 768], sizes = [64, 128], strides = [1, 1]} : vector<64x1152xbf16> to vector<64x128xbf16>
    %12 = vector.extract_strided_slice %4 {offsets = [0, 896], sizes = [64, 128], strides = [1, 1]} : vector<64x1152xbf16> to vector<64x128xbf16>
    %13 = vector.extract_strided_slice %4 {offsets = [0, 1024], sizes = [64, 128], strides = [1, 1]} : vector<64x1152xbf16> to vector<64x128xbf16>
    %14 = tpu.concatenate %5, %6, %7, %8, %9, %10, %11, %12, %13 in 0 : vector<64x128xbf16>, vector<64x128xbf16>, vector<64x128xbf16>, vector<64x128xbf16>, vector<64x128xbf16>, vector<64x128xbf16>, vector<64x128xbf16>, vector<64x128xbf16>, vector<64x128xbf16> -> vector<576x128xbf16>
    %c0_4 = arith.constant 0 : index
    %c0_5 = arith.constant 0 : index
    %15 = vector.load %arg4[%c0_4, %c0_5] : memref<200x576xbf16, #tpu.memory_space<vmem>>, vector<200x576xbf16>
    %cst_6 = arith.constant dense<0.000000e+00> : vector<200x128xf32>
    %16 = tpu.matmul %15, %14, %cst_6 {dimension_numbers = #tpu.dot_dimension_numbers<[1], [0], [0], [1], [0, 0, 1, 1], [], []>} : vector<200x576xbf16>, vector<576x128xbf16>, vector<200x128xf32> -> vector<200x128xf32>
    %c0_7 = arith.constant 0 : index
    %c0_8 = arith.constant 0 : index
    %17 = vector.load %arg6[%c0_7, %c0_8] : memref<1x128xf32, #tpu.memory_space<vmem>>, vector<1x128xf32>
    %18 = vector.broadcast %17 : vector<1x128xf32> to vector<200x128xf32>
    %19 = arith.addf %16, %18 : vector<200x128xf32>
    %cst_9 = arith.constant 0.000000e+00 : f32
    %20 = vector.broadcast %cst_9 : f32 to vector<200x128xf32>
    %21 = arith.maximumf %19, %20 : vector<200x128xf32>
    %c0_10 = arith.constant 0 : index
    %c0_11 = arith.constant 0 : index
    %c0_12 = arith.constant 0 : index
    %22 = vector.load %arg22[%c0_10, %c0_11, %c0_12] : memref<1x200x128xf32, #tpu.memory_space<vmem>>, vector<1x200x128xf32>
    %23 = vector.shape_cast %22 : vector<1x200x128xf32> to vector<200x128xf32>
    %24 = vector.shape_cast %21 : vector<200x128xf32> to vector<1x200x128xf32>
    tpu.vector_store %arg22[%c0_10, %c0_11, %c0_12], %24 {strides = array<i32>} : memref<1x200x128xf32, #tpu.memory_space<vmem>>, vector<1x200x128xf32>,
    %c0_13 = arith.constant 0 : index
    %c0_14 = arith.constant 0 : index
    %c0_15 = arith.constant 0 : index
    %25 = vector.load %arg2[%c0_13, %c0_14, %c0_15] : memref<1x64x256xbf16, #tpu.memory_space<vmem>>, vector<1x64x256xbf16>
    %26 = vector.shape_cast %25 : vector<1x64x256xbf16> to vector<64x256xbf16>
    %c0_16 = arith.constant 0 : index
    %c0_17 = arith.constant 0 : index
    %27 = vector.load %arg8[%c0_16, %c0_17] : memref<256x1152xbf16, #tpu.memory_space<vmem>>, vector<256x1152xbf16>
    %cst_18 = arith.constant dense<0.000000e+00> : vector<64x1152xf32>
    %28 = tpu.matmul %26, %27, %cst_18 {dimension_numbers = #tpu.dot_dimension_numbers<[1], [0], [0], [1], [0, 0, 1, 1], [], []>} : vector<64x256xbf16>, vector<256x1152xbf16>, vector<64x1152xf32> -> vector<64x1152xf32>
    %29 = arith.truncf %28 : vector<64x1152xf32> to vector<64x1152xbf16>
    %30 = vector.extract_strided_slice %29 {offsets = [0, 0], sizes = [64, 128], strides = [1, 1]} : vector<64x1152xbf16> to vector<64x128xbf16>
    %31 = vector.extract_strided_slice %29 {offsets = [0, 128], sizes = [64, 128], strides = [1, 1]} : vector<64x1152xbf16> to vector<64x128xbf16>
    %32 = vector.extract_strided_slice %29 {offsets = [0, 256], sizes = [64, 128], strides = [1, 1]} : vector<64x1152xbf16> to vector<64x128xbf16>
    %33 = vector.extract_strided_slice %29 {offsets = [0, 384], sizes = [64, 128], strides = [1, 1]} : vector<64x1152xbf16> to vector<64x128xbf16>
    %34 = vector.extract_strided_slice %29 {offsets = [0, 512], sizes = [64, 128], strides = [1, 1]} : vector<64x1152xbf16> to vector<64x128xbf16>
    %35 = vector.extract_strided_slice %29 {offsets = [0, 640], sizes = [64, 128], strides = [1, 1]} : vector<64x1152xbf16> to vector<64x128xbf16>
    %36 = vector.extract_strided_slice %29 {offsets = [0, 768], sizes = [64, 128], strides = [1, 1]} : vector<64x1152xbf16> to vector<64x128xbf16>
    %37 = vector.extract_strided_slice %29 {offsets = [0, 896], sizes = [64, 128], strides = [1, 1]} : vector<64x1152xbf16> to vector<64x128xbf16>
    %38 = vector.extract_strided_slice %29 {offsets = [0, 1024], sizes = [64, 128], strides = [1, 1]} : vector<64x1152xbf16> to vector<64x128xbf16>
    %39 = tpu.concatenate %30, %31, %32, %33, %34, %35, %36, %37, %38 in 0 : vector<64x128xbf16>, vector<64x128xbf16>, vector<64x128xbf16>, vector<64x128xbf16>, vector<64x128xbf16>, vector<64x128xbf16>, vector<64x128xbf16>, vector<64x128xbf16>, vector<64x128xbf16> -> vector<576x128xbf16>
    %c0_19 = arith.constant 0 : index
    %c0_20 = arith.constant 0 : index
    %40 = vector.load %arg7[%c0_19, %c0_20] : memref<200x576xbf16, #tpu.memory_space<vmem>>, vector<200x576xbf16>
    %cst_21 = arith.constant dense<0.000000e+00> : vector<200x128xf32>
    %41 = tpu.matmul %40, %39, %cst_21 {dimension_numbers = #tpu.dot_dimension_numbers<[1], [0], [0], [1], [0, 0, 1, 1], [], []>} : vector<200x576xbf16>, vector<576x128xbf16>, vector<200x128xf32> -> vector<200x128xf32>
    %c0_22 = arith.constant 0 : index
    %c0_23 = arith.constant 0 : index
    %42 = vector.load %arg9[%c0_22, %c0_23] : memref<1x128xf32, #tpu.memory_space<vmem>>, vector<1x128xf32>
    %43 = vector.broadcast %42 : vector<1x128xf32> to vector<200x128xf32>
    %44 = arith.addf %41, %43 : vector<200x128xf32>
    %45 = arith.truncf %44 : vector<200x128xf32> to vector<200x128xbf16>
    %c0_24 = arith.constant 0 : index
    %c0_25 = arith.constant 0 : index
    %46 = vector.load %arg11[%c0_24, %c0_25] : memref<128x1152xbf16, #tpu.memory_space<vmem>>, vector<128x1152xbf16>
    %cst_26 = arith.constant dense<0.000000e+00> : vector<200x1152xf32>
    %47 = tpu.matmul %45, %46, %cst_26 {dimension_numbers = #tpu.dot_dimension_numbers<[1], [0], [0], [1], [0, 0, 1, 1], [], []>} : vector<200x128xbf16>, vector<128x1152xbf16>, vector<200x1152xf32> -> vector<200x1152xf32>
    %48 = arith.truncf %47 : vector<200x1152xf32> to vector<200x1152xbf16>
    %49 = vector.extract_strided_slice %48 {offsets = [0, 0], sizes = [200, 128], strides = [1, 1]} : vector<200x1152xbf16> to vector<200x128xbf16>
    %50 = vector.extract_strided_slice %48 {offsets = [0, 128], sizes = [200, 128], strides = [1, 1]} : vector<200x1152xbf16> to vector<200x128xbf16>
    %51 = vector.extract_strided_slice %48 {offsets = [0, 256], sizes = [200, 128], strides = [1, 1]} : vector<200x1152xbf16> to vector<200x128xbf16>
    %52 = vector.extract_strided_slice %48 {offsets = [0, 384], sizes = [200, 128], strides = [1, 1]} : vector<200x1152xbf16> to vector<200x128xbf16>
    %53 = vector.extract_strided_slice %48 {offsets = [0, 512], sizes = [200, 128], strides = [1, 1]} : vector<200x1152xbf16> to vector<200x128xbf16>
    %54 = vector.extract_strided_slice %48 {offsets = [0, 640], sizes = [200, 128], strides = [1, 1]} : vector<200x1152xbf16> to vector<200x128xbf16>
    %55 = vector.extract_strided_slice %48 {offsets = [0, 768], sizes = [200, 128], strides = [1, 1]} : vector<200x1152xbf16> to vector<200x128xbf16>
    %56 = vector.extract_strided_slice %48 {offsets = [0, 896], sizes = [200, 128], strides = [1, 1]} : vector<200x1152xbf16> to vector<200x128xbf16>
    %57 = vector.extract_strided_slice %48 {offsets = [0, 1024], sizes = [200, 128], strides = [1, 1]} : vector<200x1152xbf16> to vector<200x128xbf16>
    %58 = tpu.concatenate %49, %50, %51, %52, %53, %54, %55, %56, %57 in 0 : vector<200x128xbf16>, vector<200x128xbf16>, vector<200x128xbf16>, vector<200x128xbf16>, vector<200x128xbf16>, vector<200x128xbf16>, vector<200x128xbf16>, vector<200x128xbf16>, vector<200x128xbf16> -> vector<1800x128xbf16>
    %c0_27 = arith.constant 0 : index
    %c0_28 = arith.constant 0 : index
    %59 = vector.load %arg10[%c0_27, %c0_28] : memref<56x1800xbf16, #tpu.memory_space<vmem>>, vector<56x1800xbf16>
    %cst_29 = arith.constant dense<0.000000e+00> : vector<56x128xf32>
    %60 = tpu.matmul %59, %58, %cst_29 {dimension_numbers = #tpu.dot_dimension_numbers<[1], [0], [0], [1], [0, 0, 1, 1], [], []>} : vector<56x1800xbf16>, vector<1800x128xbf16>, vector<56x128xf32> -> vector<56x128xf32>
    %c0_30 = arith.constant 0 : index
    %c0_31 = arith.constant 0 : index
    %61 = vector.load %arg12[%c0_30, %c0_31] : memref<1x128xf32, #tpu.memory_space<vmem>>, vector<1x128xf32>
    %62 = vector.broadcast %61 : vector<1x128xf32> to vector<56x128xf32>
    %63 = arith.addf %60, %62 : vector<56x128xf32>
    %cst_32 = arith.constant 0.000000e+00 : f32
    %64 = vector.broadcast %cst_32 : f32 to vector<56x128xf32>
    %65 = arith.maximumf %63, %64 : vector<56x128xf32>
    %c0_33 = arith.constant 0 : index
    %c0_34 = arith.constant 0 : index
    %c0_35 = arith.constant 0 : index
    %66 = vector.load %arg23[%c0_33, %c0_34, %c0_35] : memref<1x56x128xf32, #tpu.memory_space<vmem>>, vector<1x56x128xf32>
    %67 = vector.shape_cast %66 : vector<1x56x128xf32> to vector<56x128xf32>
    %68 = vector.shape_cast %65 : vector<56x128xf32> to vector<1x56x128xf32>
    tpu.vector_store %arg23[%c0_33, %c0_34, %c0_35], %68 {strides = array<i32>} : memref<1x56x128xf32, #tpu.memory_space<vmem>>, vector<1x56x128xf32>,
    %c0_36 = arith.constant 0 : index
    %c0_37 = arith.constant 0 : index
    %c0_38 = arith.constant 0 : index
    %69 = vector.load %arg3[%c0_36, %c0_37, %c0_38] : memref<1x64x256xbf16, #tpu.memory_space<vmem>>, vector<1x64x256xbf16>
    %70 = vector.shape_cast %69 : vector<1x64x256xbf16> to vector<64x256xbf16>
    %c0_39 = arith.constant 0 : index
    %c0_40 = arith.constant 0 : index
    %71 = vector.load %arg14[%c0_39, %c0_40] : memref<256x1152xbf16, #tpu.memory_space<vmem>>, vector<256x1152xbf16>
    %cst_41 = arith.constant dense<0.000000e+00> : vector<64x1152xf32>
    %72 = tpu.matmul %70, %71, %cst_41 {dimension_numbers = #tpu.dot_dimension_numbers<[1], [0], [0], [1], [0, 0, 1, 1], [], []>} : vector<64x256xbf16>, vector<256x1152xbf16>, vector<64x1152xf32> -> vector<64x1152xf32>
    %73 = arith.truncf %72 : vector<64x1152xf32> to vector<64x1152xbf16>
    %74 = vector.extract_strided_slice %73 {offsets = [0, 0], sizes = [64, 128], strides = [1, 1]} : vector<64x1152xbf16> to vector<64x128xbf16>
    %75 = vector.extract_strided_slice %73 {offsets = [0, 128], sizes = [64, 128], strides = [1, 1]} : vector<64x1152xbf16> to vector<64x128xbf16>
    %76 = vector.extract_strided_slice %73 {offsets = [0, 256], sizes = [64, 128], strides = [1, 1]} : vector<64x1152xbf16> to vector<64x128xbf16>
    %77 = vector.extract_strided_slice %73 {offsets = [0, 384], sizes = [64, 128], strides = [1, 1]} : vector<64x1152xbf16> to vector<64x128xbf16>
    %78 = vector.extract_strided_slice %73 {offsets = [0, 512], sizes = [64, 128], strides = [1, 1]} : vector<64x1152xbf16> to vector<64x128xbf16>
    %79 = vector.extract_strided_slice %73 {offsets = [0, 640], sizes = [64, 128], strides = [1, 1]} : vector<64x1152xbf16> to vector<64x128xbf16>
    %80 = vector.extract_strided_slice %73 {offsets = [0, 768], sizes = [64, 128], strides = [1, 1]} : vector<64x1152xbf16> to vector<64x128xbf16>
    %81 = vector.extract_strided_slice %73 {offsets = [0, 896], sizes = [64, 128], strides = [1, 1]} : vector<64x1152xbf16> to vector<64x128xbf16>
    %82 = vector.extract_strided_slice %73 {offsets = [0, 1024], sizes = [64, 128], strides = [1, 1]} : vector<64x1152xbf16> to vector<64x128xbf16>
    %83 = tpu.concatenate %74, %75, %76, %77, %78, %79, %80, %81, %82 in 0 : vector<64x128xbf16>, vector<64x128xbf16>, vector<64x128xbf16>, vector<64x128xbf16>, vector<64x128xbf16>, vector<64x128xbf16>, vector<64x128xbf16>, vector<64x128xbf16>, vector<64x128xbf16> -> vector<576x128xbf16>
    %c0_42 = arith.constant 0 : index
    %c0_43 = arith.constant 0 : index
    %84 = vector.load %arg13[%c0_42, %c0_43] : memref<200x576xbf16, #tpu.memory_space<vmem>>, vector<200x576xbf16>
    %cst_44 = arith.constant dense<0.000000e+00> : vector<200x128xf32>
    %85 = tpu.matmul %84, %83, %cst_44 {dimension_numbers = #tpu.dot_dimension_numbers<[1], [0], [0], [1], [0, 0, 1, 1], [], []>} : vector<200x576xbf16>, vector<576x128xbf16>, vector<200x128xf32> -> vector<200x128xf32>
    %c0_45 = arith.constant 0 : index
    %c0_46 = arith.constant 0 : index
    %86 = vector.load %arg15[%c0_45, %c0_46] : memref<1x128xf32, #tpu.memory_space<vmem>>, vector<1x128xf32>
    %87 = vector.broadcast %86 : vector<1x128xf32> to vector<200x128xf32>
    %88 = arith.addf %85, %87 : vector<200x128xf32>
    %89 = arith.truncf %88 : vector<200x128xf32> to vector<200x128xbf16>
    %c0_47 = arith.constant 0 : index
    %c0_48 = arith.constant 0 : index
    %90 = vector.load %arg17[%c0_47, %c0_48] : memref<128x1152xbf16, #tpu.memory_space<vmem>>, vector<128x1152xbf16>
    %cst_49 = arith.constant dense<0.000000e+00> : vector<200x1152xf32>
    %91 = tpu.matmul %89, %90, %cst_49 {dimension_numbers = #tpu.dot_dimension_numbers<[1], [0], [0], [1], [0, 0, 1, 1], [], []>} : vector<200x128xbf16>, vector<128x1152xbf16>, vector<200x1152xf32> -> vector<200x1152xf32>
    %92 = arith.truncf %91 : vector<200x1152xf32> to vector<200x1152xbf16>
    %93 = vector.extract_strided_slice %92 {offsets = [0, 0], sizes = [200, 128], strides = [1, 1]} : vector<200x1152xbf16> to vector<200x128xbf16>
    %94 = vector.extract_strided_slice %92 {offsets = [0, 128], sizes = [200, 128], strides = [1, 1]} : vector<200x1152xbf16> to vector<200x128xbf16>
    %95 = vector.extract_strided_slice %92 {offsets = [0, 256], sizes = [200, 128], strides = [1, 1]} : vector<200x1152xbf16> to vector<200x128xbf16>
    %96 = vector.extract_strided_slice %92 {offsets = [0, 384], sizes = [200, 128], strides = [1, 1]} : vector<200x1152xbf16> to vector<200x128xbf16>
    %97 = vector.extract_strided_slice %92 {offsets = [0, 512], sizes = [200, 128], strides = [1, 1]} : vector<200x1152xbf16> to vector<200x128xbf16>
    %98 = vector.extract_strided_slice %92 {offsets = [0, 640], sizes = [200, 128], strides = [1, 1]} : vector<200x1152xbf16> to vector<200x128xbf16>
    %99 = vector.extract_strided_slice %92 {offsets = [0, 768], sizes = [200, 128], strides = [1, 1]} : vector<200x1152xbf16> to vector<200x128xbf16>
    %100 = vector.extract_strided_slice %92 {offsets = [0, 896], sizes = [200, 128], strides = [1, 1]} : vector<200x1152xbf16> to vector<200x128xbf16>
    %101 = vector.extract_strided_slice %92 {offsets = [0, 1024], sizes = [200, 128], strides = [1, 1]} : vector<200x1152xbf16> to vector<200x128xbf16>
    %102 = tpu.concatenate %93, %94, %95, %96, %97, %98, %99, %100, %101 in 0 : vector<200x128xbf16>, vector<200x128xbf16>, vector<200x128xbf16>, vector<200x128xbf16>, vector<200x128xbf16>, vector<200x128xbf16>, vector<200x128xbf16>, vector<200x128xbf16>, vector<200x128xbf16> -> vector<1800x128xbf16>
    %c0_50 = arith.constant 0 : index
    %c0_51 = arith.constant 0 : index
    %103 = vector.load %arg16[%c0_50, %c0_51] : memref<56x1800xbf16, #tpu.memory_space<vmem>>, vector<56x1800xbf16>
    %cst_52 = arith.constant dense<0.000000e+00> : vector<56x128xf32>
    %104 = tpu.matmul %103, %102, %cst_52 {dimension_numbers = #tpu.dot_dimension_numbers<[1], [0], [0], [1], [0, 0, 1, 1], [], []>} : vector<56x1800xbf16>, vector<1800x128xbf16>, vector<56x128xf32> -> vector<56x128xf32>
    %c0_53 = arith.constant 0 : index
    %c0_54 = arith.constant 0 : index
    %105 = vector.load %arg18[%c0_53, %c0_54] : memref<1x128xf32, #tpu.memory_space<vmem>>, vector<1x128xf32>
    %106 = vector.broadcast %105 : vector<1x128xf32> to vector<56x128xf32>
    %107 = arith.addf %104, %106 : vector<56x128xf32>
    %108 = arith.truncf %107 : vector<56x128xf32> to vector<56x128xbf16>
    %c0_55 = arith.constant 0 : index
    %c0_56 = arith.constant 0 : index
    %109 = vector.load %arg20[%c0_55, %c0_56] : memref<128x1152xbf16, #tpu.memory_space<vmem>>, vector<128x1152xbf16>
    %cst_57 = arith.constant dense<0.000000e+00> : vector<56x1152xf32>
    %110 = tpu.matmul %108, %109, %cst_57 {dimension_numbers = #tpu.dot_dimension_numbers<[1], [0], [0], [1], [0, 0, 1, 1], [], []>} : vector<56x128xbf16>, vector<128x1152xbf16>, vector<56x1152xf32> -> vector<56x1152xf32>
    %111 = arith.truncf %110 : vector<56x1152xf32> to vector<56x1152xbf16>
    %112 = vector.extract_strided_slice %111 {offsets = [0, 0], sizes = [56, 128], strides = [1, 1]} : vector<56x1152xbf16> to vector<56x128xbf16>
    %113 = vector.extract_strided_slice %111 {offsets = [0, 128], sizes = [56, 128], strides = [1, 1]} : vector<56x1152xbf16> to vector<56x128xbf16>
    %114 = vector.extract_strided_slice %111 {offsets = [0, 256], sizes = [56, 128], strides = [1, 1]} : vector<56x1152xbf16> to vector<56x128xbf16>
    %115 = vector.extract_strided_slice %111 {offsets = [0, 384], sizes = [56, 128], strides = [1, 1]} : vector<56x1152xbf16> to vector<56x128xbf16>
    %116 = vector.extract_strided_slice %111 {offsets = [0, 512], sizes = [56, 128], strides = [1, 1]} : vector<56x1152xbf16> to vector<56x128xbf16>
    %117 = vector.extract_strided_slice %111 {offsets = [0, 640], sizes = [56, 128], strides = [1, 1]} : vector<56x1152xbf16> to vector<56x128xbf16>
    %118 = vector.extract_strided_slice %111 {offsets = [0, 768], sizes = [56, 128], strides = [1, 1]} : vector<56x1152xbf16> to vector<56x128xbf16>
    %119 = vector.extract_strided_slice %111 {offsets = [0, 896], sizes = [56, 128], strides = [1, 1]} : vector<56x1152xbf16> to vector<56x128xbf16>
    %120 = vector.extract_strided_slice %111 {offsets = [0, 1024], sizes = [56, 128], strides = [1, 1]} : vector<56x1152xbf16> to vector<56x128xbf16>
    %121 = tpu.concatenate %112, %113, %114, %115, %116, %117, %118, %119, %120 in 0 : vector<56x128xbf16>, vector<56x128xbf16>, vector<56x128xbf16>, vector<56x128xbf16>, vector<56x128xbf16>, vector<56x128xbf16>, vector<56x128xbf16>, vector<56x128xbf16>, vector<56x128xbf16> -> vector<504x128xbf16>
    %c0_58 = arith.constant 0 : index
    %c0_59 = arith.constant 0 : index
    %122 = vector.load %arg19[%c0_58, %c0_59] : memref<16x504xbf16, #tpu.memory_space<vmem>>, vector<16x504xbf16>
    %cst_60 = arith.constant dense<0.000000e+00> : vector<16x128xf32>
    %123 = tpu.matmul %122, %121, %cst_60 {dimension_numbers = #tpu.dot_dimension_numbers<[1], [0], [0], [1], [0, 0, 1, 1], [], []>} : vector<16x504xbf16>, vector<504x128xbf16>, vector<16x128xf32> -> vector<16x128xf32>
    %c0_61 = arith.constant 0 : index
    %c0_62 = arith.constant 0 : index
    %124 = vector.load %arg21[%c0_61, %c0_62] : memref<1x128xf32, #tpu.memory_space<vmem>>, vector<1x128xf32>
    %125 = vector.broadcast %124 : vector<1x128xf32> to vector<16x128xf32>
    %126 = arith.addf %123, %125 : vector<16x128xf32>
    %cst_63 = arith.constant 0.000000e+00 : f32
    %127 = vector.broadcast %cst_63 : f32 to vector<16x128xf32>
    %128 = arith.maximumf %126, %127 : vector<16x128xf32>
    %c0_64 = arith.constant 0 : index
    %c0_65 = arith.constant 0 : index
    %c0_66 = arith.constant 0 : index
    %129 = vector.load %arg24[%c0_64, %c0_65, %c0_66] : memref<1x16x128xf32, #tpu.memory_space<vmem>>, vector<1x16x128xf32>
    %130 = vector.shape_cast %129 : vector<1x16x128xf32> to vector<16x128xf32>
    %131 = vector.shape_cast %128 : vector<16x128xf32> to vector<1x16x128xf32>
    tpu.vector_store %arg24[%c0_64, %c0_65, %c0_66], %131 {strides = array<i32>} : memref<1x16x128xf32, #tpu.memory_space<vmem>>, vector<1x16x128xf32>,
    return
  }
  func.func @transform_0(%arg0: i32) -> (i32, i32, i32) {
    %c0_i32 = arith.constant 0 : i32
    %c0_i32_0 = arith.constant 0 : i32
    %c0_i32_1 = arith.constant 0 : i32
    return %arg0, %c0_i32, %c0_i32_0 : i32, i32, i32
  }
  func.func @transform_1(%arg0: i32) -> (i32, i32, i32) {
    %c0_i32 = arith.constant 0 : i32
    %c0_i32_0 = arith.constant 0 : i32
    %c0_i32_1 = arith.constant 0 : i32
    return %arg0, %c0_i32, %c0_i32_0 : i32, i32, i32
  }
  func.func @transform_2(%arg0: i32) -> (i32, i32, i32) {
    %c0_i32 = arith.constant 0 : i32
    %c0_i32_0 = arith.constant 0 : i32
    %c0_i32_1 = arith.constant 0 : i32
    return %arg0, %c0_i32, %c0_i32_0 : i32, i32, i32
  }
  func.func @transform_3(%arg0: i32) -> (i32, i32) {
    %c0_i32 = arith.constant 0 : i32
    %c0_i32_0 = arith.constant 0 : i32
    %c0_i32_1 = arith.constant 0 : i32
    return %c0_i32, %c0_i32_0 : i32, i32
  }
  func.func @transform_4(%arg0: i32) -> (i32, i32) {
    %c0_i32 = arith.constant 0 : i32
    %c0_i32_0 = arith.constant 0 : i32
    %c0_i32_1 = arith.constant 0 : i32
    return %c0_i32, %c0_i32_0 : i32, i32
  }
  func.func @transform_5(%arg0: i32) -> (i32, i32) {
    %c0_i32 = arith.constant 0 : i32
    %c0_i32_0 = arith.constant 0 : i32
    %c0_i32_1 = arith.constant 0 : i32
    return %c0_i32, %c0_i32_0 : i32, i32
  }
  func.func @transform_6(%arg0: i32) -> (i32, i32) {
    %c0_i32 = arith.constant 0 : i32
    %c0_i32_0 = arith.constant 0 : i32
    %c0_i32_1 = arith.constant 0 : i32
    return %c0_i32, %c0_i32_0 : i32, i32
  }
  func.func @transform_7(%arg0: i32) -> (i32, i32) {
    %c0_i32 = arith.constant 0 : i32
    %c0_i32_0 = arith.constant 0 : i32
    %c0_i32_1 = arith.constant 0 : i32
    return %c0_i32, %c0_i32_0 : i32, i32
  }
  func.func @transform_8(%arg0: i32) -> (i32, i32) {
    %c0_i32 = arith.constant 0 : i32
    %c0_i32_0 = arith.constant 0 : i32
    %c0_i32_1 = arith.constant 0 : i32
    return %c0_i32, %c0_i32_0 : i32, i32
  }
  func.func @transform_9(%arg0: i32) -> (i32, i32) {
    %c0_i32 = arith.constant 0 : i32
    %c0_i32_0 = arith.constant 0 : i32
    %c0_i32_1 = arith.constant 0 : i32
    return %c0_i32, %c0_i32_0 : i32, i32
  }
  func.func @transform_10(%arg0: i32) -> (i32, i32) {
    %c0_i32 = arith.constant 0 : i32
    %c0_i32_0 = arith.constant 0 : i32
    %c0_i32_1 = arith.constant 0 : i32
    return %c0_i32, %c0_i32_0 : i32, i32
  }
  func.func @transform_11(%arg0: i32) -> (i32, i32) {
    %c0_i32 = arith.constant 0 : i32
    %c0_i32_0 = arith.constant 0 : i32
    %c0_i32_1 = arith.constant 0 : i32
    return %c0_i32, %c0_i32_0 : i32, i32
  }
  func.func @transform_12(%arg0: i32) -> (i32, i32) {
    %c0_i32 = arith.constant 0 : i32
    %c0_i32_0 = arith.constant 0 : i32
    %c0_i32_1 = arith.constant 0 : i32
    return %c0_i32, %c0_i32_0 : i32, i32
  }
  func.func @transform_13(%arg0: i32) -> (i32, i32) {
    %c0_i32 = arith.constant 0 : i32
    %c0_i32_0 = arith.constant 0 : i32
    %c0_i32_1 = arith.constant 0 : i32
    return %c0_i32, %c0_i32_0 : i32, i32
  }
  func.func @transform_14(%arg0: i32) -> (i32, i32) {
    %c0_i32 = arith.constant 0 : i32
    %c0_i32_0 = arith.constant 0 : i32
    %c0_i32_1 = arith.constant 0 : i32
    return %c0_i32, %c0_i32_0 : i32, i32
  }
  func.func @transform_15(%arg0: i32) -> (i32, i32) {
    %c0_i32 = arith.constant 0 : i32
    %c0_i32_0 = arith.constant 0 : i32
    %c0_i32_1 = arith.constant 0 : i32
    return %c0_i32, %c0_i32_0 : i32, i32
  }
  func.func @transform_16(%arg0: i32) -> (i32, i32) {
    %c0_i32 = arith.constant 0 : i32
    %c0_i32_0 = arith.constant 0 : i32
    %c0_i32_1 = arith.constant 0 : i32
    return %c0_i32, %c0_i32_0 : i32, i32
  }
  func.func @transform_17(%arg0: i32) -> (i32, i32) {
    %c0_i32 = arith.constant 0 : i32
    %c0_i32_0 = arith.constant 0 : i32
    %c0_i32_1 = arith.constant 0 : i32
    return %c0_i32, %c0_i32_0 : i32, i32
  }
  func.func @transform_18(%arg0: i32) -> (i32, i32) {
    %c0_i32 = arith.constant 0 : i32
    %c0_i32_0 = arith.constant 0 : i32
    %c0_i32_1 = arith.constant 0 : i32
    return %c0_i32, %c0_i32_0 : i32, i32
  }
  func.func @transform_19(%arg0: i32) -> (i32, i32) {
    %c0_i32 = arith.constant 0 : i32
    %c0_i32_0 = arith.constant 0 : i32
    %c0_i32_1 = arith.constant 0 : i32
    return %c0_i32, %c0_i32_0 : i32, i32
  }
  func.func @transform_20(%arg0: i32) -> (i32, i32) {
    %c0_i32 = arith.constant 0 : i32
    %c0_i32_0 = arith.constant 0 : i32
    %c0_i32_1 = arith.constant 0 : i32
    return %c0_i32, %c0_i32_0 : i32, i32
  }
  func.func @transform_21(%arg0: i32) -> (i32, i32, i32) {
    %c0_i32 = arith.constant 0 : i32
    %c0_i32_0 = arith.constant 0 : i32
    %c0_i32_1 = arith.constant 0 : i32
    return %arg0, %c0_i32, %c0_i32_0 : i32, i32, i32
  }
  func.func @transform_22(%arg0: i32) -> (i32, i32, i32) {
    %c0_i32 = arith.constant 0 : i32
    %c0_i32_0 = arith.constant 0 : i32
    %c0_i32_1 = arith.constant 0 : i32
    return %arg0, %c0_i32, %c0_i32_0 : i32, i32, i32
  }
  func.func @transform_23(%arg0: i32) -> (i32, i32, i32) {
    %c0_i32 = arith.constant 0 : i32
    %c0_i32_0 = arith.constant 0 : i32
    %c0_i32_1 = arith.constant 0 : i32
    return %arg0, %c0_i32, %c0_i32_0 : i32, i32, i32
  }
}

</mosaic_0001>

<bundles_post_ra>
// kernel: pixel_shuffle_converter.1
= control target key start
LH: loop header
LB: loop body
LE: loop exit
PB: predicated region body
PF: predicated region fallthrough
CT: control target
= control target key end

     0   :  { %s24333_s0 = inlined_call_operand.vmem [shape: bf16[2,64,256], index: 0, kind: input, shape index: {}]   ;;  %s24334_s1 = inlined_call_operand.vmem [shape: bf16[2,64,256], index: 1, kind: input, shape index: {}]   ;;  %s24335_s2 = inlined_call_operand.vmem [shape: bf16[2,64,256], index: 2, kind: input, shape index: {}]   ;;  %s24336_s3 = inlined_call_operand.vmem [shape: bf16[200,576], index: 3, kind: input, shape index: {}, may-alias: {3,6,12}]   ;;  %s24337_s4 = inlined_call_operand.vmem [shape: bf16[256,1152], index: 4, kind: input, shape index: {}]   ;;  %s24338_s5 = inlined_call_operand.vmem [shape: f32[1,128], index: 5, kind: input, shape index: {}]   ;;  %s24339_s6 = inlined_call_operand.vmem [shape: bf16[200,576], index: 6, kind: input, shape index: {}, may-alias: {3,6,12}]   ;;  %s24340_s7 = inlined_call_operand.vmem [shape: bf16[256,1152], index: 7, kind: input, shape index: {}]   ;;  %s24341_s8 = inlined_call_operand.vmem [shape: f32[1,128], index: 8, kind: input, shape index: {}]   ;;  %s24342_s9 = inlined_call_operand.vmem [shape: bf16[56,1800], index: 9, kind: input, shape index: {}, may-alias: {9,15}]   ;;  %s24343_s10 = inlined_call_operand.vmem [shape: bf16[128,1152], index: 10, kind: input, shape index: {}]   ;;  %s24344_s11 = inlined_call_operand.vmem [shape: f32[1,128], index: 11, kind: input, shape index: {}]   ;;  %s24345_s12 = inlined_call_operand.vmem [shape: bf16[200,576], index: 12, kind: input, shape index: {}, may-alias: {3,6,12}]   ;;  %s24346_s13 = inlined_call_operand.vmem [shape: bf16[256,1152], index: 13, kind: input, shape index: {}]   ;;  %s24347_s14 = inlined_call_operand.vmem [shape: f32[1,128], index: 14, kind: input, shape index: {}]   ;;  %s24348_s15 = inlined_call_operand.vmem [shape: bf16[56,1800], index: 15, kind: input, shape index: {}, may-alias: {9,15}]   ;;  %s24349_s16 = inlined_call_operand.vmem [shape: bf16[128,1152], index: 16, kind: input, shape index: {}]   ;;  %s24350_s17 = inlined_call_operand.vmem [shape: f32[1,128], index: 17, kind: input, shape index: {}]   ;;  %s24351_s18 = inlined_call_operand.vmem [shape: bf16[16,504], index: 18, kind: input, shape index: {}]   ;;  %s24352_s19 = inlined_call_operand.vmem [shape: bf16[128,1152], index: 19, kind: input, shape index: {}]   ;;  %s24353_s20 = inlined_call_operand.vmem [shape: f32[1,128], index: 20, kind: input, shape index: {}]   ;;  %s24354_s21 = inlined_call_operand.vmem [shape: f32[2,200,128], index: 21, kind: output, shape index: {0}]   ;;  %s24355_s22 = inlined_call_operand.vmem [shape: f32[2,56,128], index: 22, kind: output, shape index: {1}]   ;;  %s24356_s23 = inlined_call_operand.hbm [shape: f32[2,16,128], index: 23, kind: output, shape index: {2}]  }
   0x1   :  { %24423 = sst [smem:[#allocation37_spill]] %s24333_s0 }
   0x2   :  { %24424 = sst [smem:[#allocation38_spill]] %s24334_s1 }
   0x3   :  { %24425 = sst [smem:[#allocation39_spill]] %s24335_s2 }
   0x4   :  { %24426 = sst [smem:[#allocation40_spill]] %s24336_s3 }
   0x5   :  { %24427 = sst [smem:[#allocation41_spill]] %s24337_s4 }
   0x6   :  { %24428 = sst [smem:[#allocation42_spill]] %s24338_s5 }
   0x7   :  { %24429 = sst [smem:[#allocation43_spill]] %s24339_s6 }
   0x8   :  { %24430 = sst [smem:[#allocation44_spill]] %s24340_s7 }
   0x9   :  { %24431 = sst [smem:[#allocation45_spill]] %s24341_s8 }
   0xa   :  { %24432 = sst [smem:[#allocation46_spill]] %s24354_s21 }
   0xb   :  { %24433 = sst [smem:[#allocation47_spill]] %s24356_s23 }
   0xc   :  { %29 = vsyncpa [#allocation3], 0 }
   0xd   :  { %31 = vsyncpa [#allocation3 + $0x1], 0  ;;  %s17946_s4 = smov 0   ;;  %s17948_s30 = smov 0  }
   0xe   :  { %s17950_s24 = smov 0   ;;  %s17952_s25 = smov 0  }
   0xf LB: > { %24434 = sst [smem:[#allocation5_spill]] %s17806_s4  ;;  %s17967_s5 = sadd.s32 4294967295, %s17818_s25   ;;  %s17818_s25 = sphi %s17952_s25, %s24734_s25   ;;  %s17814_s24 = sphi %s17950_s24, %s24736_s24   ;;  %s17810_s30 = sphi %s17948_s30, %s24738_s30   ;;  %s17806_s4 = sphi %s17946_s4, %s24737_s4  }
  0x10   : > { %24435 = sst [smem:[#allocation6_spill]] %s17814_s24  ;;  %s13471_s1 = sadd.s32 4294967294, %s17818_s25  }
  0x11   : > { %24436 = sst [smem:[#allocation7_spill]] %s17818_s25  ;;  %s17971_s26 = sadd.s32 1, %s17818_s25  }
  0x12   : > { %24437 = sst [smem:[#allocation8_spill]] %s17967_s5  ;;  %s552_s2 = sadd.s32 1, %s17814_s24 }
  0x13   : > { %24438 = sst [smem:[#allocation9_spill]] %s17971_s26  ;;  %s549_s6 = ssub.s32 %s17818_s25, %s17971_s26 }
  0x14   : > { %p562_p0 = scmp.ne.s32.totalorder %s17814_s24, %s17810_s30  ;;  %p550_p1 = scmp.eq.s32.totalorder %s549_s6, 0 }
  0x15   : > { %p563_p2 = scmp.eq.s32.totalorder %s17967_s5, 1  ;;  %p568_p3 = scmp.ne.s32.totalorder %s17810_s30, %s17806_s4 }
  0x16   : > { %p569_p4 = scmp.eq.s32.totalorder %s13471_s1, 1  ;;  %p13474_p7 = scmp.ge.s32.totalorder %s17818_s25, 1 }
  0x17   : > { %s17982_s27 = scalar_select %p550_p1, %s17814_s24, %s552_s2  }
  0x18   : > { %p17984_p5 = por %p563_p2, %p562_p0  ;;  %p17988_p6 = por %p569_p4, %p568_p3 }
  0x19   : > { %24439 = sst [smem:[#allocation10_spill]] %s17982_s27  ;;  %p665_p8 = scmp.lt.s32.totalorder %s17818_s25, 3 }
  0x1a   : > { %s24440_s7 = scalar_select %p17984_p5, 1, 0 }
  0x1b   : > { %s24442_s28 = scalar_select %p17988_p6, 1, 0 }
  0x1c   : > { %24441 = sst [smem:[#allocation11_spill]] %s24440_s7  ;;  %p666_p9 = pnand %p13474_p7, %p665_p8 }
  0x1d   : > { %24443 = sst [smem:[#allocation12_spill]] %s24442_s28 }
  0x1e   : > { %669 = sbr.rel (%p666_p9) target bundleno = 3563 (0xdeb), region = 104 }
  0x23   : > { %s24444_s0 = sld [smem:[#allocation41_spill]]  ;;  %p749_p10 = scmp.lt.s32.totalorder %s17967_s5, 1  ;;  %vm17821_vm0 = vmmov 0   ;;  %vm2511_vm1 = vcmask 523264   ;;  %vm6563_vm2 = vcmask 1043456   ;;  %vm7108_vm3 = vcmask 64512  }
  0x24   : > { %s24445_s27 = sld [smem:[#allocation37_spill]]  ;;  %vm13212_vm4 = vcmask 982016  }
  0x25   : > { %s18110_s24 = scalar_select %p749_p10, %s17967_s5, 1 }
  0x26   : > { %s24446_s25 = sld [smem:[#allocation40_spill]] }
  0x27   : > { %s18125_s2 = sshll.u32 %s18110_s24, 6  ;;  %s24448_s6 = sld [smem:[#allocation38_spill]] }
  0x28   : > { %s24449_s26 = sld [smem:[#allocation44_spill]]  ;;  %s16304_s29 = smul.u32 200, %s18110_s24 }
  0x29   : > { %v16350_v0 = vld [vmem:[%s24444_s0 + $0x1fc] ss:$36 sps:$4 sm:$0xff]   ;;  %v16352_v1 = vld [vmem:[%s24444_s0 + $0x204] ss:$36 sps:$4 sm:$0xff]   ;;  %v16356_v4 = vld [vmem:[%s24444_s0 + $0x1b4] ss:$36 sps:$4 sm:$0xff]  }
  0x2a   : > { %1719 = vmatprep.subr.bf16.mxu0 %v16350_v0  ;;  %v16354_v2 = vld [vmem:[%s24444_s0 + $0x1f8] ss:$36 sps:$4 sm:$0xff]   ;;  %v16355_v3 = vld [vmem:[%s24444_s0 + $0x200] ss:$36 sps:$4 sm:$0xff]   ;;  %1792 = vmatprep.subr.bf16.mxu1 %v16352_v1  ;;  %v16360_v6 = vld [vmem:[%s24444_s0 + $0x1b0] ss:$36 sps:$4 sm:$0xff]   ;;  %s18140_s23 = scalar_lea.vmem %s24445_s27, %s18125_s2 }
  0x2b   : > { %1720 = vmatpush1.bf16.msra.mxu0 %v16354_v2  ;;  %1793 = vmatpush1.bf16.msra.mxu1 %v16355_v3  ;;  %v16358_v5 = vld [vmem:[%s24444_s0 + $0x1bc] ss:$36 sps:$4 sm:$0xff]   ;;  %v16362_v8 = vld [vmem:[%s24444_s0 + $0x16c] ss:$36 sps:$4 sm:$0xff]   ;;  %v16364_v9 = vld [vmem:[%s24444_s0 + $0x174] ss:$36 sps:$4 sm:$0xff]  }
  0x2c   : > { %1721 = vmatprep.subr.bf16.mxu0 %v16356_v4  ;;  %v16361_v7 = vld [vmem:[%s24444_s0 + $0x1b8] ss:$36 sps:$4 sm:$0xff]   ;;  %1794 = vmatprep.subr.bf16.mxu1 %v16358_v5  ;;  %v16366_v10 = vld [vmem:[%s24444_s0 + $0x168] ss:$36 sps:$4 sm:$0xff]   ;;  %v16367_v11 = vld [vmem:[%s24444_s0 + $0x170] ss:$36 sps:$4 sm:$0xff]   ;;  %s24447_s28 = smov %s24446_s25 }
  0x2d   : > { %v16368_v12 = vld [vmem:[%s24444_s0 + $0x124] ss:$36 sps:$4 sm:$0xff]   ;;  %v16370_v13 = vld [vmem:[%s24444_s0 + $0x12c] ss:$36 sps:$4 sm:$0xff]   ;;  %v16374_v16 = vld [vmem:[%s24444_s0 + $0xdc] ss:$36 sps:$4 sm:$0xff]   ;;  %s18577_s1 = scalar_lea.vmem %s24448_s6, %s18125_s2 }
  0x2e   : > { %v16372_v14 = vld [vmem:[%s24444_s0 + $0x120] ss:$36 sps:$4 sm:$0xff]   ;;  %v16373_v15 = vld [vmem:[%s24444_s0 + $0x128] ss:$36 sps:$4 sm:$0xff]   ;;  %v16378_v18 = vld [vmem:[%s24444_s0 + $0xd8] ss:$36 sps:$4 sm:$0xff]  }
  0x2f   : > { %1722 = vmatpush1.bf16.msra.mxu0 %v16360_v6  ;;  %1795 = vmatpush1.bf16.msra.mxu1 %v16361_v7  ;;  %v16376_v17 = vld [vmem:[%s24444_s0 + $0xe4] ss:$36 sps:$4 sm:$0xff]   ;;  %v16380_v20 = vld [vmem:[%s24444_s0 + $0x94] ss:$36 sps:$4 sm:$0xff]   ;;  %v16382_v21 = vld [vmem:[%s24444_s0 + $0x9c] ss:$36 sps:$4 sm:$0xff]  }
  0x30   : > { %1723 = vmatprep.subr.bf16.mxu0 %v16362_v8  ;;  %1796 = vmatprep.subr.bf16.mxu1 %v16364_v9  ;;  %v16379_v19 = vld [vmem:[%s24444_s0 + $0xe0] ss:$36 sps:$4 sm:$0xff]   ;;  %v16384_v22 = vld [vmem:[%s24444_s0 + $0x90] ss:$36 sps:$4 sm:$0xff]   ;;  %v16385_v23 = vld [vmem:[%s24444_s0 + $0x98] ss:$36 sps:$4 sm:$0xff]  }
  0x31   : > { %v16386_v24 = vld [vmem:[%s24444_s0 + $0x4c] ss:$36 sps:$4 sm:$0xff]   ;;  %v16388_v25 = vld [vmem:[%s24444_s0 + $0x54] ss:$36 sps:$4 sm:$0xff]   ;;  %v16392_v28 = vld [vmem:[%s24444_s0 + $0x4] ss:$36 sps:$4 sm:$0xff]  }
  0x32   : > { %v16390_v26 = vld [vmem:[%s24444_s0 + $0x48] ss:$36 sps:$4 sm:$0xff]   ;;  %v16391_v27 = vld [vmem:[%s24444_s0 + $0x50] ss:$36 sps:$4 sm:$0xff]   ;;  %v16396_v30 = vld [vmem:[%s24444_s0] ss:$36 sps:$4 sm:$0xff]  }
  0x33   : > { %1724 = vmatpush1.bf16.msra.mxu0 %v16366_v10  ;;  %1797 = vmatpush1.bf16.msra.mxu1 %v16367_v11  ;;  %v16394_v29 = vld [vmem:[%s24444_s0 + $0xc] ss:$36 sps:$4 sm:$0xff]   ;;  %v16398_v32 = vld [vmem:[%s24444_s0 + $0x43c] ss:$36 sps:$4 sm:$0xff]   ;;  %v16400_v33 = vld [vmem:[%s24444_s0 + $0x444] ss:$36 sps:$4 sm:$0xff]  }
  0x34   : > { %1725 = vmatprep.subr.bf16.mxu0 %v16368_v12  ;;  %1798 = vmatprep.subr.bf16.mxu1 %v16370_v13  ;;  %v16397_v31 = vld [vmem:[%s24444_s0 + $0x8] ss:$36 sps:$4 sm:$0xff]   ;;  %v16402_v34 = vld [vmem:[%s24444_s0 + $0x438] ss:$36 sps:$4 sm:$0xff]   ;;  %v16403_v35 = vld [vmem:[%s24444_s0 + $0x440] ss:$36 sps:$4 sm:$0xff]  }
  0x35   : > { %v16404_v36 = vld [vmem:[%s24444_s0 + $0x3f4] ss:$36 sps:$4 sm:$0xff]   ;;  %v16406_v37 = vld [vmem:[%s24444_s0 + $0x3fc] ss:$36 sps:$4 sm:$0xff]   ;;  %v16410_v40 = vld [vmem:[%s24444_s0 + $0x3ac] ss:$36 sps:$4 sm:$0xff]  }
  0x36   : > { %v16408_v38 = vld [vmem:[%s24444_s0 + $0x3f0] ss:$36 sps:$4 sm:$0xff]   ;;  %v16409_v39 = vld [vmem:[%s24444_s0 + $0x3f8] ss:$36 sps:$4 sm:$0xff]   ;;  %v16414_v42 = vld [vmem:[%s24444_s0 + $0x3a8] ss:$36 sps:$4 sm:$0xff]  }
  0x37   : > { %1726 = vmatpush1.bf16.msra.mxu0 %v16372_v14  ;;  %1799 = vmatpush1.bf16.msra.mxu1 %v16373_v15  ;;  %v16412_v41 = vld [vmem:[%s24444_s0 + $0x3b4] ss:$36 sps:$4 sm:$0xff]   ;;  %v16416_v44 = vld [vmem:[%s24444_s0 + $0x364] ss:$36 sps:$4 sm:$0xff]   ;;  %v16418_v45 = vld [vmem:[%s24444_s0 + $0x36c] ss:$36 sps:$4 sm:$0xff]  }
  0x38   : > { %1727 = vmatprep.subr.bf16.mxu0 %v16374_v16  ;;  %1800 = vmatprep.subr.bf16.mxu1 %v16376_v17  ;;  %v16415_v43 = vld [vmem:[%s24444_s0 + $0x3b0] ss:$36 sps:$4 sm:$0xff]   ;;  %v16420_v46 = vld [vmem:[%s24444_s0 + $0x360] ss:$36 sps:$4 sm:$0xff]   ;;  %v16421_v47 = vld [vmem:[%s24444_s0 + $0x368] ss:$36 sps:$4 sm:$0xff]  }
  0x39   : > { %v18152_v48 = vld [vmem:[%s18140_s23 + $0x4] ss:$8 sps:$4 sm:$0xff]   ;;  %v16422_v49 = vld [vmem:[%s24444_s0 + $0x31c] ss:$36 sps:$4 sm:$0xff]   ;;  %v16428_v53 = vld [vmem:[%s24444_s0 + $0x2d4] ss:$36 sps:$4 sm:$0xff]  }
  0x3a   : > { %v16424_v50 = vld [vmem:[%s24444_s0 + $0x324] ss:$36 sps:$4 sm:$0xff]   ;;  %1751 = vmatprep.mubr.bf16.mxu0 %v18152_v48  ;;  %1824 = vmatprep.mubr.bf16.mxu1 %v18152_v48  ;;  %v16426_v51 = vld [vmem:[%s24444_s0 + $0x318] ss:$36 sps:$4 sm:$0xff]   ;;  %v16432_v55 = vld [vmem:[%s24444_s0 + $0x2d0] ss:$36 sps:$4 sm:$0xff]  }
  0x3b   : > { %1728 = vmatpush1.bf16.msra.mxu0 %v16378_v18  ;;  %1801 = vmatpush1.bf16.msra.mxu1 %v16379_v19  ;;  %v16427_v52 = vld [vmem:[%s24444_s0 + $0x320] ss:$36 sps:$4 sm:$0xff]   ;;  %v16433_v56 = vld [vmem:[%s24444_s0 + $0x2d8] ss:$36 sps:$4 sm:$0xff]   ;;  %v16434_v57 = vld [vmem:[%s24444_s0 + $0x28c] ss:$36 sps:$4 sm:$0xff]  }
  0x3c   : > { %1729 = vmatprep.subr.bf16.mxu0 %v16380_v20  ;;  %1802 = vmatprep.subr.bf16.mxu1 %v16382_v21  ;;  %v16430_v54 = vld [vmem:[%s24444_s0 + $0x2dc] ss:$36 sps:$4 sm:$0xff]   ;;  %v16436_v58 = vld [vmem:[%s24444_s0 + $0x294] ss:$36 sps:$4 sm:$0xff]   ;;  %v16438_v59 = vld [vmem:[%s24444_s0 + $0x288] ss:$36 sps:$4 sm:$0xff]  }
  0x3d   : > { %v16439_v60 = vld [vmem:[%s24444_s0 + $0x290] ss:$36 sps:$4 sm:$0xff]   ;;  %v16440_v61 = vld [vmem:[%s24444_s0 + $0x244] ss:$36 sps:$4 sm:$0xff]   ;;  %v16466_v11 = vld [vmem:[%s24444_s0 + $0x17c] ss:$36 sps:$4 sm:$0xff]  }
  0x3e   : > { %v16442_v62 = vld [vmem:[%s24444_s0 + $0x24c] ss:$36 sps:$4 sm:$0xff]   ;;  %v16444_v63 = vld [vmem:[%s24444_s0 + $0x240] ss:$36 sps:$4 sm:$0xff]   ;;  %v16454_v2 = vld [vmem:[%s24444_s0 + $0x214] ss:$36 sps:$4 sm:$0xff]  }
  0x3f   : > { %1730 = vmatpush1.bf16.msra.mxu0 %v16384_v22  ;;  %1803 = vmatpush1.bf16.msra.mxu1 %v16385_v23  ;;  %v16445_v0 = vld [vmem:[%s24444_s0 + $0x248] ss:$36 sps:$4 sm:$0xff]   ;;  %v16452_v5 = vld [vmem:[%s24444_s0 + $0x210] ss:$36 sps:$4 sm:$0xff]   ;;  %v16455_v9 = vld [vmem:[%s24444_s0 + $0x1c0] ss:$36 sps:$4 sm:$0xff]  }
  0x40   : > { %1731 = vmatprep.subr.bf16.mxu0 %v16386_v24  ;;  %1804 = vmatprep.subr.bf16.mxu1 %v16388_v25  ;;  %v16451_v1 = vld [vmem:[%s24444_s0 + $0x20c] ss:$36 sps:$4 sm:$0xff]   ;;  %v18211_v3 = vld [vmem:[%s18140_s23] ss:$8 sps:$4 sm:$0xff]   ;;  %v18226_v8 = vld [vmem:[%s18140_s23 + $0x14] ss:$8 sps:$4 sm:$0xff]  }
  0x41   : > { %v16449_v4 = vld [vmem:[%s24444_s0 + $0x208] ss:$36 sps:$4 sm:$0xff]   ;;  %v18245_v13 = vld [vmem:[%s18140_s23 + $0x10] ss:$8 sps:$4 sm:$0xff]   ;;  %v16467_v15 = vld [vmem:[%s24444_s0 + $0x180] ss:$36 sps:$4 sm:$0xff]  }
  0x42   : > { %v16457_v6 = vld [vmem:[%s24444_s0 + $0x1c4] ss:$36 sps:$4 sm:$0xff]   ;;  %v16460_v7 = vld [vmem:[%s24444_s0 + $0x1cc] ss:$36 sps:$4 sm:$0xff]   ;;  %v16464_v14 = vld [vmem:[%s24444_s0 + $0x178] ss:$36 sps:$4 sm:$0xff]  }
  0x43   : > { %1732 = vmatpush1.bf16.msra.mxu0 %v16390_v26  ;;  %1805 = vmatpush1.bf16.msra.mxu1 %v16391_v27  ;;  %v16458_v10 = vld [vmem:[%s24444_s0 + $0x1c8] ss:$36 sps:$4 sm:$0xff]   ;;  %v16472_v16 = vld [vmem:[%s24444_s0 + $0x134] ss:$36 sps:$4 sm:$0xff]   ;;  %v16475_v17 = vld [vmem:[%s24444_s0 + $0x13c] ss:$36 sps:$4 sm:$0xff]  }
  0x44   : > { %1733 = vmatprep.subr.bf16.mxu0 %v16392_v28  ;;  %1806 = vmatprep.subr.bf16.mxu1 %v16394_v29  ;;  %v16469_v12 = vld [vmem:[%s24444_s0 + $0x184] ss:$36 sps:$4 sm:$0xff]   ;;  %v16470_v19 = vld [vmem:[%s24444_s0 + $0x130] ss:$36 sps:$4 sm:$0xff]   ;;  %v16473_v20 = vld [vmem:[%s24444_s0 + $0x138] ss:$36 sps:$4 sm:$0xff]  }
  0x45   : > { %v18260_v18 = vld [vmem:[%s18140_s23 + $0x24] ss:$8 sps:$4 sm:$0xff]   ;;  %v16484_v22 = vld [vmem:[%s24444_s0 + $0xf4] ss:$36 sps:$4 sm:$0xff]   ;;  %v18279_v23 = vld [vmem:[%s18140_s23 + $0x20] ss:$8 sps:$4 sm:$0xff]  }
  0x46   : > { %v16481_v21 = vld [vmem:[%s24444_s0 + $0xec] ss:$36 sps:$4 sm:$0xff]   ;;  %v16487_v26 = vld [vmem:[%s24444_s0 + $0xa4] ss:$36 sps:$4 sm:$0xff]   ;;  %v18294_v28 = vld [vmem:[%s18140_s23 + $0x34] ss:$8 sps:$4 sm:$0xff]  }
  0x47   : > { %1734 = vmatpush1.bf16.msra.mxu0 %v16396_v30  ;;  %1807 = vmatpush1.bf16.msra.mxu1 %v16397_v31  ;;  %v16479_v24 = vld [vmem:[%s24444_s0 + $0xe8] ss:$36 sps:$4 sm:$0xff]   ;;  %v16482_v25 = vld [vmem:[%s24444_s0 + $0xf0] ss:$36 sps:$4 sm:$0xff]   ;;  %v16485_v29 = vld [vmem:[%s24444_s0 + $0xa0] ss:$36 sps:$4 sm:$0xff]  }
  0x48   : > { %1735 = vmatprep.subr.bf16.mxu0 %v16398_v32  ;;  %1808 = vmatprep.subr.bf16.mxu1 %v16400_v33  ;;  %v16490_v27 = vld [vmem:[%s24444_s0 + $0xac] ss:$36 sps:$4 sm:$0xff]   ;;  %v16496_v31 = vld [vmem:[%s24444_s0 + $0x5c] ss:$36 sps:$4 sm:$0xff]   ;;  %v16499_v32 = vld [vmem:[%s24444_s0 + $0x64] ss:$36 sps:$4 sm:$0xff]  }
  0x49   : > { %v16488_v30 = vld [vmem:[%s24444_s0 + $0xa8] ss:$36 sps:$4 sm:$0xff]   ;;  %v18313_v33 = vld [vmem:[%s18140_s23 + $0x30] ss:$8 sps:$4 sm:$0xff]   ;;  %s24454_s27 = sld [smem:[#allocation42_spill]]  ;;  %s16305_s5 = smul.u32 56, %s18110_s24 }
  0x4a   : > { %s24455_s21 = sld [smem:[#allocation46_spill]]  ;;  %s746_s24 = sand.u32 1, %s17810_s30  }
  0x4b   : > { %1736 = vmatpush2.bf16.msra.mxu0 %v16402_v34  ;;  %1809 = vmatpush2.bf16.msra.mxu1 %v16403_v35  ;;  %v16494_v34 = vld [vmem:[%s24444_s0 + $0x58] ss:$36 sps:$4 sm:$0xff]   ;;  %v16497_v35 = vld [vmem:[%s24444_s0 + $0x60] ss:$36 sps:$4 sm:$0xff]   ;;  %s24483_s8 = sld [smem:[#allocation45_spill]]  ;;  %s22027_s4 = scalar_lea.vmem %s24355_s22, %s16305_s5 }
  0x4c   : > { %1737 = vmatprep.subr.bf16.mxu0 %v16404_v36  ;;  %1810 = vmatprep.subr.bf16.mxu1 %v16406_v37  ;;  %v16502_v36 = vld [vmem:[%s24444_s0 + $0x14] ss:$36 sps:$4 sm:$0xff]   ;;  %v16505_v37 = vld [vmem:[%s24444_s0 + $0x1c] ss:$36 sps:$4 sm:$0xff]   ;;  %s24293_s7 = scalar_lea.sflag [#allocation3], %s746_s24 }
  0x4f   : > { %1738 = vmatpush2.bf16.msra.mxu0 %v16408_v38  ;;  %1811 = vmatpush2.bf16.msra.mxu1 %v16409_v39  ;;  %v16500_v38 = vld [vmem:[%s24444_s0 + $0x10] ss:$36 sps:$4 sm:$0xff]   ;;  %v16503_v39 = vld [vmem:[%s24444_s0 + $0x18] ss:$36 sps:$4 sm:$0xff]  }
  0x50   : > { %1739 = vmatprep.subr.bf16.mxu0 %v16410_v40  ;;  %1812 = vmatprep.subr.bf16.mxu1 %v16412_v41  ;;  %v16508_v40 = vld [vmem:[%s24444_s0 + $0x44c] ss:$36 sps:$4 sm:$0xff]   ;;  %v16511_v41 = vld [vmem:[%s24444_s0 + $0x454] ss:$36 sps:$4 sm:$0xff]   ;;  %s19410_s6 = scalar_lea.vmem %s24455_s21, %s16304_s29 }
  0x53   : > { %1740 = vmatpush2.bf16.msra.mxu0 %v16414_v42  ;;  %1813 = vmatpush2.bf16.msra.mxu1 %v16415_v43  ;;  %v16506_v42 = vld [vmem:[%s24444_s0 + $0x448] ss:$36 sps:$4 sm:$0xff]   ;;  %v16509_v43 = vld [vmem:[%s24444_s0 + $0x450] ss:$36 sps:$4 sm:$0xff]  }
  0x54   : > { %1741 = vmatprep.subr.bf16.mxu0 %v16416_v44  ;;  %1814 = vmatprep.subr.bf16.mxu1 %v16418_v45  ;;  %v16514_v44 = vld [vmem:[%s24444_s0 + $0x404] ss:$36 sps:$4 sm:$0xff]   ;;  %v16517_v45 = vld [vmem:[%s24444_s0 + $0x40c] ss:$36 sps:$4 sm:$0xff]  }
  0x57   : > { %1742 = vmatpush2.bf16.msra.mxu0 %v16420_v46  ;;  %1815 = vmatpush2.bf16.msra.mxu1 %v16421_v47  ;;  %v16512_v46 = vld [vmem:[%s24444_s0 + $0x400] ss:$36 sps:$4 sm:$0xff]   ;;  %v16515_v47 = vld [vmem:[%s24444_s0 + $0x408] ss:$36 sps:$4 sm:$0xff]  }
  0x58   : > { %1743 = vmatprep.subr.bf16.mxu0 %v16422_v49  ;;  %1816 = vmatprep.subr.bf16.mxu1 %v16424_v50  ;;  %v16520_v49 = vld [vmem:[%s24444_s0 + $0x3bc] ss:$36 sps:$4 sm:$0xff]   ;;  %v16523_v50 = vld [vmem:[%s24444_s0 + $0x3c4] ss:$36 sps:$4 sm:$0xff]  }
  0x5b   : > { %1744 = vmatpush2.bf16.msra.mxu0 %v16426_v51  ;;  %1817 = vmatpush2.bf16.msra.mxu1 %v16427_v52  ;;  %v16518_v51 = vld [vmem:[%s24444_s0 + $0x3b8] ss:$36 sps:$4 sm:$0xff]   ;;  %v16521_v52 = vld [vmem:[%s24444_s0 + $0x3c0] ss:$36 sps:$4 sm:$0xff]  }
  0x5c   : > { %1745 = vmatprep.subr.bf16.mxu0 %v16428_v53  ;;  %1818 = vmatprep.subr.bf16.mxu1 %v16430_v54  ;;  %v16526_v53 = vld [vmem:[%s24444_s0 + $0x374] ss:$36 sps:$4 sm:$0xff]   ;;  %v16529_v54 = vld [vmem:[%s24444_s0 + $0x37c] ss:$36 sps:$4 sm:$0xff]  }
  0x5f   : > { %1746 = vmatpush2.bf16.msra.mxu0 %v16432_v55  ;;  %1819 = vmatpush2.bf16.msra.mxu1 %v16433_v56  ;;  %v16524_v55 = vld [vmem:[%s24444_s0 + $0x370] ss:$36 sps:$4 sm:$0xff]   ;;  %v16527_v56 = vld [vmem:[%s24444_s0 + $0x378] ss:$36 sps:$4 sm:$0xff]  }
  0x60   : > { %1747 = vmatprep.subr.bf16.mxu0 %v16434_v57  ;;  %1820 = vmatprep.subr.bf16.mxu1 %v16436_v58  ;;  %v16532_v57 = vld [vmem:[%s24444_s0 + $0x32c] ss:$36 sps:$4 sm:$0xff]   ;;  %v16535_v58 = vld [vmem:[%s24444_s0 + $0x334] ss:$36 sps:$4 sm:$0xff]  }
  0x63   : > { %1748 = vmatpush2.bf16.msra.mxu0 %v16438_v59  ;;  %1821 = vmatpush2.bf16.msra.mxu1 %v16439_v60  ;;  %v16530_v59 = vld [vmem:[%s24444_s0 + $0x328] ss:$36 sps:$4 sm:$0xff]   ;;  %v16533_v60 = vld [vmem:[%s24444_s0 + $0x330] ss:$36 sps:$4 sm:$0xff]  }
  0x64   : > { %1749 = vmatprep.subr.bf16.mxu0 %v16440_v61  ;;  %1822 = vmatprep.subr.bf16.mxu1 %v16442_v62  ;;  %v16538_v61 = vld [vmem:[%s24444_s0 + $0x2e4] ss:$36 sps:$4 sm:$0xff]   ;;  %v16541_v62 = vld [vmem:[%s24444_s0 + $0x2ec] ss:$36 sps:$4 sm:$0xff]  }
  0x67   : > { %1750 = vmatpush2.bf16.msra.mxu0 %v16444_v63  ;;  %1823 = vmatpush2.bf16.msra.mxu1 %v16445_v0  ;;  %v16536_v63 = vld [vmem:[%s24444_s0 + $0x2e0] ss:$36 sps:$4 sm:$0xff]   ;;  %v16539_v0 = vld [vmem:[%s24444_s0 + $0x2e8] ss:$36 sps:$4 sm:$0xff]  }
  0x68   : > { %1865 = vmatprep.subr.bf16.mxu0 %v16451_v1  ;;  %1938 = vmatprep.subr.bf16.mxu1 %v16454_v2  ;;  %v16544_v1 = vld [vmem:[%s24444_s0 + $0x29c] ss:$36 sps:$4 sm:$0xff]   ;;  %v16547_v2 = vld [vmem:[%s24444_s0 + $0x2a4] ss:$36 sps:$4 sm:$0xff]  }
  0x6a   : > { %1752 = vmatmul.mubr.bf16.vlgmr.msra.gmra.mxu0 %v18211_v3  ;;  %1825 = vmatmul.mubr.bf16.vlgmr.msra.gmra.mxu1 %v18211_v3 }
  0x6b   : > { %1866 = vmatpush1.bf16.msra.mxu0 %v16449_v4  ;;  %1939 = vmatpush1.bf16.msra.mxu1 %v16452_v5  ;;  %v16542_v4 = vld [vmem:[%s24444_s0 + $0x298] ss:$36 sps:$4 sm:$0xff]   ;;  %v16545_v5 = vld [vmem:[%s24444_s0 + $0x2a0] ss:$36 sps:$4 sm:$0xff]  }
  0x6c   : > { %1867 = vmatprep.subr.bf16.mxu0 %v16457_v6  ;;  %1940 = vmatprep.subr.bf16.mxu1 %v16460_v7  ;;  %v16550_v6 = vld [vmem:[%s24444_s0 + $0x254] ss:$36 sps:$4 sm:$0xff]   ;;  %v16553_v7 = vld [vmem:[%s24444_s0 + $0x25c] ss:$36 sps:$4 sm:$0xff]  }
  0x6d   : > { %1834 = vmatprep.mubr.bf16.mxu1 %v18226_v8  ;;  %1761 = vmatprep.mubr.bf16.mxu0 %v18226_v8 }
  0x6f   : > { %1868 = vmatpush1.bf16.msra.mxu0 %v16455_v9  ;;  %1941 = vmatpush1.bf16.msra.mxu1 %v16458_v10  ;;  %v16548_v9 = vld [vmem:[%s24444_s0 + $0x250] ss:$36 sps:$4 sm:$0xff]   ;;  %v16551_v10 = vld [vmem:[%s24444_s0 + $0x258] ss:$36 sps:$4 sm:$0xff]  }
  0x70   : > { %1869 = vmatprep.subr.bf16.mxu0 %v16466_v11  ;;  %1942 = vmatprep.subr.bf16.mxu1 %v16469_v12  ;;  %v16554_v11 = vld [vmem:[%s24444_s0 + $0x458] ss:$36 sps:$4 sm:$0xff]  }
  0x71   : > { %v16555_v12 = vld [vmem:[%s24444_s0 + $0x218] ss:$36 sps:$4 sm:$0xff]  }
  0x72   : > { %1835 = vmatmul.mubr.bf16.gmra.mxu1 %v18245_v13  ;;  %1762 = vmatmul.mubr.bf16.gmra.mxu0 %v18245_v13 }
  0x73   : > { %1870 = vmatpush1.bf16.msra.mxu0 %v16464_v14  ;;  %1943 = vmatpush1.bf16.msra.mxu1 %v16467_v15  ;;  %v16556_v14 = vld [vmem:[%s24444_s0 + $0x410] ss:$36 sps:$4 sm:$0xff]  }
  0x74   : > { %1871 = vmatprep.subr.bf16.mxu0 %v16472_v16  ;;  %1944 = vmatprep.subr.bf16.mxu1 %v16475_v17  ;;  %v16557_v15 = vld [vmem:[%s24444_s0 + $0x1d0] ss:$36 sps:$4 sm:$0xff]   ;;  %v16558_v16 = vld [vmem:[%s24444_s0 + $0x3c8] ss:$36 sps:$4 sm:$0xff]  }
  0x75   : > { %1844 = vmatprep.mubr.bf16.mxu1 %v18260_v18  ;;  %1771 = vmatprep.mubr.bf16.mxu0 %v18260_v18  ;;  %v16559_v17 = vld [vmem:[%s24444_s0 + $0x188] ss:$36 sps:$4 sm:$0xff]  }
  0x77   : > { %1872 = vmatpush1.bf16.msra.mxu0 %v16470_v19  ;;  %1945 = vmatpush1.bf16.msra.mxu1 %v16473_v20  ;;  %v16560_v19 = vld [vmem:[%s24444_s0 + $0x380] ss:$36 sps:$4 sm:$0xff]  }
  0x78   : > { %1873 = vmatprep.subr.bf16.mxu0 %v16481_v21  ;;  %1946 = vmatprep.subr.bf16.mxu1 %v16484_v22  ;;  %v16561_v20 = vld [vmem:[%s24444_s0 + $0x140] ss:$36 sps:$4 sm:$0xff]   ;;  %v16562_v21 = vld [vmem:[%s24444_s0 + $0x338] ss:$36 sps:$4 sm:$0xff]  }
  0x79   : > { %v16563_v22 = vld [vmem:[%s24444_s0 + $0xf8] ss:$36 sps:$4 sm:$0xff]  }
  0x7a   : > { %1845 = vmatmul.mubr.bf16.gmra.mxu1 %v18279_v23  ;;  %1772 = vmatmul.mubr.bf16.gmra.mxu0 %v18279_v23 }
  0x7b   : > { %1874 = vmatpush1.bf16.msra.mxu0 %v16479_v24  ;;  %1947 = vmatpush1.bf16.msra.mxu1 %v16482_v25  ;;  %v16564_v24 = vld [vmem:[%s24444_s0 + $0x2f0] ss:$36 sps:$4 sm:$0xff]  }
  0x7c   : > { %1875 = vmatprep.subr.bf16.mxu0 %v16487_v26  ;;  %1948 = vmatprep.subr.bf16.mxu1 %v16490_v27  ;;  %v16565_v25 = vld [vmem:[%s24444_s0 + $0xb0] ss:$36 sps:$4 sm:$0xff]   ;;  %v16566_v26 = vld [vmem:[%s24444_s0 + $0x2a8] ss:$36 sps:$4 sm:$0xff]  }
  0x7d   : > { %1854 = vmatprep.mubr.bf16.mxu1 %v18294_v28  ;;  %1781 = vmatprep.mubr.bf16.mxu0 %v18294_v28  ;;  %v16567_v27 = vld [vmem:[%s24444_s0 + $0x68] ss:$36 sps:$4 sm:$0xff]  }
  0x7f   : > { %1876 = vmatpush1.bf16.msra.mxu0 %v16485_v29  ;;  %1949 = vmatpush1.bf16.msra.mxu1 %v16488_v30  ;;  %v16568_v29 = vld [vmem:[%s24444_s0 + $0x260] ss:$36 sps:$4 sm:$0xff]  }
  0x80   : > { %1877 = vmatprep.subr.bf16.mxu0 %v16496_v31  ;;  %1950 = vmatprep.subr.bf16.mxu1 %v16499_v32  ;;  %v16569_v30 = vld [vmem:[%s24444_s0 + $0x20] ss:$36 sps:$4 sm:$0xff]   ;;  %s24456_s0 = sld [smem:[#allocation43_spill]] }
  0x82   : > { %1855 = vmatmul.mubr.bf16.gmra.mxu1 %v18313_v33  ;;  %1782 = vmatmul.mubr.bf16.gmra.mxu0 %v18313_v33 }
  0x83   : > { %1878 = vmatpush1.bf16.msra.mxu0 %v16494_v34  ;;  %1951 = vmatpush1.bf16.msra.mxu1 %v16497_v35 }
  0x84   : > { %1879 = vmatprep.subr.bf16.mxu0 %v16502_v36  ;;  %1952 = vmatprep.subr.bf16.mxu1 %v16505_v37 }
  0x85   : > { %1897 = vmatprep.mubr.bf16.mxu0 %v18152_v48  ;;  %1970 = vmatprep.mubr.bf16.mxu1 %v18152_v48 }
  0x87   : > { %1880 = vmatpush1.bf16.msra.mxu0 %v16500_v38  ;;  %1953 = vmatpush1.bf16.msra.mxu1 %v16503_v39 }
  0x88   : > { %1881 = vmatprep.subr.bf16.mxu0 %v16508_v40  ;;  %1954 = vmatprep.subr.bf16.mxu1 %v16511_v41 }
  0x8b   : > { %1882 = vmatpush2.bf16.msra.mxu0 %v16506_v42  ;;  %1955 = vmatpush2.bf16.msra.mxu1 %v16509_v43 }
  0x8c   : > { %1883 = vmatprep.subr.bf16.mxu0 %v16514_v44  ;;  %1956 = vmatprep.subr.bf16.mxu1 %v16517_v45 }
  0x8f   : > { %1884 = vmatpush2.bf16.msra.mxu0 %v16512_v46  ;;  %1957 = vmatpush2.bf16.msra.mxu1 %v16515_v47 }
  0x90   : > { %1885 = vmatprep.subr.bf16.mxu0 %v16520_v49  ;;  %1958 = vmatprep.subr.bf16.mxu1 %v16523_v50 }
  0x93   : > { %1886 = vmatpush2.bf16.msra.mxu0 %v16518_v51  ;;  %1959 = vmatpush2.bf16.msra.mxu1 %v16521_v52 }
  0x94   : > { %1887 = vmatprep.subr.bf16.mxu0 %v16526_v53  ;;  %1960 = vmatprep.subr.bf16.mxu1 %v16529_v54 }
  0x97   : > { %1888 = vmatpush2.bf16.msra.mxu0 %v16524_v55  ;;  %1961 = vmatpush2.bf16.msra.mxu1 %v16527_v56 }
  0x98   : > { %1889 = vmatprep.subr.bf16.mxu0 %v16532_v57  ;;  %1962 = vmatprep.subr.bf16.mxu1 %v16535_v58 }
  0x9b   : > { %1890 = vmatpush2.bf16.msra.mxu0 %v16530_v59  ;;  %1963 = vmatpush2.bf16.msra.mxu1 %v16533_v60 }
  0x9c   : > { %1891 = vmatprep.subr.bf16.mxu0 %v16538_v61  ;;  %1964 = vmatprep.subr.bf16.mxu1 %v16541_v62 }
  0x9f   : > { %1892 = vmatpush2.bf16.msra.mxu0 %v16536_v63  ;;  %1965 = vmatpush2.bf16.msra.mxu1 %v16539_v0 }
  0xa0   : > { %1893 = vmatprep.subr.bf16.mxu0 %v16544_v1  ;;  %1966 = vmatprep.subr.bf16.mxu1 %v16547_v2 }
  0xa3   : > { %1894 = vmatpush2.bf16.msra.mxu0 %v16542_v4  ;;  %1967 = vmatpush2.bf16.msra.mxu1 %v16545_v5 }
  0xa4   : > { %1895 = vmatprep.subr.bf16.mxu0 %v16550_v6  ;;  %1968 = vmatprep.subr.bf16.mxu1 %v16553_v7 }
  0xa7   : > { %1896 = vmatpush2.bf16.msra.mxu0 %v16548_v9  ;;  %1969 = vmatpush2.bf16.msra.mxu1 %v16551_v10 }
  0xa8   : > { %14538 = vmatprep.subr.bf16.mxu0 %v16554_v11 }
  0xaa   : > { %1898 = vmatmul.mubr.bf16.vlgmr.msra.gmra.mxu0 %v18211_v3  ;;  %1971 = vmatmul.mubr.bf16.vlgmr.msra.gmra.mxu1 %v18211_v3 }
  0xab   : > { %1907 = vmatprep.mubr.bf16.mxu0 %v18226_v8  ;;  %1980 = vmatprep.mubr.bf16.mxu1 %v18226_v8 }
  0xac   : > { %14539 = vmatpush3.bf16.msra.mxu0 %v16555_v12  ;;  %v16570_v12 = vld [vmem:[%s24447_s28] ss:$20 sps:$4 sm:$0xff]  }
  0xad   : > { %14540 = vmatprep.subr.bf16.mxu0 %v16556_v14 }
  0xb0   : > { %14541 = vmatpush3.bf16.msra.mxu0 %v16557_v15  ;;  %v16573_v15 = vld [vmem:[%s24447_s28 + $0x2c] ss:$20 sps:$4 sm:$0xff]  }
  0xb1   : > { %14542 = vmatprep.subr.bf16.mxu0 %v16558_v16  ;;  %v24372_v16 = vmov 0.0  }
  0xb2   : > { %1908 = vmatmul.mubr.bf16.gmra.mxu0 %v18245_v13  ;;  %1981 = vmatmul.mubr.bf16.gmra.mxu1 %v18245_v13 }
  0xb3   : > { %1917 = vmatprep.mubr.bf16.mxu0 %v18260_v18  ;;  %1990 = vmatprep.mubr.bf16.mxu1 %v18260_v18 }
  0xb4   : > { %14543 = vmatpush3.bf16.msra.mxu0 %v16559_v17 }
  0xb5   : > { %14544 = vmatprep.subr.bf16.mxu0 %v16560_v19 }
  0xb8   : > { %14545 = vmatpush3.bf16.msra.mxu0 %v16561_v20 }
  0xb9   : > { %14546 = vmatprep.subr.bf16.mxu0 %v16562_v21 }
  0xba   : > { %1918 = vmatmul.mubr.bf16.gmra.mxu0 %v18279_v23  ;;  %1991 = vmatmul.mubr.bf16.gmra.mxu1 %v18279_v23 }
  0xbb   : > { %1927 = vmatprep.mubr.bf16.mxu0 %v18294_v28  ;;  %2000 = vmatprep.mubr.bf16.mxu1 %v18294_v28 }
  0xbc   : > { %14547 = vmatpush3.bf16.msra.mxu0 %v16563_v22  ;;  %v16575_v22 = vld [vmem:[%s24447_s28 + $0x28] ss:$20 sps:$4 sm:$0xff]  }
  0xbd   : > { %14548 = vmatprep.subr.bf16.mxu0 %v16564_v24 }
  0xc0   : > { %14549 = vmatpush3.bf16.msra.mxu0 %v16565_v25 }
  0xc1   : > { %14550 = vmatprep.subr.bf16.mxu0 %v16566_v26  ;;  %v16576_v26 = vld [vmem:[%s24447_s28 + $0x54] ss:$20 sps:$4 sm:$0xff]  }
  0xc2   : > { %1928 = vmatmul.mubr.bf16.gmra.mxu0 %v18313_v33  ;;  %2001 = vmatmul.mubr.bf16.gmra.mxu1 %v18313_v33 }
  0xc3   : > { %2043 = vmatprep.mubr.bf16.mxu0 %v18152_v48  ;;  %v16572_v48 = vld [vmem:[%s24446_s25 + $0x4] ss:$20 sps:$4 sm:$0xff]  }
  0xc4   : > { %14551 = vmatpush3.bf16.msra.mxu0 %v16567_v27  ;;  %2583 = vmatprep.mubr.bf16.mxu1 %v16572_v48 }
  0xc5   : > { %14552 = vmatprep.subr.bf16.mxu0 %v16568_v29 }
  0xc8   : > { %14553 = vmatpush3.bf16.msra.mxu0 %v16569_v30 }
  0xcb   : > { %2044 = vmatmul.mubr.bf16.vlgmr.msra.gmra.mxu0 %v18211_v3  ;;  %v16598_v3 = vld [vmem:[%s24447_s28 + $0xc] ss:$20 sps:$4 sm:$0xff]  }
  0xcc   : > { %2051 = vmatprep.mubr.bf16.mxu0 %v18226_v8 }
  0xd3   : > { %2052 = vmatmul.mubr.bf16.gmra.mxu0 %v18245_v13 }
  0xd4   : > { %2059 = vmatprep.mubr.bf16.mxu0 %v18260_v18 }
  0xdb   : > { %2060 = vmatmul.mubr.bf16.gmra.mxu0 %v18279_v23 }
  0xdc   : > { %2067 = vmatprep.mubr.bf16.mxu0 %v18294_v28 }
  0xe3   : > { %2068 = vmatmul.mubr.bf16.gmra.mxu0 %v18313_v33 }
  0xe4   : > { %2719 = vmatprep.mubr.bf16.mxu0 %v16598_v3 }
 0x12a   : > { %v18509_v8 = vpop.f32.mrf.mxu0  ;;  %v1826_v13 = vpop.f32.mrf.mxu1 }
 0x12c   : > { %v1755_v18 = vpop.f32.mrf.mxu0  ;;  %v1828_v31 = vpop.f32.mrf.mxu1 }
 0x12e   : > { %v1757_v23 = vpop.f32.mrf.mxu0  ;;  %v1830_v32 = vpop.f32.mrf.mxu1 }
 0x12f   : > { %v2078_v11 = vpack.c.bf16 %v1830_v32, %v1826_v13  ;;  %v2076_v14 = vpack.c.bf16 %v1757_v23, %v18509_v8  ;;  %v16578_v13 = vld [vmem:[%s24447_s28 + $0x50] ss:$20 sps:$4 sm:$0xff]  }
 0x130   : > { %v1759_v28 = vpop.f32.mrf.mxu0  ;;  %v1832_v34 = vpop.f32.mrf.mxu1  ;;  %v16579_v23 = vld [vmem:[%s24447_s28 + $0x7c] ss:$20 sps:$4 sm:$0xff]  }
 0x131   : > { %v2079_v1 = vpack.c.bf16 %v1832_v34, %v1828_v31  ;;  %v2077_v4 = vpack.c.bf16 %v1759_v28, %v1755_v18 }
 0x132   : > { %v1836_v33 = vpop.f32.mrf.mxu1  ;;  %v1763_v35 = vpop.f32.mrf.mxu0 }
 0x134   : > { %v1838_v36 = vpop.f32.mrf.mxu1  ;;  %v1765_v37 = vpop.f32.mrf.mxu0 }
 0x136   : > { %v1840_v38 = vpop.f32.mrf.mxu1  ;;  %v1767_v39 = vpop.f32.mrf.mxu0 }
 0x137   : > { %v2087_v9 = vpack.c.bf16 %v1840_v38, %v1836_v33  ;;  %v2085_v10 = vpack.c.bf16 %v1767_v39, %v1763_v35 }
 0x138   : > { %v1842_v40 = vpop.f32.mrf.mxu1  ;;  %v1769_v41 = vpop.f32.mrf.mxu0 }
 0x139   : > { %v2088_v63 = vpack.c.bf16 %v1842_v40, %v1838_v36  ;;  %v2086_v0 = vpack.c.bf16 %v1769_v41, %v1765_v37  ;;  %v16581_v37 = vld [vmem:[%s24447_s28 + $0x78] ss:$20 sps:$4 sm:$0xff]  }
 0x13a   : > { %v1846_v42 = vpop.f32.mrf.mxu1  ;;  %v1773_v43 = vpop.f32.mrf.mxu0  ;;  %v16582_v40 = vld [vmem:[%s24447_s28 + $0xa4] ss:$20 sps:$4 sm:$0xff]  }
 0x13c   : > { %v1848_v44 = vpop.f32.mrf.mxu1  ;;  %v1775_v45 = vpop.f32.mrf.mxu0 }
 0x13e   : > { %v1850_v46 = vpop.f32.mrf.mxu1  ;;  %v1777_v47 = vpop.f32.mrf.mxu0 }
 0x13f   : > { %v2096_v6 = vpack.c.bf16 %v1850_v46, %v1846_v42  ;;  %v2094_v7 = vpack.c.bf16 %v1777_v47, %v1773_v43  ;;  %v16584_v47 = vld [vmem:[%s24447_s28 + $0xa0] ss:$20 sps:$4 sm:$0xff]  }
 0x140   : > { %v1852_v49 = vpop.f32.mrf.mxu1  ;;  %v1779_v50 = vpop.f32.mrf.mxu0 }
 0x141   : > { %v2097_v59 = vpack.c.bf16 %v1852_v49, %v1848_v44  ;;  %v2095_v62 = vpack.c.bf16 %v1779_v50, %v1775_v45 }
 0x142   : > { %v1856_v51 = vpop.f32.mrf.mxu1  ;;  %v1783_v52 = vpop.f32.mrf.mxu0 }
 0x144   : > { %v1858_v53 = vpop.f32.mrf.mxu1  ;;  %v1785_v54 = vpop.f32.mrf.mxu0 }
 0x146   : > { %v1860_v55 = vpop.f32.mrf.mxu1  ;;  %v1787_v56 = vpop.f32.mrf.mxu0 }
 0x147   : > { %v2105_v2 = vpack.c.bf16 %v1860_v55, %v1856_v51  ;;  %v2103_v5 = vpack.c.bf16 %v1787_v56, %v1783_v52  ;;  %v16585_v51 = vld [vmem:[%s24447_s28 + $0xcc] ss:$20 sps:$4 sm:$0xff]  }
 0x148   : > { %v1862_v57 = vpop.f32.mrf.mxu1  ;;  %v1789_v58 = vpop.f32.mrf.mxu0 }
 0x149   : > { %v2106_v60 = vpack.c.bf16 %v1862_v57, %v1858_v53  ;;  %v2104_v61 = vpack.c.bf16 %v1789_v58, %v1785_v54  ;;  %v16587_v58 = vld [vmem:[%s24447_s28 + $0xc8] ss:$20 sps:$4 sm:$0xff]  }
 0x14b   : > { %14578 = vmatprep.subr.bf16.mxu1 %v2106_v60 }
 0x14c   : > { %14579 = vmatpush3.bf16.msra.mxu1 %v2104_v61  ;;  %v16588_v61 = vld [vmem:[%s24447_s28 + $0xf4] ss:$20 sps:$4 sm:$0xff]  }
 0x14d   : > { %14580 = vmatprep.subr.bf16.mxu1 %v2097_v59 }
 0x150   : > { %14581 = vmatpush3.bf16.msra.mxu1 %v2095_v62 }
 0x151   : > { %14582 = vmatprep.subr.bf16.mxu1 %v2088_v63 }
 0x154   : > { %14583 = vmatpush3.bf16.msra.mxu1 %v2086_v0 }
 0x155   : > { %14584 = vmatprep.subr.bf16.mxu1 %v2079_v1 }
 0x158   : > { %14585 = vmatpush3.bf16.msra.mxu1 %v2077_v4 }
 0x159   : > { %14586 = vmatprep.subr.bf16.mxu1 %v2105_v2 }
 0x15c   : > { %14587 = vmatpush3.bf16.msra.mxu1 %v2103_v5  ;;  %v16590_v5 = vld [vmem:[%s24447_s28 + $0xf0] ss:$20 sps:$4 sm:$0xff]  }
 0x15d   : > { %14588 = vmatprep.subr.bf16.mxu1 %v2096_v6 }
 0x160   : > { %14589 = vmatpush3.bf16.msra.mxu1 %v2094_v7 }
 0x161   : > { %14590 = vmatprep.subr.bf16.mxu1 %v2087_v9 }
 0x164   : > { %14591 = vmatpush3.bf16.msra.mxu1 %v2085_v10 }
 0x165   : > { %14592 = vmatprep.subr.bf16.mxu1 %v2078_v11  ;;  %v16591_v11 = vld [vmem:[%s24447_s28 + $0x11c] ss:$20 sps:$4 sm:$0xff]  }
 0x168   : > { %14593 = vmatpush3.bf16.msra.mxu1 %v2076_v14 }
 0x169   : > { %15941 = vmatprep.subr.bf16.mxu1 %v24372_v16 }
 0x16a   : > { %v18519_v17 = vpop.f32.mrf.mxu0  ;;  %v18521_v19 = vpop.f32.mrf.mxu1 }
 0x16b   : > { %2584 = vmatmul.mubr.bf16.vlgmr.msra.gmra.mxu1 %v16570_v12 }
 0x16c   : > { %v18523_v20 = vpop.f32.mrf.mxu0  ;;  %v18525_v21 = vpop.f32.mrf.mxu1  ;;  %2591 = vmatprep.mubr.bf16.mxu1 %v16573_v15 }
 0x16e   : > { %v18530_v24 = vpop.f32.mrf.mxu0  ;;  %v18532_v25 = vpop.f32.mrf.mxu1 }
 0x170   : > { %v18537_v27 = vpop.f32.mrf.mxu0  ;;  %v1978_v29 = vpop.f32.mrf.mxu1 }
 0x171   : > { %v2083_v2 = vpack.c.bf16 %v1978_v29, %v18525_v21  ;;  %v2081_v7 = vpack.c.bf16 %v18537_v27, %v18523_v20  ;;  %v16593_v20 = vld [vmem:[%s24447_s28 + $0x118] ss:$20 sps:$4 sm:$0xff]  }
 0x172   : > { %v18539_v30 = vpop.f32.mrf.mxu0  ;;  %v18541_v48 = vpop.f32.mrf.mxu1 }
 0x173   : > { %2592 = vmatmul.mubr.bf16.gmra.mxu1 %v16575_v22 }
 0x174   : > { %v1911_v3 = vpop.f32.mrf.mxu0  ;;  %v1984_v8 = vpop.f32.mrf.mxu1  ;;  %2599 = vmatprep.mubr.bf16.mxu1 %v16576_v26 }
 0x176   : > { %v18546_v18 = vpop.f32.mrf.mxu0  ;;  %v18548_v31 = vpop.f32.mrf.mxu1 }
 0x177   : > { %v2091_v27 = vpack.c.bf16 %v18548_v31, %v18541_v48  ;;  %v16627_v48 = vld [vmem:[%s24449_s26 + $0x1fc] ss:$36 sps:$4 sm:$0xff]  }
 0x178   : > { %v1915_v32 = vpop.f32.mrf.mxu0  ;;  %v1988_v28 = vpop.f32.mrf.mxu1  ;;  %v16596_v31 = vld [vmem:[%s24447_s28 + $0x8] ss:$20 sps:$4 sm:$0xff]  }
 0x179   : > { %v2092_v62 = vpack.c.bf16 %v1988_v28, %v1984_v8  ;;  %v2090_v1 = vpack.c.bf16 %v1915_v32, %v1911_v3  ;;  %v16594_v3 = vld [vmem:[%s24447_s28 + $0x144] ss:$20 sps:$4 sm:$0xff]   ;;  %v16600_v28 = vld [vmem:[%s24447_s28 + $0x16c] ss:$20 sps:$4 sm:$0xff]  }
 0x17a   : > { %v18553_v34 = vpop.f32.mrf.mxu0  ;;  %v18555_v33 = vpop.f32.mrf.mxu1 }
 0x17b   : > { %2600 = vmatmul.mubr.bf16.gmra.mxu1 %v16578_v13  ;;  %v2089_v13 = vpack.c.bf16 %v18546_v18, %v18539_v30  ;;  %v16599_v30 = vld [vmem:[%s24447_s28 + $0x140] ss:$20 sps:$4 sm:$0xff]  }
 0x17c   : > { %v1921_v35 = vpop.f32.mrf.mxu0  ;;  %v1994_v36 = vpop.f32.mrf.mxu1  ;;  %2607 = vmatprep.mubr.bf16.mxu1 %v16579_v23  ;;  %v2082_v23 = vpack.c.bf16 %v18532_v25, %v18521_v19  ;;  %v2080_v19 = vpack.c.bf16 %v18530_v24, %v18519_v17  ;;  %v16632_v24 = vld [vmem:[%s24449_s26 + $0x1b4] ss:$36 sps:$4 sm:$0xff]  }
 0x17e   : > { %v18560_v38 = vpop.f32.mrf.mxu0  ;;  %v1996_v39 = vpop.f32.mrf.mxu1 }
 0x17f   : > { %v2100_v15 = vpack.c.bf16 %v1996_v39, %v18555_v33  ;;  %v2098_v26 = vpack.c.bf16 %v18560_v38, %v18553_v34  ;;  %v16602_v34 = vld [vmem:[%s24447_s28 + $0x34] ss:$20 sps:$4 sm:$0xff]  }
 0x180   : > { %v1925_v41 = vpop.f32.mrf.mxu0  ;;  %v1998_v42 = vpop.f32.mrf.mxu1 }
 0x181   : > { %v2101_v56 = vpack.c.bf16 %v1998_v42, %v1994_v36  ;;  %v2099_v60 = vpack.c.bf16 %v1925_v41, %v1921_v35  ;;  %v16625_v36 = vld [vmem:[%s24449_s26 + $0x1f8] ss:$36 sps:$4 sm:$0xff]   ;;  %v16605_v41 = vld [vmem:[%s24447_s28 + $0x30] ss:$20 sps:$4 sm:$0xff]  }
 0x182   : > { %v1929_v43 = vpop.f32.mrf.mxu0  ;;  %v2002_v44 = vpop.f32.mrf.mxu1  ;;  %v16630_v42 = vld [vmem:[%s24449_s26 + $0x1b0] ss:$36 sps:$4 sm:$0xff]  }
 0x183   : > { %2608 = vmatmul.mubr.bf16.gmra.mxu1 %v16581_v37 }
 0x184   : > { %v1931_v45 = vpop.f32.mrf.mxu0  ;;  %v2004_v46 = vpop.f32.mrf.mxu1  ;;  %2615 = vmatprep.mubr.bf16.mxu1 %v16582_v40  ;;  %v16604_v40 = vld [vmem:[%s24447_s28 + $0x168] ss:$20 sps:$4 sm:$0xff]  }
 0x186   : > { %v1933_v49 = vpop.f32.mrf.mxu0  ;;  %v2006_v50 = vpop.f32.mrf.mxu1 }
 0x187   : > { %v2109_v9 = vpack.c.bf16 %v2006_v50, %v2002_v44  ;;  %v2107_v14 = vpack.c.bf16 %v1933_v49, %v1929_v43  ;;  %v16608_v49 = vld [vmem:[%s24447_s28 + $0x5c] ss:$20 sps:$4 sm:$0xff]   ;;  %v16635_v50 = vld [vmem:[%s24449_s26 + $0x168] ss:$36 sps:$4 sm:$0xff]  }
 0x188   : > { %v1935_v52 = vpop.f32.mrf.mxu0  ;;  %v2008_v53 = vpop.f32.mrf.mxu1 }
 0x189   : > { %v2108_v54 = vpack.c.bf16 %v1935_v52, %v1931_v45  ;;  %v2110_v55 = vpack.c.bf16 %v2008_v53, %v2004_v46  ;;  %v16637_v46 = vld [vmem:[%s24449_s26 + $0x16c] ss:$36 sps:$4 sm:$0xff]  }
 0x18b   : > { %2616 = vmatmul.mubr.bf16.gmra.mxu1 %v16584_v47  ;;  %14672 = vmatprep.subr.bf16.mxu0 %v2110_v55  ;;  %v18571_v57 = vpop.f32.mrf.mxu0  ;;  %v16606_v47 = vld [vmem:[%s24447_s28 + $0x194] ss:$20 sps:$4 sm:$0xff]   ;;  %v16610_v55 = vld [vmem:[%s24447_s28 + $0x190] ss:$20 sps:$4 sm:$0xff]  }
 0x18c   : > { %14673 = vmatpush3.bf16.msra.mxu0 %v2108_v54  ;;  %2623 = vmatprep.mubr.bf16.mxu1 %v16585_v51  ;;  %v16642_v54 = vld [vmem:[%s24449_s26 + $0x124] ss:$36 sps:$4 sm:$0xff]  }
 0x18d   : > { %14674 = vmatprep.subr.bf16.mxu0 %v2101_v56  ;;  %v18582_v59 = vpop.f32.mrf.mxu0  ;;  %v16611_v56 = vld [vmem:[%s24447_s28 + $0x58] ss:$20 sps:$4 sm:$0xff]  }
 0x18e   : > { %v14556_v51 = vadd.f32 %v18582_v59, %v18571_v57  ;;  %v16640_v57 = vld [vmem:[%s24449_s26 + $0x120] ss:$36 sps:$4 sm:$0xff]   ;;  %v16612_v59 = vld [vmem:[%s24447_s28 + $0x1bc] ss:$20 sps:$4 sm:$0xff]  }
 0x18f   : > { %v18587_v63 = vpop.f32.mrf.mxu0 }
 0x190   : > { %14675 = vmatpush3.bf16.msra.mxu0 %v2099_v60  ;;  %v16647_v60 = vld [vmem:[%s24449_s26 + $0xdc] ss:$36 sps:$4 sm:$0xff]  }
 0x191   : > { %14676 = vmatprep.subr.bf16.mxu0 %v2092_v62  ;;  %v18589_v0 = vpop.f32.mrf.mxu0  ;;  %v16645_v62 = vld [vmem:[%s24449_s26 + $0xd8] ss:$36 sps:$4 sm:$0xff]  }
 0x192   : > { %v14559_v52 = vadd.f32 %v18589_v0, %v18587_v63  ;;  %v16728_v63 = vld [vmem:[%s24449_s26 + $0x20c] ss:$36 sps:$4 sm:$0xff]   ;;  %v16652_v0 = vld [vmem:[%s24449_s26 + $0x94] ss:$36 sps:$4 sm:$0xff]  }
 0x193   : > { %2624 = vmatmul.mubr.bf16.gmra.mxu1 %v16587_v58  ;;  %v14560_v4 = vpop.f32.mrf.mxu0 }
 0x194   : > { %14677 = vmatpush3.bf16.msra.mxu0 %v2090_v1  ;;  %2631 = vmatprep.mubr.bf16.mxu1 %v16588_v61  ;;  %v2084_v58 = vpack.c.bf16 %v14559_v52, %v14556_v51  ;;  %v16614_v61 = vld [vmem:[%s24447_s28 + $0x84] ss:$20 sps:$4 sm:$0xff]   ;;  %v16658_v51 = vld [vmem:[%s24447_s28 + $0x148] ss:$20 sps:$4 sm:$0xff]  }
 0x195   : > { %14678 = vmatprep.subr.bf16.mxu0 %v2083_v2  ;;  %v14561_v6 = vpop.f32.mrf.mxu0  ;;  %v2184_v1 = vld [vmem:[%s24447_s28 + $0x1e0] sm:$0xff]  ;;  %v16616_v2 = vld [vmem:[%s24447_s28 + $0x1b8] ss:$20 sps:$4 sm:$0xff]   ;;  %v16659_v52 = vld [vmem:[%s24447_s28 + $0x88] ss:$20 sps:$4 sm:$0xff]  }
 0x196   : > { %v14562_v43 = vadd.f32 %v14561_v6, %v14560_v4  ;;  %v16617_v4 = vld [vmem:[%s24447_s28 + $0x80] ss:$20 sps:$4 sm:$0xff]   ;;  %v16657_v6 = vld [vmem:[%s24449_s26 + $0x4c] ss:$36 sps:$4 sm:$0xff]  }
 0x197   : > { %v14563_v10 = vpop.f32.mrf.mxu0 }
 0x198   : > { %14679 = vmatpush3.bf16.msra.mxu0 %v2081_v7  ;;  %v13698_v7 = vcombine.high %v2184_v1, %v2184_v1 }
 0x199   : > { %14680 = vmatprep.subr.bf16.mxu0 %v2109_v9  ;;  %v14564_v12 = vpop.f32.mrf.mxu0  ;;  %v16619_v9 = vld [vmem:[%s24447_s28 + $0xac] ss:$20 sps:$4 sm:$0xff]  }
 0x19a   : > { %v14565_v44 = vadd.f32 %v14564_v12, %v14563_v10  ;;  %v16655_v10 = vld [vmem:[%s24449_s26 + $0x48] ss:$36 sps:$4 sm:$0xff]  }
 0x19b   : > { %2632 = vmatmul.mubr.bf16.gmra.mxu1 %v16590_v5  ;;  %v14566_v21 = vpop.f32.mrf.mxu0  ;;  %v16650_v5 = vld [vmem:[%s24449_s26 + $0x90] ss:$36 sps:$4 sm:$0xff]   ;;  %v16622_v12 = vld [vmem:[%s24447_s28 + $0xa8] ss:$20 sps:$4 sm:$0xff]  }
 0x19c   : > { %14681 = vmatpush3.bf16.msra.mxu0 %v2107_v14  ;;  %2639 = vmatprep.mubr.bf16.mxu1 %v16591_v11  ;;  %v2093_v53 = vpack.c.bf16 %v14565_v44, %v14562_v43  ;;  %v16662_v11 = vld [vmem:[%s24449_s26 + $0x4] ss:$36 sps:$4 sm:$0xff]   ;;  %v16757_v43 = vld [vmem:[%s24449_s26 + $0xec] ss:$36 sps:$4 sm:$0xff]  }
 0x19d   : > { %14682 = vmatprep.subr.bf16.mxu0 %v2100_v15  ;;  %v14567_v22 = vpop.f32.mrf.mxu0  ;;  %v16660_v14 = vld [vmem:[%s24449_s26] ss:$36 sps:$4 sm:$0xff]   ;;  %v16694_v44 = vld [vmem:[%s24449_s26 + $0x288] ss:$36 sps:$4 sm:$0xff]  }
 0x19e   : > { %v14568_v37 = vadd.f32 %v14567_v22, %v14566_v21  ;;  %v16667_v15 = vld [vmem:[%s24449_s26 + $0x43c] ss:$36 sps:$4 sm:$0xff]   ;;  %v13697_v21 = vcombine.low %v2184_v1, %v2184_v1  ;;  %v16678_v1 = vld [vmem:[%s24447_s28 + $0x198] ss:$20 sps:$4 sm:$0xff]  }
 0x19f   : > { %v14569_v29 = vpop.f32.mrf.mxu0  ;;  %v16665_v22 = vld [vmem:[%s24449_s26 + $0x438] ss:$36 sps:$4 sm:$0xff]  }
 0x1a0   : > { %14683 = vmatpush3.bf16.msra.mxu0 %v2098_v26  ;;  %v16672_v26 = vld [vmem:[%s24449_s26 + $0x3f4] ss:$36 sps:$4 sm:$0xff]  }
 0x1a1   : > { %14684 = vmatprep.subr.bf16.mxu0 %v2091_v27  ;;  %v14570_v8 = vpop.f32.mrf.mxu0  ;;  %v16628_v27 = vld [vmem:[%s24447_s28 + $0xd0] ss:$20 sps:$4 sm:$0xff]  }
 0x1a2   : > { %v14571_v38 = vadd.f32 %v14570_v8, %v14569_v29  ;;  %v16629_v29 = vld [vmem:[%s24447_s28 + $0x10] ss:$20 sps:$4 sm:$0xff]  }
 0x1a3   : > { %2640 = vmatmul.mubr.bf16.gmra.mxu1 %v16593_v20  ;;  %v14572_v32 = vpop.f32.mrf.mxu0  ;;  %v16623_v20 = vld [vmem:[%s24447_s28 + $0xd4] ss:$20 sps:$4 sm:$0xff]   ;;  %v16633_v8 = vld [vmem:[%s24447_s28 + $0xfc] ss:$20 sps:$4 sm:$0xff]  }
 0x1a4   : > { %14685 = vmatpush3.bf16.msra.mxu0 %v2089_v13  ;;  %2647 = vmatprep.mubr.bf16.mxu1 %v16594_v3  ;;  %v2102_v45 = vpack.c.bf16 %v14571_v38, %v14568_v37  ;;  %v16670_v3 = vld [vmem:[%s24449_s26 + $0x3f0] ss:$36 sps:$4 sm:$0xff]   ;;  %v16739_v37 = vld [vmem:[%s24449_s26 + $0x178] ss:$36 sps:$4 sm:$0xff]  }
 0x1a5   : > { %14686 = vmatprep.subr.bf16.mxu0 %v2082_v23  ;;  %v14573_v18 = vpop.f32.mrf.mxu0  ;;  %v16677_v13 = vld [vmem:[%s24449_s26 + $0x3ac] ss:$36 sps:$4 sm:$0xff]   ;;  %v16751_v38 = vld [vmem:[%s24449_s26 + $0x134] ss:$36 sps:$4 sm:$0xff]  }
 0x1a6   : > { %v14574_v33 = vadd.f32 %v14573_v18, %v14572_v32  ;;  %v16675_v23 = vld [vmem:[%s24449_s26 + $0x3a8] ss:$36 sps:$4 sm:$0xff]   ;;  %v16687_v18 = vld [vmem:[%s24449_s26 + $0x31c] ss:$36 sps:$4 sm:$0xff]  }
 0x1a7   : > { %v14575_v25 = vpop.f32.mrf.mxu0  ;;  %v16682_v32 = vld [vmem:[%s24449_s26 + $0x364] ss:$36 sps:$4 sm:$0xff]  }
 0x1a8   : > { %14687 = vmatpush3.bf16.msra.mxu0 %v2080_v19  ;;  %v16638_v19 = vld [vmem:[%s24447_s28 + $0xf8] ss:$20 sps:$4 sm:$0xff]  }
 0x1a9   : > { %v14576_v35 = vpop.f32.mrf.mxu0  ;;  %3953 = vmatprep.subr.bf16.mxu0 %v16627_v48  ;;  %v16726_v48 = vld [vmem:[%s24449_s26 + $0x208] ss:$36 sps:$4 sm:$0xff]  }
 0x1aa   : > { %v14577_v17 = vadd.f32 %v14576_v35, %v14575_v25  ;;  %v16639_v25 = vld [vmem:[%s24447_s28 + $0x38] ss:$20 sps:$4 sm:$0xff]  }
 0x1ab   : > { %2648 = vmatmul.mubr.bf16.gmra.mxu1 %v16599_v30  ;;  %2720 = vmatmul.mubr.bf16.vlgmr.msra.gmra.mxu0 %v16596_v31  ;;  %v16735_v31 = vld [vmem:[%s24449_s26 + $0x1c4] ss:$36 sps:$4 sm:$0xff]   ;;  %v16685_v35 = vld [vmem:[%s24449_s26 + $0x318] ss:$36 sps:$4 sm:$0xff]  }
 0x1ac   : > { %2655 = vmatprep.mubr.bf16.mxu1 %v16600_v28  ;;  %2727 = vmatprep.mubr.bf16.mxu0 %v16602_v34  ;;  %v2111_v39 = vpack.c.bf16 %v14577_v17, %v14574_v33  ;;  %v16680_v30 = vld [vmem:[%s24449_s26 + $0x360] ss:$36 sps:$4 sm:$0xff]   ;;  %v16690_v17 = vld [vmem:[%s24449_s26 + $0x2d0] ss:$36 sps:$4 sm:$0xff]  }
 0x1ad   : > { %3954 = vmatpush1.bf16.msra.mxu0 %v16625_v36  ;;  %v16733_v28 = vld [vmem:[%s24449_s26 + $0x1c0] ss:$36 sps:$4 sm:$0xff]   ;;  %v16692_v36 = vld [vmem:[%s24449_s26 + $0x2d4] ss:$36 sps:$4 sm:$0xff]  }
 0x1ae   : > { %15942 = vmatpush3.bf16.msra.mxu1 %v2111_v39  ;;  %3955 = vmatprep.subr.bf16.mxu0 %v16632_v24  ;;  %v16643_v34 = vld [vmem:[%s24447_s28 + $0x124] ss:$20 sps:$4 sm:$0xff]   ;;  %v16741_v33 = vld [vmem:[%s24449_s26 + $0x17c] ss:$36 sps:$4 sm:$0xff]   ;;  %v16696_v24 = vld [vmem:[%s24449_s26 + $0x28c] ss:$36 sps:$4 sm:$0xff]  }
 0x1af   : > { %15943 = vmatprep.subr.bf16.mxu1 %v24372_v16  ;;  %v16648_v39 = vld [vmem:[%s24447_s28 + $0x120] ss:$20 sps:$4 sm:$0xff]  }
 0x1b1   : > { %3956 = vmatpush1.bf16.msra.mxu0 %v16630_v42  ;;  %v16653_v42 = vld [vmem:[%s24447_s28 + $0x14c] ss:$20 sps:$4 sm:$0xff]  }
 0x1b2   : > { %15944 = vmatpush3.bf16.msra.mxu1 %v2102_v45  ;;  %3957 = vmatprep.subr.bf16.mxu0 %v16637_v46  ;;  %v16701_v45 = vld [vmem:[%s24449_s26 + $0x244] ss:$36 sps:$4 sm:$0xff]  }
 0x1b3   : > { %2656 = vmatmul.mubr.bf16.gmra.mxu1 %v16604_v40  ;;  %2728 = vmatmul.mubr.bf16.gmra.mxu0 %v16605_v41  ;;  %v16649_v40 = vld [vmem:[%s24447_s28 + $0x60] ss:$20 sps:$4 sm:$0xff]   ;;  %v16755_v46 = vld [vmem:[%s24449_s26 + $0xe8] ss:$36 sps:$4 sm:$0xff]  }
 0x1b4   : > { %2663 = vmatprep.mubr.bf16.mxu1 %v16606_v47  ;;  %2735 = vmatprep.mubr.bf16.mxu0 %v16608_v49  ;;  %v16749_v41 = vld [vmem:[%s24449_s26 + $0x130] ss:$36 sps:$4 sm:$0xff]   ;;  %v16766_v47 = vld [vmem:[%s24449_s26 + $0xa4] ss:$36 sps:$4 sm:$0xff]  }
 0x1b5   : > { %15945 = vmatprep.subr.bf16.mxu1 %v24372_v16  ;;  %3958 = vmatpush1.bf16.msra.mxu0 %v16635_v50  ;;  %v16699_v49 = vld [vmem:[%s24449_s26 + $0x240] ss:$36 sps:$4 sm:$0xff]  }
 0x1b6   : > { %15946 = vmatpush3.bf16.msra.mxu1 %v2093_v53  ;;  %3959 = vmatprep.subr.bf16.mxu0 %v16642_v54  ;;  %v16706_v50 = vld [vmem:[%s24449_s26 + $0x204] ss:$36 sps:$4 sm:$0xff]   ;;  %v16772_v54 = vld [vmem:[%s24449_s26 + $0x5c] ss:$36 sps:$4 sm:$0xff]  }
 0x1b7   : > { %15947 = vmatprep.subr.bf16.mxu1 %v24372_v16  ;;  %v16764_v53 = vld [vmem:[%s24449_s26 + $0xa0] ss:$36 sps:$4 sm:$0xff]  }
 0x1b9   : > { %3960 = vmatpush1.bf16.msra.mxu0 %v16640_v57  ;;  %v16781_v57 = vld [vmem:[%s24449_s26 + $0x14] ss:$36 sps:$4 sm:$0xff]  }
 0x1ba   : > { %15948 = vmatpush3.bf16.msra.mxu1 %v2084_v58  ;;  %3961 = vmatprep.subr.bf16.mxu0 %v16647_v60  ;;  %v16668_v58 = vld [vmem:[%s24447_s28 + $0x170] ss:$20 sps:$4 sm:$0xff]  }
 0x1bb   : > { %2664 = vmatmul.mubr.bf16.gmra.mxu1 %v16610_v55  ;;  %2736 = vmatmul.mubr.bf16.gmra.mxu0 %v16611_v56  ;;  %v16663_v55 = vld [vmem:[%s24447_s28 + $0x174] ss:$20 sps:$4 sm:$0xff]   ;;  %v16770_v56 = vld [vmem:[%s24449_s26 + $0x58] ss:$36 sps:$4 sm:$0xff]  }
 0x1bc   : > { %2671 = vmatprep.mubr.bf16.mxu1 %v16612_v59  ;;  %2743 = vmatprep.mubr.bf16.mxu0 %v16614_v61  ;;  %v16669_v59 = vld [vmem:[%s24447_s28 + $0xb0] ss:$20 sps:$4 sm:$0xff]  }
 0x1bd   : > { %3962 = vmatpush1.bf16.msra.mxu0 %v16645_v62  ;;  %4099 = vmatprep.subr.bf16.mxu1 %v16728_v63  ;;  %v16779_v60 = vld [vmem:[%s24449_s26 + $0x10] ss:$36 sps:$4 sm:$0xff]   ;;  %v16785_v63 = vld [vmem:[%s24449_s26 + $0x448] ss:$36 sps:$4 sm:$0xff]  }
 0x1be   : > { %3963 = vmatprep.subr.bf16.mxu0 %v16652_v0  ;;  %v16787_v61 = vld [vmem:[%s24449_s26 + $0x44c] ss:$36 sps:$4 sm:$0xff]   ;;  %v16793_v0 = vld [vmem:[%s24449_s26 + $0x404] ss:$36 sps:$4 sm:$0xff]  }
 0x1bf   : > { %v16673_v62 = vld [vmem:[%s24447_s28 + $0x19c] ss:$20 sps:$4 sm:$0xff]  }
 0x1c1   : > { %3964 = vmatpush1.bf16.msra.mxu0 %v16650_v5  ;;  %v16799_v5 = vld [vmem:[%s24449_s26 + $0x3bc] ss:$36 sps:$4 sm:$0xff]  }
 0x1c2   : > { %3965 = vmatprep.subr.bf16.mxu0 %v16657_v6  ;;  %v16683_v6 = vld [vmem:[%s24447_s28 + $0x1c4] ss:$20 sps:$4 sm:$0xff]  }
 0x1c3   : > { %2672 = vmatmul.mubr.bf16.gmra.mxu1 %v16616_v2  ;;  %2744 = vmatmul.mubr.bf16.gmra.mxu0 %v16617_v4  ;;  %v16679_v2 = vld [vmem:[%s24447_s28 + $0xd8] ss:$20 sps:$4 sm:$0xff]   ;;  %v16791_v4 = vld [vmem:[%s24449_s26 + $0x400] ss:$36 sps:$4 sm:$0xff]  }
 0x1c4   : > { %2679 = vmatprep.mubr.bf16.mxu1 %v13698_v7  ;;  %2751 = vmatprep.mubr.bf16.mxu0 %v16619_v9  ;;  %v16797_v7 = vld [vmem:[%s24449_s26 + $0x3b8] ss:$36 sps:$4 sm:$0xff]  }
 0x1c5   : > { %3966 = vmatpush1.bf16.msra.mxu0 %v16655_v10  ;;  %v16805_v9 = vld [vmem:[%s24449_s26 + $0x374] ss:$36 sps:$4 sm:$0xff]   ;;  %v2185_v10 = vld [vmem:[%s24447_s28 + $0x1e8] sm:$0xff] }
 0x1c6   : > { %3967 = vmatprep.subr.bf16.mxu0 %v16662_v11  ;;  %v16803_v11 = vld [vmem:[%s24449_s26 + $0x370] ss:$36 sps:$4 sm:$0xff]  }
 0x1c9   : > { %3968 = vmatpush1.bf16.msra.mxu0 %v16660_v14  ;;  %v16688_v14 = vld [vmem:[%s24447_s28 + $0x1c0] ss:$20 sps:$4 sm:$0xff]  }
 0x1ca   : > { %3969 = vmatprep.subr.bf16.mxu0 %v16667_v15  ;;  %v16689_v15 = vld [vmem:[%s24447_s28 + $0x100] ss:$20 sps:$4 sm:$0xff]  }
 0x1cb   : > { %2680 = vmatmul.mubr.bf16.gmra.mxu1 %v13697_v21  ;;  %2752 = vmatmul.mubr.bf16.gmra.mxu0 %v16622_v12  ;;  %v16811_v12 = vld [vmem:[%s24449_s26 + $0x32c] ss:$36 sps:$4 sm:$0xff]   ;;  %v13700_v21 = vcombine.high %v2185_v10, %v2185_v10 }
 0x1cc   : > { %2759 = vmatprep.mubr.bf16.mxu0 %v16623_v20  ;;  %15949 = vmatprep.mubr.msk.bf16.mxu1 %vm17821_vm0, %v24372_v16  ;;  %v16809_v20 = vld [vmem:[%s24449_s26 + $0x328] ss:$36 sps:$4 sm:$0xff]  }
 0x1cd   : > { %3970 = vmatpush2.bf16.msra.mxu0 %v16665_v22  ;;  %v16817_v22 = vld [vmem:[%s24449_s26 + $0x2e4] ss:$36 sps:$4 sm:$0xff]  }
 0x1ce   : > { %3971 = vmatprep.subr.bf16.mxu0 %v16672_v26  ;;  %v16815_v26 = vld [vmem:[%s24449_s26 + $0x2e0] ss:$36 sps:$4 sm:$0xff]  }
 0x1d1   : > { %3972 = vmatpush2.bf16.msra.mxu0 %v16670_v3  ;;  %v16698_v3 = vld [vmem:[%s24447_s28 + $0x128] ss:$20 sps:$4 sm:$0xff]  }
 0x1d2   : > { %3973 = vmatprep.subr.bf16.mxu0 %v16677_v13  ;;  %v16821_v13 = vld [vmem:[%s24449_s26 + $0x298] ss:$36 sps:$4 sm:$0xff]  }
 0x1d3   : > { %2760 = vmatmul.mubr.bf16.gmra.mxu0 %v16628_v27  ;;  %15950 = vmatmul.mubr.msk.bf16.vlgmr.msra.gmra.mxu1 %vm2511_vm1, %v16629_v29  ;;  %v16823_v27 = vld [vmem:[%s24449_s26 + $0x29c] ss:$36 sps:$4 sm:$0xff]   ;;  %v13699_v29 = vcombine.low %v2185_v10, %v2185_v10  ;;  %v16838_v10 = vld [vmem:[%s24449_s26 + $0x410] ss:$36 sps:$4 sm:$0xff]  }
 0x1d4   : > { %2767 = vmatprep.mubr.bf16.mxu0 %v16633_v8  ;;  %15953 = vmatprep.mubr.msk.bf16.mxu1 %vm17821_vm0, %v24372_v16  ;;  %v18954_v8 = vld [vmem:[%s18577_s1 + $0x4] ss:$8 sps:$4 sm:$0xff]  }
 0x1d5   : > { %3974 = vmatpush2.bf16.msra.mxu0 %v16675_v23  ;;  %4100 = vmatpush1.bf16.msra.mxu1 %v16726_v48  ;;  %v16829_v23 = vld [vmem:[%s24449_s26 + $0x254] ss:$36 sps:$4 sm:$0xff]  }
 0x1d6   : > { %3975 = vmatprep.subr.bf16.mxu0 %v16682_v32  ;;  %4101 = vmatprep.subr.bf16.mxu1 %v16735_v31  ;;  %v16827_v32 = vld [vmem:[%s24449_s26 + $0x250] ss:$36 sps:$4 sm:$0xff]   ;;  %v16833_v48 = vld [vmem:[%s24449_s26 + $0x458] ss:$36 sps:$4 sm:$0xff]  }
 0x1d7   : > { %v16707_v31 = vld [vmem:[%s24447_s28 + $0x150] ss:$20 sps:$4 sm:$0xff]  }
 0x1d9   : > { %3976 = vmatpush2.bf16.msra.mxu0 %v16680_v30  ;;  %4102 = vmatpush1.bf16.msra.mxu1 %v16733_v28  ;;  %v18976_v30 = vld [vmem:[%s18577_s1] ss:$8 sps:$4 sm:$0xff]   ;;  %v16709_v28 = vld [vmem:[%s24449_s26 + $0x1b8] ss:$36 sps:$4 sm:$0xff]  }
 0x1da   : > { %3977 = vmatprep.subr.bf16.mxu0 %v16687_v18  ;;  %4103 = vmatprep.subr.bf16.mxu1 %v16741_v33  ;;  %v16704_v18 = vld [vmem:[%s24449_s26 + $0x200] ss:$36 sps:$4 sm:$0xff]   ;;  %v16715_v33 = vld [vmem:[%s24447_s28 + $0x178] ss:$20 sps:$4 sm:$0xff]  }
 0x1db   : > { %2768 = vmatmul.mubr.bf16.gmra.mxu0 %v16638_v19  ;;  %15954 = vmatmul.mubr.msk.bf16.gmra.mxu1 %vm2511_vm1, %v16639_v25  ;;  %v16711_v19 = vld [vmem:[%s24449_s26 + $0x1bc] ss:$36 sps:$4 sm:$0xff]  }
 0x1dc   : > { %2775 = vmatprep.mubr.bf16.mxu0 %v16643_v34  ;;  %15957 = vmatprep.mubr.msk.bf16.mxu1 %vm17821_vm0, %v24372_v16  ;;  %v18985_v25 = vld [vmem:[%s18577_s1 + $0x14] ss:$8 sps:$4 sm:$0xff]  }
 0x1dd   : > { %3978 = vmatpush2.bf16.msra.mxu0 %v16685_v35  ;;  %4104 = vmatpush1.bf16.msra.mxu1 %v16739_v37  ;;  %v16714_v34 = vld [vmem:[%s24449_s26 + $0x174] ss:$36 sps:$4 sm:$0xff]   ;;  %v16718_v37 = vld [vmem:[%s24449_s26 + $0x12c] ss:$36 sps:$4 sm:$0xff]  }
 0x1de   : > { %3979 = vmatprep.subr.bf16.mxu0 %v16692_v36  ;;  %4105 = vmatprep.subr.bf16.mxu1 %v16751_v38  ;;  %v19002_v35 = vld [vmem:[%s18577_s1 + $0x10] ss:$8 sps:$4 sm:$0xff]   ;;  %v19011_v38 = vld [vmem:[%s18577_s1 + $0x24] ss:$8 sps:$4 sm:$0xff]  }
 0x1df   : > { %v16712_v36 = vld [vmem:[%s24449_s26 + $0x170] ss:$36 sps:$4 sm:$0xff]  }
 0x1e1   : > { %3980 = vmatpush2.bf16.msra.mxu0 %v16690_v17  ;;  %4106 = vmatpush1.bf16.msra.mxu1 %v16749_v41  ;;  %v16716_v17 = vld [vmem:[%s24449_s26 + $0x128] ss:$36 sps:$4 sm:$0xff]   ;;  %v16719_v41 = vld [vmem:[%s24449_s26 + $0xe0] ss:$36 sps:$4 sm:$0xff]  }
 0x1e2   : > { %3981 = vmatprep.subr.bf16.mxu0 %v16696_v24  ;;  %4107 = vmatprep.subr.bf16.mxu1 %v16757_v43  ;;  %v16721_v24 = vld [vmem:[%s24449_s26 + $0xe4] ss:$36 sps:$4 sm:$0xff]   ;;  %v19037_v43 = vld [vmem:[%s18577_s1 + $0x34] ss:$8 sps:$4 sm:$0xff]  }
 0x1e3   : > { %2776 = vmatmul.mubr.bf16.gmra.mxu0 %v16648_v39  ;;  %15958 = vmatmul.mubr.msk.bf16.gmra.mxu1 %vm2511_vm1, %v16649_v40  ;;  %v16722_v39 = vld [vmem:[%s24447_s28 + $0x1a0] ss:$20 sps:$4 sm:$0xff]  }
 0x1e4   : > { %2783 = vmatprep.mubr.bf16.mxu0 %v16653_v42  ;;  %15961 = vmatprep.mubr.msk.bf16.mxu1 %vm17821_vm0, %v24372_v16  ;;  %v19028_v40 = vld [vmem:[%s18577_s1 + $0x20] ss:$8 sps:$4 sm:$0xff]  }
 0x1e5   : > { %3982 = vmatpush2.bf16.msra.mxu0 %v16694_v44  ;;  %4108 = vmatpush1.bf16.msra.mxu1 %v16755_v46  ;;  %v16725_v42 = vld [vmem:[%s24449_s26 + $0x9c] ss:$36 sps:$4 sm:$0xff]  }
 0x1e6   : > { %3983 = vmatprep.subr.bf16.mxu0 %v16701_v45  ;;  %4109 = vmatprep.subr.bf16.mxu1 %v16766_v47  ;;  %v16723_v44 = vld [vmem:[%s24449_s26 + $0x98] ss:$36 sps:$4 sm:$0xff]  }
 0x1e7   : > { %v16731_v45 = vld [vmem:[%s24449_s26 + $0x54] ss:$36 sps:$4 sm:$0xff]   ;;  %v16732_v46 = vld [vmem:[%s24447_s28 + $0x1c8] ss:$20 sps:$4 sm:$0xff]  }
 0x1e8   : > { %v19054_v47 = vld [vmem:[%s18577_s1 + $0x30] ss:$8 sps:$4 sm:$0xff]  }
 0x1e9   : > { %3984 = vmatpush2.bf16.msra.mxu0 %v16699_v49  ;;  %4110 = vmatpush1.bf16.msra.mxu1 %v16764_v53  ;;  %v16729_v49 = vld [vmem:[%s24449_s26 + $0x50] ss:$36 sps:$4 sm:$0xff]  }
 0x1ea   : > { %4026 = vmatprep.subr.bf16.mxu0 %v16706_v50  ;;  %4111 = vmatprep.subr.bf16.mxu1 %v16772_v54  ;;  %v16738_v50 = vld [vmem:[%s24449_s26 + $0xc] ss:$36 sps:$4 sm:$0xff]   ;;  %v16744_v54 = vld [vmem:[%s24449_s26 + $0x444] ss:$36 sps:$4 sm:$0xff]  }
 0x1eb   : > { %2784 = vmatmul.mubr.bf16.gmra.mxu0 %v16658_v51  ;;  %15962 = vmatmul.mubr.msk.bf16.gmra.mxu1 %vm2511_vm1, %v16659_v52  ;;  %v16736_v52 = vld [vmem:[%s24449_s26 + $0x8] ss:$36 sps:$4 sm:$0xff]  }
 0x1ec   : > { %2791 = vmatprep.mubr.bf16.mxu0 %v16663_v55  ;;  %15965 = vmatprep.mubr.msk.bf16.mxu1 %vm17821_vm0, %v24372_v16 }
 0x1ed   : > { %4112 = vmatpush1.bf16.msra.mxu1 %v16770_v56 }
 0x1ee   : > { %4113 = vmatprep.subr.bf16.mxu1 %v16781_v57  ;;  %v16745_v57 = vld [vmem:[%s24447_s28 + $0x1f0] ss:$0 sps:$4 sm:$0xff]  }
 0x1f1   : > { %4114 = vmatpush1.bf16.msra.mxu1 %v16779_v60  ;;  %v16754_v60 = vld [vmem:[%s24449_s26 + $0x3fc] ss:$36 sps:$4 sm:$0xff]  }
 0x1f2   : > { %4115 = vmatprep.subr.bf16.mxu1 %v16787_v61 }
 0x1f3   : > { %2792 = vmatmul.mubr.bf16.gmra.mxu0 %v16668_v58  ;;  %15966 = vmatmul.mubr.msk.bf16.gmra.mxu1 %vm2511_vm1, %v16669_v59  ;;  %v16742_v58 = vld [vmem:[%s24449_s26 + $0x440] ss:$36 sps:$4 sm:$0xff]  }
 0x1f4   : > { %2799 = vmatprep.mubr.bf16.mxu0 %v16673_v62  ;;  %15969 = vmatprep.mubr.msk.bf16.mxu1 %vm17821_vm0, %v24372_v16 }
 0x1f5   : > { %4116 = vmatpush2.bf16.msra.mxu1 %v16785_v63  ;;  %v16752_v63 = vld [vmem:[%s24449_s26 + $0x3f8] ss:$36 sps:$4 sm:$0xff]  }
 0x1f6   : > { %4117 = vmatprep.subr.bf16.mxu1 %v16793_v0 }
 0x1f9   : > { %4118 = vmatpush2.bf16.msra.mxu1 %v16791_v4 }
 0x1fa   : > { %4119 = vmatprep.subr.bf16.mxu1 %v16799_v5  ;;  %v16758_v5 = vld [vmem:[%s24449_s26 + $0x3b0] ss:$36 sps:$4 sm:$0xff]  }
 0x1fb   : > { %2800 = vmatmul.mubr.bf16.gmra.mxu0 %v16678_v1  ;;  %15970 = vmatmul.mubr.msk.bf16.gmra.mxu1 %vm2511_vm1, %v16679_v2  ;;  %v16760_v1 = vld [vmem:[%s24449_s26 + $0x3b4] ss:$36 sps:$4 sm:$0xff]  }
 0x1fc   : > { %2807 = vmatprep.mubr.bf16.mxu0 %v16683_v6  ;;  %15973 = vmatprep.mubr.msk.bf16.mxu1 %vm17821_vm0, %v24372_v16  ;;  %v16837_v6 = vld [vmem:[%s24449_s26 + $0x218] ss:$36 sps:$4 sm:$0xff]  }
 0x1fd   : > { %4120 = vmatpush2.bf16.msra.mxu1 %v16797_v7 }
 0x1fe   : > { %4121 = vmatprep.subr.bf16.mxu1 %v16805_v9  ;;  %v16769_v9 = vld [vmem:[%s24449_s26 + $0x36c] ss:$36 sps:$4 sm:$0xff]  }
 0x201   : > { %4122 = vmatpush2.bf16.msra.mxu1 %v16803_v11 }
 0x202   : > { %4123 = vmatprep.subr.bf16.mxu1 %v16811_v12 }
 0x203   : > { %2808 = vmatmul.mubr.bf16.gmra.mxu0 %v16688_v14  ;;  %15974 = vmatmul.mubr.msk.bf16.gmra.mxu1 %vm2511_vm1, %v16689_v15  ;;  %v16767_v14 = vld [vmem:[%s24449_s26 + $0x368] ss:$36 sps:$4 sm:$0xff]   ;;  %v16842_v15 = vld [vmem:[%s24449_s26 + $0x1d0] ss:$36 sps:$4 sm:$0xff]  }
 0x204   : > { %2815 = vmatprep.mubr.bf16.mxu0 %v13700_v21  ;;  %15977 = vmatprep.mubr.msk.bf16.mxu1 %vm17821_vm0, %v24372_v16 }
 0x205   : > { %4124 = vmatpush2.bf16.msra.mxu1 %v16809_v20  ;;  %v16775_v20 = vld [vmem:[%s24449_s26 + $0x324] ss:$36 sps:$4 sm:$0xff]  }
 0x206   : > { %4125 = vmatprep.subr.bf16.mxu1 %v16817_v22  ;;  %v16843_v22 = vld [vmem:[%s24449_s26 + $0x3c8] ss:$36 sps:$4 sm:$0xff]  }
 0x209   : > { %4126 = vmatpush2.bf16.msra.mxu1 %v16815_v26 }
 0x20a   : > { %4127 = vmatprep.subr.bf16.mxu1 %v16823_v27 }
 0x20b   : > { %2816 = vmatmul.mubr.bf16.gmra.mxu0 %v13699_v29  ;;  %15978 = vmatmul.mubr.msk.bf16.gmra.mxu1 %vm2511_vm1, %v16698_v3  ;;  %v16773_v29 = vld [vmem:[%s24449_s26 + $0x320] ss:$36 sps:$4 sm:$0xff]   ;;  %v16847_v3 = vld [vmem:[%s24449_s26 + $0x188] ss:$36 sps:$4 sm:$0xff]  }
 0x20c   : > { %15981 = vmatprep.mubr.msk.bf16.mxu1 %vm17821_vm0, %v24372_v16  ;;  %3985 = vmatprep.mubr.bf16.mxu0 %v18954_v8 }
 0x20d   : > { %4128 = vmatpush2.bf16.msra.mxu1 %v16821_v13 }
 0x20e   : > { %4129 = vmatprep.subr.bf16.mxu1 %v16829_v23  ;;  %v16784_v23 = vld [vmem:[%s24449_s26 + $0x2dc] ss:$36 sps:$4 sm:$0xff]  }
 0x211   : > { %4130 = vmatpush2.bf16.msra.mxu1 %v16827_v32  ;;  %v16848_v32 = vld [vmem:[%s24449_s26 + $0x380] ss:$36 sps:$4 sm:$0xff]  }
 0x212   : > { %14783 = vmatprep.subr.bf16.mxu1 %v16833_v48 }
 0x213   : > { %15982 = vmatmul.mubr.msk.bf16.gmra.mxu1 %vm2511_vm1, %v16707_v31  ;;  %3986 = vmatmul.mubr.bf16.vlgmr.msra.gmra.mxu0 %v18976_v30 }
 0x214   : > { %4027 = vmatpush1.bf16.msra.mxu0 %v16704_v18  ;;  %15985 = vmatprep.mubr.msk.bf16.mxu1 %vm17821_vm0, %v24372_v16  ;;  %v16782_v18 = vld [vmem:[%s24449_s26 + $0x2d8] ss:$36 sps:$4 sm:$0xff]  }
 0x215   : > { %4028 = vmatprep.subr.bf16.mxu0 %v16711_v19  ;;  %3995 = vmatprep.mubr.bf16.mxu0 %v18985_v25  ;;  %v16852_v19 = vld [vmem:[%s24449_s26 + $0x140] ss:$36 sps:$4 sm:$0xff]  }
 0x218   : > { %4029 = vmatpush1.bf16.msra.mxu0 %v16709_v28 }
 0x219   : > { %4030 = vmatprep.subr.bf16.mxu0 %v16714_v34  ;;  %v16790_v34 = vld [vmem:[%s24449_s26 + $0x294] ss:$36 sps:$4 sm:$0xff]  }
 0x21b   : > { %15986 = vmatmul.mubr.msk.bf16.gmra.mxu1 %vm2511_vm1, %v16715_v33  ;;  %3996 = vmatmul.mubr.bf16.gmra.mxu0 %v19002_v35  ;;  %v16853_v33 = vld [vmem:[%s24449_s26 + $0x338] ss:$36 sps:$4 sm:$0xff]  }
 0x21c   : > { %4031 = vmatpush1.bf16.msra.mxu0 %v16712_v36  ;;  %15989 = vmatprep.mubr.msk.bf16.mxu1 %vm17821_vm0, %v24372_v16 }
 0x21d   : > { %4032 = vmatprep.subr.bf16.mxu0 %v16718_v37  ;;  %4005 = vmatprep.mubr.bf16.mxu0 %v19011_v38 }
 0x220   : > { %4033 = vmatpush1.bf16.msra.mxu0 %v16716_v17  ;;  %v16788_v17 = vld [vmem:[%s24449_s26 + $0x290] ss:$36 sps:$4 sm:$0xff]  }
 0x221   : > { %4034 = vmatprep.subr.bf16.mxu0 %v16721_v24  ;;  %v16857_v24 = vld [vmem:[%s24449_s26 + $0xf8] ss:$36 sps:$4 sm:$0xff]  }
 0x223   : > { %15990 = vmatmul.mubr.msk.bf16.gmra.mxu1 %vm2511_vm1, %v16722_v39  ;;  %4006 = vmatmul.mubr.bf16.gmra.mxu0 %v19028_v40 }
 0x224   : > { %4035 = vmatpush1.bf16.msra.mxu0 %v16719_v41  ;;  %15993 = vmatprep.mubr.msk.bf16.mxu1 %vm17821_vm0, %v24372_v16  ;;  %v16796_v41 = vld [vmem:[%s24449_s26 + $0x24c] ss:$36 sps:$4 sm:$0xff]  }
 0x225   : > { %4036 = vmatprep.subr.bf16.mxu0 %v16725_v42  ;;  %4015 = vmatprep.mubr.bf16.mxu0 %v19037_v43  ;;  %v16858_v42 = vld [vmem:[%s24449_s26 + $0x2f0] ss:$36 sps:$4 sm:$0xff]  }
 0x228   : > { %4037 = vmatpush1.bf16.msra.mxu0 %v16723_v44 }
 0x229   : > { %4038 = vmatprep.subr.bf16.mxu0 %v16731_v45 }
 0x22b   : > { %v14594_v51 = vpop.f32.mrf.mxu1  ;;  %15994 = vmatmul.mubr.msk.bf16.gmra.mxu1 %vm2511_vm1, %v16732_v46  ;;  %4016 = vmatmul.mubr.bf16.gmra.mxu0 %v19054_v47  ;;  %v16794_v46 = vld [vmem:[%s24449_s26 + $0x248] ss:$36 sps:$4 sm:$0xff]  }
 0x22c   : > { %4039 = vmatpush1.bf16.msra.mxu0 %v16729_v49  ;;  %15997 = vmatprep.mubr.msk.bf16.mxu1 %vm17821_vm0, %v24372_v16  ;;  %v16862_v49 = vld [vmem:[%s24449_s26 + $0xb0] ss:$36 sps:$4 sm:$0xff]  }
 0x22d   : > { %v14595_v53 = vpop.f32.mrf.mxu1  ;;  %4040 = vmatprep.subr.bf16.mxu0 %v16738_v50  ;;  %4058 = vmatprep.mubr.bf16.mxu0 %v18954_v8 }
 0x22e   : > { %v19073_v55 = vadd.f32 %v14595_v53, %v14594_v51  ;;  %v16802_v51 = vld [vmem:[%s24449_s26 + $0x214] ss:$36 sps:$4 sm:$0xff]  }
 0x22f   : > { %v14597_v56 = vpop.f32.mrf.mxu1 }
 0x230   : > { %4041 = vmatpush1.bf16.msra.mxu0 %v16736_v52  ;;  %v16863_v52 = vld [vmem:[%s24449_s26 + $0x2a8] ss:$36 sps:$4 sm:$0xff]  }
 0x231   : > { %v14598_v59 = vpop.f32.mrf.mxu1  ;;  %4042 = vmatprep.subr.bf16.mxu0 %v16744_v54 }
 0x232   : > { %v19084_v61 = vadd.f32 %v14598_v59, %v14597_v56  ;;  %v16800_v56 = vld [vmem:[%s24449_s26 + $0x210] ss:$36 sps:$4 sm:$0xff]   ;;  %v16867_v59 = vld [vmem:[%s24449_s26 + $0x68] ss:$36 sps:$4 sm:$0xff]  }
 0x233   : > { %v14600_v62 = vpop.f32.mrf.mxu1  ;;  %15998 = vmatmul.mubr.msk.bf16.gmra.mxu1 %vm2511_vm1, %v16745_v57 }
 0x234   : > { %4043 = vmatpush2.bf16.msra.mxu0 %v16742_v58  ;;  %4131 = vmatprep.mubr.bf16.mxu1 %v18954_v8  ;;  %v16808_v58 = vld [vmem:[%s24449_s26 + $0x1cc] ss:$36 sps:$4 sm:$0xff]  }
 0x235   : > { %v14601_v0 = vpop.f32.mrf.mxu1  ;;  %4044 = vmatprep.subr.bf16.mxu0 %v16754_v60 }
 0x236   : > { %v19094_v2 = vadd.f32 %v14601_v0, %v14600_v62  ;;  %v16868_v62 = vld [vmem:[%s24449_s26 + $0x260] ss:$36 sps:$4 sm:$0xff]   ;;  %v16806_v0 = vld [vmem:[%s24449_s26 + $0x1c8] ss:$36 sps:$4 sm:$0xff]  }
 0x237   : > { %v14603_v4 = vpop.f32.mrf.mxu1 }
 0x238   : > { %4045 = vmatpush2.bf16.msra.mxu0 %v16752_v63 }
 0x239   : > { %v14604_v7 = vpop.f32.mrf.mxu1  ;;  %4046 = vmatprep.subr.bf16.mxu0 %v16760_v1 }
 0x23a   : > { %v19108_v11 = vadd.f32 %v14604_v7, %v14603_v4  ;;  %v16814_v4 = vld [vmem:[%s24449_s26 + $0x184] ss:$36 sps:$4 sm:$0xff]  }
 0x23b   : > { %v14606_v12 = vpop.f32.mrf.mxu1  ;;  %4132 = vmatmul.mubr.bf16.vlgmr.msra.gmra.mxu1 %v18976_v30 }
 0x23c   : > { %4047 = vmatpush2.bf16.msra.mxu0 %v16758_v5  ;;  %14784 = vmatpush3.bf16.msra.mxu1 %v16837_v6  ;;  %v16872_v5 = vld [vmem:[%s24449_s26 + $0x20] ss:$36 sps:$4 sm:$0xff]  }
 0x23d   : > { %v14607_v21 = vpop.f32.mrf.mxu1  ;;  %4048 = vmatprep.subr.bf16.mxu0 %v16769_v9  ;;  %14785 = vmatprep.subr.bf16.mxu1 %v16838_v10  ;;  %v16812_v9 = vld [vmem:[%s24449_s26 + $0x180] ss:$36 sps:$4 sm:$0xff]  }
 0x23e   : > { %v19123_v26 = vadd.f32 %v14607_v21, %v14606_v12  ;;  %4141 = vmatprep.mubr.bf16.mxu1 %v18985_v25  ;;  %v16820_v12 = vld [vmem:[%s24449_s26 + $0x13c] ss:$36 sps:$4 sm:$0xff]  }
 0x23f   : > { %v14609_v27 = vpop.f32.mrf.mxu1  ;;  %v16818_v21 = vld [vmem:[%s24449_s26 + $0x138] ss:$36 sps:$4 sm:$0xff]  }
 0x240   : > { %4049 = vmatpush2.bf16.msra.mxu0 %v16767_v14  ;;  %14786 = vmatpush3.bf16.msra.mxu1 %v16842_v15 }
 0x241   : > { %v14610_v13 = vpop.f32.mrf.mxu1  ;;  %4050 = vmatprep.subr.bf16.mxu0 %v16775_v20  ;;  %14787 = vmatprep.subr.bf16.mxu1 %v16843_v22  ;;  %v16826_v22 = vld [vmem:[%s24449_s26 + $0xf4] ss:$36 sps:$4 sm:$0xff]  }
 0x242   : > { %v19138_v48 = vadd.f32 %v14610_v13, %v14609_v27 }
 0x243   : > { %v14612_v31 = vpop.f32.mrf.mxu1  ;;  %4142 = vmatmul.mubr.bf16.gmra.mxu1 %v19002_v35 }
 0x244   : > { %4051 = vmatpush2.bf16.msra.mxu0 %v16773_v29  ;;  %14788 = vmatpush3.bf16.msra.mxu1 %v16847_v3  ;;  %v16824_v3 = vld [vmem:[%s24449_s26 + $0xf0] ss:$36 sps:$4 sm:$0xff]  }
 0x245   : > { %v14613_v28 = vpop.f32.mrf.mxu1  ;;  %4052 = vmatprep.subr.bf16.mxu0 %v16784_v23  ;;  %14789 = vmatprep.subr.bf16.mxu1 %v16848_v32  ;;  %v16832_v23 = vld [vmem:[%s24449_s26 + $0xac] ss:$36 sps:$4 sm:$0xff]  }
 0x246   : > { %v19153_v36 = vadd.f32 %v14613_v28, %v14612_v31  ;;  %4151 = vmatprep.mubr.bf16.mxu1 %v19011_v38  ;;  %v16830_v31 = vld [vmem:[%s24449_s26 + $0xa8] ss:$36 sps:$4 sm:$0xff]  }
 0x247   : > { %v14615_v37 = vpop.f32.mrf.mxu1 }
 0x248   : > { %4053 = vmatpush2.bf16.msra.mxu0 %v16782_v18  ;;  %14790 = vmatpush3.bf16.msra.mxu1 %v16852_v19  ;;  %v16836_v19 = vld [vmem:[%s24449_s26 + $0x64] ss:$36 sps:$4 sm:$0xff]  }
 0x249   : > { %v14616_v39 = vpop.f32.mrf.mxu1  ;;  %4054 = vmatprep.subr.bf16.mxu0 %v16790_v34  ;;  %14791 = vmatprep.subr.bf16.mxu1 %v16853_v33  ;;  %v16834_v33 = vld [vmem:[%s24449_s26 + $0x60] ss:$36 sps:$4 sm:$0xff]  }
 0x24a   : > { %v19168_v44 = vadd.f32 %v14616_v39, %v14615_v37 }
 0x24b   : > { %v14618_v45 = vpop.f32.mrf.mxu1  ;;  %4152 = vmatmul.mubr.bf16.gmra.mxu1 %v19028_v40 }
 0x24c   : > { %4055 = vmatpush2.bf16.msra.mxu0 %v16788_v17  ;;  %14792 = vmatpush3.bf16.msra.mxu1 %v16857_v24  ;;  %v16841_v17 = vld [vmem:[%s24449_s26 + $0x1c] ss:$36 sps:$4 sm:$0xff]  }
 0x24d   : > { %v14619_v50 = vpop.f32.mrf.mxu1  ;;  %4056 = vmatprep.subr.bf16.mxu0 %v16796_v41  ;;  %14793 = vmatprep.subr.bf16.mxu1 %v16858_v42  ;;  %v16839_v41 = vld [vmem:[%s24449_s26 + $0x18] ss:$36 sps:$4 sm:$0xff]  }
 0x24e   : > { %v19183_v53 = vadd.f32 %v14619_v50, %v14618_v45  ;;  %4161 = vmatprep.mubr.bf16.mxu1 %v19037_v43 }
 0x24f   : > { %v14621_v54 = vpop.f32.mrf.mxu1 }
 0x250   : > { %4057 = vmatpush2.bf16.msra.mxu0 %v16794_v46  ;;  %14794 = vmatpush3.bf16.msra.mxu1 %v16862_v49  ;;  %v16846_v46 = vld [vmem:[%s24449_s26 + $0x454] ss:$36 sps:$4 sm:$0xff]  }
 0x251   : > { %v14622_v57 = vpop.f32.mrf.mxu1  ;;  %4172 = vmatprep.subr.bf16.mxu0 %v16802_v51  ;;  %14795 = vmatprep.subr.bf16.mxu1 %v16863_v52 }
 0x252   : > { %v19195_v60 = vadd.f32 %v14622_v57, %v14621_v54 }
 0x253   : > { %4059 = vmatmul.mubr.bf16.vlgmr.msra.gmra.mxu0 %v18976_v30  ;;  %v14624_v63 = vpop.f32.mrf.mxu1  ;;  %4162 = vmatmul.mubr.bf16.gmra.mxu1 %v19054_v47 }
 0x254   : > { %4173 = vmatpush1.bf16.msra.mxu0 %v16800_v56  ;;  %4068 = vmatprep.mubr.bf16.mxu0 %v18985_v25  ;;  %v16851_v56 = vld [vmem:[%s24449_s26 + $0x40c] ss:$36 sps:$4 sm:$0xff]  }
 0x255   : > { %v14625_v1 = vpop.f32.mrf.mxu1  ;;  %4174 = vmatprep.subr.bf16.mxu0 %v16808_v58  ;;  %14796 = vmatpush3.bf16.msra.mxu1 %v16867_v59  ;;  %v16849_v59 = vld [vmem:[%s24449_s26 + $0x408] ss:$36 sps:$4 sm:$0xff]  }
 0x256   : > { %v19212_v6 = vadd.f32 %v14625_v1, %v14624_v63  ;;  %14797 = vmatprep.subr.bf16.mxu1 %v16868_v62  ;;  %4277 = vmatprep.mubr.bf16.mxu1 %v18954_v8 }
 0x257   : > { %v14627_v7 = vpop.f32.mrf.mxu1 }
 0x258   : > { %4175 = vmatpush1.bf16.msra.mxu0 %v16806_v0  ;;  %v16856_v0 = vld [vmem:[%s24449_s26 + $0x3c4] ss:$36 sps:$4 sm:$0xff]  }
 0x259   : > { %v14628_v10 = vpop.f32.mrf.mxu1  ;;  %4176 = vmatprep.subr.bf16.mxu0 %v16814_v4  ;;  %14798 = vmatpush3.bf16.msra.mxu1 %v16872_v5 }
 0x25a   : > { %v19221_v14 = vadd.f32 %v14628_v10, %v14627_v7  ;;  %v16854_v7 = vld [vmem:[%s24449_s26 + $0x3c0] ss:$36 sps:$4 sm:$0xff]  }
 0x25b   : > { %4069 = vmatmul.mubr.bf16.gmra.mxu0 %v19002_v35  ;;  %v14630_v15 = vpop.f32.mrf.mxu1 }
 0x25c   : > { %4177 = vmatpush1.bf16.msra.mxu0 %v16812_v9  ;;  %4078 = vmatprep.mubr.bf16.mxu0 %v19011_v38 }
 0x25d   : > { %v14631_v20 = vpop.f32.mrf.mxu1  ;;  %4178 = vmatprep.subr.bf16.mxu0 %v16820_v12  ;;  %4278 = vmatmul.mubr.bf16.vlgmr.msra.gmra.mxu1 %v18976_v30  ;;  %v16861_v12 = vld [vmem:[%s24449_s26 + $0x37c] ss:$36 sps:$4 sm:$0xff]  }
 0x25e   : > { %v19232_v27 = vadd.f32 %v14631_v20, %v14630_v15  ;;  %4285 = vmatprep.mubr.bf16.mxu1 %v18985_v25  ;;  %v16859_v20 = vld [vmem:[%s24449_s26 + $0x378] ss:$36 sps:$4 sm:$0xff]  }
 0x25f   : > { %v19235_v29 = vpop.f32.mrf.mxu1 }
 0x260   : > { %4179 = vmatpush1.bf16.msra.mxu0 %v16818_v21 }
 0x261   : > { %v19240_v13 = vpop.f32.mrf.mxu1  ;;  %4180 = vmatprep.subr.bf16.mxu0 %v16826_v22 }
 0x263   : > { %4079 = vmatmul.mubr.bf16.gmra.mxu0 %v19028_v40  ;;  %v14636_v32 = vpop.f32.mrf.mxu1 }
 0x264   : > { %4181 = vmatpush1.bf16.msra.mxu0 %v16824_v3  ;;  %4088 = vmatprep.mubr.bf16.mxu0 %v19037_v43 }
 0x265   : > { %v14637_v18 = vpop.f32.mrf.mxu1  ;;  %4182 = vmatprep.subr.bf16.mxu0 %v16832_v23  ;;  %4286 = vmatmul.mubr.bf16.gmra.mxu1 %v19002_v35  ;;  %v16866_v23 = vld [vmem:[%s24449_s26 + $0x334] ss:$36 sps:$4 sm:$0xff]  }
 0x266   : > { %v19254_v28 = vadd.f32 %v14637_v18, %v14636_v32  ;;  %4293 = vmatprep.mubr.bf16.mxu1 %v19011_v38 }
 0x267   : > { %v19257_v34 = vpop.f32.mrf.mxu1 }
 0x268   : > { %4183 = vmatpush1.bf16.msra.mxu0 %v16830_v31 }
 0x269   : > { %v19262_v37 = vpop.f32.mrf.mxu1  ;;  %4184 = vmatprep.subr.bf16.mxu0 %v16836_v19  ;;  %v16864_v19 = vld [vmem:[%s24449_s26 + $0x330] ss:$36 sps:$4 sm:$0xff]  }
 0x26b   : > { %4089 = vmatmul.mubr.bf16.gmra.mxu0 %v19054_v47  ;;  %v14642_v24 = vpop.f32.mrf.mxu1  ;;  %v19268_v39 = vpop.f32.mrf.mxu0 }
 0x26c   : > { %4185 = vmatpush1.bf16.msra.mxu0 %v16834_v33  ;;  %4204 = vmatprep.mubr.bf16.mxu0 %v18954_v8  ;;  %v16844_v8 = vld [vmem:[%s24449_s26 + $0x450] ss:$36 sps:$4 sm:$0xff]  }
 0x26d   : > { %v14643_v42 = vpop.f32.mrf.mxu1  ;;  %v19274_v45 = vpop.f32.mrf.mxu0  ;;  %4186 = vmatprep.subr.bf16.mxu0 %v16841_v17  ;;  %4294 = vmatmul.mubr.bf16.gmra.mxu1 %v19028_v40 }
 0x26e   : > { %v19280_v49 = vadd.f32 %v14643_v42, %v14642_v24  ;;  %4301 = vmatprep.mubr.bf16.mxu1 %v19037_v43  ;;  %v16871_v24 = vld [vmem:[%s24449_s26 + $0x2ec] ss:$36 sps:$4 sm:$0xff]  }
 0x26f   : > { %v19283_v50 = vpop.f32.mrf.mxu1  ;;  %v19285_v51 = vpop.f32.mrf.mxu0 }
 0x270   : > { %4187 = vmatpush1.bf16.msra.mxu0 %v16839_v41 }
 0x271   : > { %v19290_v52 = vpop.f32.mrf.mxu1  ;;  %v19292_v54 = vpop.f32.mrf.mxu0  ;;  %4188 = vmatprep.subr.bf16.mxu0 %v16846_v46  ;;  %v16869_v46 = vld [vmem:[%s24449_s26 + $0x2e8] ss:$36 sps:$4 sm:$0xff]  }
 0x273   : > { %v14648_v57 = vpop.f32.mrf.mxu1  ;;  %v19297_v58 = vpop.f32.mrf.mxu0 }
 0x274   : > { %4189 = vmatpush2.bf16.msra.mxu0 %v16844_v8 }
 0x275   : > { %v14649_v62 = vpop.f32.mrf.mxu1  ;;  %v19302_v63 = vpop.f32.mrf.mxu0  ;;  %4190 = vmatprep.subr.bf16.mxu0 %v16851_v56  ;;  %4302 = vmatmul.mubr.bf16.gmra.mxu1 %v19054_v47 }
 0x276   : > { %v19308_v1 = vadd.f32 %v14649_v62, %v14648_v57  ;;  %v16875_v57 = vld [vmem:[%s24449_s26 + $0x2a4] ss:$36 sps:$4 sm:$0xff]  }
 0x277   : > { %v19310_v4 = vpop.f32.mrf.mxu1  ;;  %v19312_v5 = vpop.f32.mrf.mxu0 }
 0x278   : > { %4191 = vmatpush2.bf16.msra.mxu0 %v16849_v59 }
 0x279   : > { %v19317_v9 = vpop.f32.mrf.mxu1  ;;  %v19319_v10 = vpop.f32.mrf.mxu0  ;;  %4192 = vmatprep.subr.bf16.mxu0 %v16856_v0 }
 0x27b   : > { %v14654_v15 = vpop.f32.mrf.mxu1  ;;  %v19324_v21 = vpop.f32.mrf.mxu0 }
 0x27c   : > { %4193 = vmatpush2.bf16.msra.mxu0 %v16854_v7  ;;  %v16873_v7 = vld [vmem:[%s24449_s26 + $0x2a0] ss:$36 sps:$4 sm:$0xff]  }
 0x27d   : > { %v14655_v22 = vpop.f32.mrf.mxu1  ;;  %v19329_v3 = vpop.f32.mrf.mxu0  ;;  %4194 = vmatprep.subr.bf16.mxu0 %v16861_v12 }
 0x27e   : > { %v19334_v32 = vadd.f32 %v14655_v22, %v14654_v15  ;;  %v19379_v22 = vld [vmem:[%s24454_s27] ss:$0 sm:$0xff] }
 0x27f   : > { %v19336_v31 = vpop.f32.mrf.mxu1  ;;  %v19338_v18 = vpop.f32.mrf.mxu0 }
 0x280   : > { %4195 = vmatpush2.bf16.msra.mxu0 %v16859_v20  ;;  %v16878_v20 = vld [vmem:[%s24449_s26 + $0x25c] ss:$36 sps:$4 sm:$0xff]  }
 0x281   : > { %v19343_v33 = vpop.f32.mrf.mxu1  ;;  %v19345_v17 = vpop.f32.mrf.mxu0  ;;  %4196 = vmatprep.subr.bf16.mxu0 %v16866_v23 }
 0x282   : > { %24450 = vst [vmem:[#allocation13_spill] sm:$0xff] %v19343_v33  ;;  %v2589_v33 = vadd.f32 %v19084_v61, %v19379_v22 }
 0x283   : > { %v14660_v41 = vpop.f32.mrf.mxu1  ;;  %v19350_v42 = vpop.f32.mrf.mxu0 }
 0x284   : > { %4197 = vmatpush2.bf16.msra.mxu0 %v16864_v19 }
 0x285   : > { %v14661_v8 = vpop.f32.mrf.mxu1  ;;  %v19355_v56 = vpop.f32.mrf.mxu0  ;;  %4198 = vmatprep.subr.bf16.mxu0 %v16871_v24  ;;  %v16876_v24 = vld [vmem:[%s24449_s26 + $0x258] ss:$36 sps:$4 sm:$0xff]  }
 0x286   : > { %v19360_v59 = vadd.f32 %v14661_v8, %v14660_v41  ;;  %v2586_v8 = vadd.f32 %v19073_v55, %v19379_v22 }
 0x287   : > { %v19362_v62 = vpop.f32.mrf.mxu1  ;;  %v19364_v0 = vpop.f32.mrf.mxu0 }
 0x288   : > { %24451 = vst [vmem:[#allocation14_spill] sm:$0xff] %v19360_v59  ;;  %24452 = vst [vmem:[#allocation15_spill] sm:$0xff] %v19362_v62  ;;  %4199 = vmatpush2.bf16.msra.mxu0 %v16869_v46 }
 0x289   : > { %v19369_v12 = vpop.f32.mrf.mxu1  ;;  %v19371_v15 = vpop.f32.mrf.mxu0  ;;  %4200 = vmatprep.subr.bf16.mxu0 %v16875_v57  ;;  %v14690_v57 = vadd.f32 %v19274_v45, %v19268_v39 }
 0x28a   : > { %24453 = vst [vmem:[#allocation16_spill] sm:$0xff] %v19369_v12 }
 0x28b   : > { %v14666_v23 = vpop.f32.mrf.mxu1  ;;  %v19381_v19 = vpop.f32.mrf.mxu0  ;;  %v2722_v55 = vadd.f32 %v14690_v57, %v2586_v8 }
 0x28c   : > { %4201 = vmatpush2.bf16.msra.mxu0 %v16873_v7 }
 0x28d   : > { %v14667_v41 = vpop.f32.mrf.mxu1  ;;  %v19386_v46 = vpop.f32.mrf.mxu0  ;;  %4202 = vmatprep.subr.bf16.mxu0 %v16878_v20  ;;  %v14693_v20 = vadd.f32 %v19292_v54, %v19285_v51  ;;  %v2594_v51 = vadd.f32 %v19094_v2, %v19379_v22  ;;  %v14699_v2 = vadd.f32 %v19319_v10, %v19312_v5  ;;  %v14702_v5 = vadd.f32 %v19329_v3, %v19324_v21 }
 0x28e   : > { %v19392_v16 = vadd.f32 %v14667_v41, %v14666_v23 }
 0x28f   : > { %v14669_v12 = vpop.f32.mrf.mxu1  ;;  %v19394_v62 = vpop.f32.mrf.mxu0 }
 0x290   : > { %4203 = vmatpush2.bf16.msra.mxu0 %v16876_v24  ;;  %v2725_v24 = vadd.f32 %v14693_v20, %v2589_v33 }
 0x291   : > { %v14670_v7 = vpop.f32.mrf.mxu1  ;;  %v19397_v59 = vpop.f32.mrf.mxu0 }
 0x293   : > { %4205 = vmatmul.mubr.bf16.vlgmr.msra.gmra.mxu0 %v18976_v30  ;;  %v19404_v39 = vpop.f32.mrf.mxu0  ;;  %v2857_v45 = vpop.f32.mrf.mxu1  ;;  %v14696_v30 = vadd.f32 %v19302_v63, %v19297_v58 }
 0x294   : > { %v2858_v12 = vadd.f32 %v2857_v45, %v2722_v55  ;;  %4214 = vmatprep.mubr.bf16.mxu0 %v18985_v25  ;;  %v2597_v55 = vadd.f32 %v19108_v11, %v19379_v22  ;;  %v2602_v11 = vadd.f32 %v19123_v26, %v19379_v22  ;;  %v14705_v26 = vadd.f32 %v19345_v17, %v19338_v18 }
 0x295   : > { %v19412_v23 = vpop.f32.mrf.mxu0  ;;  %v15951_v61 = vpop.f32.mrf.mxu1  ;;  %v2730_v58 = vadd.f32 %v14696_v30, %v2594_v51  ;;  %v14708_v18 = vadd.f32 %v19355_v56, %v19350_v42 }
 0x296   : > { %v2959_v54 = vmax.f32 %v2858_v12, 0.0  ;;  %v2733_v51 = vadd.f32 %v14699_v2, %v2597_v55  ;;  %v2738_v21 = vadd.f32 %v14702_v5, %v2602_v11  ;;  %v2613_v11 = vadd.f32 %v19168_v44, %v19379_v22 }
 0x297   : > { %v19418_v41 = vpop.f32.mrf.mxu0  ;;  %v2860_v25 = vpop.f32.mrf.mxu1  ;;  %v14714_v44 = vadd.f32 %v19386_v46, %v19381_v19 }
 0x298   : > { %2984 = vst [vmem:[%s19410_s6] sm:$0xff] %v2959_v54  ;;  %v2861_v8 = vadd.f32 %v2860_v25, %v2725_v24  ;;  %v2605_v25 = vadd.f32 %v19138_v48, %v19379_v22  ;;  %v2610_v48 = vadd.f32 %v19153_v36, %v19379_v22  ;;  %v14711_v36 = vadd.f32 %v19371_v15, %v19364_v0 }
 0x299   : > { %v19421_v57 = vpop.f32.mrf.mxu0  ;;  %v15952_v7 = vpop.f32.mrf.mxu1 }
 0x29a   : > { %v2960_v45 = vmax.f32 %v2861_v8, 0.0  ;;  %v2746_v42 = vadd.f32 %v14708_v18, %v2610_v48  ;;  %v2749_v15 = vadd.f32 %v14711_v36, %v2613_v11 }
 0x29b   : > { %4215 = vmatmul.mubr.bf16.gmra.mxu0 %v19002_v35  ;;  %v19428_v63 = vpop.f32.mrf.mxu0  ;;  %v2865_v33 = vpop.f32.mrf.mxu1 }
 0x29c   : > { %2985 = vst [vmem:[%s19410_s6 + $0x8] sm:$0xff] %v2960_v45  ;;  %v2866_v20 = vadd.f32 %v2865_v33, %v2730_v58  ;;  %4224 = vmatprep.mubr.bf16.mxu0 %v19011_v38  ;;  %v2741_v58 = vadd.f32 %v14705_v26, %v2605_v25 }
 0x29d   : > { %v19432_v12 = vpop.f32.mrf.mxu0  ;;  %v15955_v61 = vpop.f32.mrf.mxu1 }
 0x29e   : > { %v2961_v10 = vmax.f32 %v2866_v20, 0.0 }
 0x29f   : > { %v19438_v35 = vpop.f32.mrf.mxu0  ;;  %v2868_v30 = vpop.f32.mrf.mxu1 }
 0x2a0   : > { %2986 = vst [vmem:[%s19410_s6 + $0x10] sm:$0xff] %v2961_v10  ;;  %v2869_v54 = vadd.f32 %v2868_v30, %v2733_v51 }
 0x2a1   : > { %v19441_v24 = vpop.f32.mrf.mxu0  ;;  %v15956_v38 = vpop.f32.mrf.mxu1 }
 0x2a2   : > { %v2962_v8 = vmax.f32 %v2869_v54, 0.0  ;;  %v2618_v38 = vadd.f32 %v19183_v53, %v19379_v22  ;;  %v14717_v53 = vadd.f32 %v19397_v59, %v19394_v62 }
 0x2a3   : > { %4225 = vmatmul.mubr.bf16.gmra.mxu0 %v19028_v40  ;;  %v19448_v3 = vpop.f32.mrf.mxu0  ;;  %v2873_v7 = vpop.f32.mrf.mxu1 }
 0x2a4   : > { %2987 = vst [vmem:[%s19410_s6 + $0x18] sm:$0xff] %v2962_v8  ;;  %v2874_v55 = vadd.f32 %v2873_v7, %v2738_v21  ;;  %4234 = vmatprep.mubr.bf16.mxu0 %v19037_v43  ;;  %v2621_v7 = vadd.f32 %v19195_v60, %v19379_v22  ;;  %v14720_v60 = vadd.f32 %v19412_v23, %v19404_v39 }
 0x2a5   : > { %v19452_v2 = vpop.f32.mrf.mxu0  ;;  %v15959_v45 = vpop.f32.mrf.mxu1 }
 0x2a6   : > { %v2963_v17 = vmax.f32 %v2874_v55, 0.0  ;;  %v2754_v45 = vadd.f32 %v14714_v44, %v2618_v38 }
 0x2a7   : > { %v19458_v40 = vpop.f32.mrf.mxu0  ;;  %v2876_v33 = vpop.f32.mrf.mxu1 }
 0x2a8   : > { %2988 = vst [vmem:[%s19410_s6 + $0x20] sm:$0xff] %v2963_v17  ;;  %v2877_v20 = vadd.f32 %v2876_v33, %v2741_v58  ;;  %v2626_v58 = vadd.f32 %v19212_v6, %v19379_v22  ;;  %v14723_v6 = vadd.f32 %v19421_v57, %v19418_v41  ;;  %v14726_v41 = vadd.f32 %v19432_v12, %v19428_v63 }
 0x2a9   : > { %v19461_v61 = vpop.f32.mrf.mxu0  ;;  %v15960_v43 = vpop.f32.mrf.mxu1 }
 0x2aa   : > { %v2964_v5 = vmax.f32 %v2877_v20, 0.0  ;;  %v2757_v20 = vadd.f32 %v14717_v53, %v2621_v7  ;;  %v14729_v53 = vadd.f32 %v19441_v24, %v19438_v35  ;;  %v14732_v35 = vadd.f32 %v19452_v2, %v19448_v3 }
 0x2ab   : > { %4235 = vmatmul.mubr.bf16.gmra.mxu0 %v19054_v47  ;;  %v19468_v56 = vpop.f32.mrf.mxu0  ;;  %v2881_v10 = vpop.f32.mrf.mxu1 }
 0x2ac   : > { %2989 = vst [vmem:[%s19410_s6 + $0x28] sm:$0xff] %v2964_v5  ;;  %v2882_v51 = vadd.f32 %v2881_v10, %v2746_v42  ;;  %v2629_v5 = vadd.f32 %v19221_v14, %v19379_v22  ;;  %v2762_v10 = vadd.f32 %v14720_v60, %v2626_v58  ;;  %v14635_v14 = vadd.f32 %v19240_v13, %v19235_v29 }
 0x2ad   : > { %v19471_v30 = vpop.f32.mrf.mxu0  ;;  %v15963_v54 = vpop.f32.mrf.mxu1 }
 0x2ae   : > { %v2965_v0 = vmax.f32 %v2882_v51, 0.0  ;;  %v2634_v54 = vadd.f32 %v19232_v27, %v19379_v22  ;;  %v2637_v7 = vadd.f32 %v14635_v14, %v19379_v22 }
 0x2af   : > { %v19477_v25 = vpop.f32.mrf.mxu0  ;;  %v2884_v47 = vpop.f32.mrf.mxu1 }
 0x2b0   : > { %2990 = vst [vmem:[%s19410_s6 + $0x30] sm:$0xff] %v2965_v0  ;;  %v2885_v26 = vadd.f32 %v2884_v47, %v2749_v15  ;;  %v2765_v0 = vadd.f32 %v14723_v6, %v2629_v5  ;;  %v2770_v13 = vadd.f32 %v14726_v41, %v2634_v54  ;;  %v2773_v58 = vadd.f32 %v14729_v53, %v2637_v7 }
 0x2b1   : > { %v19480_v8 = vpop.f32.mrf.mxu0  ;;  %v15964_v21 = vpop.f32.mrf.mxu1  ;;  %v2650_v6 = vadd.f32 %v19280_v49, %v19379_v22  ;;  %v16881_v49 = vld [vmem:[%s24456_s0 + $0x4] ss:$20 sps:$4 sm:$0xff]  }
 0x2b2   : > { %v2966_v55 = vmax.f32 %v2885_v26, 0.0  ;;  %4816 = vmatprep.mubr.bf16.mxu1 %v16881_v49 }
 0x2b3   : > { %v19486_v19 = vpop.f32.mrf.mxu0  ;;  %v2889_v46 = vpop.f32.mrf.mxu1 }
 0x2b4   : > { %2991 = vst [vmem:[%s19410_s6 + $0x38] sm:$0xff] %v2966_v55  ;;  %v2890_v48 = vadd.f32 %v2889_v46, %v2754_v45  ;;  %v2642_v45 = vadd.f32 %v19254_v28, %v19379_v22 }
 0x2b5   : > { %v19489_v18 = vpop.f32.mrf.mxu0  ;;  %v15967_v17 = vpop.f32.mrf.mxu1 }
 0x2b6   : > { %v2967_v33 = vmax.f32 %v2890_v48, 0.0  ;;  %v14641_v17 = vadd.f32 %v19262_v37, %v19257_v34  ;;  %v2778_v37 = vadd.f32 %v14732_v35, %v2642_v45 }
 0x2b7   : > { %v19495_v59 = vpop.f32.mrf.mxu0  ;;  %v2892_v62 = vpop.f32.mrf.mxu1 }
 0x2b8   : > { %2992 = vst [vmem:[%s19410_s6 + $0x40] sm:$0xff] %v2967_v33  ;;  %v2893_v43 = vadd.f32 %v2892_v62, %v2757_v20 }
 0x2b9   : > { %v19498_v11 = vpop.f32.mrf.mxu0  ;;  %v15968_v36 = vpop.f32.mrf.mxu1 }
 0x2ba   : > { %v2968_v42 = vmax.f32 %v2893_v43, 0.0  ;;  %v2645_v43 = vadd.f32 %v14641_v17, %v19379_v22  ;;  %v14735_v36 = vadd.f32 %v19461_v61, %v19458_v40  ;;  %v14738_v40 = vadd.f32 %v19471_v30, %v19468_v56 }
 0x2bb   : > { %v19504_v39 = vpop.f32.mrf.mxu0  ;;  %v2897_v23 = vpop.f32.mrf.mxu1 }
 0x2bc   : > { %2993 = vst [vmem:[%s19410_s6 + $0x48] sm:$0xff] %v2968_v42  ;;  %v2898_v51 = vadd.f32 %v2897_v23, %v2762_v10  ;;  %v14647_v23 = vadd.f32 %v19290_v52, %v19283_v50  ;;  %v14741_v50 = vadd.f32 %v19480_v8, %v19477_v25  ;;  %v2786_v56 = vadd.f32 %v14738_v40, %v2650_v6 }
 0x2bd   : > { %v19509_v38 = vpop.f32.mrf.mxu0  ;;  %v15971_v44 = vpop.f32.mrf.mxu1  ;;  %v14744_v25 = vadd.f32 %v19489_v18, %v19486_v19 }
 0x2be   : > { %v2969_v57 = vmax.f32 %v2898_v51, 0.0  ;;  %v2781_v51 = vadd.f32 %v14735_v36, %v2645_v43  ;;  %v24457_v43 = vld [vmem:[#allocation13_spill] sm:$0xff] }
 0x2bf   : > { %v19515_v15 = vpop.f32.mrf.mxu0  ;;  %v2900_v47 = vpop.f32.mrf.mxu1  ;;  %v14659_v36 = vadd.f32 %v24457_v43, %v19336_v31 }
 0x2c0   : > { %2994 = vst [vmem:[%s19410_s6 + $0x50] sm:$0xff] %v2969_v57  ;;  %v2901_v26 = vadd.f32 %v2900_v47, %v2765_v0  ;;  %v2653_v0 = vadd.f32 %v14647_v23, %v19379_v22 }
 0x2c1   : > { %v19518_v21 = vpop.f32.mrf.mxu0  ;;  %v15972_v27 = vpop.f32.mrf.mxu1 }
 0x2c2   : > { %v2970_v29 = vmax.f32 %v2901_v26, 0.0  ;;  %v2658_v27 = vadd.f32 %v19308_v1, %v19379_v22  ;;  %v14753_v31 = vadd.f32 %v19518_v21, %v19515_v15 }
 0x2c3   : > { %v19523_v55 = vpop.f32.mrf.mxu0  ;;  %v2905_v63 = vpop.f32.mrf.mxu1 }
 0x2c4   : > { %2995 = vst [vmem:[%s19410_s6 + $0x58] sm:$0xff] %v2970_v29  ;;  %v2906_v12 = vadd.f32 %v2905_v63, %v2770_v13  ;;  %v14653_v29 = vadd.f32 %v19317_v9, %v19310_v4  ;;  %v2789_v13 = vadd.f32 %v14741_v50, %v2653_v0  ;;  %v14747_v4 = vadd.f32 %v19498_v11, %v19495_v59 }
 0x2c5   : > { %v19528_v46 = vpop.f32.mrf.mxu0  ;;  %v15975_v48 = vpop.f32.mrf.mxu1  ;;  %v2794_v19 = vadd.f32 %v14744_v25, %v2658_v27  ;;  %v14750_v59 = vadd.f32 %v19509_v38, %v19504_v39 }
 0x2c6   : > { %v2971_v24 = vmax.f32 %v2906_v12, 0.0  ;;  %v2661_v35 = vadd.f32 %v14653_v29, %v19379_v22 }
 0x2c7   : > { %v19534_v60 = vpop.f32.mrf.mxu0  ;;  %v2908_v33 = vpop.f32.mrf.mxu1 }
 0x2c8   : > { %2996 = vst [vmem:[%s19410_s6 + $0x60] sm:$0xff] %v2971_v24  ;;  %v2909_v20 = vadd.f32 %v2908_v33, %v2773_v58  ;;  %v2666_v33 = vadd.f32 %v19334_v32, %v19379_v22 }
 0x2c9   : > { %v19537_v62 = vpop.f32.mrf.mxu0  ;;  %v15976_v28 = vpop.f32.mrf.mxu1 }
 0x2ca   : > { %v2972_v34 = vmax.f32 %v2909_v20, 0.0  ;;  %v2802_v40 = vadd.f32 %v14750_v59, %v2666_v33 }
 0x2cb   : > { %v19542_v5 = vpop.f32.mrf.mxu0  ;;  %v2913_v3 = vpop.f32.mrf.mxu1 }
 0x2cc   : > { %2997 = vst [vmem:[%s19410_s6 + $0x68] sm:$0xff] %v2972_v34  ;;  %v2914_v2 = vadd.f32 %v2913_v3, %v2778_v37  ;;  %v2797_v34 = vadd.f32 %v14747_v4, %v2661_v35 }
 0x2cd   : > { %v19547_v42 = vpop.f32.mrf.mxu0  ;;  %v15979_v10 = vpop.f32.mrf.mxu1 }
 0x2ce   : > { %v2973_v61 = vmax.f32 %v2914_v2, 0.0  ;;  %v2669_v10 = vadd.f32 %v14659_v36, %v19379_v22 }
 0x2cf   : > { %v14763_v54 = vpop.f32.mrf.mxu0  ;;  %v2916_v44 = vpop.f32.mrf.mxu1 }
 0x2d0   : > { %2998 = vst [vmem:[%s19410_s6 + $0x70] sm:$0xff] %v2973_v61  ;;  %v2917_v14 = vadd.f32 %v2916_v44, %v2781_v51  ;;  %v24458_v61 = vld [vmem:[#allocation14_spill] sm:$0xff]  ;;  %v24459_v44 = vld [vmem:[#allocation15_spill] sm:$0xff]  ;;  %v2805_v0 = vadd.f32 %v14753_v31, %v2669_v10 }
 0x2d1   : > { %v14764_v41 = vpop.f32.mrf.mxu0  ;;  %v15980_v57 = vpop.f32.mrf.mxu1  ;;  %v2674_v51 = vadd.f32 %v24458_v61, %v19379_v22 }
 0x2d2   : > { %v2974_v52 = vmax.f32 %v2917_v14, 0.0  ;;  %v24460_v14 = vld [vmem:[#allocation16_spill] sm:$0xff]  ;;  %v14756_v57 = vadd.f32 %v19528_v46, %v19523_v55  ;;  %v2682_v55 = vadd.f32 %v19392_v16, %v19379_v22  ;;  %v14762_v46 = vadd.f32 %v19547_v42, %v19542_v5 }
 0x2d3   : > { %v2921_v30 = vpop.f32.mrf.mxu1  ;;  %v19560_v47 = vpop.f32.mrf.mxu0  ;;  %v14665_v41 = vadd.f32 %v24460_v14, %v24459_v44  ;;  %v16908_v44 = vld [vmem:[%s24456_s0 + $0xc] ss:$20 sps:$4 sm:$0xff]  }
 0x2d4   : > { %2999 = vst [vmem:[%s19410_s6 + $0x78] sm:$0xff] %v2974_v52  ;;  %v2922_v26 = vadd.f32 %v2921_v30, %v2786_v56  ;;  %v14759_v56 = vadd.f32 %v19537_v62, %v19534_v60  ;;  %4952 = vmatprep.mubr.bf16.mxu0 %v16908_v44 }
 0x2d5   : > { %v15983_v7 = vpop.f32.mrf.mxu1  ;;  %v19565_v53 = vpop.f32.mrf.mxu0  ;;  %v2677_v52 = vadd.f32 %v14665_v41, %v19379_v22 }
 0x2d6   : > { %v2975_v8 = vmax.f32 %v2922_v26, 0.0  ;;  %v2810_v26 = vadd.f32 %v14756_v57, %v2674_v51 }
 0x2d7   : > { %v2924_v63 = vpop.f32.mrf.mxu1  ;;  %v19571_v12 = vpop.f32.mrf.mxu0 }
 0x2d8   : > { %3000 = vst [vmem:[%s19410_s6 + $0x80] sm:$0xff] %v2975_v8  ;;  %v2925_v45 = vadd.f32 %v2924_v63, %v2789_v13  ;;  %v2813_v8 = vadd.f32 %v14759_v56, %v2677_v52 }
 0x2d9   : > { %v15984_v48 = vpop.f32.mrf.mxu1  ;;  %v19576_v17 = vpop.f32.mrf.mxu0 }
 0x2da   : > { %v2976_v9 = vmax.f32 %v2925_v45, 0.0  ;;  %v2818_v48 = vadd.f32 %v14762_v46, %v2682_v55 }
 0x2db   : > { %v2929_v18 = vpop.f32.mrf.mxu1  ;;  %v19581_v24 = vpop.f32.mrf.mxu0 }
 0x2dc   : > { %3001 = vst [vmem:[%s19410_s6 + $0x88] sm:$0xff] %v2976_v9  ;;  %v2930_v58 = vadd.f32 %v2929_v18, %v2794_v19 }
 0x2dd   : > { %v15987_v20 = vpop.f32.mrf.mxu1  ;;  %v19586_v28 = vpop.f32.mrf.mxu0 }
 0x2de   : > { %v2977_v11 = vmax.f32 %v2930_v58, 0.0 }
 0x2df   : > { %v2932_v37 = vpop.f32.mrf.mxu1  ;;  %v19592_v3 = vpop.f32.mrf.mxu0 }
 0x2e0   : > { %3002 = vst [vmem:[%s19410_s6 + $0x90] sm:$0xff] %v2977_v11  ;;  %v2933_v2 = vadd.f32 %v2932_v37, %v2797_v34 }
 0x2e1   : > { %v15988_v6 = vpop.f32.mrf.mxu1  ;;  %v19617_v62 = vpop.f32.mrf.mxu0 }
 0x2e2   : > { %v2978_v23 = vmax.f32 %v2933_v2, 0.0 }
 0x2e3   : > { %v2937_v39 = vpop.f32.mrf.mxu1  ;;  %v19620_v9 = vpop.f32.mrf.mxu0 }
 0x2e4   : > { %3003 = vst [vmem:[%s19410_s6 + $0x98] sm:$0xff] %v2978_v23  ;;  %v2938_v38 = vadd.f32 %v2937_v39, %v2802_v40 }
 0x2e5   : > { %v15991_v54 = vpop.f32.mrf.mxu1  ;;  %v19623_v5 = vpop.f32.mrf.mxu0 }
 0x2e6   : > { %v2979_v49 = vmax.f32 %v2938_v38, 0.0 }
 0x2e7   : > { %v2940_v50 = vpop.f32.mrf.mxu1  ;;  %v19627_v58 = vpop.f32.mrf.mxu0 }
 0x2e8   : > { %3004 = vst [vmem:[%s19410_s6 + $0xa0] sm:$0xff] %v2979_v49  ;;  %v2941_v15 = vadd.f32 %v2940_v50, %v2805_v0 }
 0x2e9   : > { %v15992_v21 = vpop.f32.mrf.mxu1  ;;  %v4013_v36 = vpop.f32.mrf.mxu0 }
 0x2ea   : > { %v2980_v30 = vmax.f32 %v2941_v15, 0.0  ;;  %v4329_v1 = vpack.c.bf16 %v4013_v36, %v19623_v5 }
 0x2eb   : > { %v2945_v27 = vpop.f32.mrf.mxu1  ;;  %v19639_v34 = vpop.f32.mrf.mxu0 }
 0x2ec   : > { %3005 = vst [vmem:[%s19410_s6 + $0xa8] sm:$0xff] %v2980_v30  ;;  %v2946_v7 = vadd.f32 %v2945_v27, %v2810_v26 }
 0x2ed   : > { %v15995_v29 = vpop.f32.mrf.mxu1  ;;  %v4019_v10 = vpop.f32.mrf.mxu0 }
 0x2ee   : > { %v2981_v25 = vmax.f32 %v2946_v7, 0.0 }
 0x2ef   : > { %v2948_v13 = vpop.f32.mrf.mxu1  ;;  %v19651_v40 = vpop.f32.mrf.mxu0 }
 0x2f0   : > { %3006 = vst [vmem:[%s19410_s6 + $0xb0] sm:$0xff] %v2981_v25  ;;  %v2949_v63 = vadd.f32 %v2948_v13, %v2813_v8  ;;  %v4337_v5 = vpack.c.bf16 %v19651_v40, %v19639_v34  ;;  %v16879_v34 = vld [vmem:[%s24456_s0] ss:$20 sps:$4 sm:$0xff]  }
 0x2f1   : > { %v15996_v60 = vpop.f32.mrf.mxu1  ;;  %v4023_v51 = vpop.f32.mrf.mxu0 }
 0x2f2   : > { %v2982_v45 = vmax.f32 %v2949_v63, 0.0  ;;  %v4338_v6 = vpack.c.bf16 %v4023_v51, %v4019_v10  ;;  %v4311_v10 = vpack.c.bf16 %v19576_v17, %v19565_v53  ;;  %v24464_v17 = vpack.c.bf16 %v19592_v3, %v19581_v24 }
 0x2f3   : > { %v2953_v35 = vpop.f32.mrf.mxu1  ;;  %v24466_v24 = vmov 0.0  }
 0x2f4   : > { %3007 = vst [vmem:[%s19410_s6 + $0xb8] sm:$0xff] %v2982_v45  ;;  %v2954_v4 = vadd.f32 %v2953_v35, %v2818_v48 }
 0x2f5   : > { %v15999_v16 = vpop.f32.mrf.mxu1 }
 0x2f6   : > { %v2983_v22 = vmax.f32 %v2954_v4, 0.0 }
 0x2f7   : > { %v2956_v19 = vpop.f32.mrf.mxu1 }
 0x2f8   : > { %3008 = vst [vmem:[%s19410_s6 + $0xc0] sm:$0xff] %v2983_v22  ;;  %s24599_s6 = sld [smem:[#allocation39_spill]] }
 0x2f9   : > { %v16000_v42 = vpop.f32.mrf.mxu1 }
 0x2fb   : > { %v19625_v18 = vpop.f32.mrf.mxu1 }
 0x2fc   : > { %24461 = vst [vmem:[#allocation13_spill] sm:$0xff] %v19625_v18 }
 0x2fd   : > { %v19629_v33 = vpop.f32.mrf.mxu1 }
 0x2fe   : > { %s21354_s23 = scalar_lea.vmem %s24599_s6, %s18125_s2  ;;  %s13475_s2 = sshll.u32 %s746_s24, 4 }
 0x2ff   : > { %v19631_v20 = vpop.f32.mrf.mxu1  ;;  %s748_s29 = scalar_lea.vmem [#allocation2], %s13475_s2  ;;  %s24730_s6 = sld [smem:[#allocation47_spill]] }
 0x300   : > { %24462 = vst [vmem:[#allocation14_spill] sm:$0xff] %v19631_v20  ;;  %v4320_v20 = vpack.c.bf16 %v19617_v62, %v19586_v28  ;;  %v4328_v28 = vpack.c.bf16 %v19627_v58, %v19620_v9  ;;  %v24465_v9 = vpack.c.bf16 %v19571_v12, %v19560_v47  ;;  %v16884_v58 = vld [vmem:[%s24456_s0 + $0x2c] ss:$20 sps:$4 sm:$0xff]   ;;  %v16882_v12 = vld [vmem:[%s24456_s0 + $0x28] ss:$20 sps:$4 sm:$0xff]   ;;  %s13335_s1 = sshll.u32 %s748_s29, 4  ;;  %s24286_s1 = int_to_ptr.vmem [resolvable:$true] %s13335_s1 }
 0x301   : > { %v19635_v59 = vpop.f32.mrf.mxu1  ;;  %s17758_s27 = scalar_lea.vmem %s24286_s1, 256 }
 0x302   : > { %p17759_p11 = scmp.ne.s32.totalorder %s24286_s1, %s17758_s27 }
 0x303   : > { %v19637_v11 = vpop.f32.mrf.mxu1 }
 0x304   : > { %24463 = vst [vmem:[#allocation15_spill] sm:$0xff] %v19637_v11  ;;  %p17760_p12 = pnand %p17759_p11, %p17984_p5 }
 0x305   : > { %v19641_v37 = vpop.f32.mrf.mxu1 }
 0x306   : > { %p17761_p13 = pneg %p17760_p12 }
 0x307   : > { %v19643_v2 = vpop.f32.mrf.mxu1 }
 0x309   : > { %v19647_v31 = vpop.f32.mrf.mxu1 }
 0x30b   : > { %v19649_v23 = vpop.f32.mrf.mxu1 }
 0x30d   : > { %v19653_v39 = vpop.f32.mrf.mxu1 }
 0x30f   : > { %v19655_v38 = vpop.f32.mrf.mxu1 }
 0x311   : > { %v19659_v54 = vpop.f32.mrf.mxu1 }
 0x313   : > { %v19664_v14 = vpop.f32.mrf.mxu0  ;;  %v19666_v41 = vpop.f32.mrf.mxu1 }
 0x315   : > { %v4062_v57 = vpop.f32.mrf.mxu0  ;;  %v19668_v49 = vpop.f32.mrf.mxu1 }
 0x317   : > { %v19670_v0 = vpop.f32.mrf.mxu0  ;;  %v19672_v50 = vpop.f32.mrf.mxu1 }
 0x318   : > { %v4312_v53 = vpack.c.bf16 %v19670_v0, %v19664_v14 }
 0x319   : > { %v4066_v21 = vpop.f32.mrf.mxu0  ;;  %v19676_v52 = vpop.f32.mrf.mxu1 }
 0x31a   : > { %v4313_v11 = vpack.c.bf16 %v4066_v21, %v4062_v57 }
 0x31b   : > { %v4070_v56 = vpop.f32.mrf.mxu0 }
 0x31d   : > { %v4072_v30 = vpop.f32.mrf.mxu0  ;;  %v19678_v26 = vpop.f32.mrf.mxu1 }
 0x31f   : > { %v4074_v27 = vpop.f32.mrf.mxu0  ;;  %v19680_v7 = vpop.f32.mrf.mxu1 }
 0x320   : > { %v4321_v62 = vpack.c.bf16 %v4074_v27, %v4070_v56  ;;  %v16887_v27 = vld [vmem:[%s24456_s0 + $0x54] ss:$20 sps:$4 sm:$0xff]  }
 0x321   : > { %v4076_v29 = vpop.f32.mrf.mxu0  ;;  %v19682_v55 = vpop.f32.mrf.mxu1 }
 0x322   : > { %v4322_v32 = vpack.c.bf16 %v4076_v29, %v4072_v30 }
 0x323   : > { %v4080_v46 = vpop.f32.mrf.mxu0  ;;  %v19684_v25 = vpop.f32.mrf.mxu1 }
 0x325   : > { %v4082_v8 = vpop.f32.mrf.mxu0  ;;  %v14805_v13 = vpop.f32.mrf.mxu1 }
 0x327   : > { %v4084_v63 = vpop.f32.mrf.mxu0  ;;  %v14806_v60 = vpop.f32.mrf.mxu1 }
 0x328   : > { %v14807_v57 = vadd.f32 %v14806_v60, %v14805_v13 }
 0x329   : > { %v4086_v45 = vpop.f32.mrf.mxu0  ;;  %v14808_v48 = vpop.f32.mrf.mxu1 }
 0x32a   : > { %v4331_v61 = vpack.c.bf16 %v4086_v45, %v4082_v8  ;;  %v16888_v45 = vld [vmem:[%s24456_s0 + $0x78] ss:$20 sps:$4 sm:$0xff]  }
 0x32b   : > { %v4090_v35 = vpop.f32.mrf.mxu0  ;;  %v14809_v4 = vpop.f32.mrf.mxu1 }
 0x32c   : > { %v14810_v21 = vadd.f32 %v14809_v4, %v14808_v48 }
 0x32d   : > { %v4092_v16 = vpop.f32.mrf.mxu0  ;;  %v14811_v22 = vpop.f32.mrf.mxu1 }
 0x32f   : > { %v4094_v19 = vpop.f32.mrf.mxu0  ;;  %v14812_v43 = vpop.f32.mrf.mxu1 }
 0x330   : > { %v4339_v51 = vpack.c.bf16 %v4094_v19, %v4090_v35  ;;  %v14813_v40 = vadd.f32 %v14812_v43, %v14811_v22  ;;  %v14804_v43 = vadd.f32 %v19684_v25, %v19682_v55  ;;  %v16890_v25 = vld [vmem:[%s24456_s0 + $0x7c] ss:$20 sps:$4 sm:$0xff]   ;;  %v16893_v35 = vld [vmem:[%s24456_s0 + $0xa4] ss:$20 sps:$4 sm:$0xff]  }
 0x331   : > { %v4096_v42 = vpop.f32.mrf.mxu0  ;;  %v14814_v15 = vpop.f32.mrf.mxu1 }
 0x332   : > { %v4340_v44 = vpack.c.bf16 %v4096_v42, %v4092_v16  ;;  %v16891_v42 = vld [vmem:[%s24456_s0 + $0xa0] ss:$20 sps:$4 sm:$0xff]  }
 0x333   : > { %v14815_v18 = vpop.f32.mrf.mxu1 }
 0x334   : > { %14823 = vmatprep.subr.bf16.mxu1 %v4340_v44  ;;  %v4342_v44 = vpack.c.bf16 %v19676_v52, %v19668_v49  ;;  %v16894_v49 = vld [vmem:[%s24456_s0 + $0xc8] ss:$20 sps:$4 sm:$0xff]  }
 0x335   : > { %14824 = vmatpush3.bf16.msra.mxu1 %v4338_v6  ;;  %v14817_v16 = vpop.f32.mrf.mxu1  ;;  %v16899_v52 = vld [vmem:[%s24456_s0 + $0xf4] ss:$20 sps:$4 sm:$0xff]  }
 0x336   : > { %14825 = vmatprep.subr.bf16.mxu1 %v4331_v61  ;;  %v14816_v61 = vadd.f32 %v14815_v18, %v14814_v15  ;;  %v14801_v18 = vadd.f32 %v19680_v7, %v19678_v26  ;;  %v4327_v15 = vpack.c.bf16 %v14810_v21, %v14807_v57  ;;  %v16885_v7 = vld [vmem:[%s24456_s0 + $0x50] ss:$20 sps:$4 sm:$0xff]  }
 0x337   : > { %v14818_v6 = vpop.f32.mrf.mxu1  ;;  %v16915_v57 = vld [vmem:[%s24456_s0 + $0x190] ss:$20 sps:$4 sm:$0xff]  }
 0x338   : > { %v14819_v36 = vadd.f32 %v14818_v6, %v14817_v16  ;;  %v4336_v56 = vpack.c.bf16 %v14816_v61, %v14813_v40  ;;  %v16909_v40 = vld [vmem:[%s24456_s0 + $0x168] ss:$20 sps:$4 sm:$0xff]   ;;  %v16912_v61 = vld [vmem:[%s24456_s0 + $0x30] ss:$20 sps:$4 sm:$0xff]  }
 0x339   : > { %14826 = vmatpush3.bf16.msra.mxu1 %v4329_v1  ;;  %v4330_v1 = vpack.c.bf16 %v4084_v63, %v4080_v46  ;;  %v4318_v46 = vpack.c.bf16 %v14804_v43, %v14801_v18  ;;  %v16923_v21 = vld [vmem:[%s24456_s0 + $0x1bc] ss:$20 sps:$4 sm:$0xff]   ;;  %v16924_v18 = vld [vmem:[%s24456_s0 + $0x80] ss:$20 sps:$4 sm:$0xff]  }
 0x33a   : > { %14827 = vmatprep.subr.bf16.mxu1 %v4322_v32  ;;  %v14820_v32 = vpop.f32.mrf.mxu1 }
 0x33d   : > { %14828 = vmatpush3.bf16.msra.mxu1 %v4320_v20  ;;  %v14821_v20 = vpop.f32.mrf.mxu1 }
 0x33e   : > { %14829 = vmatprep.subr.bf16.mxu1 %v4313_v11  ;;  %v14822_v11 = vadd.f32 %v14821_v20, %v14820_v32  ;;  %v4324_v32 = vpack.c.bf16 %v19647_v31, %v19641_v37  ;;  %v16902_v20 = vld [vmem:[%s24456_s0 + $0x11c] ss:$20 sps:$4 sm:$0xff]   ;;  %v24467_v31 = vpack.c.bf16 %v19672_v50, %v19666_v41 }
 0x33f   : > { %v24469_v50 = vld [vmem:[#allocation15_spill] sm:$0xff] }
 0x340   : > { %v4345_v14 = vpack.c.bf16 %v14822_v11, %v14819_v36  ;;  %v24470_v36 = vpack.c.bf16 %v19643_v2, %v24469_v50  ;;  %v24471_v11 = vld [vmem:[#allocation14_spill] sm:$0xff]  ;;  %v16986_v50 = vld [vmem:[%s24343_s10 + $0x120] ss:$36 sps:$4 sm:$0xff]  }
 0x341   : > { %14830 = vmatpush3.bf16.msra.mxu1 %v4311_v10  ;;  %v16896_v10 = vld [vmem:[%s24456_s0 + $0xcc] ss:$20 sps:$4 sm:$0xff]   ;;  %v16914_v2 = vld [vmem:[%s24456_s0 + $0x34] ss:$20 sps:$4 sm:$0xff]  }
 0x342   : > { %14831 = vmatprep.subr.bf16.mxu1 %v4339_v51 }
 0x345   : > { %14832 = vmatpush3.bf16.msra.mxu1 %v4337_v5  ;;  %v4333_v5 = vpack.c.bf16 %v19659_v54, %v19653_v39  ;;  %v4315_v54 = vpack.c.bf16 %v19635_v59, %v19629_v33  ;;  %v16900_v59 = vld [vmem:[%s24456_s0 + $0x118] ss:$20 sps:$4 sm:$0xff]  }
 0x346   : > { %14833 = vmatprep.subr.bf16.mxu1 %v4330_v1 }
 0x349   : > { %14834 = vmatpush3.bf16.msra.mxu1 %v4328_v28 }
 0x34a   : > { %14835 = vmatprep.subr.bf16.mxu1 %v4321_v62  ;;  %v16897_v62 = vld [vmem:[%s24456_s0 + $0xf0] ss:$20 sps:$4 sm:$0xff]  }
 0x34d   : > { %14836 = vmatpush3.bf16.msra.mxu1 %v24464_v17  ;;  %v16905_v17 = vld [vmem:[%s24456_s0 + $0x144] ss:$20 sps:$4 sm:$0xff]  }
 0x34e   : > { %14837 = vmatprep.subr.bf16.mxu1 %v4312_v53  ;;  %v24468_v53 = vpack.c.bf16 %v19655_v38, %v19649_v23  ;;  %v16903_v23 = vld [vmem:[%s24456_s0 + $0x140] ss:$20 sps:$4 sm:$0xff]   ;;  %v16906_v38 = vld [vmem:[%s24456_s0 + $0x8] ss:$20 sps:$4 sm:$0xff]  }
 0x351   : > { %14838 = vmatpush3.bf16.msra.mxu1 %v24465_v9 }
 0x352   : > { %16001 = vmatprep.subr.bf16.mxu1 %v24466_v24 }
 0x353   : > { %v19710_v3 = vpop.f32.mrf.mxu0 }
 0x354   : > { %4817 = vmatmul.mubr.bf16.vlgmr.msra.gmra.mxu1 %v16879_v34  ;;  %v24472_v34 = vld [vmem:[#allocation13_spill] sm:$0xff] }
 0x355   : > { %v19712_v0 = vpop.f32.mrf.mxu0  ;;  %4824 = vmatprep.mubr.bf16.mxu1 %v16884_v58  ;;  %16002 = vmatpush3.bf16.msra.mxu1 %v4345_v14  ;;  %v24473_v9 = vpack.c.bf16 %v24471_v11, %v24472_v34  ;;  %v16911_v58 = vld [vmem:[%s24456_s0 + $0x16c] ss:$20 sps:$4 sm:$0xff]   ;;  %v16917_v14 = vld [vmem:[%s24456_s0 + $0x194] ss:$20 sps:$4 sm:$0xff]   ;;  %v16992_v11 = vld [vmem:[%s24343_s10 + $0xd8] ss:$36 sps:$4 sm:$0xff]  }
 0x356   : > { %16003 = vmatprep.subr.bf16.mxu1 %v24466_v24  ;;  %v16995_v34 = vld [vmem:[%s24343_s10 + $0xe0] ss:$36 sps:$4 sm:$0xff]  }
 0x357   : > { %v19715_v47 = vpop.f32.mrf.mxu0 }
 0x358   : > { %v4316_v41 = vpack.c.bf16 %v19715_v47, %v19710_v3  ;;  %v16920_v3 = vld [vmem:[%s24456_s0 + $0x5c] ss:$20 sps:$4 sm:$0xff]   ;;  %v4418_v47 = vld [vmem:[%s24456_s0 + $0x1e0] sm:$0xff] }
 0x359   : > { %v4212_v30 = vpop.f32.mrf.mxu0  ;;  %16004 = vmatpush3.bf16.msra.mxu1 %v4336_v56  ;;  %v16926_v56 = vld [vmem:[%s24456_s0 + $0x84] ss:$20 sps:$4 sm:$0xff]   ;;  %v13929_v43 = vcombine.high %v4418_v47, %v4418_v47 }
 0x35a   : > { %16005 = vmatprep.subr.bf16.mxu1 %v24466_v24  ;;  %v4317_v28 = vpack.c.bf16 %v4212_v30, %v19712_v0  ;;  %v16918_v0 = vld [vmem:[%s24456_s0 + $0x58] ss:$20 sps:$4 sm:$0xff]   ;;  %v13928_v30 = vcombine.low %v4418_v47, %v4418_v47 }
 0x35b   : > { %v19728_v29 = vpop.f32.mrf.mxu0  ;;  %v16964_v47 = vld [vmem:[%s24456_s0 + $0x178] ss:$20 sps:$4 sm:$0xff]  }
 0x35c   : > { %4825 = vmatmul.mubr.bf16.gmra.mxu1 %v16882_v12  ;;  %v16921_v12 = vld [vmem:[%s24456_s0 + $0x1b8] ss:$20 sps:$4 sm:$0xff]  }
 0x35d   : > { %v4218_v8 = vpop.f32.mrf.mxu0  ;;  %4832 = vmatprep.mubr.bf16.mxu1 %v16887_v27  ;;  %16006 = vmatpush3.bf16.msra.mxu1 %v4327_v15  ;;  %v16931_v15 = vld [vmem:[%s24456_s0 + $0xac] ss:$20 sps:$4 sm:$0xff]   ;;  %v16929_v27 = vld [vmem:[%s24456_s0 + $0xa8] ss:$20 sps:$4 sm:$0xff]  }
 0x35e   : > { %16007 = vmatprep.subr.bf16.mxu1 %v24466_v24 }
 0x35f   : > { %v4220_v26 = vpop.f32.mrf.mxu0 }
 0x360   : > { %v4325_v33 = vpack.c.bf16 %v4220_v26, %v19728_v29  ;;  %v16934_v29 = vld [vmem:[%s24456_s0 + $0xd4] ss:$20 sps:$4 sm:$0xff]   ;;  %v16938_v26 = vld [vmem:[%s24456_s0 + $0xfc] ss:$20 sps:$4 sm:$0xff]  }
 0x361   : > { %v4222_v55 = vpop.f32.mrf.mxu0  ;;  %16008 = vmatpush3.bf16.msra.mxu1 %v4318_v46  ;;  %v16932_v46 = vld [vmem:[%s24456_s0 + $0xd0] ss:$20 sps:$4 sm:$0xff]  }
 0x362   : > { %v4326_v1 = vpack.c.bf16 %v4222_v55, %v4218_v8  ;;  %v16935_v8 = vld [vmem:[%s24456_s0 + $0x10] ss:$20 sps:$4 sm:$0xff]   ;;  %v16939_v55 = vld [vmem:[%s24456_s0 + $0x38] ss:$20 sps:$4 sm:$0xff]  }
 0x363   : > { %v4226_v13 = vpop.f32.mrf.mxu0 }
 0x364   : > { %4833 = vmatmul.mubr.bf16.gmra.mxu1 %v16885_v7  ;;  %v16936_v7 = vld [vmem:[%s24456_s0 + $0xf8] ss:$20 sps:$4 sm:$0xff]  }
 0x365   : > { %v4228_v63 = vpop.f32.mrf.mxu0  ;;  %4840 = vmatprep.mubr.bf16.mxu1 %v16890_v25  ;;  %v16942_v25 = vld [vmem:[%s24456_s0 + $0x124] ss:$20 sps:$4 sm:$0xff]  }
 0x367   : > { %v4230_v60 = vpop.f32.mrf.mxu0 }
 0x368   : > { %v4334_v37 = vpack.c.bf16 %v4230_v60, %v4226_v13  ;;  %v16940_v13 = vld [vmem:[%s24456_s0 + $0x120] ss:$20 sps:$4 sm:$0xff]  }
 0x369   : > { %v4232_v48 = vpop.f32.mrf.mxu0  ;;  %v16946_v60 = vld [vmem:[%s24456_s0 + $0x14c] ss:$20 sps:$4 sm:$0xff]  }
 0x36a   : > { %v4335_v51 = vpack.c.bf16 %v4232_v48, %v4228_v63  ;;  %v16943_v63 = vld [vmem:[%s24456_s0 + $0x60] ss:$20 sps:$4 sm:$0xff]   ;;  %v16947_v48 = vld [vmem:[%s24456_s0 + $0x88] ss:$20 sps:$4 sm:$0xff]  }
 0x36b   : > { %v4236_v4 = vpop.f32.mrf.mxu0 }
 0x36c   : > { %4841 = vmatmul.mubr.bf16.gmra.mxu1 %v16888_v45  ;;  %v16944_v45 = vld [vmem:[%s24456_s0 + $0x148] ss:$20 sps:$4 sm:$0xff]  }
 0x36d   : > { %v4238_v22 = vpop.f32.mrf.mxu0  ;;  %4848 = vmatprep.mubr.bf16.mxu1 %v16893_v35  ;;  %v16950_v35 = vld [vmem:[%s24456_s0 + $0x174] ss:$20 sps:$4 sm:$0xff]  }
 0x36f   : > { %v4240_v19 = vpop.f32.mrf.mxu0 }
 0x370   : > { %v4343_v39 = vpack.c.bf16 %v4240_v19, %v4236_v4  ;;  %v16948_v4 = vld [vmem:[%s24456_s0 + $0x170] ss:$20 sps:$4 sm:$0xff]  }
 0x371   : > { %v4242_v16 = vpop.f32.mrf.mxu0  ;;  %v16954_v19 = vld [vmem:[%s24456_s0 + $0x19c] ss:$20 sps:$4 sm:$0xff]  }
 0x372   : > { %v4344_v6 = vpack.c.bf16 %v4242_v16, %v4238_v22  ;;  %v16951_v22 = vld [vmem:[%s24456_s0 + $0xb0] ss:$20 sps:$4 sm:$0xff]  }
 0x373   : > { %v16958_v16 = vld [vmem:[%s24456_s0 + $0x1c4] ss:$20 sps:$4 sm:$0xff]  }
 0x374   : > { %4849 = vmatmul.mubr.bf16.gmra.mxu1 %v16891_v42  ;;  %14917 = vmatprep.subr.bf16.mxu0 %v4344_v6  ;;  %v16952_v42 = vld [vmem:[%s24456_s0 + $0x198] ss:$20 sps:$4 sm:$0xff]   ;;  %v16973_v6 = vld [vmem:[%s24343_s10 + $0x204] ss:$36 sps:$4 sm:$0xff]  }
 0x375   : > { %14918 = vmatpush3.bf16.msra.mxu0 %v4342_v44  ;;  %4856 = vmatprep.mubr.bf16.mxu1 %v16896_v10  ;;  %v16955_v44 = vld [vmem:[%s24456_s0 + $0xd8] ss:$20 sps:$4 sm:$0xff]   ;;  %v16970_v10 = vld [vmem:[%s24343_s10 + $0x1fc] ss:$36 sps:$4 sm:$0xff]  }
 0x376   : > { %14919 = vmatprep.subr.bf16.mxu0 %v4335_v51  ;;  %v16968_v51 = vld [vmem:[%s24343_s10 + $0x1f8] ss:$36 sps:$4 sm:$0xff]   ;;  %5814 = vmatprep.subr.bf16.mxu1 %v16973_v6 }
 0x379   : > { %14920 = vmatpush3.bf16.msra.mxu0 %v4333_v5  ;;  %v16971_v5 = vld [vmem:[%s24343_s10 + $0x200] ss:$36 sps:$4 sm:$0xff]  }
 0x37a   : > { %14921 = vmatprep.subr.bf16.mxu0 %v4326_v1  ;;  %v4419_v1 = vld [vmem:[%s24456_s0 + $0x1e8] sm:$0xff] }
 0x37c   : > { %4857 = vmatmul.mubr.bf16.gmra.mxu1 %v16894_v49  ;;  %v16956_v49 = vld [vmem:[%s24456_s0 + $0x1c0] ss:$20 sps:$4 sm:$0xff]  }
 0x37d   : > { %14922 = vmatpush3.bf16.msra.mxu0 %v4324_v32  ;;  %4864 = vmatprep.mubr.bf16.mxu1 %v16899_v52  ;;  %v16976_v52 = vld [vmem:[%s24343_s10 + $0x1b4] ss:$36 sps:$4 sm:$0xff]   ;;  %v16979_v32 = vld [vmem:[%s24343_s10 + $0x1bc] ss:$36 sps:$4 sm:$0xff]  }
 0x37e   : > { %14923 = vmatprep.subr.bf16.mxu0 %v4317_v28  ;;  %v16959_v28 = vld [vmem:[%s24456_s0 + $0x100] ss:$20 sps:$4 sm:$0xff]  }
 0x381   : > { %14924 = vmatpush3.bf16.msra.mxu0 %v4315_v54  ;;  %v16977_v54 = vld [vmem:[%s24343_s10 + $0x1b8] ss:$36 sps:$4 sm:$0xff]  }
 0x382   : > { %14925 = vmatprep.subr.bf16.mxu0 %v4343_v39  ;;  %v16974_v39 = vld [vmem:[%s24343_s10 + $0x1b0] ss:$36 sps:$4 sm:$0xff]  }
 0x384   : > { %4865 = vmatmul.mubr.bf16.gmra.mxu1 %v16897_v62  ;;  %v13931_v62 = vcombine.high %v4419_v1, %v4419_v1 }
 0x385   : > { %14926 = vmatpush3.bf16.msra.mxu0 %v24467_v31  ;;  %4872 = vmatprep.mubr.bf16.mxu1 %v16902_v20  ;;  %v16982_v20 = vld [vmem:[%s24343_s10 + $0x16c] ss:$36 sps:$4 sm:$0xff]  }
 0x386   : > { %14927 = vmatprep.subr.bf16.mxu0 %v4334_v37  ;;  %v16985_v37 = vld [vmem:[%s24343_s10 + $0x174] ss:$36 sps:$4 sm:$0xff]   ;;  %v16980_v31 = vld [vmem:[%s24343_s10 + $0x168] ss:$36 sps:$4 sm:$0xff]  }
 0x389   : > { %14928 = vmatpush3.bf16.msra.mxu0 %v24468_v53  ;;  %v16991_v53 = vld [vmem:[%s24343_s10 + $0x12c] ss:$36 sps:$4 sm:$0xff]  }
 0x38a   : > { %14929 = vmatprep.subr.bf16.mxu0 %v4325_v33  ;;  %v16983_v33 = vld [vmem:[%s24343_s10 + $0x170] ss:$36 sps:$4 sm:$0xff]  }
 0x38c   : > { %4873 = vmatmul.mubr.bf16.gmra.mxu1 %v16900_v59  ;;  %v16988_v59 = vld [vmem:[%s24343_s10 + $0x124] ss:$36 sps:$4 sm:$0xff]  }
 0x38d   : > { %14930 = vmatpush3.bf16.msra.mxu0 %v24470_v36  ;;  %4880 = vmatprep.mubr.bf16.mxu1 %v16905_v17  ;;  %v13930_v17 = vcombine.low %v4419_v1, %v4419_v1  ;;  %v16989_v36 = vld [vmem:[%s24343_s10 + $0x128] ss:$36 sps:$4 sm:$0xff]  }
 0x38e   : > { %14931 = vmatprep.subr.bf16.mxu0 %v4316_v41  ;;  %v16962_v41 = vld [vmem:[%s24456_s0 + $0x128] ss:$20 sps:$4 sm:$0xff]  }
 0x391   : > { %14932 = vmatpush3.bf16.msra.mxu0 %v24473_v9  ;;  %v17000_v9 = vld [vmem:[%s24343_s10 + $0x94] ss:$36 sps:$4 sm:$0xff]  }
 0x392   : > { %5653 = vmatprep.subr.bf16.mxu0 %v16970_v10 }
 0x394   : > { %4881 = vmatmul.mubr.bf16.gmra.mxu1 %v16903_v23  ;;  %4953 = vmatmul.mubr.bf16.vlgmr.msra.gmra.mxu0 %v16906_v38  ;;  %v16994_v23 = vld [vmem:[%s24343_s10 + $0xdc] ss:$36 sps:$4 sm:$0xff]   ;;  %v16997_v38 = vld [vmem:[%s24343_s10 + $0xe4] ss:$36 sps:$4 sm:$0xff]  }
 0x395   : > { %4888 = vmatprep.mubr.bf16.mxu1 %v16911_v58  ;;  %4960 = vmatprep.mubr.bf16.mxu0 %v16914_v2  ;;  %v17003_v58 = vld [vmem:[%s24343_s10 + $0x9c] ss:$36 sps:$4 sm:$0xff]   ;;  %v16963_v2 = vld [vmem:[%s24456_s0 + $0x150] ss:$20 sps:$4 sm:$0xff]  }
 0x396   : > { %5654 = vmatpush1.bf16.msra.mxu0 %v16968_v51 }
 0x397   : > { %5655 = vmatprep.subr.bf16.mxu0 %v16976_v52 }
 0x39a   : > { %5656 = vmatpush1.bf16.msra.mxu0 %v16974_v39 }
 0x39b   : > { %5657 = vmatprep.subr.bf16.mxu0 %v16982_v20 }
 0x39c   : > { %4889 = vmatmul.mubr.bf16.gmra.mxu1 %v16909_v40  ;;  %4961 = vmatmul.mubr.bf16.gmra.mxu0 %v16912_v61  ;;  %v16998_v40 = vld [vmem:[%s24343_s10 + $0x90] ss:$36 sps:$4 sm:$0xff]   ;;  %v17001_v61 = vld [vmem:[%s24343_s10 + $0x98] ss:$36 sps:$4 sm:$0xff]  }
 0x39d   : > { %4896 = vmatprep.mubr.bf16.mxu1 %v16917_v14  ;;  %4968 = vmatprep.mubr.bf16.mxu0 %v16920_v3  ;;  %v17006_v14 = vld [vmem:[%s24343_s10 + $0x4c] ss:$36 sps:$4 sm:$0xff]   ;;  %v17009_v3 = vld [vmem:[%s24343_s10 + $0x54] ss:$36 sps:$4 sm:$0xff]  }
 0x39e   : > { %5658 = vmatpush1.bf16.msra.mxu0 %v16980_v31 }
 0x39f   : > { %5659 = vmatprep.subr.bf16.mxu0 %v16988_v59 }
 0x3a2   : > { %5660 = vmatpush1.bf16.msra.mxu0 %v16986_v50 }
 0x3a3   : > { %5661 = vmatprep.subr.bf16.mxu0 %v16994_v23 }
 0x3a4   : > { %4897 = vmatmul.mubr.bf16.gmra.mxu1 %v16915_v57  ;;  %4969 = vmatmul.mubr.bf16.gmra.mxu0 %v16918_v0  ;;  %v17004_v57 = vld [vmem:[%s24343_s10 + $0x48] ss:$36 sps:$4 sm:$0xff]   ;;  %v17007_v0 = vld [vmem:[%s24343_s10 + $0x50] ss:$36 sps:$4 sm:$0xff]  }
 0x3a5   : > { %4904 = vmatprep.mubr.bf16.mxu1 %v16923_v21  ;;  %4976 = vmatprep.mubr.bf16.mxu0 %v16926_v56  ;;  %v17012_v21 = vld [vmem:[%s24343_s10 + $0x4] ss:$36 sps:$4 sm:$0xff]   ;;  %v17015_v56 = vld [vmem:[%s24343_s10 + $0xc] ss:$36 sps:$4 sm:$0xff]  }
 0x3a6   : > { %5662 = vmatpush1.bf16.msra.mxu0 %v16992_v11 }
 0x3a7   : > { %5663 = vmatprep.subr.bf16.mxu0 %v17000_v9 }
 0x3aa   : > { %5664 = vmatpush1.bf16.msra.mxu0 %v16998_v40 }
 0x3ab   : > { %5665 = vmatprep.subr.bf16.mxu0 %v17006_v14 }
 0x3ac   : > { %4905 = vmatmul.mubr.bf16.gmra.mxu1 %v16921_v12  ;;  %4977 = vmatmul.mubr.bf16.gmra.mxu0 %v16924_v18  ;;  %v17010_v12 = vld [vmem:[%s24343_s10] ss:$36 sps:$4 sm:$0xff]   ;;  %v17013_v18 = vld [vmem:[%s24343_s10 + $0x8] ss:$36 sps:$4 sm:$0xff]  }
 0x3ad   : > { %4912 = vmatprep.mubr.bf16.mxu1 %v13929_v43  ;;  %4984 = vmatprep.mubr.bf16.mxu0 %v16931_v15  ;;  %v24377_v43 = vmov 0   ;;  %v16965_v15 = vld [vmem:[%s24456_s0 + $0x1a0] ss:$20 sps:$4 sm:$0xff]  }
 0x3ae   : > { %5666 = vmatpush1.bf16.msra.mxu0 %v17004_v57 }
 0x3af   : > { %5667 = vmatprep.subr.bf16.mxu0 %v17012_v21 }
 0x3b2   : > { %5668 = vmatpush1.bf16.msra.mxu0 %v17010_v12 }
 0x3b4   : > { %4913 = vmatmul.mubr.bf16.gmra.mxu1 %v13928_v30  ;;  %4985 = vmatmul.mubr.bf16.gmra.mxu0 %v16929_v27  ;;  %v16966_v30 = vld [vmem:[%s24456_s0 + $0x1c8] ss:$20 sps:$4 sm:$0xff]  }
 0x3b5   : > { %4992 = vmatprep.mubr.bf16.mxu0 %v16934_v29  ;;  %16009 = vmatprep.mubr.msk.bf16.mxu1 %vm17821_vm0, %v24466_v24 }
 0x3bc   : > { %4993 = vmatmul.mubr.bf16.gmra.mxu0 %v16932_v46  ;;  %16010 = vmatmul.mubr.msk.bf16.vlgmr.msra.gmra.mxu1 %vm2511_vm1, %v16935_v8 }
 0x3bd   : > { %5000 = vmatprep.mubr.bf16.mxu0 %v16938_v26  ;;  %16013 = vmatprep.mubr.msk.bf16.mxu1 %vm17821_vm0, %v24466_v24  ;;  %v16967_v26 = vld [vmem:[%s24456_s0 + $0x1f0] ss:$0 sps:$4 sm:$0xff]  }
 0x3be   : > { %5815 = vmatpush1.bf16.msra.mxu1 %v16971_v5 }
 0x3bf   : > { %5816 = vmatprep.subr.bf16.mxu1 %v16979_v32 }
 0x3c2   : > { %5817 = vmatpush1.bf16.msra.mxu1 %v16977_v54 }
 0x3c3   : > { %5818 = vmatprep.subr.bf16.mxu1 %v16985_v37  ;;  %v17018_v37 = vld [vmem:[%s24343_s10 + $0x20c] ss:$36 sps:$4 sm:$0xff]  }
 0x3c4   : > { %5001 = vmatmul.mubr.bf16.gmra.mxu0 %v16936_v7  ;;  %16014 = vmatmul.mubr.msk.bf16.gmra.mxu1 %vm2511_vm1, %v16939_v55 }
 0x3c5   : > { %5008 = vmatprep.mubr.bf16.mxu0 %v16942_v25  ;;  %16017 = vmatprep.mubr.msk.bf16.mxu1 %vm17821_vm0, %v24466_v24 }
 0x3c6   : > { %5819 = vmatpush1.bf16.msra.mxu1 %v16983_v33  ;;  %5975 = vmatprep.subr.bf16.mxu0 %v17018_v37 }
 0x3c7   : > { %5820 = vmatprep.subr.bf16.mxu1 %v16991_v53  ;;  %v17021_v53 = vld [vmem:[%s24343_s10 + $0x214] ss:$36 sps:$4 sm:$0xff]  }
 0x3ca   : > { %5821 = vmatpush1.bf16.msra.mxu1 %v16989_v36 }
 0x3cb   : > { %5822 = vmatprep.subr.bf16.mxu1 %v16997_v38 }
 0x3cc   : > { %5009 = vmatmul.mubr.bf16.gmra.mxu0 %v16940_v13  ;;  %16018 = vmatmul.mubr.msk.bf16.gmra.mxu1 %vm2511_vm1, %v16943_v63 }
 0x3cd   : > { %5016 = vmatprep.mubr.bf16.mxu0 %v16946_v60  ;;  %16021 = vmatprep.mubr.msk.bf16.mxu1 %vm17821_vm0, %v24466_v24 }
 0x3ce   : > { %5823 = vmatpush1.bf16.msra.mxu1 %v16995_v34 }
 0x3cf   : > { %5824 = vmatprep.subr.bf16.mxu1 %v17003_v58 }
 0x3d2   : > { %5825 = vmatpush1.bf16.msra.mxu1 %v17001_v61 }
 0x3d3   : > { %5826 = vmatprep.subr.bf16.mxu1 %v17009_v3 }
 0x3d4   : > { %5017 = vmatmul.mubr.bf16.gmra.mxu0 %v16944_v45  ;;  %16022 = vmatmul.mubr.msk.bf16.gmra.mxu1 %vm2511_vm1, %v16947_v48 }
 0x3d5   : > { %5024 = vmatprep.mubr.bf16.mxu0 %v16950_v35  ;;  %16025 = vmatprep.mubr.msk.bf16.mxu1 %vm17821_vm0, %v24466_v24 }
 0x3d6   : > { %5827 = vmatpush1.bf16.msra.mxu1 %v17007_v0 }
 0x3d7   : > { %5828 = vmatprep.subr.bf16.mxu1 %v17015_v56 }
 0x3da   : > { %5829 = vmatpush1.bf16.msra.mxu1 %v17013_v18 }
 0x3db   : > { %6136 = vmatprep.subr.bf16.mxu1 %v17021_v53 }
 0x3dc   : > { %5025 = vmatmul.mubr.bf16.gmra.mxu0 %v16948_v4  ;;  %16026 = vmatmul.mubr.msk.bf16.gmra.mxu1 %vm2511_vm1, %v16951_v22 }
 0x3dd   : > { %5032 = vmatprep.mubr.bf16.mxu0 %v16954_v19  ;;  %16029 = vmatprep.mubr.msk.bf16.mxu1 %vm17821_vm0, %v24466_v24 }
 0x3e4   : > { %5033 = vmatmul.mubr.bf16.gmra.mxu0 %v16952_v42  ;;  %16030 = vmatmul.mubr.msk.bf16.gmra.mxu1 %vm2511_vm1, %v16955_v44 }
 0x3e5   : > { %5040 = vmatprep.mubr.bf16.mxu0 %v16958_v16  ;;  %16033 = vmatprep.mubr.msk.bf16.mxu1 %vm17821_vm0, %v24466_v24 }
 0x3ec   : > { %5041 = vmatmul.mubr.bf16.gmra.mxu0 %v16956_v49  ;;  %16034 = vmatmul.mubr.msk.bf16.gmra.mxu1 %vm2511_vm1, %v16959_v28 }
 0x3ed   : > { %5048 = vmatprep.mubr.bf16.mxu0 %v13931_v62  ;;  %16037 = vmatprep.mubr.msk.bf16.mxu1 %vm17821_vm0, %v24466_v24 }
 0x3f4   : > { %5049 = vmatmul.mubr.bf16.gmra.mxu0 %v13930_v17  ;;  %16038 = vmatmul.mubr.msk.bf16.gmra.mxu1 %vm2511_vm1, %v16962_v41 }
 0x3f5   : > { %16041 = vmatprep.mubr.msk.bf16.mxu1 %vm17821_vm0, %v24466_v24  ;;  %5685 = vmatprep.mubr.bf16.mxu0 %v24377_v43 }
 0x3fc   : > { %16042 = vmatmul.mubr.msk.bf16.gmra.mxu1 %vm2511_vm1, %v16963_v2 }
 0x3fd   : > { %16045 = vmatprep.mubr.msk.bf16.mxu1 %vm17821_vm0, %v24466_v24 }
 0x404   : > { %16046 = vmatmul.mubr.msk.bf16.gmra.mxu1 %vm2511_vm1, %v16964_v47 }
 0x405   : > { %16049 = vmatprep.mubr.msk.bf16.mxu1 %vm17821_vm0, %v24466_v24 }
 0x40c   : > { %16050 = vmatmul.mubr.msk.bf16.gmra.mxu1 %vm2511_vm1, %v16965_v15 }
 0x40d   : > { %16053 = vmatprep.mubr.msk.bf16.mxu1 %vm17821_vm0, %v24466_v24 }
 0x414   : > { %v14839_v27 = vpop.f32.mrf.mxu1  ;;  %16054 = vmatmul.mubr.msk.bf16.gmra.mxu1 %vm2511_vm1, %v16966_v30 }
 0x415   : > { %16057 = vmatprep.mubr.msk.bf16.mxu1 %vm17821_vm0, %v24466_v24 }
 0x416   : > { %v14840_v29 = vpop.f32.mrf.mxu1 }
 0x417   : > { %v20058_v46 = vadd.f32 %v14840_v29, %v14839_v27 }
 0x418   : > { %v20060_v8 = vpop.f32.mrf.mxu1 }
 0x41a   : > { %v20065_v7 = vpop.f32.mrf.mxu1 }
 0x41c   : > { %v14845_v55 = vpop.f32.mrf.mxu1  ;;  %16058 = vmatmul.mubr.msk.bf16.gmra.mxu1 %vm2511_vm1, %v16967_v26 }
 0x41d   : > { %5846 = vmatprep.mubr.bf16.mxu1 %v24377_v43 }
 0x41e   : > { %v14846_v25 = vpop.f32.mrf.mxu1 }
 0x41f   : > { %v20069_v13 = vadd.f32 %v14846_v25, %v14845_v55 }
 0x420   : > { %v20071_v63 = vpop.f32.mrf.mxu1 }
 0x422   : > { %v20073_v60 = vpop.f32.mrf.mxu1 }
 0x424   : > { %v14851_v45 = vpop.f32.mrf.mxu1 }
 0x426   : > { %v14852_v48 = vpop.f32.mrf.mxu1 }
 0x427   : > { %v20075_v35 = vadd.f32 %v14852_v48, %v14851_v45 }
 0x428   : > { %v20077_v4 = vpop.f32.mrf.mxu1 }
 0x42a   : > { %v20079_v22 = vpop.f32.mrf.mxu1 }
 0x42c   : > { %v14857_v19 = vpop.f32.mrf.mxu1 }
 0x42e   : > { %v14858_v42 = vpop.f32.mrf.mxu1 }
 0x42f   : > { %v20081_v44 = vadd.f32 %v14858_v42, %v14857_v19 }
 0x430   : > { %v20083_v16 = vpop.f32.mrf.mxu1 }
 0x432   : > { %v20085_v10 = vpop.f32.mrf.mxu1 }
 0x434   : > { %v14863_v51 = vpop.f32.mrf.mxu1 }
 0x436   : > { %v14864_v6 = vpop.f32.mrf.mxu1 }
 0x437   : > { %v20087_v5 = vadd.f32 %v14864_v6, %v14863_v51 }
 0x438   : > { %v20089_v1 = vpop.f32.mrf.mxu1 }
 0x43a   : > { %v20091_v49 = vpop.f32.mrf.mxu1 }
 0x43c   : > { %v14869_v52 = vpop.f32.mrf.mxu1 }
 0x43e   : > { %v14870_v32 = vpop.f32.mrf.mxu1 }
 0x43f   : > { %v20093_v28 = vadd.f32 %v14870_v32, %v14869_v52 }
 0x440   : > { %v20095_v39 = vpop.f32.mrf.mxu1 }
 0x442   : > { %v20097_v54 = vpop.f32.mrf.mxu1 }
 0x444   : > { %v14875_v62 = vpop.f32.mrf.mxu1 }
 0x446   : > { %v14876_v20 = vpop.f32.mrf.mxu1 }
 0x447   : > { %v20102_v31 = vadd.f32 %v14876_v20, %v14875_v62 }
 0x448   : > { %v20104_v33 = vpop.f32.mrf.mxu1 }
 0x44a   : > { %v20106_v59 = vpop.f32.mrf.mxu1 }
 0x44c   : > { %v14881_v17 = vpop.f32.mrf.mxu1 }
 0x44e   : > { %v14882_v41 = vpop.f32.mrf.mxu1 }
 0x44f   : > { %v20111_v50 = vadd.f32 %v14882_v41, %v14881_v17 }
 0x450   : > { %v20113_v36 = vpop.f32.mrf.mxu1 }
 0x452   : > { %v20115_v23 = vpop.f32.mrf.mxu1 }
 0x454   : > { %v14887_v38 = vpop.f32.mrf.mxu1  ;;  %v14933_v11 = vpop.f32.mrf.mxu0 }
 0x456   : > { %v14888_v34 = vpop.f32.mrf.mxu1  ;;  %v14934_v9 = vpop.f32.mrf.mxu0 }
 0x457   : > { %v20117_v58 = vadd.f32 %v14888_v34, %v14887_v38 }
 0x458   : > { %v20119_v2 = vpop.f32.mrf.mxu1  ;;  %v14936_v40 = vpop.f32.mrf.mxu0 }
 0x45a   : > { %v20121_v61 = vpop.f32.mrf.mxu1  ;;  %v14937_v14 = vpop.f32.mrf.mxu0 }
 0x45c   : > { %v14893_v3 = vpop.f32.mrf.mxu1  ;;  %v14939_v57 = vpop.f32.mrf.mxu0 }
 0x45e   : > { %v14894_v0 = vpop.f32.mrf.mxu1  ;;  %v14940_v21 = vpop.f32.mrf.mxu0 }
 0x45f   : > { %v20123_v56 = vadd.f32 %v14894_v0, %v14893_v3 }
 0x460   : > { %v20125_v47 = vpop.f32.mrf.mxu1  ;;  %v14942_v12 = vpop.f32.mrf.mxu0 }
 0x461   : > { %24474 = vst [vmem:[#allocation16_spill] sm:$0xff] %v20123_v56  ;;  %v14941_v56 = vadd.f32 %v14940_v21, %v14939_v57  ;;  %v17027_v57 = vld [vmem:[%s24343_s10 + $0x1cc] ss:$36 sps:$4 sm:$0xff]  }
 0x462   : > { %v20127_v18 = vpop.f32.mrf.mxu1  ;;  %v14943_v15 = vpop.f32.mrf.mxu0 }
 0x463   : > { %24475 = vst [vmem:[#allocation15_spill] sm:$0xff] %v20127_v18 }
 0x464   : > { %v14899_v30 = vpop.f32.mrf.mxu1  ;;  %v20129_v27 = vpop.f32.mrf.mxu0 }
 0x466   : > { %v14900_v29 = vpop.f32.mrf.mxu1  ;;  %v20131_v26 = vpop.f32.mrf.mxu0 }
 0x467   : > { %v20133_v55 = vadd.f32 %v14900_v29, %v14899_v30  ;;  %v14844_v29 = vadd.f32 %v20065_v7, %v20060_v8 }
 0x468   : > { %v20135_v25 = vpop.f32.mrf.mxu1  ;;  %v20137_v45 = vpop.f32.mrf.mxu0 }
 0x469   : > { %24476 = vst [vmem:[#allocation14_spill] sm:$0xff] %v20133_v55  ;;  %24477 = vst [vmem:[#allocation13_spill] sm:$0xff] %v20135_v25 }
 0x46a   : > { %v20139_v48 = vpop.f32.mrf.mxu1  ;;  %v20141_v19 = vpop.f32.mrf.mxu0 }
 0x46b   : > { %24478 = vst [vmem:[#allocation17_spill] sm:$0xff] %v20139_v48 }
 0x46c   : > { %v14905_v42 = vpop.f32.mrf.mxu1  ;;  %v20143_v51 = vpop.f32.mrf.mxu0 }
 0x46e   : > { %v14906_v6 = vpop.f32.mrf.mxu1  ;;  %v20145_v52 = vpop.f32.mrf.mxu0 }
 0x46f   : > { %v20147_v32 = vadd.f32 %v14906_v6, %v14905_v42  ;;  %v20170_v42 = vld [vmem:[%s24483_s8] ss:$0 sm:$0xff] }
 0x470   : > { %v20149_v62 = vpop.f32.mrf.mxu1  ;;  %v20151_v20 = vpop.f32.mrf.mxu0  ;;  %v4827_v21 = vadd.f32 %v20069_v13, %v20170_v42  ;;  %v17022_v13 = vld [vmem:[%s24343_s10 + $0x1c0] ss:$36 sps:$4 sm:$0xff]  }
 0x471   : > { %24479 = vst [vmem:[#allocation18_spill] sm:$0xff] %v20147_v32  ;;  %24480 = vst [vmem:[#allocation19_spill] sm:$0xff] %v20149_v62  ;;  %v14935_v32 = vadd.f32 %v14934_v9, %v14933_v11  ;;  %v14850_v11 = vadd.f32 %v20073_v60, %v20071_v63  ;;  %v17024_v60 = vld [vmem:[%s24343_s10 + $0x1c4] ss:$36 sps:$4 sm:$0xff]  }
 0x472   : > { %v20153_v37 = vpop.f32.mrf.mxu1  ;;  %v20155_v53 = vpop.f32.mrf.mxu0 }
 0x473   : > { %24481 = vst [vmem:[#allocation20_spill] sm:$0xff] %v20153_v37  ;;  %v14938_v37 = vadd.f32 %v14937_v14, %v14936_v40 }
 0x474   : > { %v14911_v17 = vpop.f32.mrf.mxu1  ;;  %v20157_v41 = vpop.f32.mrf.mxu0 }
 0x476   : > { %v14912_v38 = vpop.f32.mrf.mxu1  ;;  %v20159_v34 = vpop.f32.mrf.mxu0 }
 0x477   : > { %v20161_v3 = vadd.f32 %v14912_v38, %v14911_v17  ;;  %v4819_v38 = vadd.f32 %v20058_v46, %v20170_v42  ;;  %v14944_v46 = vadd.f32 %v14943_v15, %v14942_v12  ;;  %v4830_v12 = vadd.f32 %v14850_v11, %v20170_v42 }
 0x478   : > { %v14914_v0 = vpop.f32.mrf.mxu1  ;;  %v20163_v30 = vpop.f32.mrf.mxu0  ;;  %v14856_v11 = vadd.f32 %v20079_v22, %v20077_v4  ;;  %v17031_v4 = vld [vmem:[%s24343_s10 + $0x180] ss:$36 sps:$4 sm:$0xff]  }
 0x479   : > { %24482 = vst [vmem:[#allocation21_spill] sm:$0xff] %v20161_v3  ;;  %v4822_v0 = vadd.f32 %v14844_v29, %v20170_v42  ;;  %v4955_v7 = vadd.f32 %v14935_v32, %v4819_v38  ;;  %v17016_v32 = vld [vmem:[%s24343_s10 + $0x208] ss:$36 sps:$4 sm:$0xff]   ;;  %v4966_v38 = vadd.f32 %v14944_v46, %v4830_v12 }
 0x47a   : > { %v14915_v6 = vpop.f32.mrf.mxu1  ;;  %v20172_v43 = vpop.f32.mrf.mxu0 }
 0x47b   : > { %v4958_v55 = vadd.f32 %v14938_v37, %v4822_v0  ;;  %v17019_v37 = vld [vmem:[%s24343_s10 + $0x210] ss:$36 sps:$4 sm:$0xff]   ;;  %v17025_v0 = vld [vmem:[%s24343_s10 + $0x1c8] ss:$36 sps:$4 sm:$0xff]  }
 0x47c   : > { %v20174_v62 = vpop.f32.mrf.mxu0  ;;  %v5090_v17 = vpop.f32.mrf.mxu1 }
 0x47d   : > { %v5091_v9 = vadd.f32 %v5090_v17, %v4955_v7  ;;  %v4963_v17 = vadd.f32 %v14941_v56, %v4827_v21  ;;  %v17030_v56 = vld [vmem:[%s24343_s10 + $0x17c] ss:$36 sps:$4 sm:$0xff]  }
 0x47e   : > { %v20179_v3 = vpop.f32.mrf.mxu0  ;;  %v16011_v8 = vpop.f32.mrf.mxu1  ;;  %v17028_v21 = vld [vmem:[%s24343_s10 + $0x178] ss:$36 sps:$4 sm:$0xff]  }
 0x480   : > { %v20181_v48 = vpop.f32.mrf.mxu0  ;;  %v5093_v6 = vpop.f32.mrf.mxu1 }
 0x481   : > { %v5094_v40 = vadd.f32 %v5093_v6, %v4958_v55  ;;  %v17033_v6 = vld [vmem:[%s24343_s10 + $0x184] ss:$36 sps:$4 sm:$0xff]  }
 0x482   : > { %v20185_v14 = vpop.f32.mrf.mxu0  ;;  %v16012_v25 = vpop.f32.mrf.mxu1 }
 0x483   : > { %v20187_v18 = vpack.c.bf16 %v5094_v40, %v5091_v9  ;;  %v24484_v25 = vmov 0  }
 0x484   : > { %v20195_v29 = vpop.f32.mrf.mxu0  ;;  %v5098_v63 = vpop.f32.mrf.mxu1 }
 0x485   : > { %5686 = vmatmul.mubr.bf16.vlgmr.msra.gmra.mxu0 %v20187_v18  ;;  %5847 = vmatmul.mubr.bf16.vlgmr.msra.gmra.mxu1 %v20187_v18  ;;  %v5099_v9 = vadd.f32 %v5098_v63, %v4963_v17 }
 0x486   : > { %v20208_v15 = vpop.f32.mrf.mxu0  ;;  %v16015_v55 = vpop.f32.mrf.mxu1  ;;  %5695 = vmatprep.mubr.bf16.mxu0 %v24484_v25  ;;  %5856 = vmatprep.mubr.bf16.mxu1 %v24484_v25 }
 0x487   : > { %5976 = vmatpush1.bf16.msra.mxu0 %v17016_v32  ;;  %6137 = vmatpush1.bf16.msra.mxu1 %v17019_v37  ;;  %v14947_v37 = vadd.f32 %v20131_v26, %v20129_v27  ;;  %v17036_v27 = vld [vmem:[%s24343_s10 + $0x134] ss:$36 sps:$4 sm:$0xff]   ;;  %v17039_v26 = vld [vmem:[%s24343_s10 + $0x13c] ss:$36 sps:$4 sm:$0xff]  }
 0x488   : > { %v20218_v8 = vpop.f32.mrf.mxu0  ;;  %v5101_v7 = vpop.f32.mrf.mxu1  ;;  %5977 = vmatprep.subr.bf16.mxu0 %v17024_v60  ;;  %6138 = vmatprep.subr.bf16.mxu1 %v17027_v57  ;;  %v14950_v60 = vadd.f32 %v20141_v19, %v20137_v45  ;;  %v4835_v45 = vadd.f32 %v20075_v35, %v20170_v42  ;;  %v4838_v19 = vadd.f32 %v14856_v11, %v20170_v42  ;;  %v17034_v35 = vld [vmem:[%s24343_s10 + $0x130] ss:$36 sps:$4 sm:$0xff]  }
 0x489   : > { %v5102_v40 = vadd.f32 %v5101_v7, %v4966_v38  ;;  %v14862_v11 = vadd.f32 %v20085_v10, %v20083_v16  ;;  %v17043_v16 = vld [vmem:[%s24343_s10 + $0xf0] ss:$36 sps:$4 sm:$0xff]  }
 0x48a   : > { %v20228_v46 = vpop.f32.mrf.mxu0  ;;  %v16016_v32 = vpop.f32.mrf.mxu1  ;;  %v4971_v17 = vadd.f32 %v14947_v37, %v4835_v45  ;;  %v4974_v38 = vadd.f32 %v14950_v60, %v4838_v19  ;;  %v14953_v60 = vadd.f32 %v20145_v52, %v20143_v51  ;;  %v17048_v51 = vld [vmem:[%s24343_s10 + $0xa4] ss:$36 sps:$4 sm:$0xff]   ;;  %v17051_v52 = vld [vmem:[%s24343_s10 + $0xac] ss:$36 sps:$4 sm:$0xff]  }
 0x48b   : > { %v20234_v57 = vpack.c.bf16 %v5102_v40, %v5099_v9  ;;  %5978 = vmatpush1.bf16.msra.mxu0 %v17022_v13  ;;  %6139 = vmatpush1.bf16.msra.mxu1 %v17025_v0  ;;  %v17037_v13 = vld [vmem:[%s24343_s10 + $0x138] ss:$36 sps:$4 sm:$0xff]  }
 0x48c   : > { %v20242_v22 = vpop.f32.mrf.mxu0  ;;  %v5106_v63 = vpop.f32.mrf.mxu1  ;;  %5979 = vmatprep.subr.bf16.mxu0 %v17030_v56  ;;  %6140 = vmatprep.subr.bf16.mxu1 %v17033_v6  ;;  %v17042_v56 = vld [vmem:[%s24343_s10 + $0xec] ss:$36 sps:$4 sm:$0xff]   ;;  %v17045_v6 = vld [vmem:[%s24343_s10 + $0xf4] ss:$36 sps:$4 sm:$0xff]  }
 0x48d   : > { %5696 = vmatmul.mubr.bf16.gmra.mxu0 %v20234_v57  ;;  %5857 = vmatmul.mubr.bf16.gmra.mxu1 %v20234_v57  ;;  %v5107_v9 = vadd.f32 %v5106_v63, %v4971_v17  ;;  %v17049_v17 = vld [vmem:[%s24343_s10 + $0xa8] ss:$36 sps:$4 sm:$0xff]  }
 0x48e   : > { %v20255_v12 = vpop.f32.mrf.mxu0  ;;  %v16019_v55 = vpop.f32.mrf.mxu1  ;;  %5705 = vmatprep.mubr.bf16.mxu0 %v24484_v25  ;;  %5866 = vmatprep.mubr.bf16.mxu1 %v24484_v25 }
 0x48f   : > { %5980 = vmatpush1.bf16.msra.mxu0 %v17028_v21  ;;  %6141 = vmatpush1.bf16.msra.mxu1 %v17031_v4  ;;  %v14956_v21 = vadd.f32 %v20155_v53, %v20151_v20  ;;  %v4843_v20 = vadd.f32 %v20081_v44, %v20170_v42  ;;  %v4846_v53 = vadd.f32 %v14862_v11, %v20170_v42  ;;  %v17046_v44 = vld [vmem:[%s24343_s10 + $0xa0] ss:$36 sps:$4 sm:$0xff]  }
 0x490   : > { %v20265_v0 = vpop.f32.mrf.mxu0  ;;  %v5109_v7 = vpop.f32.mrf.mxu1  ;;  %5981 = vmatprep.subr.bf16.mxu0 %v17036_v27  ;;  %6142 = vmatprep.subr.bf16.mxu1 %v17039_v26  ;;  %v17040_v27 = vld [vmem:[%s24343_s10 + $0xe8] ss:$36 sps:$4 sm:$0xff]  }
 0x491   : > { %v5110_v40 = vadd.f32 %v5109_v7, %v4974_v38  ;;  %v4979_v19 = vadd.f32 %v14953_v60, %v4843_v20  ;;  %v4982_v55 = vadd.f32 %v14956_v21, %v4846_v53  ;;  %v17057_v7 = vld [vmem:[%s24343_s10 + $0x64] ss:$36 sps:$4 sm:$0xff]   ;;  %v14962_v60 = vadd.f32 %v20172_v43, %v20163_v30  ;;  %v17060_v43 = vld [vmem:[%s24343_s10 + $0x14] ss:$36 sps:$4 sm:$0xff]  }
 0x492   : > { %v20275_v32 = vpop.f32.mrf.mxu0  ;;  %v16020_v37 = vpop.f32.mrf.mxu1  ;;  %v17061_v53 = vld [vmem:[%s24343_s10 + $0x18] ss:$36 sps:$4 sm:$0xff]  }
 0x493   : > { %v20281_v4 = vpack.c.bf16 %v5110_v40, %v5107_v9  ;;  %5982 = vmatpush1.bf16.msra.mxu0 %v17034_v35  ;;  %6143 = vmatpush1.bf16.msra.mxu1 %v17037_v13  ;;  %v17054_v13 = vld [vmem:[%s24343_s10 + $0x5c] ss:$36 sps:$4 sm:$0xff]   ;;  %v14959_v37 = vadd.f32 %v20159_v34, %v20157_v41  ;;  %v4851_v34 = vadd.f32 %v20087_v5, %v20170_v42  ;;  %v17058_v5 = vld [vmem:[%s24343_s10 + $0x10] ss:$36 sps:$4 sm:$0xff]  }
 0x494   : > { %v20289_v10 = vpop.f32.mrf.mxu0  ;;  %v5114_v63 = vpop.f32.mrf.mxu1  ;;  %5983 = vmatprep.subr.bf16.mxu0 %v17042_v56  ;;  %6144 = vmatprep.subr.bf16.mxu1 %v17045_v6  ;;  %v14868_v56 = vadd.f32 %v20091_v49, %v20089_v1  ;;  %v17055_v1 = vld [vmem:[%s24343_s10 + $0x60] ss:$36 sps:$4 sm:$0xff]  }
 0x495   : > { %5706 = vmatmul.mubr.bf16.gmra.mxu0 %v20281_v4  ;;  %5867 = vmatmul.mubr.bf16.gmra.mxu1 %v20281_v4  ;;  %v5115_v6 = vadd.f32 %v5114_v63, %v4979_v19  ;;  %v17063_v41 = vld [vmem:[%s24343_s10 + $0x1c] ss:$36 sps:$4 sm:$0xff]  }
 0x496   : > { %v20302_v26 = vpop.f32.mrf.mxu0  ;;  %v16023_v45 = vpop.f32.mrf.mxu1  ;;  %5715 = vmatprep.mubr.bf16.mxu0 %v24484_v25  ;;  %5876 = vmatprep.mubr.bf16.mxu1 %v24484_v25  ;;  %v4854_v30 = vadd.f32 %v14868_v56, %v20170_v42  ;;  %v14968_v56 = vadd.f32 %v20185_v14, %v20181_v48 }
 0x497   : > { %5984 = vmatpush1.bf16.msra.mxu0 %v17040_v27  ;;  %6145 = vmatpush1.bf16.msra.mxu1 %v17043_v16  ;;  %v17052_v27 = vld [vmem:[%s24343_s10 + $0x58] ss:$36 sps:$4 sm:$0xff]  }
 0x498   : > { %v20312_v38 = vpop.f32.mrf.mxu0  ;;  %v5117_v35 = vpop.f32.mrf.mxu1  ;;  %5985 = vmatprep.subr.bf16.mxu0 %v17048_v51  ;;  %6146 = vmatprep.subr.bf16.mxu1 %v17051_v52  ;;  %v4987_v52 = vadd.f32 %v14959_v37, %v4851_v34  ;;  %v4990_v20 = vadd.f32 %v14962_v60, %v4854_v30  ;;  %v14974_v34 = vadd.f32 %v20228_v46, %v20218_v8 }
 0x499   : > { %v5118_v11 = vadd.f32 %v5117_v35, %v4982_v55  ;;  %v14874_v55 = vadd.f32 %v20097_v54, %v20095_v39  ;;  %v4859_v39 = vadd.f32 %v20093_v28, %v20170_v42  ;;  %v14880_v28 = vadd.f32 %v20106_v59, %v20104_v33 }
 0x49a   : > { %v20322_v9 = vpop.f32.mrf.mxu0  ;;  %v16024_v40 = vpop.f32.mrf.mxu1 }
 0x49b   : > { %v20328_v21 = vpack.c.bf16 %v5118_v11, %v5115_v6  ;;  %5986 = vmatpush1.bf16.msra.mxu0 %v17046_v44  ;;  %6147 = vmatpush1.bf16.msra.mxu1 %v17049_v17  ;;  %v4862_v54 = vadd.f32 %v14874_v55, %v20170_v42  ;;  %v4870_v33 = vadd.f32 %v14880_v28, %v20170_v42 }
 0x49c   : > { %v20336_v49 = vpop.f32.mrf.mxu0  ;;  %v5122_v16 = vpop.f32.mrf.mxu1  ;;  %5987 = vmatprep.subr.bf16.mxu0 %v17054_v13  ;;  %6148 = vmatprep.subr.bf16.mxu1 %v17057_v7  ;;  %v14965_v7 = vadd.f32 %v20179_v3, %v20174_v62  ;;  %v14983_v28 = vadd.f32 %v20302_v26, %v20289_v10 }
 0x49d   : > { %5716 = vmatmul.mubr.bf16.gmra.mxu0 %v20328_v21  ;;  %5877 = vmatmul.mubr.bf16.gmra.mxu1 %v20328_v21  ;;  %v5123_v44 = vadd.f32 %v5122_v16, %v4987_v52  ;;  %v4998_v14 = vadd.f32 %v14968_v56, %v4862_v54  ;;  %v5006_v8 = vadd.f32 %v14974_v34, %v4870_v33 }
 0x49e   : > { %v20349_v63 = vpop.f32.mrf.mxu0  ;;  %v16027_v51 = vpop.f32.mrf.mxu1  ;;  %5725 = vmatprep.mubr.bf16.mxu0 %v24484_v25  ;;  %5886 = vmatprep.mubr.bf16.mxu1 %v24484_v25  ;;  %v4995_v3 = vadd.f32 %v14965_v7, %v4859_v39  ;;  %v4875_v39 = vadd.f32 %v20111_v50, %v20170_v42  ;;  %v14892_v50 = vadd.f32 %v20121_v61, %v20119_v2 }
 0x49f   : > { %5988 = vmatpush1.bf16.msra.mxu0 %v17052_v27  ;;  %6149 = vmatpush1.bf16.msra.mxu1 %v17055_v1  ;;  %v14989_v33 = vadd.f32 %v20349_v63, %v20336_v49 }
 0x4a0   : > { %v20359_v45 = vpop.f32.mrf.mxu0  ;;  %v5125_v19 = vpop.f32.mrf.mxu1  ;;  %5989 = vmatprep.subr.bf16.mxu0 %v17060_v43  ;;  %6150 = vmatprep.subr.bf16.mxu1 %v17063_v41  ;;  %v14971_v41 = vadd.f32 %v20208_v15, %v20195_v29  ;;  %v4886_v34 = vadd.f32 %v14892_v50, %v20170_v42 }
 0x4a1   : > { %v5126_v17 = vadd.f32 %v5125_v19, %v4990_v20  ;;  %v4867_v20 = vadd.f32 %v20102_v31, %v20170_v42  ;;  %v14886_v31 = vadd.f32 %v20115_v23, %v20113_v36 }
 0x4a2   : > { %v20363_v35 = vpop.f32.mrf.mxu0  ;;  %v16028_v13 = vpop.f32.mrf.mxu1 }
 0x4a3   : > { %v20369_v6 = vpack.c.bf16 %v5126_v17, %v5123_v44  ;;  %5990 = vmatpush1.bf16.msra.mxu0 %v17058_v5  ;;  %6151 = vmatpush1.bf16.msra.mxu1 %v17061_v53  ;;  %v5003_v15 = vadd.f32 %v14971_v41, %v4867_v20  ;;  %v14977_v17 = vadd.f32 %v20255_v12, %v20242_v22 }
 0x4a4   : > { %v20371_v11 = vpop.f32.mrf.mxu0  ;;  %v5130_v40 = vpop.f32.mrf.mxu1  ;;  %16061 = vmatprep.subr.bf16.mxu0 %v24466_v24  ;;  %v14980_v13 = vadd.f32 %v20275_v32, %v20265_v0  ;;  %v4878_v36 = vadd.f32 %v14886_v31, %v20170_v42  ;;  %v4883_v41 = vadd.f32 %v20117_v58, %v20170_v42 }
 0x4a5   : > { %5726 = vmatmul.mubr.bf16.gmra.mxu0 %v20369_v6  ;;  %5887 = vmatmul.mubr.bf16.gmra.mxu1 %v20369_v6  ;;  %v5131_v27 = vadd.f32 %v5130_v40, %v4995_v3  ;;  %v5011_v12 = vadd.f32 %v14977_v17, %v4875_v39 }
 0x4a6   : > { %v20379_v62 = vpop.f32.mrf.mxu0  ;;  %v16031_v48 = vpop.f32.mrf.mxu1  ;;  %5735 = vmatprep.mubr.bf16.mxu0 %v24484_v25  ;;  %5896 = vmatprep.mubr.bf16.mxu1 %v24484_v25  ;;  %v5014_v0 = vadd.f32 %v14980_v13, %v4878_v36  ;;  %v5019_v61 = vadd.f32 %v14983_v28, %v4883_v41 }
 0x4a7   : > { %v14995_v39 = vadd.f32 %v20379_v62, %v20371_v11 }
 0x4a8   : > { %v20383_v37 = vpop.f32.mrf.mxu0  ;;  %v5133_v60 = vpop.f32.mrf.mxu1 }
 0x4a9   : > { %v5134_v1 = vadd.f32 %v5133_v60, %v4998_v14 }
 0x4aa   : > { %v20387_v16 = vpop.f32.mrf.mxu0  ;;  %v16032_v43 = vpop.f32.mrf.mxu1 }
 0x4ab   : > { %v20393_v30 = vpack.c.bf16 %v5134_v1, %v5131_v27  ;;  %v14986_v27 = vadd.f32 %v20322_v9, %v20312_v38  ;;  %v24485_v38 = vld [vmem:[#allocation15_spill] sm:$0xff]  ;;  %v14998_v36 = vadd.f32 %v20387_v16, %v20383_v37 }
 0x4ac   : > { %v20395_v51 = vpop.f32.mrf.mxu0  ;;  %v5138_v52 = vpop.f32.mrf.mxu1  ;;  %v14898_v9 = vadd.f32 %v24485_v38, %v20125_v47  ;;  %v24490_v16 = vld [vmem:[#allocation19_spill] sm:$0xff] }
 0x4ad   : > { %5736 = vmatmul.mubr.bf16.gmra.mxu0 %v20393_v30  ;;  %5897 = vmatmul.mubr.bf16.gmra.mxu1 %v20393_v30  ;;  %v5139_v53 = vadd.f32 %v5138_v52, %v5003_v15  ;;  %v5022_v10 = vadd.f32 %v14986_v27, %v4886_v34 }
 0x4ae   : > { %v20402_v59 = vpop.f32.mrf.mxu0  ;;  %v16035_v29 = vpop.f32.mrf.mxu1  ;;  %5745 = vmatprep.mubr.bf16.mxu0 %v24484_v25  ;;  %5906 = vmatprep.mubr.bf16.mxu1 %v24484_v25 }
 0x4af   : > { %v14992_v29 = vadd.f32 %v20363_v35, %v20359_v45  ;;  %v24487_v35 = vld [vmem:[#allocation13_spill] sm:$0xff]  ;;  %v15001_v27 = vadd.f32 %v20402_v59, %v20395_v51 }
 0x4b0   : > { %v20406_v46 = vpop.f32.mrf.mxu0  ;;  %v5141_v5 = vpop.f32.mrf.mxu1 }
 0x4b1   : > { %v5142_v19 = vadd.f32 %v5141_v5, %v5006_v8  ;;  %v24486_v5 = vld [vmem:[#allocation16_spill] sm:$0xff] }
 0x4b2   : > { %v20410_v55 = vpop.f32.mrf.mxu0  ;;  %v16036_v44 = vpop.f32.mrf.mxu1  ;;  %v4891_v31 = vadd.f32 %v24486_v5, %v20170_v42 }
 0x4b3   : > { %v20416_v7 = vpack.c.bf16 %v5142_v19, %v5139_v53  ;;  %v4894_v53 = vadd.f32 %v14898_v9, %v20170_v42  ;;  %v24488_v19 = vld [vmem:[#allocation17_spill] sm:$0xff] }
 0x4b4   : > { %v20418_v56 = vpop.f32.mrf.mxu0  ;;  %v5146_v40 = vpop.f32.mrf.mxu1  ;;  %v5027_v49 = vadd.f32 %v14989_v33, %v4891_v31  ;;  %v14904_v44 = vadd.f32 %v24488_v19, %v24487_v35  ;;  %v17069_v35 = vld [vmem:[%s24343_s10 + $0xb0] ss:$36 sps:$4 sm:$0xff]   ;;  %v17070_v19 = vld [vmem:[%s24343_s10 + $0x68] ss:$36 sps:$4 sm:$0xff]  }
 0x4b5   : > { %5746 = vmatmul.mubr.bf16.gmra.mxu0 %v20416_v7  ;;  %5907 = vmatmul.mubr.bf16.gmra.mxu1 %v20416_v7  ;;  %v5147_v48 = vadd.f32 %v5146_v40, %v5011_v12  ;;  %v5030_v63 = vadd.f32 %v14992_v29, %v4894_v53 }
 0x4b6   : > { %v20425_v23 = vpop.f32.mrf.mxu0  ;;  %v16039_v22 = vpop.f32.mrf.mxu1  ;;  %5755 = vmatprep.mubr.bf16.mxu0 %v24484_v25  ;;  %5916 = vmatprep.mubr.bf16.mxu1 %v24484_v25 }
 0x4b8   : > { %v5149_v32 = vpop.f32.mrf.mxu1  ;;  %v15008_v54 = vpop.f32.mrf.mxu0 }
 0x4b9   : > { %v5150_v3 = vadd.f32 %v5149_v32, %v5014_v0  ;;  %v24489_v0 = vld [vmem:[#allocation14_spill] sm:$0xff]  ;;  %v4902_v54 = vadd.f32 %v14904_v44, %v20170_v42  ;;  %v17071_v44 = vld [vmem:[%s24343_s10 + $0x20] ss:$36 sps:$4 sm:$0xff]  }
 0x4ba   : > { %v16040_v14 = vpop.f32.mrf.mxu1  ;;  %v15009_v60 = vpop.f32.mrf.mxu0  ;;  %v4899_v32 = vadd.f32 %v24489_v0, %v20170_v42 }
 0x4bb   : > { %v20435_v1 = vpack.c.bf16 %v5150_v3, %v5147_v48  ;;  %v5038_v62 = vadd.f32 %v14998_v36, %v4902_v54  ;;  %v24491_v48 = vld [vmem:[#allocation20_spill] sm:$0xff]  ;;  %v17074_v54 = vld [vmem:[%s24342_s9 + $0x4] ss:$60 sps:$4 sm:$0xff]  }
 0x4bc   : > { %v5154_v43 = vpop.f32.mrf.mxu1  ;;  %v5035_v11 = vadd.f32 %v14995_v39, %v4899_v32  ;;  %v14910_v3 = vadd.f32 %v24491_v48, %v24490_v16 }
 0x4bd   : > { %5756 = vmatmul.mubr.bf16.gmra.mxu0 %v20435_v1  ;;  %5917 = vmatmul.mubr.bf16.gmra.mxu1 %v20435_v1  ;;  %v5155_v52 = vadd.f32 %v5154_v43, %v5019_v61  ;;  %v15004_v43 = vadd.f32 %v20410_v55, %v20406_v46  ;;  %v15007_v55 = vadd.f32 %v20425_v23, %v20418_v56 }
 0x4be   : > { %v16043_v2 = vpop.f32.mrf.mxu1  ;;  %5765 = vmatprep.mubr.bf16.mxu0 %v24484_v25  ;;  %5926 = vmatprep.mubr.bf16.mxu1 %v24484_v25 }
 0x4bf   : > { %v24492_v2 = vld [vmem:[#allocation18_spill] sm:$0xff] }
 0x4c0   : > { %v5157_v26 = vpop.f32.mrf.mxu1  ;;  %v4907_v61 = vadd.f32 %v24492_v2, %v20170_v42 }
 0x4c1   : > { %v5158_v20 = vadd.f32 %v5157_v26, %v5022_v10  ;;  %v4910_v10 = vadd.f32 %v14910_v3, %v20170_v42 }
 0x4c2   : > { %v16044_v58 = vpop.f32.mrf.mxu1  ;;  %v5043_v51 = vadd.f32 %v15001_v27, %v4907_v61 }
 0x4c3   : > { %v20450_v15 = vpack.c.bf16 %v5158_v20, %v5155_v52  ;;  %v5046_v59 = vadd.f32 %v15004_v43, %v4910_v10  ;;  %v24493_v20 = vld [vmem:[#allocation21_spill] sm:$0xff] }
 0x4c4   : > { %v5162_v8 = vpop.f32.mrf.mxu1  ;;  %v4915_v58 = vadd.f32 %v24493_v20, %v20170_v42  ;;  %v17064_v42 = vld [vmem:[%s24343_s10 + $0x218] ss:$36 sps:$4 sm:$0xff]  }
 0x4c5   : > { %5766 = vmatmul.mubr.bf16.gmra.mxu0 %v20450_v15  ;;  %5927 = vmatmul.mubr.bf16.gmra.mxu1 %v20450_v15  ;;  %v5163_v17 = vadd.f32 %v5162_v8, %v5027_v49  ;;  %v17066_v49 = vld [vmem:[%s24343_s10 + $0x188] ss:$36 sps:$4 sm:$0xff]  }
 0x4c6   : > { %v16047_v47 = vpop.f32.mrf.mxu1  ;;  %5775 = vmatprep.mubr.bf16.mxu0 %v24484_v25  ;;  %5936 = vmatprep.mubr.bf16.mxu1 %v24484_v25  ;;  %v5051_v8 = vadd.f32 %v15007_v55, %v4915_v58 }
 0x4c7   : > { %v17065_v47 = vld [vmem:[%s24343_s10 + $0x1d0] ss:$36 sps:$4 sm:$0xff]  }
 0x4c8   : > { %v5165_v45 = vpop.f32.mrf.mxu1 }
 0x4c9   : > { %v5166_v13 = vadd.f32 %v5165_v45, %v5030_v63  ;;  %v17067_v63 = vld [vmem:[%s24343_s10 + $0x140] ss:$36 sps:$4 sm:$0xff]   ;;  %v17068_v45 = vld [vmem:[%s24343_s10 + $0xf8] ss:$36 sps:$4 sm:$0xff]  }
 0x4ca   : > { %v16048_v40 = vpop.f32.mrf.mxu1 }
 0x4cb   : > { %v20465_v22 = vpack.c.bf16 %v5166_v13, %v5163_v17 }
 0x4cc   : > { %v5170_v12 = vpop.f32.mrf.mxu1 }
 0x4cd   : > { %5776 = vmatmul.mubr.bf16.gmra.mxu0 %v20465_v22  ;;  %5937 = vmatmul.mubr.bf16.gmra.mxu1 %v20465_v22  ;;  %v5171_v14 = vadd.f32 %v5170_v12, %v5035_v11 }
 0x4ce   : > { %v16051_v50 = vpop.f32.mrf.mxu1  ;;  %5785 = vmatprep.mubr.bf16.mxu0 %v24484_v25  ;;  %5946 = vmatprep.mubr.bf16.mxu1 %v24484_v25 }
 0x4d0   : > { %v5173_v37 = vpop.f32.mrf.mxu1 }
 0x4d1   : > { %v5174_v60 = vadd.f32 %v5173_v37, %v5038_v62 }
 0x4d2   : > { %v16052_v28 = vpop.f32.mrf.mxu1 }
 0x4d3   : > { %v20480_v41 = vpack.c.bf16 %v5174_v60, %v5171_v14 }
 0x4d4   : > { %v5178_v34 = vpop.f32.mrf.mxu1 }
 0x4d5   : > { %5786 = vmatmul.mubr.bf16.gmra.mxu0 %v20480_v41  ;;  %5947 = vmatmul.mubr.bf16.gmra.mxu1 %v20480_v41  ;;  %v5179_v38 = vadd.f32 %v5178_v34, %v5043_v51 }
 0x4d6   : > { %v16055_v26 = vpop.f32.mrf.mxu1  ;;  %5795 = vmatprep.mubr.bf16.mxu0 %v24484_v25  ;;  %5956 = vmatprep.mubr.bf16.mxu1 %v24484_v25 }
 0x4d8   : > { %v5181_v46 = vpop.f32.mrf.mxu1 }
 0x4d9   : > { %v5182_v9 = vadd.f32 %v5181_v46, %v5046_v59 }
 0x4da   : > { %v16056_v52 = vpop.f32.mrf.mxu1 }
 0x4db   : > { %v20493_v33 = vpack.c.bf16 %v5182_v9, %v5179_v38 }
 0x4dc   : > { %v5186_v29 = vpop.f32.mrf.mxu1 }
 0x4dd   : > { %5796 = vmatmul.mubr.bf16.gmra.mxu0 %v20493_v33  ;;  %5957 = vmatmul.mubr.bf16.gmra.mxu1 %v20493_v33  ;;  %v5187_v56 = vadd.f32 %v5186_v29, %v5051_v8 }
 0x4de   : > { %v16059_v5 = vpop.f32.mrf.mxu1  ;;  %5805 = vmatprep.mubr.bf16.mxu0 %v24484_v25  ;;  %5966 = vmatprep.mubr.bf16.mxu1 %v24484_v25 }
 0x4df   : > { %v20499_v53 = vpack.c.bf16 %v5187_v56, %v5187_v56 }
 0x4e0   : > { %v5189_v23 = vpop.f32.mrf.mxu1 }
 0x4e2   : > { %v16060_v31 = vpop.f32.mrf.mxu1 }
 0x4e5   : > { %5806 = vmatmul.mubr.bf16.gmra.mxu0 %v20499_v53  ;;  %5967 = vmatmul.mubr.bf16.gmra.mxu1 %v20499_v53 }
 0x4e6   : > { %6007 = vmatprep.mubr.bf16.mxu0 %v24484_v25  ;;  %6168 = vmatprep.mubr.bf16.mxu1 %v24484_v25 }
 0x4ed   : > { %6008 = vmatmul.mubr.bf16.vlgmr.msra.gmra.mxu0 %v20187_v18  ;;  %6169 = vmatmul.mubr.bf16.vlgmr.msra.gmra.mxu1 %v20187_v18 }
 0x4ee   : > { %6017 = vmatprep.mubr.bf16.mxu0 %v24484_v25  ;;  %6178 = vmatprep.mubr.bf16.mxu1 %v24484_v25 }
 0x4ef   : > { %16062 = vmatpush3.bf16.msra.mxu0 %v17064_v42 }
 0x4f0   : > { %16063 = vmatprep.subr.bf16.mxu0 %v24466_v24 }
 0x4f3   : > { %16064 = vmatpush3.bf16.msra.mxu0 %v17065_v47 }
 0x4f4   : > { %16065 = vmatprep.subr.bf16.mxu0 %v24466_v24 }
 0x4f5   : > { %6018 = vmatmul.mubr.bf16.gmra.mxu0 %v20234_v57  ;;  %6179 = vmatmul.mubr.bf16.gmra.mxu1 %v20234_v57 }
 0x4f6   : > { %6027 = vmatprep.mubr.bf16.mxu0 %v24484_v25  ;;  %6188 = vmatprep.mubr.bf16.mxu1 %v24484_v25 }
 0x4f7   : > { %16066 = vmatpush3.bf16.msra.mxu0 %v17066_v49 }
 0x4f8   : > { %16067 = vmatprep.subr.bf16.mxu0 %v24466_v24 }
 0x4fb   : > { %16068 = vmatpush3.bf16.msra.mxu0 %v17067_v63 }
 0x4fc   : > { %16069 = vmatprep.subr.bf16.mxu0 %v24466_v24 }
 0x4fd   : > { %6028 = vmatmul.mubr.bf16.gmra.mxu0 %v20281_v4  ;;  %6189 = vmatmul.mubr.bf16.gmra.mxu1 %v20281_v4 }
 0x4fe   : > { %6037 = vmatprep.mubr.bf16.mxu0 %v24484_v25  ;;  %6198 = vmatprep.mubr.bf16.mxu1 %v24484_v25 }
 0x4ff   : > { %16070 = vmatpush3.bf16.msra.mxu0 %v17068_v45 }
 0x500   : > { %16071 = vmatprep.subr.bf16.mxu0 %v24466_v24 }
 0x503   : > { %16072 = vmatpush3.bf16.msra.mxu0 %v17069_v35 }
 0x504   : > { %16073 = vmatprep.subr.bf16.mxu0 %v24466_v24 }
 0x505   : > { %6038 = vmatmul.mubr.bf16.gmra.mxu0 %v20328_v21  ;;  %6199 = vmatmul.mubr.bf16.gmra.mxu1 %v20328_v21 }
 0x506   : > { %6047 = vmatprep.mubr.bf16.mxu0 %v24484_v25  ;;  %6208 = vmatprep.mubr.bf16.mxu1 %v24484_v25 }
 0x507   : > { %16074 = vmatpush3.bf16.msra.mxu0 %v17070_v19 }
 0x508   : > { %16075 = vmatprep.subr.bf16.mxu0 %v24466_v24 }
 0x50b   : > { %16076 = vmatpush3.bf16.msra.mxu0 %v17071_v44 }
 0x50d   : > { %6048 = vmatmul.mubr.bf16.gmra.mxu0 %v20369_v6  ;;  %6209 = vmatmul.mubr.bf16.gmra.mxu1 %v20369_v6 }
 0x50e   : > { %6057 = vmatprep.mubr.bf16.mxu0 %v24484_v25  ;;  %6218 = vmatprep.mubr.bf16.mxu1 %v24484_v25 }
 0x515   : > { %6058 = vmatmul.mubr.bf16.gmra.mxu0 %v20393_v30  ;;  %6219 = vmatmul.mubr.bf16.gmra.mxu1 %v20393_v30 }
 0x516   : > { %6067 = vmatprep.mubr.bf16.mxu0 %v24484_v25  ;;  %6228 = vmatprep.mubr.bf16.mxu1 %v24484_v25 }
 0x51d   : > { %6068 = vmatmul.mubr.bf16.gmra.mxu0 %v20416_v7  ;;  %6229 = vmatmul.mubr.bf16.gmra.mxu1 %v20416_v7 }
 0x51e   : > { %6077 = vmatprep.mubr.bf16.mxu0 %v24484_v25  ;;  %6238 = vmatprep.mubr.bf16.mxu1 %v24484_v25 }
 0x525   : > { %6078 = vmatmul.mubr.bf16.gmra.mxu0 %v20435_v1  ;;  %6239 = vmatmul.mubr.bf16.gmra.mxu1 %v20435_v1 }
 0x526   : > { %6087 = vmatprep.mubr.bf16.mxu0 %v24484_v25  ;;  %6248 = vmatprep.mubr.bf16.mxu1 %v24484_v25 }
 0x52d   : > { %6088 = vmatmul.mubr.bf16.gmra.mxu0 %v20450_v15  ;;  %6249 = vmatmul.mubr.bf16.gmra.mxu1 %v20450_v15 }
 0x52e   : > { %6097 = vmatprep.mubr.bf16.mxu0 %v24484_v25  ;;  %6258 = vmatprep.mubr.bf16.mxu1 %v24484_v25 }
 0x535   : > { %6098 = vmatmul.mubr.bf16.gmra.mxu0 %v20465_v22  ;;  %6259 = vmatmul.mubr.bf16.gmra.mxu1 %v20465_v22 }
 0x536   : > { %6107 = vmatprep.mubr.bf16.mxu0 %v24484_v25  ;;  %6268 = vmatprep.mubr.bf16.mxu1 %v24484_v25 }
 0x53d   : > { %6108 = vmatmul.mubr.bf16.gmra.mxu0 %v20480_v41  ;;  %6269 = vmatmul.mubr.bf16.gmra.mxu1 %v20480_v41 }
 0x53e   : > { %6117 = vmatprep.mubr.bf16.mxu0 %v24484_v25  ;;  %6278 = vmatprep.mubr.bf16.mxu1 %v24484_v25 }
 0x545   : > { %v20580_v17 = vpop.f32.mrf.mxu0  ;;  %v20582_v13 = vpop.f32.mrf.mxu1  ;;  %6118 = vmatmul.mubr.bf16.gmra.mxu0 %v20493_v33  ;;  %6279 = vmatmul.mubr.bf16.gmra.mxu1 %v20493_v33 }
 0x546   : > { %24494 = vst [vmem:[#allocation15_spill] sm:$0xff] %v20582_v13  ;;  %6127 = vmatprep.mubr.bf16.mxu0 %v24484_v25  ;;  %6288 = vmatprep.mubr.bf16.mxu1 %v24484_v25 }
 0x547   : > { %v20588_v40 = vpop.f32.mrf.mxu0  ;;  %v5850_v39 = vpop.f32.mrf.mxu1 }
 0x549   : > { %v20590_v36 = vpop.f32.mrf.mxu0  ;;  %v20592_v12 = vpop.f32.mrf.mxu1 }
 0x54a   : > { %24495 = vst [vmem:[#allocation16_spill] sm:$0xff] %v20592_v12 }
 0x54b   : > { %v20601_v50 = vpop.f32.mrf.mxu0  ;;  %v5854_v11 = vpop.f32.mrf.mxu1 }
 0x54c   : > { %v6436_v60 = vpack.c.bf16 %v5854_v11, %v5850_v39 }
 0x54d   : > { %v20603_v62 = vpop.f32.mrf.mxu0  ;;  %v20605_v37 = vpop.f32.mrf.mxu1  ;;  %6128 = vmatmul.mubr.bf16.gmra.mxu0 %v20499_v53  ;;  %6289 = vmatmul.mubr.bf16.gmra.mxu1 %v20499_v53 }
 0x54e   : > { %24496 = vst [vmem:[#allocation13_spill] sm:$0xff] %v20605_v37  ;;  %16077 = vmatprep.mubr.msk.bf16.mxu0 %vm17821_vm0, %v24466_v24  ;;  %7156 = vmatprep.mubr.bf16.mxu1 %v17074_v54  ;;  %v20628_v26 = vrot.slane %v6436_v60, 4 }
 0x54f   : > { %v20611_v16 = vpop.f32.mrf.mxu0  ;;  %v5860_v48 = vpop.f32.mrf.mxu1 }
 0x550   : > { %24498 = vst [vmem:[#allocation14_spill] sm:$0xff] %v20628_v26 }
 0x551   : > { %v20613_v3 = vpop.f32.mrf.mxu0  ;;  %v20615_v14 = vpop.f32.mrf.mxu1 }
 0x552   : > { %24497 = vst [vmem:[#allocation17_spill] sm:$0xff] %v20615_v14 }
 0x553   : > { %v20621_v43 = vpop.f32.mrf.mxu0  ;;  %v5864_v34 = vpop.f32.mrf.mxu1 }
 0x554   : > { %v6445_v2 = vpack.c.bf16 %v5864_v34, %v5860_v48 }
 0x555   : > { %v20623_v61 = vpop.f32.mrf.mxu0  ;;  %v20625_v10 = vpop.f32.mrf.mxu1  ;;  %16078 = vmatmul.mubr.bf16.vlgmr.msra.gmra.mxu0 %v20187_v18 }
 0x556   : > { %v6615_v51 = vrot.slane %v6445_v2, 4  ;;  %16081 = vmatprep.mubr.msk.bf16.mxu0 %vm17821_vm0, %v24466_v24 }
 0x557   : > { %v5709_v59 = vpop.f32.mrf.mxu0  ;;  %v5870_v46 = vpop.f32.mrf.mxu1 }
 0x558   : > { %v20634_v55 = vsel %vm6563_vm2, %v20628_v26, %v6615_v51 }
 0x559   : > { %24499 = vst [vmem:[#allocation19_spill] sm:$0xff] %v20634_v55  ;;  %v20636_v38 = vpop.f32.mrf.mxu0  ;;  %v20638_v9 = vpop.f32.mrf.mxu1 }
 0x55b   : > { %v5713_v20 = vpop.f32.mrf.mxu0  ;;  %v5874_v58 = vpop.f32.mrf.mxu1 }
 0x55c   : > { %v6454_v29 = vpack.c.bf16 %v5874_v58, %v5870_v46  ;;  %v6452_v63 = vpack.c.bf16 %v5713_v20, %v5709_v59 }
 0x55d   : > { %v20644_v8 = vpop.f32.mrf.mxu0  ;;  %v20646_v5 = vpop.f32.mrf.mxu1  ;;  %16082 = vmatmul.mubr.bf16.gmra.mxu0 %v20234_v57 }
 0x55e   : > { %v6617_v56 = vrot.slane %v6454_v29, 4  ;;  %16085 = vmatprep.mubr.msk.bf16.mxu0 %vm17821_vm0, %v24466_v24  ;;  %v20667_v48 = vrot.slane %v6452_v63, 4 }
 0x55f   : > { %v5719_v23 = vpop.f32.mrf.mxu0  ;;  %v5880_v31 = vpop.f32.mrf.mxu1 }
 0x560   : > { %v20652_v42 = vsel %vm6563_vm2, %v6615_v51, %v6617_v56 }
 0x561   : > { %24500 = vst [vmem:[#allocation20_spill] sm:$0xff] %v20652_v42  ;;  %v20654_v47 = vpop.f32.mrf.mxu0  ;;  %v20656_v49 = vpop.f32.mrf.mxu1 }
 0x563   : > { %v5723_v35 = vpop.f32.mrf.mxu0  ;;  %v5884_v19 = vpop.f32.mrf.mxu1 }
 0x564   : > { %v6461_v44 = vpack.c.bf16 %v5723_v35, %v5719_v23  ;;  %v6463_v39 = vpack.c.bf16 %v5884_v19, %v5880_v31 }
 0x565   : > { %v20662_v54 = vpop.f32.mrf.mxu0  ;;  %v20664_v11 = vpop.f32.mrf.mxu1  ;;  %16086 = vmatmul.mubr.bf16.gmra.mxu0 %v20281_v4 }
 0x566   : > { %v6569_v60 = vrot.slane %v6461_v44, 4  ;;  %v6619_v34 = vrot.slane %v6463_v39, 4  ;;  %16089 = vmatprep.mubr.msk.bf16.mxu0 %vm17821_vm0, %v24466_v24 }
 0x567   : > { %v5729_v2 = vpop.f32.mrf.mxu0  ;;  %v5890_v51 = vpop.f32.mrf.mxu1 }
 0x568   : > { %v6570_v59 = vsel %vm6563_vm2, %v20667_v48, %v6569_v60  ;;  %v20674_v46 = vsel %vm6563_vm2, %v6617_v56, %v6619_v34 }
 0x569   : > { %24501 = vst [vmem:[#allocation18_spill] sm:$0xff] %v20674_v46  ;;  %v20676_v20 = vpop.f32.mrf.mxu0  ;;  %v20678_v58 = vpop.f32.mrf.mxu1  ;;  %15049 = vmatprep.subr.bf16.mxu1 %v6570_v59 }
 0x56b   : > { %v5733_v29 = vpop.f32.mrf.mxu0  ;;  %v5894_v23 = vpop.f32.mrf.mxu1 }
 0x56c   : > { %v6470_v31 = vpack.c.bf16 %v5733_v29, %v5729_v2  ;;  %v6472_v63 = vpack.c.bf16 %v5894_v23, %v5890_v51 }
 0x56d   : > { %v20682_v35 = vpop.f32.mrf.mxu0  ;;  %v20684_v19 = vpop.f32.mrf.mxu1  ;;  %16090 = vmatmul.mubr.bf16.gmra.mxu0 %v20328_v21 }
 0x56e   : > { %v6571_v56 = vrot.slane %v6470_v31, 4  ;;  %v6621_v44 = vrot.slane %v6472_v63, 4  ;;  %16093 = vmatprep.mubr.msk.bf16.mxu0 %vm17821_vm0, %v24466_v24 }
 0x56f   : > { %v5739_v39 = vpop.f32.mrf.mxu0  ;;  %v5900_v59 = vpop.f32.mrf.mxu1 }
 0x570   : > { %v20690_v32 = vsel %vm6563_vm2, %v6569_v60, %v6571_v56  ;;  %v20693_v27 = vsel %vm6563_vm2, %v6619_v34, %v6621_v44 }
 0x571   : > { %24502 = vst [vmem:[#allocation21_spill] sm:$0xff] %v20690_v32  ;;  %24503 = vst [vmem:[#allocation22_spill] sm:$0xff] %v20693_v27  ;;  %v5741_v2 = vpop.f32.mrf.mxu0  ;;  %v20695_v51 = vpop.f32.mrf.mxu1 }
 0x573   : > { %v5743_v29 = vpop.f32.mrf.mxu0  ;;  %v5904_v23 = vpop.f32.mrf.mxu1 }
 0x574   : > { %v6479_v0 = vpack.c.bf16 %v5743_v29, %v5739_v39  ;;  %v6481_v21 = vpack.c.bf16 %v5904_v23, %v5900_v59 }
 0x575   : > { %v5747_v31 = vpop.f32.mrf.mxu0  ;;  %v5908_v63 = vpop.f32.mrf.mxu1  ;;  %16094 = vmatmul.mubr.bf16.gmra.mxu0 %v20369_v6 }
 0x576   : > { %v20698_v52 = vrot.slane %v6479_v0, 4  ;;  %v6623_v28 = vrot.slane %v6481_v21, 4  ;;  %16097 = vmatprep.mubr.msk.bf16.mxu0 %vm17821_vm0, %v24466_v24 }
 0x577   : > { %v20702_v60 = vpop.f32.mrf.mxu0  ;;  %v5910_v34 = vpop.f32.mrf.mxu1 }
 0x578   : > { %24504 = vst [vmem:[#allocation23_spill] sm:$0xff] %v20698_v52  ;;  %v20706_v57 = vsel %vm6563_vm2, %v6571_v56, %v20698_v52  ;;  %v20709_v39 = vsel %vm6563_vm2, %v6621_v44, %v6623_v28  ;;  %v6443_v56 = vpack.c.bf16 %v20621_v43, %v20611_v16 }
 0x579   : > { %24505 = vst [vmem:[#allocation24_spill] sm:$0xff] %v20706_v57  ;;  %24506 = vst [vmem:[#allocation25_spill] sm:$0xff] %v20709_v39  ;;  %v5751_v59 = vpop.f32.mrf.mxu0  ;;  %v5912_v29 = vpop.f32.mrf.mxu1 }
 0x57a   : > { %v6489_v23 = vpack.c.bf16 %v5912_v29, %v5908_v63  ;;  %v6565_v16 = vrot.slane %v6443_v56, 4 }
 0x57b   : > { %v20711_v6 = vpop.f32.mrf.mxu0  ;;  %v5914_v0 = vpop.f32.mrf.mxu1 }
 0x57c   : > { %v6490_v21 = vpack.c.bf16 %v5914_v0, %v5910_v34  ;;  %15089 = vmatprep.subr.bf16.mxu0 %v6489_v23 }
 0x57d   : > { %v5757_v18 = vpop.f32.mrf.mxu0  ;;  %v20713_v4 = vpop.f32.mrf.mxu1  ;;  %16098 = vmatmul.mubr.bf16.gmra.mxu0 %v20393_v30  ;;  %v6434_v30 = vpack.c.bf16 %v20601_v50, %v20588_v40  ;;  %v6487_v50 = vpack.c.bf16 %v5751_v59, %v5747_v31 }
 0x57e   : > { %24507 = vst [vmem:[#allocation26_spill] sm:$0xff] %v20713_v4  ;;  %v20718_v45 = vrot.slane %v6490_v21, 4  ;;  %16101 = vmatprep.mubr.msk.bf16.mxu0 %vm17821_vm0, %v24466_v24 }
 0x57f   : > { %v20722_v44 = vpop.f32.mrf.mxu0  ;;  %v20724_v63 = vpop.f32.mrf.mxu1  ;;  %v20747_v40 = vrot.slane %v6434_v30, 4 }
 0x580   : > { %24508 = vst [vmem:[#allocation27_spill] sm:$0xff] %v20718_v45  ;;  %v20728_v34 = vsel %vm6563_vm2, %v6623_v28, %v20718_v45  ;;  %v6568_v28 = vsel %vm6563_vm2, %v6565_v16, %v20667_v48 }
 0x581   : > { %24509 = vst [vmem:[#allocation28_spill] sm:$0xff] %v20728_v34  ;;  %v5761_v29 = vpop.f32.mrf.mxu0  ;;  %v20730_v23 = vpop.f32.mrf.mxu1  ;;  %v6566_v48 = vsel %vm6563_vm2, %v20747_v40, %v6565_v16 }
 0x582   : > { %24510 = vst [vmem:[#allocation29_spill] sm:$0xff] %v20730_v23  ;;  %v6496_v43 = vpack.c.bf16 %v5761_v29, %v5757_v18 }
 0x583   : > { %v20736_v21 = vpop.f32.mrf.mxu0  ;;  %v20738_v25 = vpop.f32.mrf.mxu1 }
 0x584   : > { %15050 = vmatpush3.bf16.msra.mxu1 %v6496_v43 }
 0x585   : > { %v20742_v46 = vpop.f32.mrf.mxu0  ;;  %v20744_v27 = vpop.f32.mrf.mxu1  ;;  %16102 = vmatmul.mubr.bf16.gmra.mxu0 %v20416_v7  ;;  %15051 = vmatprep.subr.bf16.mxu1 %v6568_v28  ;;  %v6478_v7 = vpack.c.bf16 %v5741_v2, %v20682_v35 }
 0x586   : > { %24511 = vst [vmem:[#allocation30_spill] sm:$0xff] %v20744_v27  ;;  %16105 = vmatprep.mubr.msk.bf16.mxu0 %vm17821_vm0, %v24466_v24 }
 0x587   : > { %v20751_v18 = vpop.f32.mrf.mxu0  ;;  %v20753_v56 = vpop.f32.mrf.mxu1 }
 0x588   : > { %15052 = vmatpush3.bf16.msra.mxu1 %v6487_v50 }
 0x589   : > { %v20757_v29 = vpop.f32.mrf.mxu0  ;;  %v20759_v43 = vpop.f32.mrf.mxu1  ;;  %15053 = vmatprep.subr.bf16.mxu1 %v6566_v48 }
 0x58a   : > { %24512 = vst [vmem:[#allocation31_spill] sm:$0xff] %v20759_v43 }
 0x58b   : > { %v20764_v59 = vpop.f32.mrf.mxu0  ;;  %v20766_v30 = vpop.f32.mrf.mxu1 }
 0x58c   : > { %15054 = vmatpush3.bf16.msra.mxu1 %v6478_v7 }
 0x58d   : > { %v20768_v28 = vpop.f32.mrf.mxu0  ;;  %v20770_v50 = vpop.f32.mrf.mxu1  ;;  %16106 = vmatmul.mubr.bf16.gmra.mxu0 %v20435_v1 }
 0x58e   : > { %24513 = vst [vmem:[#allocation32_spill] sm:$0xff] %v20770_v50  ;;  %16109 = vmatprep.mubr.msk.bf16.mxu0 %vm17821_vm0, %v24466_v24 }
 0x58f   : > { %v5779_v16 = vpop.f32.mrf.mxu0  ;;  %v20775_v48 = vpop.f32.mrf.mxu1 }
 0x591   : > { %v20777_v35 = vpop.f32.mrf.mxu0  ;;  %v20779_v2 = vpop.f32.mrf.mxu1 }
 0x592   : > { %24514 = vst [vmem:[#allocation33_spill] sm:$0xff] %v20779_v2 }
 0x593   : > { %v5783_v0 = vpop.f32.mrf.mxu0  ;;  %v20781_v31 = vpop.f32.mrf.mxu1 }
 0x595   : > { %v20783_v7 = vpop.f32.mrf.mxu0  ;;  %v20785_v4 = vpop.f32.mrf.mxu1  ;;  %16110 = vmatmul.mubr.bf16.gmra.mxu0 %v20450_v15 }
 0x596   : > { %24515 = vst [vmem:[#allocation34_spill] sm:$0xff] %v20785_v4  ;;  %16113 = vmatprep.mubr.msk.bf16.mxu0 %vm17821_vm0, %v24466_v24 }
 0x597   : > { %v5789_v1 = vpop.f32.mrf.mxu0  ;;  %v5950_v23 = vpop.f32.mrf.mxu1 }
 0x599   : > { %v5791_v27 = vpop.f32.mrf.mxu0  ;;  %v20790_v43 = vpop.f32.mrf.mxu1 }
 0x59a   : > { %24516 = vst [vmem:[#allocation35_spill] sm:$0xff] %v20790_v43 }
 0x59b   : > { %v5793_v50 = vpop.f32.mrf.mxu0  ;;  %v5954_v39 = vpop.f32.mrf.mxu1 }
 0x59c   : > { %v6524_v26 = vpack.c.bf16 %v5793_v50, %v5789_v1  ;;  %v6526_v55 = vpack.c.bf16 %v5954_v39, %v5950_v23  ;;  %v6469_v39 = vpack.c.bf16 %v20676_v20, %v20662_v54  ;;  %v6515_v23 = vpack.c.bf16 %v5783_v0, %v5779_v16 }
 0x59d   : > { %v5797_v2 = vpop.f32.mrf.mxu0  ;;  %v20792_v34 = vpop.f32.mrf.mxu1  ;;  %16114 = vmatmul.mubr.bf16.gmra.mxu0 %v20465_v22  ;;  %v6506_v20 = vpack.c.bf16 %v20764_v59, %v20751_v18  ;;  %v6523_v0 = vpack.c.bf16 %v5791_v27, %v20783_v7  ;;  %v24518_v18 = vpack.c.bf16 %v20654_v47, %v20644_v8  ;;  %v6497_v59 = vpack.c.bf16 %v20736_v21, %v20722_v44 }
 0x59e   : > { %24517 = vst [vmem:[#allocation36_spill] sm:$0xff] %v20792_v34  ;;  %16117 = vmatprep.mubr.msk.bf16.mxu0 %vm17821_vm0, %v24466_v24  ;;  %v6583_v22 = vrot.slane %v6524_v26, 4  ;;  %v20808_v50 = vrot.slane %v6526_v55, 4  ;;  %v24519_v27 = vpack.c.bf16 %v20678_v58, %v20664_v11  ;;  %v24520_v21 = vpack.c.bf16 %v20636_v38, %v20623_v61  ;;  %v17077_v61 = vld [vmem:[%s24342_s9 + $0xc] ss:$60 sps:$4 sm:$0xff]  }
 0x59f   : > { %v5799_v4 = vpop.f32.mrf.mxu0  ;;  %v5960_v15 = vpop.f32.mrf.mxu1  ;;  %v6505_v38 = vpack.c.bf16 %v20757_v29, %v20742_v46  ;;  %v24523_v46 = vpack.c.bf16 %v20638_v9, %v20625_v10  ;;  %v17072_v10 = vld [vmem:[%s24342_s9] ss:$60 sps:$4 sm:$0xff]  }
 0x5a1   : > { %v5801_v45 = vpop.f32.mrf.mxu0  ;;  %v20797_v32 = vpop.f32.mrf.mxu1 }
 0x5a3   : > { %v5803_v57 = vpop.f32.mrf.mxu0  ;;  %v5964_v13 = vpop.f32.mrf.mxu1 }
 0x5a4   : > { %v6533_v43 = vpack.c.bf16 %v5803_v57, %v5799_v4  ;;  %v6535_v12 = vpack.c.bf16 %v5964_v13, %v5960_v15  ;;  %v6532_v4 = vpack.c.bf16 %v5801_v45, %v5797_v2 }
 0x5a5   : > { %v5807_v42 = vpop.f32.mrf.mxu0  ;;  %v20799_v52 = vpop.f32.mrf.mxu1  ;;  %16118 = vmatmul.mubr.bf16.gmra.mxu0 %v20480_v41  ;;  %v6480_v41 = vpack.c.bf16 %v20695_v51, %v20684_v19  ;;  %v6581_v19 = vrot.slane %v6515_v23, 4 }
 0x5a6   : > { %v20802_v34 = vrot.slane %v6533_v43, 4  ;;  %v6635_v37 = vrot.slane %v6535_v12, 4  ;;  %v6541_v14 = vpack.c.bf16 %v5807_v42, %v5807_v42  ;;  %16121 = vmatprep.mubr.msk.bf16.mxu0 %vm17821_vm0, %v24466_v24 }
 0x5a7   : > { %v20810_v13 = vpop.f32.mrf.mxu0  ;;  %v5970_v57 = vpop.f32.mrf.mxu1  ;;  %v6584_v2 = vsel %vm6563_vm2, %v6581_v19, %v6583_v22 }
 0x5a8   : > { %v6544_v26 = vpack.c.bf16 %v5970_v57, %v5970_v57  ;;  %v6754_v12 = vsel %vm6563_vm2, %v6541_v14, %v20747_v40  ;;  %v6586_v42 = vsel %vm6563_vm2, %v6583_v22, %v20802_v34  ;;  %v20820_v55 = vsel %vm6563_vm2, %v20808_v50, %v6635_v37 }
 0x5a9   : > { %v5811_v43 = vpop.f32.mrf.mxu0  ;;  %v5972_v1 = vpop.f32.mrf.mxu1  ;;  %15055 = vmatprep.subr.bf16.mxu1 %v6754_v12  ;;  %15090 = vmatpush3.bf16.msra.mxu0 %v6586_v42  ;;  %v6517_v22 = vpack.c.bf16 %v20781_v31, %v20775_v48  ;;  %v6508_v48 = vpack.c.bf16 %v20766_v30, %v20753_v56  ;;  %v24524_v42 = vpack.c.bf16 %v20590_v36, %v20580_v17  ;;  %v24528_v36 = vld [vmem:[#allocation23_spill] sm:$0xff] }
 0x5aa   : > { %v6637_v54 = vrot.slane %v6544_v26, 4  ;;  %15056 = vmatpush3.bf16.msra.mxu1 %v6469_v39  ;;  %15091 = vmatprep.subr.bf16.mxu0 %v6480_v41  ;;  %v24521_v39 = vpack.c.bf16 %v20656_v49, %v20646_v5  ;;  %v24522_v49 = vpack.c.bf16 %v20613_v3, %v20603_v62  ;;  %v24525_v43 = vld [vmem:[#allocation17_spill] sm:$0xff] }
 0x5ab   : > { %v5812_v14 = vpop.f32.mrf.mxu0  ;;  %v5973_v51 = vpop.f32.mrf.mxu1  ;;  %15057 = vmatprep.subr.bf16.mxu1 %v6532_v4  ;;  %v6631_v41 = vrot.slane %v6517_v22, 4  ;;  %v6499_v4 = vpack.c.bf16 %v20738_v25, %v20724_v63  ;;  %v24526_v1 = vld [vmem:[#allocation13_spill] sm:$0xff] }
 0x5ac   : > { %v20825_v45 = vsel %vm6563_vm2, %v6635_v37, %v6637_v54  ;;  %v6579_v37 = vrot.slane %v6506_v20, 4  ;;  %v24527_v54 = vpack.c.bf16 %v24525_v43, %v24526_v1  ;;  %v17080_v51 = vld [vmem:[%s24342_s9 + $0x7c] ss:$60 sps:$4 sm:$0xff]   ;;  %v24537_v1 = vld [vmem:[#allocation21_spill] sm:$0xff] }
 0x5ad   : > { %v20828_v40 = vpop.f32.mrf.mxu0  ;;  %v20830_v16 = vpop.f32.mrf.mxu1  ;;  %16122 = vmatmul.mubr.bf16.gmra.mxu0 %v20493_v33  ;;  %v6514_v33 = vpack.c.bf16 %v20777_v35, %v20768_v28  ;;  %v6488_v28 = vpack.c.bf16 %v20711_v6, %v20702_v60  ;;  %v6577_v35 = vrot.slane %v6497_v59, 4  ;;  %v6634_v56 = vsel %vm6563_vm2, %v6631_v41, %v20808_v50 }
 0x5ae   : > { %15092 = vmatpush3.bf16.msra.mxu0 %v6584_v2  ;;  %15058 = vmatpush3.bf16.msra.mxu1 %v24518_v18  ;;  %v6582_v44 = vsel %vm6563_vm2, %v6579_v37, %v6581_v19  ;;  %v6629_v50 = vrot.slane %v6508_v48, 4  ;;  %v24534_v48 = vld [vmem:[#allocation24_spill] sm:$0xff] }
 0x5af   : > { %15093 = vmatprep.subr.bf16.mxu0 %v24519_v27  ;;  %v20842_v7 = vpop.f32.mrf.mxu0  ;;  %v6172_v15 = vpop.f32.mrf.mxu1  ;;  %15059 = vmatprep.subr.bf16.mxu1 %v6523_v0  ;;  %v6580_v5 = vsel %vm6563_vm2, %v6577_v35, %v6579_v37  ;;  %v6575_v31 = vrot.slane %v6488_v28, 4  ;;  %v24529_v27 = vld [vmem:[#allocation20_spill] sm:$0xff] }
 0x5b0   : > { %16125 = vmatprep.mubr.msk.bf16.mxu0 %vm17821_vm0, %v24466_v24  ;;  %v6632_v63 = vsel %vm6563_vm2, %v6629_v50, %v6631_v41  ;;  %v24535_v41 = vld [vmem:[#allocation19_spill] sm:$0xff]  ;;  %v17113_v24 = vld [vmem:[%s24342_s9 + $0x24] ss:$60 sps:$4 sm:$0xff]  }
 0x5b1   : > { %v20848_v8 = vpop.f32.mrf.mxu0  ;;  %v20850_v47 = vpop.f32.mrf.mxu1  ;;  %v6578_v3 = vsel %vm6563_vm2, %v6575_v31, %v6577_v35  ;;  %v6576_v25 = vsel %vm6563_vm2, %v24528_v36, %v6575_v31 }
 0x5b2   : > { %15094 = vmatpush3.bf16.msra.mxu0 %v6582_v44  ;;  %15060 = vmatpush3.bf16.msra.mxu1 %v24520_v21  ;;  %v24531_v44 = vld [vmem:[#allocation15_spill] sm:$0xff] }
 0x5b3   : > { %15095 = vmatprep.subr.bf16.mxu0 %v24521_v39  ;;  %v20867_v23 = vpop.f32.mrf.mxu0  ;;  %v6176_v57 = vpop.f32.mrf.mxu1  ;;  %15061 = vmatprep.subr.bf16.mxu1 %v6514_v33  ;;  %v24530_v33 = vld [vmem:[#allocation16_spill] sm:$0xff] }
 0x5b4   : > { %v6440_v9 = vpack.c.bf16 %v6176_v57, %v6172_v15  ;;  %v6627_v15 = vrot.slane %v6499_v4, 4  ;;  %v24532_v21 = vpack.c.bf16 %v24530_v33, %v24531_v44  ;;  %v6438_v22 = vpack.c.bf16 %v20867_v23, %v20842_v7  ;;  %v17075_v4 = vld [vmem:[%s24342_s9 + $0x8] ss:$60 sps:$4 sm:$0xff]   ;;  %v17081_v44 = vld [vmem:[%s24342_s9 + $0xf0] ss:$60 sps:$4 sm:$0xff]  }
 0x5b5   : > { %v20874_v60 = vpop.f32.mrf.mxu0  ;;  %v20876_v6 = vpop.f32.mrf.mxu1  ;;  %16126 = vmatmul.mubr.bf16.gmra.mxu0 %v20499_v53  ;;  %v6542_v53 = vpack.c.bf16 %v20810_v13, %v20810_v13  ;;  %v6543_v57 = vpack.c.bf16 %v20799_v52, %v20799_v52 }
 0x5b6   : > { %15096 = vmatpush3.bf16.msra.mxu0 %v6580_v5  ;;  %15062 = vmatpush3.bf16.msra.mxu1 %v24522_v49  ;;  %v20922_v18 = vrot.slane %v6440_v9, 4  ;;  %v6630_v5 = vsel %vm6563_vm2, %v6627_v15, %v6629_v50  ;;  %v17078_v49 = vld [vmem:[%s24342_s9 + $0x78] ss:$60 sps:$4 sm:$0xff]  }
 0x5b7   : > { %15097 = vmatprep.subr.bf16.mxu0 %v24523_v46  ;;  %v6021_v29 = vpop.f32.mrf.mxu0  ;;  %v6182_v26 = vpop.f32.mrf.mxu1  ;;  %15063 = vmatprep.subr.bf16.mxu1 %v6505_v38  ;;  %v6587_v2 = vrot.slane %v6542_v53, 4 }
 0x5b8   : > { %7220 = vmatprep.mubr.bf16.mxu0 %v17077_v61 }
 0x5b9   : > { %v20890_v12 = vpop.f32.mrf.mxu0  ;;  %v20892_v62 = vpop.f32.mrf.mxu1  ;;  %v6588_v52 = vsel %vm6563_vm2, %v20802_v34, %v6587_v2 }
 0x5ba   : > { %15098 = vmatpush3.bf16.msra.mxu0 %v6578_v3  ;;  %15064 = vmatpush3.bf16.msra.mxu1 %v24524_v42  ;;  %v24536_v42 = vld [vmem:[#allocation14_spill] sm:$0xff] }
 0x5bb   : > { %15099 = vmatprep.subr.bf16.mxu0 %v24527_v54  ;;  %v6025_v20 = vpop.f32.mrf.mxu0  ;;  %v6186_v19 = vpop.f32.mrf.mxu1  ;;  %15129 = vmatprep.subr.bf16.mxu1 %v6634_v56  ;;  %v17083_v56 = vld [vmem:[%s24342_s9 + $0xf4] ss:$60 sps:$4 sm:$0xff]   ;;  %v6758_v34 = vsel %vm6563_vm2, %v6543_v57, %v24536_v42  ;;  %v24544_v42 = vld [vmem:[#allocation25_spill] sm:$0xff] }
 0x5bc   : > { %v6449_v14 = vpack.c.bf16 %v6186_v19, %v6182_v26  ;;  %v6447_v59 = vpack.c.bf16 %v6025_v20, %v6021_v29  ;;  %v20952_v26 = vrot.slane %v6438_v22, 4  ;;  %v24538_v20 = vld [vmem:[#allocation27_spill] sm:$0xff]  ;;  %v24541_v22 = vld [vmem:[#allocation28_spill] sm:$0xff] }
 0x5bd   : > { %v20915_v0 = vpop.f32.mrf.mxu0  ;;  %v20917_v17 = vpop.f32.mrf.mxu1  ;;  %7157 = vmatmul.mubr.bf16.vlgmr.msra.gmra.mxu1 %v17072_v10  ;;  %v6628_v19 = vsel %vm6563_vm2, %v24538_v20, %v6627_v15  ;;  %v24543_v57 = vld [vmem:[#allocation35_spill] sm:$0xff] }
 0x5be   : > { %v6715_v37 = vrot.slane %v6449_v14, 4  ;;  %15100 = vmatpush3.bf16.msra.mxu0 %v6576_v25  ;;  %15130 = vmatpush3.bf16.msra.mxu1 %v24529_v27  ;;  %v6665_v31 = vrot.slane %v6447_v59, 4  ;;  %v17091_v14 = vld [vmem:[%s24342_s9 + $0x84] ss:$60 sps:$4 sm:$0xff]   ;;  %v6816_v25 = vld [vmem:[%s24342_s9 + $0x168] sm:$0xff] }
 0x5bf   : > { %15101 = vmatprep.subr.bf16.mxu0 %v24532_v21  ;;  %v6031_v28 = vpop.f32.mrf.mxu0  ;;  %v6192_v35 = vpop.f32.mrf.mxu1  ;;  %15131 = vmatprep.subr.bf16.mxu1 %v6632_v63  ;;  %v24539_v63 = vld [vmem:[#allocation36_spill] sm:$0xff] }
 0x5c0   : > { %7164 = vmatprep.mubr.bf16.mxu1 %v17080_v51  ;;  %v20932_v39 = vsel %vm6563_vm2, %v20922_v18, %v6715_v37  ;;  %v6666_v54 = vsel %vm6563_vm2, %v20952_v26, %v6665_v31  ;;  %v6534_v2 = vpack.c.bf16 %v20797_v32, %v24539_v63  ;;  %v14065_v32 = vcombine.high %v6816_v25, %v6816_v25 }
 0x5c1   : > { %24533 = vst [vmem:[#allocation17_spill] sm:$0xff] %v20932_v39  ;;  %v20936_v61 = vpop.f32.mrf.mxu0  ;;  %v20938_v38 = vpop.f32.mrf.mxu1 }
 0x5c2   : > { %15102 = vmatpush3.bf16.msra.mxu0 %v24534_v48  ;;  %15132 = vmatpush3.bf16.msra.mxu1 %v24535_v41  ;;  %v17089_v41 = vld [vmem:[%s24342_s9 + $0x80] ss:$60 sps:$4 sm:$0xff]  }
 0x5c3   : > { %15103 = vmatprep.subr.bf16.mxu0 %v6588_v52  ;;  %v6035_v46 = vpop.f32.mrf.mxu0  ;;  %v6196_v29 = vpop.f32.mrf.mxu1  ;;  %15133 = vmatprep.subr.bf16.mxu1 %v6630_v5 }
 0x5c4   : > { %v6456_v53 = vpack.c.bf16 %v6035_v46, %v6031_v28  ;;  %v6458_v3 = vpack.c.bf16 %v6196_v29, %v6192_v35 }
 0x5c5   : > { %v20957_v10 = vpop.f32.mrf.mxu0  ;;  %v20959_v9 = vpop.f32.mrf.mxu1  ;;  %7165 = vmatmul.mubr.bf16.gmra.mxu1 %v17078_v49 }
 0x5c6   : > { %v6667_v50 = vrot.slane %v6456_v53, 4  ;;  %v6717_v43 = vrot.slane %v6458_v3, 4  ;;  %15104 = vmatpush3.bf16.msra.mxu0 %v24537_v1  ;;  %15134 = vmatpush3.bf16.msra.mxu1 %v6758_v34  ;;  %v17094_v53 = vld [vmem:[%s24342_s9 + $0xfc] ss:$60 sps:$4 sm:$0xff]  }
 0x5c7   : > { %15169 = vmatprep.subr.bf16.mxu0 %v6666_v54  ;;  %v6041_v51 = vpop.f32.mrf.mxu0  ;;  %v6202_v36 = vpop.f32.mrf.mxu1  ;;  %15135 = vmatprep.subr.bf16.mxu1 %v6628_v19  ;;  %v24545_v34 = vld [vmem:[#allocation32_spill] sm:$0xff] }
 0x5c8   : > { %7172 = vmatprep.mubr.bf16.mxu1 %v17083_v56  ;;  %v20980_v59 = vsel %vm6563_vm2, %v6665_v31, %v6667_v50  ;;  %v20983_v27 = vsel %vm6563_vm2, %v6715_v37, %v6717_v43  ;;  %v24542_v37 = vld [vmem:[#allocation34_spill] sm:$0xff] }
 0x5c9   : > { %24540 = vst [vmem:[#allocation13_spill] sm:$0xff] %v20983_v27  ;;  %v20985_v15 = vpop.f32.mrf.mxu0  ;;  %v20987_v33 = vpop.f32.mrf.mxu1  ;;  %7221 = vmatmul.mubr.bf16.vlgmr.msra.gmra.mxu0 %v17075_v4  ;;  %v6525_v5 = vpack.c.bf16 %v24543_v57, %v24542_v37  ;;  %v24546_v4 = vld [vmem:[#allocation33_spill] sm:$0xff]  ;;  %v24551_v37 = vld [vmem:[#allocation30_spill] sm:$0xff] }
 0x5ca   : > { %15136 = vmatpush3.bf16.msra.mxu1 %v6534_v2  ;;  %7228 = vmatprep.mubr.bf16.mxu0 %v17091_v14  ;;  %v6516_v1 = vpack.c.bf16 %v24546_v4, %v24545_v34  ;;  %v17086_v4 = vld [vmem:[%s24342_s9 + $0x10] ss:$60 sps:$4 sm:$0xff]  }
 0x5cb   : > { %v6045_v28 = vpop.f32.mrf.mxu0  ;;  %v6206_v35 = vpop.f32.mrf.mxu1  ;;  %15137 = vmatprep.subr.bf16.mxu1 %v24541_v22  ;;  %v24550_v22 = vld [vmem:[#allocation31_spill] sm:$0xff] }
 0x5cc   : > { %v6465_v49 = vpack.c.bf16 %v6045_v28, %v6041_v51  ;;  %v6467_v31 = vpack.c.bf16 %v6206_v35, %v6202_v36  ;;  %v14064_v51 = vcombine.low %v6816_v25, %v6816_v25  ;;  %v17088_v36 = vld [vmem:[%s24342_s9 + $0x14] ss:$60 sps:$4 sm:$0xff]   ;;  %v24552_v57 = vpack.c.bf16 %v24550_v22, %v24551_v37 }
 0x5cd   : > { %v20997_v48 = vpop.f32.mrf.mxu0  ;;  %v6210_v52 = vpop.f32.mrf.mxu1  ;;  %7173 = vmatmul.mubr.bf16.gmra.mxu1 %v17081_v44  ;;  %v24548_v44 = vld [vmem:[#allocation22_spill] sm:$0xff]  ;;  %v17092_v25 = vld [vmem:[%s24342_s9 + $0xf8] ss:$60 sps:$4 sm:$0xff]  }
 0x5ce   : > { %v21002_v46 = vrot.slane %v6465_v49, 4  ;;  %v6719_v29 = vrot.slane %v6467_v31, 4  ;;  %15138 = vmatpush3.bf16.msra.mxu1 %v6525_v5  ;;  %7180 = vmatprep.mubr.bf16.mxu1 %v14065_v32 }
 0x5cf   : > { %v21007_v3 = vpop.f32.mrf.mxu0  ;;  %v6212_v56 = vpop.f32.mrf.mxu1  ;;  %15139 = vmatprep.subr.bf16.mxu1 %v24544_v42 }
 0x5d0   : > { %v21014_v54 = vsel %vm6563_vm2, %v6667_v50, %v21002_v46  ;;  %v21017_v20 = vsel %vm6563_vm2, %v6717_v43, %v6719_v29  ;;  %v6817_v50 = vld [vmem:[%s24342_s9 + $0x170] sm:$0xff] }
 0x5d1   : > { %24547 = vst [vmem:[#allocation23_spill] sm:$0xff] %v21017_v20  ;;  %v21019_v19 = vpop.f32.mrf.mxu0  ;;  %v6214_v14 = vpop.f32.mrf.mxu1  ;;  %7229 = vmatmul.mubr.bf16.gmra.mxu0 %v17089_v41  ;;  %v14067_v5 = vcombine.high %v6817_v50, %v6817_v50  ;;  %v24553_v41 = vld [vmem:[#allocation18_spill] sm:$0xff]  ;;  %v14066_v22 = vcombine.low %v6817_v50, %v6817_v50 }
 0x5d2   : > { %15140 = vmatpush3.bf16.msra.mxu1 %v6516_v1  ;;  %7236 = vmatprep.mubr.bf16.mxu0 %v17094_v53  ;;  %v17095_v50 = vld [vmem:[%s24342_s9 + $0x88] ss:$60 sps:$4 sm:$0xff]  }
 0x5d3   : > { %v21024_v63 = vpop.f32.mrf.mxu0  ;;  %v6216_v2 = vpop.f32.mrf.mxu1  ;;  %15141 = vmatprep.subr.bf16.mxu1 %v24548_v44 }
 0x5d4   : > { %v6476_v43 = vpack.c.bf16 %v6216_v2, %v6212_v56  ;;  %v6475_v56 = vpack.c.bf16 %v6214_v14, %v6210_v52  ;;  %v24557_v2 = vld [vmem:[#allocation26_spill] sm:$0xff] }
 0x5d5   : > { %v6059_v32 = vpop.f32.mrf.mxu0  ;;  %v21030_v28 = vpop.f32.mrf.mxu1  ;;  %7181 = vmatmul.mubr.bf16.gmra.mxu1 %v14064_v51  ;;  %v17097_v52 = vld [vmem:[%s24342_s9 + $0x8c] ss:$60 sps:$4 sm:$0xff]  }
 0x5d6   : > { %24549 = vst [vmem:[#allocation20_spill] sm:$0xff] %v21030_v28  ;;  %v6721_v35 = vrot.slane %v6476_v43, 4  ;;  %15142 = vmatpush3.bf16.msra.mxu1 %v24552_v57  ;;  %7284 = vmatprep.mubr.bf16.mxu1 %v17088_v36  ;;  %v24556_v36 = vld [vmem:[#allocation29_spill] sm:$0xff]  ;;  %v17105_v57 = vld [vmem:[%s24342_s9 + $0x1c] ss:$60 sps:$4 sm:$0xff]  }
 0x5d7   : > { %v21038_v49 = vpop.f32.mrf.mxu0  ;;  %v6222_v31 = vpop.f32.mrf.mxu1  ;;  %15143 = vmatprep.subr.bf16.mxu1 %v24553_v41  ;;  %v24558_v44 = vpack.c.bf16 %v24556_v36, %v24557_v2 }
 0x5d8   : > { %v21042_v53 = vsel %vm6563_vm2, %v6719_v29, %v6721_v35 }
 0x5d9   : > { %24554 = vst [vmem:[#allocation16_spill] sm:$0xff] %v21042_v53  ;;  %v6063_v42 = vpop.f32.mrf.mxu0  ;;  %v21044_v34 = vpop.f32.mrf.mxu1  ;;  %7237 = vmatmul.mubr.bf16.gmra.mxu0 %v17092_v25 }
 0x5da   : > { %24555 = vst [vmem:[#allocation15_spill] sm:$0xff] %v21044_v34  ;;  %v6482_v1 = vpack.c.bf16 %v6063_v42, %v6059_v32  ;;  %15144 = vmatpush3.bf16.msra.mxu1 %v24558_v44  ;;  %7244 = vmatprep.mubr.bf16.mxu0 %v14067_v5 }
 0x5db   : > { %v21057_v29 = vpop.f32.mrf.mxu0  ;;  %v6226_v14 = vpop.f32.mrf.mxu1  ;;  %15209 = vmatprep.subr.bf16.mxu1 %v6475_v56 }
 0x5dc   : > { %v6485_v43 = vpack.c.bf16 %v6226_v14, %v6222_v31  ;;  %15170 = vmatpush3.bf16.msra.mxu0 %v6482_v1  ;;  %v6818_v1 = vld [vmem:[%s24342_s9 + $0x178] sm:$0xff] }
 0x5dd   : > { %v21059_v25 = vpop.f32.mrf.mxu0  ;;  %v21061_v32 = vpop.f32.mrf.mxu1  ;;  %7285 = vmatmul.mubr.bf16.vlgmr.msra.gmra.mxu1 %v17086_v4  ;;  %v14068_v23 = vcombine.low %v6818_v1, %v6818_v1 }
 0x5de   : > { %24559 = vst [vmem:[#allocation24_spill] sm:$0xff] %v21061_v32  ;;  %v6723_v37 = vrot.slane %v6485_v43, 4  ;;  %7292 = vmatprep.mubr.bf16.mxu1 %v17097_v52 }
 0x5df   : > { %v21066_v41 = vpop.f32.mrf.mxu0  ;;  %v6232_v5 = vpop.f32.mrf.mxu1 }
 0x5e0   : > { %v21069_v42 = vsel %vm6563_vm2, %v6721_v35, %v6723_v37  ;;  %v17102_v35 = vld [vmem:[%s24342_s9 + $0x104] ss:$60 sps:$4 sm:$0xff]  }
 0x5e1   : > { %24560 = vst [vmem:[#allocation19_spill] sm:$0xff] %v21069_v42  ;;  %v21071_v31 = vpop.f32.mrf.mxu0  ;;  %v21073_v56 = vpop.f32.mrf.mxu1  ;;  %7245 = vmatmul.mubr.bf16.gmra.mxu0 %v14066_v22 }
 0x5e2   : > { %24561 = vst [vmem:[#allocation14_spill] sm:$0xff] %v21073_v56  ;;  %7348 = vmatprep.mubr.bf16.mxu0 %v17105_v57 }
 0x5e3   : > { %v21085_v36 = vpop.f32.mrf.mxu0  ;;  %v6236_v2 = vpop.f32.mrf.mxu1 }
 0x5e4   : > { %v6494_v44 = vpack.c.bf16 %v6236_v2, %v6232_v5 }
 0x5e5   : > { %v21087_v52 = vpop.f32.mrf.mxu0  ;;  %v21089_v14 = vpop.f32.mrf.mxu1  ;;  %7293 = vmatmul.mubr.bf16.gmra.mxu1 %v17095_v50  ;;  %v17100_v50 = vld [vmem:[%s24342_s9 + $0x100] ss:$60 sps:$4 sm:$0xff]  }
 0x5e6   : > { %24562 = vst [vmem:[#allocation21_spill] sm:$0xff] %v21089_v14  ;;  %v21091_v43 = vrot.slane %v6494_v44, 4  ;;  %7300 = vmatprep.mubr.bf16.mxu1 %v17102_v35  ;;  %v14069_v44 = vcombine.high %v6818_v1, %v6818_v1 }
 0x5e7   : > { %v6081_v22 = vpop.f32.mrf.mxu0  ;;  %v21093_v51 = vpop.f32.mrf.mxu1 }
 0x5e8   : > { %24563 = vst [vmem:[#allocation27_spill] sm:$0xff] %v21091_v43  ;;  %v21100_v57 = vsel %vm6563_vm2, %v6723_v37, %v21091_v43 }
 0x5e9   : > { %24564 = vst [vmem:[#allocation36_spill] sm:$0xff] %v21100_v57  ;;  %v21102_v5 = vpop.f32.mrf.mxu0  ;;  %v21104_v2 = vpop.f32.mrf.mxu1 }
 0x5ea   : > { %24565 = vst [vmem:[#allocation28_spill] sm:$0xff] %v21104_v2 }
 0x5eb   : > { %v6085_v4 = vpop.f32.mrf.mxu0  ;;  %v21111_v11 = vpop.f32.mrf.mxu1 }
 0x5ed   : > { %v21113_v30 = vpop.f32.mrf.mxu0  ;;  %v21115_v7 = vpop.f32.mrf.mxu1  ;;  %7301 = vmatmul.mubr.bf16.gmra.mxu1 %v17100_v50 }
 0x5ee   : > { %24566 = vst [vmem:[#allocation34_spill] sm:$0xff] %v21115_v7  ;;  %7308 = vmatprep.mubr.bf16.mxu1 %v14069_v44 }
 0x5ef   : > { %v6091_v37 = vpop.f32.mrf.mxu0  ;;  %v6252_v21 = vpop.f32.mrf.mxu1 }
 0x5f1   : > { %v21117_v58 = vpop.f32.mrf.mxu0  ;;  %v21119_v13 = vpop.f32.mrf.mxu1 }
 0x5f2   : > { %24567 = vst [vmem:[#allocation35_spill] sm:$0xff] %v21119_v13  ;;  %v6501_v13 = vpack.c.bf16 %v6085_v4, %v6081_v22 }
 0x5f3   : > { %v6095_v28 = vpop.f32.mrf.mxu0  ;;  %v6256_v34 = vpop.f32.mrf.mxu1 }
 0x5f4   : > { %v6510_v27 = vpack.c.bf16 %v6095_v28, %v6091_v37  ;;  %v6512_v35 = vpack.c.bf16 %v6256_v34, %v6252_v21  ;;  %v6466_v21 = vpack.c.bf16 %v20987_v33, %v20959_v9 }
 0x5f5   : > { %v21126_v39 = vpop.f32.mrf.mxu0  ;;  %v21128_v50 = vpop.f32.mrf.mxu1  ;;  %7309 = vmatmul.mubr.bf16.gmra.mxu1 %v14068_v23 }
 0x5f6   : > { %24568 = vst [vmem:[#allocation25_spill] sm:$0xff] %v21128_v50  ;;  %7412 = vmatprep.mubr.bf16.mxu1 %v17113_v24  ;;  %v6679_v50 = vrot.slane %v6510_v27, 4  ;;  %v21138_v23 = vrot.slane %v6512_v35, 4  ;;  %v6483_v35 = vpack.c.bf16 %v21057_v29, %v21038_v49  ;;  %v24571_v29 = vpack.c.bf16 %v20892_v62, %v20876_v6 }
 0x5f7   : > { %v6101_v44 = vpop.f32.mrf.mxu0  ;;  %v6262_v32 = vpop.f32.mrf.mxu1  ;;  %v6473_v6 = vpack.c.bf16 %v21019_v19, %v20997_v48 }
 0x5f8   : > { %v6673_v49 = vrot.slane %v6483_v35, 4  ;;  %v24572_v35 = vpack.c.bf16 %v20850_v47, %v20830_v16 }
 0x5f9   : > { %v21130_v56 = vpop.f32.mrf.mxu0  ;;  %v21132_v1 = vpop.f32.mrf.mxu1 }
 0x5fa   : > { %24569 = vst [vmem:[#allocation32_spill] sm:$0xff] %v21132_v1 }
 0x5fb   : > { %v6105_v14 = vpop.f32.mrf.mxu0  ;;  %v6266_v2 = vpop.f32.mrf.mxu1 }
 0x5fc   : > { %v6519_v20 = vpack.c.bf16 %v6105_v14, %v6101_v44  ;;  %v6521_v7 = vpack.c.bf16 %v6266_v2, %v6262_v32 }
 0x5fd   : > { %v21134_v53 = vpop.f32.mrf.mxu0  ;;  %v21136_v42 = vpop.f32.mrf.mxu1 }
 0x5fe   : > { %v21140_v24 = vrot.slane %v6519_v20, 4  ;;  %v6731_v57 = vrot.slane %v6521_v7, 4  ;;  %v6492_v7 = vpack.c.bf16 %v21085_v36, %v21066_v41  ;;  %v6677_v20 = vrot.slane %v6501_v13, 4 }
 0x5ff   : > { %v21142_v43 = vpop.f32.mrf.mxu0  ;;  %v6272_v1 = vpop.f32.mrf.mxu1 }
 0x600   : > { %v6682_v28 = vsel %vm6563_vm2, %v6679_v50, %v21140_v24  ;;  %v21150_v34 = vsel %vm6563_vm2, %v21138_v23, %v6731_v57  ;;  %v6680_v33 = vsel %vm6563_vm2, %v6677_v20, %v6679_v50  ;;  %v6675_v37 = vrot.slane %v6492_v7, 4 }
 0x601   : > { %v21152_v32 = vpop.f32.mrf.mxu0  ;;  %v21154_v27 = vpop.f32.mrf.mxu1  ;;  %15210 = vmatpush3.bf16.msra.mxu1 %v6682_v28  ;;  %v24570_v28 = vpack.c.bf16 %v20938_v38, %v20917_v17  ;;  %v6474_v50 = vpack.c.bf16 %v21024_v63, %v21007_v3 }
 0x602   : > { %15211 = vmatprep.subr.bf16.mxu1 %v6466_v21  ;;  %v6678_v36 = vsel %vm6563_vm2, %v6675_v37, %v6677_v20  ;;  %v6676_v20 = vsel %vm6563_vm2, %v6673_v49, %v6675_v37 }
 0x603   : > { %v6115_v4 = vpop.f32.mrf.mxu0  ;;  %v6276_v14 = vpop.f32.mrf.mxu1 }
 0x604   : > { %v6530_v9 = vpack.c.bf16 %v6276_v14, %v6272_v1  ;;  %v6528_v37 = vpack.c.bf16 %v6115_v4, %v21142_v43 }
 0x605   : > { %v6119_v22 = vpop.f32.mrf.mxu0  ;;  %v21159_v2 = vpop.f32.mrf.mxu1  ;;  %15212 = vmatpush3.bf16.msra.mxu1 %v6680_v33 }
 0x606   : > { %v6733_v44 = vrot.slane %v6530_v9, 4  ;;  %15213 = vmatprep.subr.bf16.mxu1 %v24570_v28  ;;  %v6671_v9 = vrot.slane %v6474_v50, 4  ;;  %v6683_v43 = vrot.slane %v6528_v37, 4  ;;  %v24578_v37 = vld [vmem:[#allocation27_spill] sm:$0xff] }
 0x607   : > { %v6121_v13 = vpop.f32.mrf.mxu0  ;;  %v6282_v41 = vpop.f32.mrf.mxu1 }
 0x608   : > { %v21168_v1 = vsel %vm6563_vm2, %v6731_v57, %v6733_v44 }
 0x609   : > { %v6123_v21 = vpop.f32.mrf.mxu0  ;;  %v21172_v14 = vpop.f32.mrf.mxu1  ;;  %15214 = vmatpush3.bf16.msra.mxu1 %v6678_v36 }
 0x60a   : > { %15215 = vmatprep.subr.bf16.mxu1 %v24571_v29 }
 0x60b   : > { %v6125_v17 = vpop.f32.mrf.mxu0  ;;  %v6286_v38 = vpop.f32.mrf.mxu1 }
 0x60c   : > { %v6539_v7 = vpack.c.bf16 %v6286_v38, %v6282_v41  ;;  %v6537_v3 = vpack.c.bf16 %v6125_v17, %v6121_v13  ;;  %v6674_v41 = vsel %vm6563_vm2, %v6671_v9, %v6673_v49  ;;  %v6536_v17 = vpack.c.bf16 %v6123_v21, %v6119_v22 }
 0x60d   : > { %v6129_v57 = vpop.f32.mrf.mxu0  ;;  %v21178_v33 = vpop.f32.mrf.mxu1  ;;  %15216 = vmatpush3.bf16.msra.mxu1 %v6676_v20  ;;  %v6527_v22 = vpack.c.bf16 %v21152_v32, %v21134_v53 }
 0x60e   : > { %v6735_v63 = vrot.slane %v6539_v7, 4  ;;  %v6545_v28 = vpack.c.bf16 %v6129_v57, %v6129_v57  ;;  %15217 = vmatprep.subr.bf16.mxu1 %v24572_v35  ;;  %v6685_v47 = vrot.slane %v6537_v3, 4  ;;  %v24573_v57 = vpack.c.bf16 %v20985_v15, %v20957_v10 }
 0x60f   : > { %v6131_v62 = vpop.f32.mrf.mxu0  ;;  %v6292_v36 = vpop.f32.mrf.mxu1  ;;  %v6684_v10 = vsel %vm6563_vm2, %v21140_v24, %v6683_v43 }
 0x610   : > { %v6546_v50 = vpack.c.bf16 %v6131_v62, %v6131_v62  ;;  %v6548_v29 = vpack.c.bf16 %v6292_v36, %v6292_v36  ;;  %v6762_v13 = vsel %vm6563_vm2, %v6545_v28, %v20952_v26  ;;  %v21190_v16 = vsel %vm6563_vm2, %v6733_v44, %v6735_v63  ;;  %v17103_v62 = vld [vmem:[%s24342_s9 + $0x18] ss:$60 sps:$4 sm:$0xff]   ;;  %v6820_v36 = vld [vmem:[%s24342_s9 + $0x188] sm:$0xff] }
 0x611   : > { %v6133_v38 = vpop.f32.mrf.mxu0  ;;  %v6294_v7 = vpop.f32.mrf.mxu1  ;;  %15171 = vmatprep.subr.bf16.mxu0 %v6762_v13  ;;  %15218 = vmatpush3.bf16.msra.mxu1 %v6674_v41  ;;  %v6672_v44 = vsel %vm6563_vm2, %v21002_v46, %v6671_v9  ;;  %v6686_v3 = vsel %vm6563_vm2, %v6683_v43, %v6685_v47  ;;  %v24574_v46 = vpack.c.bf16 %v20936_v61, %v20915_v0  ;;  %v17111_v9 = vld [vmem:[%s24342_s9 + $0x20] ss:$60 sps:$4 sm:$0xff]  }
 0x612   : > { %v6687_v48 = vrot.slane %v6546_v50, 4  ;;  %v6737_v19 = vrot.slane %v6548_v29, 4  ;;  %15172 = vmatpush3.bf16.msra.mxu0 %v6473_v6  ;;  %v24575_v0 = vpack.c.bf16 %v20890_v12, %v20874_v60  ;;  %v17119_v61 = vld [vmem:[%s24342_s9 + $0x9c] ss:$60 sps:$4 sm:$0xff]   ;;  %v24576_v60 = vpack.c.bf16 %v20848_v8, %v20828_v40 }
 0x613   : > { %v6134_v49 = vpop.f32.mrf.mxu0  ;;  %v6295_v20 = vpop.f32.mrf.mxu1  ;;  %15173 = vmatprep.subr.bf16.mxu0 %v6536_v17  ;;  %v24577_v8 = vpack.c.bf16 %v21071_v31, %v21059_v25  ;;  %v17110_v31 = vld [vmem:[%s24342_s9 + $0x94] ss:$60 sps:$4 sm:$0xff]   ;;  %v14073_v29 = vcombine.high %v6820_v36, %v6820_v36  ;;  %v6538_v17 = vpack.c.bf16 %v21172_v14, %v21159_v2  ;;  %v6529_v2 = vpack.c.bf16 %v21154_v27, %v21136_v42 }
 0x614   : > { %v6688_v4 = vsel %vm6563_vm2, %v6685_v47, %v6687_v48  ;;  %v21194_v26 = vsel %vm6563_vm2, %v6735_v63, %v6737_v19  ;;  %v6518_v63 = vpack.c.bf16 %v21130_v56, %v21126_v39  ;;  %v6509_v39 = vpack.c.bf16 %v21117_v58, %v21113_v30  ;;  %v17116_v47 = vld [vmem:[%s24342_s9 + $0x10c] ss:$60 sps:$4 sm:$0xff]   ;;  %v24579_v19 = vld [vmem:[#allocation36_spill] sm:$0xff]  ;;  %v17140_v20 = vld [vmem:[%s24342_s9 + $0x34] ss:$60 sps:$4 sm:$0xff]  }
 0x615   : > { %v21198_v21 = vpop.f32.mrf.mxu0  ;;  %15219 = vmatprep.subr.bf16.mxu1 %v6688_v4  ;;  %v6500_v58 = vpack.c.bf16 %v21102_v5, %v21087_v52  ;;  %v17117_v52 = vld [vmem:[%s24342_s9 + $0x98] ss:$60 sps:$4 sm:$0xff]   ;;  %v14072_v49 = vcombine.low %v6820_v36, %v6820_v36  ;;  %v24595_v36 = vld [vmem:[#allocation17_spill] sm:$0xff] }
 0x616   : > { %15174 = vmatpush3.bf16.msra.mxu0 %v24573_v57  ;;  %15220 = vmatpush3.bf16.msra.mxu1 %v6672_v44  ;;  %v17124_v5 = vld [vmem:[%s24342_s9 + $0x114] ss:$60 sps:$4 sm:$0xff]   ;;  %v24581_v44 = vld [vmem:[#allocation25_spill] sm:$0xff]  ;;  %v24582_v57 = vld [vmem:[#allocation32_spill] sm:$0xff] }
 0x617   : > { %v16079_v28 = vpop.f32.mrf.mxu0  ;;  %15175 = vmatprep.subr.bf16.mxu0 %v6527_v22  ;;  %15221 = vmatprep.subr.bf16.mxu1 %v6686_v3  ;;  %v24580_v4 = vld [vmem:[#allocation19_spill] sm:$0xff]  ;;  %v6819_v22 = vld [vmem:[%s24342_s9 + $0x180] sm:$0xff]  ;;  %v6520_v42 = vpack.c.bf16 %v24582_v57, %v24581_v44 }
 0x618   : > { %v17114_v3 = vld [vmem:[%s24342_s9 + $0x108] ss:$60 sps:$4 sm:$0xff]   ;;  %v17133_v44 = vld [vmem:[%s24342_s9 + $0x118] ss:$60 sps:$4 sm:$0xff]  }
 0x619   : > { %v21208_v53 = vpop.f32.mrf.mxu0 }
 0x61a   : > { %v6441_v32 = vpack.c.bf16 %v21208_v53, %v21198_v21  ;;  %15176 = vmatpush3.bf16.msra.mxu0 %v24574_v46  ;;  %15222 = vmatpush3.bf16.msra.mxu1 %v21014_v54  ;;  %v17164_v21 = vld [vmem:[%s24346_s13 + $0x128] ss:$36 sps:$4 sm:$0xff]  }
 0x61b   : > { %v16080_v15 = vpop.f32.mrf.mxu0  ;;  %15177 = vmatprep.subr.bf16.mxu0 %v6518_v63  ;;  %15223 = vmatprep.subr.bf16.mxu1 %v6684_v10  ;;  %v14071_v63 = vcombine.high %v6819_v22, %v6819_v22  ;;  %v24583_v10 = vld [vmem:[#allocation16_spill] sm:$0xff] }
 0x61d   : > { %v21220_v56 = vpop.f32.mrf.mxu0 }
 0x61e   : > { %15178 = vmatpush3.bf16.msra.mxu0 %v24575_v0  ;;  %15224 = vmatpush3.bf16.msra.mxu1 %v20980_v59  ;;  %v6503_v59 = vpack.c.bf16 %v21111_v11, %v21093_v51  ;;  %v6547_v11 = vpack.c.bf16 %v21178_v33, %v21178_v33 }
 0x61f   : > { %v16083_v54 = vpop.f32.mrf.mxu0  ;;  %15179 = vmatprep.subr.bf16.mxu0 %v6509_v39  ;;  %v24584_v39 = vld [vmem:[#allocation35_spill] sm:$0xff] }
 0x620   : > { %v6727_v6 = vrot.slane %v6503_v59, 4  ;;  %v24587_v54 = vld [vmem:[#allocation23_spill] sm:$0xff]  ;;  %v24588_v59 = vld [vmem:[#allocation28_spill] sm:$0xff] }
 0x621   : > { %v21234_v30 = vpop.f32.mrf.mxu0  ;;  %7413 = vmatmul.mubr.bf16.vlgmr.msra.gmra.mxu1 %v17111_v9  ;;  %v24585_v9 = vld [vmem:[#allocation34_spill] sm:$0xff] }
 0x622   : > { %v6450_v24 = vpack.c.bf16 %v21234_v30, %v21220_v56  ;;  %15180 = vmatpush3.bf16.msra.mxu0 %v24576_v60  ;;  %7420 = vmatprep.mubr.bf16.mxu1 %v17119_v61  ;;  %v6730_v25 = vsel %vm6563_vm2, %v6727_v6, %v21138_v23  ;;  %v17122_v23 = vld [vmem:[%s24342_s9 + $0x110] ss:$60 sps:$4 sm:$0xff]   ;;  %v6728_v50 = vsel %vm6563_vm2, %v24578_v37, %v6727_v6  ;;  %v24591_v6 = vld [vmem:[#allocation13_spill] sm:$0xff] }
 0x623   : > { %v16084_v12 = vpop.f32.mrf.mxu0  ;;  %15181 = vmatprep.subr.bf16.mxu0 %v6500_v58  ;;  %v24586_v0 = vpack.c.bf16 %v24584_v39, %v24585_v9  ;;  %v14070_v60 = vcombine.low %v6819_v22, %v6819_v22  ;;  %v24596_v37 = vld [vmem:[#allocation15_spill] sm:$0xff]  ;;  %v17183_v30 = vld [vmem:[%s24342_s9 + $0x1a0] ss:$0 sps:$4 sm:$0xff]  }
 0x624   : > { %v17141_v39 = vld [vmem:[%s24342_s9 + $0x38] ss:$60 sps:$4 sm:$0xff]  }
 0x625   : > { %v21243_v35 = vpop.f32.mrf.mxu0 }
 0x626   : > { %15182 = vmatpush3.bf16.msra.mxu0 %v20825_v45 }
 0x627   : > { %v16087_v40 = vpop.f32.mrf.mxu0  ;;  %15183 = vmatprep.subr.bf16.mxu0 %v24577_v8 }
 0x628   : > { %v17127_v40 = vld [vmem:[%s24342_s9 + $0x2c] ss:$60 sps:$4 sm:$0xff]  }
 0x629   : > { %v21257_v51 = vpop.f32.mrf.mxu0  ;;  %7421 = vmatmul.mubr.bf16.gmra.mxu1 %v17117_v52  ;;  %v24589_v52 = vld [vmem:[#allocation21_spill] sm:$0xff] }
 0x62a   : > { %v6459_v45 = vpack.c.bf16 %v21257_v51, %v21243_v35  ;;  %15184 = vmatpush3.bf16.msra.mxu0 %v20820_v55  ;;  %7428 = vmatprep.mubr.bf16.mxu1 %v17124_v5  ;;  %v6766_v55 = vsel %vm6563_vm2, %v6547_v11, %v20922_v18  ;;  %v17108_v18 = vld [vmem:[%s24342_s9 + $0x90] ss:$60 sps:$4 sm:$0xff]   ;;  %v24590_v5 = vpack.c.bf16 %v24588_v59, %v24589_v52  ;;  %v17149_v35 = vld [vmem:[%s24346_s13 + $0x1b8] ss:$36 sps:$4 sm:$0xff]  }
 0x62b   : > { %v16088_v33 = vpop.f32.mrf.mxu0  ;;  %15249 = vmatprep.subr.bf16.mxu0 %v6730_v25  ;;  %v24593_v25 = vld [vmem:[#allocation24_spill] sm:$0xff] }
 0x62d   : > { %v21273_v41 = vpop.f32.mrf.mxu0  ;;  %7349 = vmatmul.mubr.bf16.vlgmr.msra.gmra.mxu0 %v17103_v62  ;;  %v24592_v62 = vld [vmem:[#allocation14_spill] sm:$0xff] }
 0x62e   : > { %15250 = vmatpush3.bf16.msra.mxu0 %v6766_v55  ;;  %7356 = vmatprep.mubr.bf16.mxu0 %v17110_v31  ;;  %v24594_v31 = vpack.c.bf16 %v24592_v62, %v24593_v25 }
 0x62f   : > { %v16091_v13 = vpop.f32.mrf.mxu0  ;;  %15251 = vmatprep.subr.bf16.mxu0 %v6728_v50  ;;  %v24597_v50 = vld [vmem:[#allocation20_spill] sm:$0xff] }
 0x630   : > { %v17132_v13 = vld [vmem:[%s24342_s9 + $0xa4] ss:$60 sps:$4 sm:$0xff]  }
 0x631   : > { %v21284_v38 = vpop.f32.mrf.mxu0  ;;  %7429 = vmatmul.mubr.bf16.gmra.mxu1 %v17122_v23  ;;  %v17125_v23 = vld [vmem:[%s24342_s9 + $0x28] ss:$60 sps:$4 sm:$0xff]  }
 0x632   : > { %v6468_v7 = vpack.c.bf16 %v21284_v38, %v21273_v41  ;;  %15252 = vmatpush3.bf16.msra.mxu0 %v6538_v17  ;;  %7436 = vmatprep.mubr.bf16.mxu1 %v14073_v29  ;;  %v24598_v29 = vpack.c.bf16 %v24596_v37, %v24597_v50  ;;  %v17145_v37 = vld [vmem:[%s24342_s9 + $0xb0] ss:$60 sps:$4 sm:$0xff]   ;;  %v17142_v41 = vld [vmem:[%s24346_s13 + $0x200] ss:$36 sps:$4 sm:$0xff]  }
 0x633   : > { %v16092_v48 = vpop.f32.mrf.mxu0  ;;  %15253 = vmatprep.subr.bf16.mxu0 %v24579_v19  ;;  %v17130_v19 = vld [vmem:[%s24342_s9 + $0xa0] ss:$60 sps:$4 sm:$0xff]  }
 0x634   : > { %v17151_v38 = vld [vmem:[%s24346_s13 + $0x1bc] ss:$36 sps:$4 sm:$0xff]  }
 0x635   : > { %v21297_v14 = vpop.f32.mrf.mxu0  ;;  %7357 = vmatmul.mubr.bf16.gmra.mxu0 %v17108_v18 }
 0x636   : > { %15254 = vmatpush3.bf16.msra.mxu0 %v6529_v2  ;;  %7364 = vmatprep.mubr.bf16.mxu0 %v17116_v47  ;;  %v17135_v2 = vld [vmem:[%s24342_s9 + $0x11c] ss:$60 sps:$4 sm:$0xff]  }
 0x637   : > { %v16095_v43 = vpop.f32.mrf.mxu0  ;;  %15255 = vmatprep.subr.bf16.mxu0 %v24580_v4  ;;  %v6821_v4 = vld [vmem:[%s24342_s9 + $0x190] sm:$0xff] }
 0x638   : > { %v14075_v57 = vcombine.high %v6821_v4, %v6821_v4 }
 0x639   : > { %v21308_v27 = vpop.f32.mrf.mxu0  ;;  %7437 = vmatmul.mubr.bf16.gmra.mxu1 %v14072_v49 }
 0x63a   : > { %v6477_v28 = vpack.c.bf16 %v21308_v27, %v21297_v14  ;;  %15256 = vmatpush3.bf16.msra.mxu0 %v6520_v42  ;;  %7540 = vmatprep.mubr.bf16.mxu1 %v17140_v20  ;;  %v17138_v14 = vld [vmem:[%s24342_s9 + $0x30] ss:$60 sps:$4 sm:$0xff]  }
 0x63b   : > { %v16096_v46 = vpop.f32.mrf.mxu0  ;;  %15257 = vmatprep.subr.bf16.mxu0 %v24583_v10  ;;  %v14074_v10 = vcombine.low %v6821_v4, %v6821_v4 }
 0x63d   : > { %v21316_v15 = vpop.f32.mrf.mxu0  ;;  %7365 = vmatmul.mubr.bf16.gmra.mxu0 %v17114_v3 }
 0x63e   : > { %15258 = vmatpush3.bf16.msra.mxu0 %v24586_v0  ;;  %7372 = vmatprep.mubr.bf16.mxu0 %v14071_v63 }
 0x63f   : > { %v16099_v61 = vpop.f32.mrf.mxu0  ;;  %15259 = vmatprep.subr.bf16.mxu0 %v24587_v54 }
 0x641   : > { %v21322_v58 = vpop.f32.mrf.mxu0 }
 0x642   : > { %v6486_v12 = vpack.c.bf16 %v21322_v58, %v21316_v15  ;;  %15260 = vmatpush3.bf16.msra.mxu0 %v24590_v5 }
 0x643   : > { %v16100_v8 = vpop.f32.mrf.mxu0  ;;  %15261 = vmatprep.subr.bf16.mxu0 %v24591_v6 }
 0x645   : > { %v21333_v11 = vpop.f32.mrf.mxu0  ;;  %7373 = vmatmul.mubr.bf16.gmra.mxu0 %v14070_v60 }
 0x646   : > { %15262 = vmatpush3.bf16.msra.mxu0 %v24594_v31  ;;  %7476 = vmatprep.mubr.bf16.mxu0 %v17127_v40  ;;  %v17144_v31 = vld [vmem:[%s24346_s13 + $0x204] ss:$36 sps:$4 sm:$0xff]  }
 0x647   : > { %v16103_v33 = vpop.f32.mrf.mxu0  ;;  %15263 = vmatprep.subr.bf16.mxu0 %v24595_v36 }
 0x649   : > { %v21339_v55 = vpop.f32.mrf.mxu0 }
 0x64a   : > { %15264 = vmatpush3.bf16.msra.mxu0 %v24598_v29  ;;  %v17179_v29 = vld [vmem:[%s24342_s9 + $0x128] ss:$60 sps:$4 sm:$0xff]  }
 0x64b   : > { %v16104_v17 = vpop.f32.mrf.mxu0 }
 0x64d   : > { %v21356_v18 = vpop.f32.mrf.mxu0  ;;  %7477 = vmatmul.mubr.bf16.vlgmr.msra.gmra.mxu0 %v17125_v23 }
 0x64e   : > { %7484 = vmatprep.mubr.bf16.mxu0 %v17132_v13 }
 0x64f   : > { %v16107_v47 = vpop.f32.mrf.mxu0 }
 0x650   : > { %v17158_v47 = vld [vmem:[%s24346_s13 + $0x170] ss:$36 sps:$4 sm:$0xff]  }
 0x651   : > { %v21358_v48 = vpop.f32.mrf.mxu0 }
 0x652   : > { %v6504_v56 = vpack.c.bf16 %v21358_v48, %v21356_v18  ;;  %v17166_v18 = vld [vmem:[%s24346_s13 + $0x12c] ss:$36 sps:$4 sm:$0xff]  }
 0x653   : > { %v16108_v49 = vpop.f32.mrf.mxu0 }
 0x654   : > { %v6495_v49 = vpack.c.bf16 %v21339_v55, %v21333_v11  ;;  %v21440_v11 = vld [vmem:[%s24344_s11] ss:$0 sm:$0xff] }
 0x655   : > { %v6395_v20 = vpop.f32.mrf.mxu0  ;;  %7485 = vmatmul.mubr.bf16.gmra.mxu0 %v17130_v19 }
 0x656   : > { %7492 = vmatprep.mubr.bf16.mxu0 %v17135_v2  ;;  %v21425_v2 = vld [vmem:[%s21354_s23 + $0x4] ss:$8 sps:$4 sm:$0xff]  }
 0x657   : > { %v16111_v43 = vpop.f32.mrf.mxu0 }
 0x659   : > { %v6398_v22 = vpop.f32.mrf.mxu0 }
 0x65a   : > { %v6513_v13 = vpack.c.bf16 %v6398_v22, %v6395_v20  ;;  %v17173_v20 = vld [vmem:[%s24346_s13 + $0xe0] ss:$36 sps:$4 sm:$0xff]  }
 0x65b   : > { %v16112_v42 = vpop.f32.mrf.mxu0  ;;  %v17182_v22 = vld [vmem:[%s24346_s13 + $0x9c] ss:$36 sps:$4 sm:$0xff]  }
 0x65d   : > { %v6403_v3 = vpop.f32.mrf.mxu0  ;;  %7493 = vmatmul.mubr.bf16.gmra.mxu0 %v17133_v44 }
 0x65e   : > { %7500 = vmatprep.mubr.bf16.mxu0 %v14075_v57 }
 0x65f   : > { %v16115_v63 = vpop.f32.mrf.mxu0 }
 0x660   : > { %v17180_v63 = vld [vmem:[%s24346_s13 + $0x98] ss:$36 sps:$4 sm:$0xff]  }
 0x661   : > { %v6406_v46 = vpop.f32.mrf.mxu0 }
 0x662   : > { %v6522_v36 = vpack.c.bf16 %v6406_v46, %v6403_v3 }
 0x663   : > { %v16116_v9 = vpop.f32.mrf.mxu0 }
 0x665   : > { %v6411_v0 = vpop.f32.mrf.mxu0  ;;  %7501 = vmatmul.mubr.bf16.gmra.mxu0 %v14074_v10 }
 0x666   : > { %16131 = vmatprep.mubr.msk.bf16.mxu0 %vm7108_vm3, %v17141_v39 }
 0x667   : > { %v16119_v61 = vpop.f32.mrf.mxu0 }
 0x668   : > { %v17157_v61 = vld [vmem:[%s24342_s9 + $0xac] ss:$60 sps:$4 sm:$0xff]  }
 0x669   : > { %v6414_v54 = vpop.f32.mrf.mxu0 }
 0x66a   : > { %v6531_v6 = vpack.c.bf16 %v6414_v54, %v6411_v0  ;;  %v17146_v0 = vld [vmem:[%s24346_s13 + $0x1f8] ss:$36 sps:$4 sm:$0xff]  }
 0x66b   : > { %v16120_v60 = vpop.f32.mrf.mxu0 }
 0x66d   : > { %v6419_v59 = vpop.f32.mrf.mxu0 }
 0x66f   : > { %v16123_v52 = vpop.f32.mrf.mxu0 }
 0x671   : > { %v6422_v5 = vpop.f32.mrf.mxu0 }
 0x672   : > { %v6540_v40 = vpack.c.bf16 %v6422_v5, %v6419_v59  ;;  %v17154_v59 = vld [vmem:[%s24346_s13 + $0x1b4] ss:$36 sps:$4 sm:$0xff]  }
 0x673   : > { %v16124_v8 = vpop.f32.mrf.mxu0 }
 0x674   : > { %15289 = vmatprep.subr.bf16.mxu1 %v6540_v40  ;;  %v17197_v8 = vld [vmem:[%s24346_s13 + $0xc] ss:$36 sps:$4 sm:$0xff]  }
 0x675   : > { %v6427_v62 = vpop.f32.mrf.mxu0  ;;  %15290 = vmatpush3.bf16.msra.mxu1 %v6468_v7 }
 0x676   : > { %v6549_v25 = vpack.c.bf16 %v6427_v62, %v6427_v62  ;;  %15291 = vmatprep.subr.bf16.mxu1 %v6531_v6 }
 0x677   : > { %v16127_v33 = vpop.f32.mrf.mxu0 }
 0x678   : > { %v7122_v23 = vsel %vm6563_vm2, %v6549_v25, 0  ;;  %16301 = vmatprep.subr.msk.bf16.mxu0 %vm6563_vm2, %v6549_v25 }
 0x679   : > { %v6430_v50 = vpop.f32.mrf.mxu0  ;;  %15292 = vmatpush3.bf16.msra.mxu1 %v6459_v45  ;;  %16130 = vmatpush3.bf16.msra.mxu0 %v7122_v23  ;;  %v17160_v45 = vld [vmem:[%s24346_s13 + $0x174] ss:$36 sps:$4 sm:$0xff]   ;;  %v17163_v23 = vld [vmem:[%s24346_s13 + $0x16c] ss:$36 sps:$4 sm:$0xff]  }
 0x67a   : > { %15293 = vmatprep.subr.bf16.mxu1 %v6522_v36  ;;  %8667 = vmatprep.subr.bf16.mxu0 %v17144_v31  ;;  %v17152_v31 = vld [vmem:[%s24346_s13 + $0x1b0] ss:$36 sps:$4 sm:$0xff]  }
 0x67b   : > { %v16128_v7 = vpop.f32.mrf.mxu0 }
 0x67c   : > { %16132 = vmatmul.mubr.msk.bf16.vlgmr.msra.gmra.mxu0 %vm7108_vm3, %v17145_v37  ;;  %v17195_v37 = vld [vmem:[%s24346_s13 + $0x8] ss:$36 sps:$4 sm:$0xff]  }
 0x67d   : > { %15294 = vmatpush3.bf16.msra.mxu1 %v6450_v24  ;;  %8668 = vmatpush1.bf16.msra.mxu0 %v17142_v41  ;;  %v15065_v51 = vpop.f32.mrf.mxu1 }
 0x67e   : > { %15295 = vmatprep.subr.bf16.mxu1 %v6513_v13  ;;  %8669 = vmatprep.subr.bf16.mxu0 %v17151_v38  ;;  %v17203_v38 = vld [vmem:[%s24346_s13 + $0x444] ss:$36 sps:$4 sm:$0xff]  }
 0x67f   : > { %16135 = vmatprep.mubr.msk.bf16.mxu0 %vm7108_vm3, %v17179_v29  ;;  %v15066_v17 = vpop.f32.mrf.mxu1  ;;  %v17155_v13 = vld [vmem:[%s24342_s9 + $0xa8] ss:$60 sps:$4 sm:$0xff]  }
 0x680   : > { %v15067_v24 = vadd.f32 %v15066_v17, %v15065_v51  ;;  %v17172_v17 = vld [vmem:[%s24342_s9 + $0x124] ss:$60 sps:$4 sm:$0xff]  }
 0x681   : > { %15296 = vmatpush3.bf16.msra.mxu1 %v6441_v32  ;;  %8670 = vmatpush1.bf16.msra.mxu0 %v17149_v35  ;;  %v15068_v19 = vpop.f32.mrf.mxu1  ;;  %v17175_v32 = vld [vmem:[%s24346_s13 + $0xe4] ss:$36 sps:$4 sm:$0xff]  }
 0x682   : > { %15297 = vmatprep.subr.bf16.mxu1 %v6504_v56  ;;  %8671 = vmatprep.subr.bf16.mxu0 %v17160_v45  ;;  %v7159_v44 = vadd.f32 %v15067_v24, %v21440_v11  ;;  %v17161_v45 = vld [vmem:[%s24346_s13 + $0x168] ss:$36 sps:$4 sm:$0xff]  }
 0x683   : > { %v15069_v48 = vpop.f32.mrf.mxu1  ;;  %v17169_v24 = vld [vmem:[%s24346_s13 + $0x124] ss:$36 sps:$4 sm:$0xff]  }
 0x684   : > { %16136 = vmatmul.mubr.msk.bf16.gmra.mxu0 %vm7108_vm3, %v17183_v30  ;;  %v15070_v57 = vadd.f32 %v15069_v48, %v15068_v19 }
 0x685   : > { %15298 = vmatpush3.bf16.msra.mxu1 %v21194_v26  ;;  %8672 = vmatpush1.bf16.msra.mxu0 %v17158_v47  ;;  %v15071_v53 = vpop.f32.mrf.mxu1  ;;  %v17201_v47 = vld [vmem:[%s24346_s13 + $0x440] ss:$36 sps:$4 sm:$0xff]  }
 0x686   : > { %15299 = vmatprep.subr.bf16.mxu1 %v6495_v49  ;;  %8673 = vmatprep.subr.bf16.mxu0 %v17166_v18  ;;  %v7162_v46 = vadd.f32 %v15070_v57, %v21440_v11  ;;  %v17209_v49 = vld [vmem:[%s24346_s13 + $0x3fc] ss:$36 sps:$4 sm:$0xff]  }
 0x687   : > { %v15072_v55 = vpop.f32.mrf.mxu1  ;;  %8699 = vmatprep.mubr.bf16.mxu0 %v21425_v2 }
 0x688   : > { %v15073_v26 = vadd.f32 %v15072_v55, %v15071_v53  ;;  %v17167_v55 = vld [vmem:[%s24346_s13 + $0x120] ss:$36 sps:$4 sm:$0xff]  }
 0x689   : > { %15300 = vmatpush3.bf16.msra.mxu1 %v21190_v16  ;;  %8674 = vmatpush1.bf16.msra.mxu0 %v17164_v21  ;;  %v15074_v43 = vpop.f32.mrf.mxu1  ;;  %v15105_v4 = vpop.f32.mrf.mxu0 }
 0x68a   : > { %15301 = vmatprep.subr.bf16.mxu1 %v6486_v12  ;;  %8675 = vmatprep.subr.bf16.mxu0 %v17175_v32  ;;  %v17148_v12 = vld [vmem:[%s24346_s13 + $0x1fc] ss:$36 sps:$4 sm:$0xff]   ;;  %v7167_v52 = vadd.f32 %v15073_v26, %v21440_v11 }
 0x68b   : > { %v15075_v16 = vpop.f32.mrf.mxu1  ;;  %v15106_v42 = vpop.f32.mrf.mxu0 }
 0x68c   : > { %v15107_v3 = vadd.f32 %v15106_v42, %v15105_v4  ;;  %v15076_v5 = vadd.f32 %v15075_v16, %v15074_v43  ;;  %v17178_v43 = vld [vmem:[%s24346_s13 + $0xdc] ss:$36 sps:$4 sm:$0xff]   ;;  %v17215_v16 = vld [vmem:[%s24346_s13 + $0x3b4] ss:$36 sps:$4 sm:$0xff]  }
 0x68d   : > { %15302 = vmatpush3.bf16.msra.mxu1 %v21168_v1  ;;  %8676 = vmatpush1.bf16.msra.mxu0 %v17173_v20  ;;  %v15077_v15 = vpop.f32.mrf.mxu1  ;;  %v15108_v58 = vpop.f32.mrf.mxu0  ;;  %v17191_v1 = vld [vmem:[%s24346_s13 + $0x54] ss:$36 sps:$4 sm:$0xff]  }
 0x68e   : > { %15303 = vmatprep.subr.bf16.mxu1 %v6477_v28  ;;  %8677 = vmatprep.subr.bf16.mxu0 %v17182_v22  ;;  %v21468_v10 = vadd.f32 %v15107_v3, %v7159_v44  ;;  %v7170_v50 = vadd.f32 %v15076_v5, %v21440_v11  ;;  %v6822_v4 = vld [vmem:[%s24342_s9 + $0x198] sm:$0xff]  ;;  %v17194_v5 = vld [vmem:[%s24346_s13 + $0x4c] ss:$36 sps:$4 sm:$0xff]  }
 0x68f   : > { %v15078_v39 = vpop.f32.mrf.mxu1  ;;  %v15109_v9 = vpop.f32.mrf.mxu0  ;;  %v17207_v22 = vld [vmem:[%s24346_s13 + $0x3f8] ss:$36 sps:$4 sm:$0xff]  }
 0x690   : > { %v15079_v27 = vadd.f32 %v15078_v39, %v15077_v15  ;;  %v15110_v28 = vadd.f32 %v15109_v9, %v15108_v58  ;;  %v17186_v9 = vld [vmem:[%s24346_s13 + $0x94] ss:$36 sps:$4 sm:$0xff]  }
 0x691   : > { %15304 = vmatpush3.bf16.msra.mxu1 %v21150_v34  ;;  %8678 = vmatpush1.bf16.msra.mxu0 %v17180_v63  ;;  %v15080_v54 = vpop.f32.mrf.mxu1  ;;  %v15111_v60 = vpop.f32.mrf.mxu0  ;;  %v17189_v34 = vld [vmem:[%s24346_s13 + $0x50] ss:$36 sps:$4 sm:$0xff]   ;;  %v17170_v63 = vld [vmem:[%s24342_s9 + $0x120] ss:$60 sps:$4 sm:$0xff]  }
 0x692   : > { %8594 = vmatprep.subr.bf16.mxu1 %v17148_v12  ;;  %8679 = vmatprep.subr.bf16.mxu0 %v17191_v1  ;;  %v21487_v40 = vadd.f32 %v15110_v28, %v7162_v46  ;;  %v7175_v19 = vadd.f32 %v15079_v27, %v21440_v11  ;;  %v17176_v12 = vld [vmem:[%s24346_s13 + $0xd8] ss:$36 sps:$4 sm:$0xff]   ;;  %v14077_v1 = vcombine.high %v6822_v4, %v6822_v4 }
 0x693   : > { %v15081_v6 = vpop.f32.mrf.mxu1  ;;  %v15112_v62 = vpop.f32.mrf.mxu0 }
 0x694   : > { %7541 = vmatmul.mubr.bf16.vlgmr.msra.gmra.mxu1 %v17138_v14  ;;  %v15113_v25 = vadd.f32 %v15112_v62, %v15111_v60  ;;  %v15082_v18 = vadd.f32 %v15081_v6, %v15080_v54  ;;  %v17213_v14 = vld [vmem:[%s24346_s13 + $0x3b0] ss:$36 sps:$4 sm:$0xff]  }
 0x695   : > { %8595 = vmatpush1.bf16.msra.mxu1 %v17146_v0  ;;  %7548 = vmatprep.mubr.bf16.mxu1 %v17157_v61  ;;  %v15083_v33 = vpop.f32.mrf.mxu1  ;;  %v15114_v36 = vpop.f32.mrf.mxu0  ;;  %v17221_v61 = vld [vmem:[%s24346_s13 + $0x36c] ss:$36 sps:$4 sm:$0xff]  }
 0x696   : > { %8596 = vmatprep.subr.bf16.mxu1 %v17154_v59  ;;  %8680 = vmatpush1.bf16.msra.mxu0 %v17189_v34  ;;  %v21502_v41 = vadd.f32 %v15113_v25, %v7167_v52  ;;  %v7178_v44 = vadd.f32 %v15082_v18, %v21440_v11  ;;  %v17227_v25 = vld [vmem:[%s24346_s13 + $0x324] ss:$36 sps:$4 sm:$0xff]  }
 0x697   : > { %8681 = vmatprep.subr.bf16.mxu0 %v17197_v8  ;;  %v15084_v7 = vpop.f32.mrf.mxu1  ;;  %v15115_v29 = vpop.f32.mrf.mxu0  ;;  %v17219_v8 = vld [vmem:[%s24346_s13 + $0x368] ss:$36 sps:$4 sm:$0xff]  }
 0x698   : > { %v15085_v35 = vadd.f32 %v15084_v7, %v15083_v33  ;;  %v15116_v51 = vadd.f32 %v15115_v29, %v15114_v36  ;;  %v14076_v36 = vcombine.low %v6822_v4, %v6822_v4  ;;  %v17233_v29 = vld [vmem:[%s24346_s13 + $0x2dc] ss:$36 sps:$4 sm:$0xff]   ;;  %v17243_v4 = vld [vmem:[%s24346_s13 + $0x248] ss:$36 sps:$4 sm:$0xff]  }
 0x699   : > { %8597 = vmatpush1.bf16.msra.mxu1 %v17152_v31  ;;  %v15086_v56 = vpop.f32.mrf.mxu1  ;;  %v15117_v30 = vpop.f32.mrf.mxu0 }
 0x69a   : > { %8598 = vmatprep.subr.bf16.mxu1 %v17163_v23  ;;  %8682 = vmatpush1.bf16.msra.mxu0 %v17195_v37  ;;  %v21523_v48 = vadd.f32 %v15116_v51, %v7170_v50  ;;  %v7183_v27 = vadd.f32 %v15085_v35, %v21440_v11  ;;  %v17184_v11 = vld [vmem:[%s24346_s13 + $0x90] ss:$36 sps:$4 sm:$0xff]   ;;  %v17192_v37 = vld [vmem:[%s24346_s13 + $0x48] ss:$36 sps:$4 sm:$0xff]   ;;  %v17198_v51 = vld [vmem:[%s24346_s13] ss:$36 sps:$4 sm:$0xff]  }
 0x69b   : > { %8683 = vmatprep.subr.bf16.mxu0 %v17203_v38  ;;  %v15087_v21 = vpop.f32.mrf.mxu1  ;;  %v15118_v53 = vpop.f32.mrf.mxu0  ;;  %v17225_v38 = vld [vmem:[%s24346_s13 + $0x320] ss:$36 sps:$4 sm:$0xff]  }
 0x69c   : > { %7549 = vmatmul.mubr.bf16.gmra.mxu1 %v17155_v13  ;;  %v15119_v32 = vadd.f32 %v15118_v53, %v15117_v30  ;;  %v17239_v30 = vld [vmem:[%s24346_s13 + $0x294] ss:$36 sps:$4 sm:$0xff]   ;;  %v17245_v53 = vld [vmem:[%s24346_s13 + $0x24c] ss:$36 sps:$4 sm:$0xff]  }
 0x69d   : > { %8599 = vmatpush1.bf16.msra.mxu1 %v17161_v45  ;;  %7556 = vmatprep.mubr.bf16.mxu1 %v17172_v17  ;;  %v15145_v26 = vpop.f32.mrf.mxu1  ;;  %v15120_v20 = vpop.f32.mrf.mxu0  ;;  %v17231_v17 = vld [vmem:[%s24346_s13 + $0x2d8] ss:$36 sps:$4 sm:$0xff]  }
 0x69e   : > { %8600 = vmatprep.subr.bf16.mxu1 %v17169_v24  ;;  %8684 = vmatpush2.bf16.msra.mxu0 %v17201_v47  ;;  %v21541_v57 = vadd.f32 %v15119_v32, %v7175_v19  ;;  %v17204_v19 = vld [vmem:[%s24346_s13 + $0x438] ss:$36 sps:$4 sm:$0xff]  }
 0x69f   : > { %8685 = vmatprep.subr.bf16.mxu0 %v17209_v49  ;;  %v15146_v42 = vpop.f32.mrf.mxu1  ;;  %v15121_v3 = vpop.f32.mrf.mxu0  ;;  %v17212_v49 = vld [vmem:[%s24346_s13 + $0x3f4] ss:$36 sps:$4 sm:$0xff]  }
 0x6a0   : > { %v15147_v15 = vadd.f32 %v15146_v42, %v15145_v26  ;;  %v15122_v58 = vadd.f32 %v15121_v3, %v15120_v20  ;;  %v17210_v26 = vld [vmem:[%s24346_s13 + $0x3f0] ss:$36 sps:$4 sm:$0xff]   ;;  %v17216_v42 = vld [vmem:[%s24346_s13 + $0x3a8] ss:$36 sps:$4 sm:$0xff]  }
 0x6a1   : > { %8601 = vmatpush1.bf16.msra.mxu1 %v17167_v55  ;;  %v15148_v46 = vpop.f32.mrf.mxu1  ;;  %v15123_v39 = vpop.f32.mrf.mxu0  ;;  %v21649_v3 = vld [vmem:[%s21354_s23] ss:$8 sps:$4 sm:$0xff]  }
 0x6a2   : > { %8602 = vmatprep.subr.bf16.mxu1 %v17178_v43  ;;  %8686 = vmatpush2.bf16.msra.mxu0 %v17207_v22  ;;  %v21560_v28 = vadd.f32 %v15147_v15, %v21468_v10  ;;  %v21562_v0 = vadd.f32 %v15122_v58, %v7178_v44  ;;  %v17218_v43 = vld [vmem:[%s24346_s13 + $0x3ac] ss:$36 sps:$4 sm:$0xff]   ;;  %v17254_v44 = vld [vmem:[%s24346_s13 + $0x214] ss:$36 sps:$4 sm:$0xff]   ;;  %v17224_v15 = vld [vmem:[%s24346_s13 + $0x364] ss:$36 sps:$4 sm:$0xff]  }
 0x6a3   : > { %8687 = vmatprep.subr.bf16.mxu0 %v17215_v16  ;;  %v15149_v54 = vpop.f32.mrf.mxu1  ;;  %v15124_v60 = vpop.f32.mrf.mxu0  ;;  %v17252_v58 = vld [vmem:[%s24346_s13 + $0x210] ss:$36 sps:$4 sm:$0xff]  }
 0x6a4   : > { %7557 = vmatmul.mubr.bf16.gmra.mxu1 %v17170_v63  ;;  %v15150_v59 = vadd.f32 %v15149_v54, %v15148_v46  ;;  %v15125_v34 = vadd.f32 %v15124_v60, %v15123_v39  ;;  %v21664_v46 = vld [vmem:[%s21354_s23 + $0x14] ss:$8 sps:$4 sm:$0xff]   ;;  %v21684_v54 = vld [vmem:[%s21354_s23 + $0x10] ss:$8 sps:$4 sm:$0xff]  }
 0x6a5   : > { %8603 = vmatpush1.bf16.msra.mxu1 %v17176_v12  ;;  %7564 = vmatprep.mubr.bf16.mxu1 %v14077_v1  ;;  %v15151_v10 = vpop.f32.mrf.mxu1  ;;  %v15126_v52 = vpop.f32.mrf.mxu0  ;;  %v17260_v1 = vld [vmem:[%s24346_s13 + $0x1cc] ss:$36 sps:$4 sm:$0xff]   ;;  %v17236_v60 = vld [vmem:[%s24346_s13 + $0x2d4] ss:$36 sps:$4 sm:$0xff]  }
 0x6a6   : > { %8604 = vmatprep.subr.bf16.mxu1 %v17186_v9  ;;  %8688 = vmatpush2.bf16.msra.mxu0 %v17213_v14  ;;  %v21577_v6 = vadd.f32 %v15150_v59, %v21487_v40  ;;  %v21579_v62 = vadd.f32 %v15125_v34, %v7183_v27  ;;  %v17200_v40 = vld [vmem:[%s24346_s13 + $0x4] ss:$36 sps:$4 sm:$0xff]   ;;  %v17230_v14 = vld [vmem:[%s24346_s13 + $0x31c] ss:$36 sps:$4 sm:$0xff]   ;;  %v17242_v52 = vld [vmem:[%s24346_s13 + $0x28c] ss:$36 sps:$4 sm:$0xff]  }
 0x6a7   : > { %8689 = vmatprep.subr.bf16.mxu0 %v17221_v61  ;;  %v15152_v31 = vpop.f32.mrf.mxu1  ;;  %v15127_v33 = vpop.f32.mrf.mxu0  ;;  %v17222_v9 = vld [vmem:[%s24346_s13 + $0x360] ss:$36 sps:$4 sm:$0xff]   ;;  %v17258_v27 = vld [vmem:[%s24346_s13 + $0x1c8] ss:$36 sps:$4 sm:$0xff]   ;;  %v17228_v61 = vld [vmem:[%s24346_s13 + $0x318] ss:$36 sps:$4 sm:$0xff]  }
 0x6a8   : > { %v15153_v23 = vadd.f32 %v15152_v31, %v15151_v10  ;;  %v17267_v59 = vld [vmem:[%s24346_s13 + $0x180] ss:$36 sps:$4 sm:$0xff]   ;;  %v17234_v10 = vld [vmem:[%s24346_s13 + $0x2d0] ss:$36 sps:$4 sm:$0xff]  }
 0x6a9   : > { %8605 = vmatpush1.bf16.msra.mxu1 %v17184_v11  ;;  %v15154_v50 = vpop.f32.mrf.mxu1  ;;  %v17275_v34 = vld [vmem:[%s24346_s13 + $0x13c] ss:$36 sps:$4 sm:$0xff]   ;;  %v21696_v11 = vld [vmem:[%s21354_s23 + $0x24] ss:$8 sps:$4 sm:$0xff]   ;;  %v17282_v33 = vld [vmem:[%s24346_s13 + $0xf0] ss:$36 sps:$4 sm:$0xff]  }
 0x6aa   : > { %8606 = vmatprep.subr.bf16.mxu1 %v17194_v5  ;;  %8690 = vmatpush2.bf16.msra.mxu0 %v17219_v8  ;;  %v21594_v7 = vadd.f32 %v15153_v23, %v21502_v41  ;;  %v17206_v41 = vld [vmem:[%s24346_s13 + $0x43c] ss:$36 sps:$4 sm:$0xff]   ;;  %v17284_v8 = vld [vmem:[%s24346_s13 + $0xf4] ss:$36 sps:$4 sm:$0xff]   ;;  %v17248_v31 = vld [vmem:[%s24346_s13 + $0x244] ss:$36 sps:$4 sm:$0xff]  }
 0x6ab   : > { %8691 = vmatprep.subr.bf16.mxu0 %v17227_v25  ;;  %v15155_v13 = vpop.f32.mrf.mxu1  ;;  %v17273_v5 = vld [vmem:[%s24346_s13 + $0x138] ss:$36 sps:$4 sm:$0xff]   ;;  %v21716_v25 = vld [vmem:[%s21354_s23 + $0x20] ss:$8 sps:$4 sm:$0xff]  }
 0x6ac   : > { %7565 = vmatmul.mubr.bf16.gmra.mxu1 %v14076_v36  ;;  %v15156_v35 = vadd.f32 %v15155_v13, %v15154_v50  ;;  %v17290_v36 = vld [vmem:[%s24346_s13 + $0xac] ss:$36 sps:$4 sm:$0xff]   ;;  %v21728_v23 = vld [vmem:[%s21354_s23 + $0x34] ss:$8 sps:$4 sm:$0xff]   ;;  %v17263_v13 = vld [vmem:[%s24346_s13 + $0x1c4] ss:$36 sps:$4 sm:$0xff]  }
 0x6ad   : > { %8607 = vmatpush1.bf16.msra.mxu1 %v17192_v37  ;;  %8626 = vmatprep.mubr.bf16.mxu1 %v21425_v2  ;;  %v15157_v45 = vpop.f32.mrf.mxu1  ;;  %v17246_v37 = vld [vmem:[%s24346_s13 + $0x240] ss:$36 sps:$4 sm:$0xff]   ;;  %v17257_v50 = vld [vmem:[%s24346_s13 + $0x20c] ss:$36 sps:$4 sm:$0xff]  }
 0x6ae   : > { %8608 = vmatprep.subr.bf16.mxu1 %v17200_v40  ;;  %8692 = vmatpush2.bf16.msra.mxu0 %v17225_v38  ;;  %v21610_v56 = vadd.f32 %v15156_v35, %v21523_v48  ;;  %v17237_v48 = vld [vmem:[%s24346_s13 + $0x290] ss:$36 sps:$4 sm:$0xff]   ;;  %v17288_v40 = vld [vmem:[%s24346_s13 + $0xa8] ss:$36 sps:$4 sm:$0xff]  }
 0x6af   : > { %8693 = vmatprep.subr.bf16.mxu0 %v17233_v29  ;;  %v15158_v24 = vpop.f32.mrf.mxu1  ;;  %v17299_v38 = vld [vmem:[%s24346_s13 + $0x64] ss:$36 sps:$4 sm:$0xff]   ;;  %v21751_v35 = vld [vmem:[%s21354_s23 + $0x30] ss:$8 sps:$4 sm:$0xff]  }
 0x6b0   : > { %v15159_v47 = vadd.f32 %v15158_v24, %v15157_v45  ;;  %v17255_v29 = vld [vmem:[%s24346_s13 + $0x208] ss:$36 sps:$4 sm:$0xff]   ;;  %v17305_v45 = vld [vmem:[%s24346_s13 + $0x1c] ss:$36 sps:$4 sm:$0xff]   ;;  %v17311_v24 = vld [vmem:[%s24346_s13 + $0x454] ss:$36 sps:$4 sm:$0xff]  }
 0x6b1   : > { %8609 = vmatpush1.bf16.msra.mxu1 %v17198_v51  ;;  %v15160_v18 = vpop.f32.mrf.mxu1  ;;  %v17297_v51 = vld [vmem:[%s24346_s13 + $0x60] ss:$36 sps:$4 sm:$0xff]  }
 0x6b2   : > { %8610 = vmatprep.subr.bf16.mxu1 %v17206_v41  ;;  %8694 = vmatpush2.bf16.msra.mxu0 %v17231_v17  ;;  %v21625_v21 = vadd.f32 %v15159_v47, %v21541_v57  ;;  %v17261_v41 = vld [vmem:[%s24346_s13 + $0x1c0] ss:$36 sps:$4 sm:$0xff]   ;;  %v17270_v47 = vld [vmem:[%s24346_s13 + $0x178] ss:$36 sps:$4 sm:$0xff]  }
 0x6b3   : > { %8695 = vmatprep.subr.bf16.mxu0 %v17239_v30  ;;  %v15161_v32 = vpop.f32.mrf.mxu1  ;;  %v17272_v17 = vld [vmem:[%s24346_s13 + $0x17c] ss:$36 sps:$4 sm:$0xff]  }
 0x6b4   : > { %v15162_v55 = vadd.f32 %v15161_v32, %v15160_v18  ;;  %v17303_v30 = vld [vmem:[%s24346_s13 + $0x18] ss:$36 sps:$4 sm:$0xff]   ;;  %v17309_v18 = vld [vmem:[%s24346_s13 + $0x450] ss:$36 sps:$4 sm:$0xff]   ;;  %v17315_v32 = vld [vmem:[%s24346_s13 + $0x408] ss:$36 sps:$4 sm:$0xff]  }
 0x6b5   : > { %8611 = vmatpush2.bf16.msra.mxu1 %v17204_v19  ;;  %v15163_v20 = vpop.f32.mrf.mxu1  ;;  %v17278_v19 = vld [vmem:[%s24346_s13 + $0x134] ss:$36 sps:$4 sm:$0xff]  }
 0x6b6   : > { %8612 = vmatprep.subr.bf16.mxu1 %v17212_v49  ;;  %8696 = vmatpush2.bf16.msra.mxu0 %v17237_v48  ;;  %v21640_v22 = vadd.f32 %v15162_v55, %v21562_v0  ;;  %v17269_v0 = vld [vmem:[%s24346_s13 + $0x184] ss:$36 sps:$4 sm:$0xff]   ;;  %v17317_v49 = vld [vmem:[%s24346_s13 + $0x40c] ss:$36 sps:$4 sm:$0xff]  }
 0x6b7   : > { %8697 = vmatprep.subr.bf16.mxu0 %v17245_v53  ;;  %v15164_v57 = vpop.f32.mrf.mxu1  ;;  %v17276_v48 = vld [vmem:[%s24346_s13 + $0x130] ss:$36 sps:$4 sm:$0xff]   ;;  %v17323_v55 = vld [vmem:[%s24346_s13 + $0x3c4] ss:$36 sps:$4 sm:$0xff]  }
 0x6b8   : > { %v15165_v16 = vadd.f32 %v15164_v57, %v15163_v20  ;;  %v17287_v53 = vld [vmem:[%s24346_s13 + $0xec] ss:$36 sps:$4 sm:$0xff]  }
 0x6b9   : > { %8613 = vmatpush2.bf16.msra.mxu1 %v17210_v26  ;;  %v15166_v63 = vpop.f32.mrf.mxu1  ;;  %v17285_v26 = vld [vmem:[%s24346_s13 + $0xe8] ss:$36 sps:$4 sm:$0xff]  }
 0x6ba   : > { %8614 = vmatprep.subr.bf16.mxu1 %v17218_v43  ;;  %8698 = vmatpush2.bf16.msra.mxu0 %v17243_v4  ;;  %v21658_v12 = vadd.f32 %v15165_v16, %v21579_v62  ;;  %v17240_v62 = vld [vmem:[%s24346_s13 + $0x288] ss:$36 sps:$4 sm:$0xff]   ;;  %v17329_v16 = vld [vmem:[%s24346_s13 + $0x37c] ss:$36 sps:$4 sm:$0xff]  }
 0x6bb   : > { %8813 = vmatprep.subr.bf16.mxu0 %v17254_v44  ;;  %v15167_v39 = vpop.f32.mrf.mxu1  ;;  %v17293_v43 = vld [vmem:[%s24346_s13 + $0xa4] ss:$36 sps:$4 sm:$0xff]  }
 0x6bc   : > { %v17321_v44 = vld [vmem:[%s24346_s13 + $0x3c0] ss:$36 sps:$4 sm:$0xff]   ;;  %v17335_v39 = vld [vmem:[%s24346_s13 + $0x334] ss:$36 sps:$4 sm:$0xff]  }
 0x6bd   : > { %8615 = vmatpush2.bf16.msra.mxu1 %v17216_v42  ;;  %8700 = vmatmul.mubr.bf16.vlgmr.msra.gmra.mxu0 %v21649_v3  ;;  %v17291_v42 = vld [vmem:[%s24346_s13 + $0xa0] ss:$36 sps:$4 sm:$0xff]  }
 0x6be   : > { %8616 = vmatprep.subr.bf16.mxu1 %v17224_v15  ;;  %8814 = vmatpush1.bf16.msra.mxu0 %v17252_v58  ;;  %v17302_v15 = vld [vmem:[%s24346_s13 + $0x5c] ss:$36 sps:$4 sm:$0xff]  }
 0x6bf   : > { %8815 = vmatprep.subr.bf16.mxu0 %v17260_v1  ;;  %8709 = vmatprep.mubr.bf16.mxu0 %v21664_v46  ;;  %v17327_v1 = vld [vmem:[%s24346_s13 + $0x378] ss:$36 sps:$4 sm:$0xff]  }
 0x6c1   : > { %8617 = vmatpush2.bf16.msra.mxu1 %v17222_v9  ;;  %v17300_v9 = vld [vmem:[%s24346_s13 + $0x58] ss:$36 sps:$4 sm:$0xff]  }
 0x6c2   : > { %8618 = vmatprep.subr.bf16.mxu1 %v17230_v14  ;;  %8816 = vmatpush1.bf16.msra.mxu0 %v17258_v27  ;;  %v17308_v27 = vld [vmem:[%s24346_s13 + $0x14] ss:$36 sps:$4 sm:$0xff]  }
 0x6c3   : > { %8817 = vmatprep.subr.bf16.mxu0 %v17269_v0 }
 0x6c5   : > { %8619 = vmatpush2.bf16.msra.mxu1 %v17228_v61  ;;  %8710 = vmatmul.mubr.bf16.gmra.mxu0 %v21684_v54  ;;  %v17333_v61 = vld [vmem:[%s24346_s13 + $0x330] ss:$36 sps:$4 sm:$0xff]  }
 0x6c6   : > { %8620 = vmatprep.subr.bf16.mxu1 %v17236_v60  ;;  %8818 = vmatpush1.bf16.msra.mxu0 %v17267_v59  ;;  %v17341_v59 = vld [vmem:[%s24346_s13 + $0x2ec] ss:$36 sps:$4 sm:$0xff]  }
 0x6c7   : > { %8819 = vmatprep.subr.bf16.mxu0 %v17275_v34  ;;  %8719 = vmatprep.mubr.bf16.mxu0 %v21696_v11 }
 0x6c9   : > { %8621 = vmatpush2.bf16.msra.mxu1 %v17234_v10  ;;  %v17306_v10 = vld [vmem:[%s24346_s13 + $0x10] ss:$36 sps:$4 sm:$0xff]  }
 0x6ca   : > { %8622 = vmatprep.subr.bf16.mxu1 %v17242_v52  ;;  %8820 = vmatpush1.bf16.msra.mxu0 %v17273_v5  ;;  %v17314_v5 = vld [vmem:[%s24346_s13 + $0x44c] ss:$36 sps:$4 sm:$0xff]  }
 0x6cb   : > { %8821 = vmatprep.subr.bf16.mxu0 %v17284_v8 }
 0x6cd   : > { %8623 = vmatpush2.bf16.msra.mxu1 %v17240_v62  ;;  %8720 = vmatmul.mubr.bf16.gmra.mxu0 %v21716_v25 }
 0x6ce   : > { %8624 = vmatprep.subr.bf16.mxu1 %v17248_v31  ;;  %8822 = vmatpush1.bf16.msra.mxu0 %v17282_v33  ;;  %v17339_v31 = vld [vmem:[%s24346_s13 + $0x2e8] ss:$36 sps:$4 sm:$0xff]  }
 0x6cf   : > { %8823 = vmatprep.subr.bf16.mxu0 %v17290_v36  ;;  %8729 = vmatprep.mubr.bf16.mxu0 %v21728_v23  ;;  %v17347_v36 = vld [vmem:[%s24346_s13 + $0x2a4] ss:$36 sps:$4 sm:$0xff]  }
 0x6d1   : > { %8625 = vmatpush2.bf16.msra.mxu1 %v17246_v37 }
 0x6d2   : > { %8740 = vmatprep.subr.bf16.mxu1 %v17257_v50  ;;  %8824 = vmatpush1.bf16.msra.mxu0 %v17288_v40 }
 0x6d3   : > { %8825 = vmatprep.subr.bf16.mxu0 %v17299_v38  ;;  %v17320_v38 = vld [vmem:[%s24346_s13 + $0x404] ss:$36 sps:$4 sm:$0xff]  }
 0x6d4   : > { %8627 = vmatmul.mubr.bf16.vlgmr.msra.gmra.mxu1 %v21649_v3 }
 0x6d5   : > { %8741 = vmatpush1.bf16.msra.mxu1 %v17255_v29  ;;  %8636 = vmatprep.mubr.bf16.mxu1 %v21664_v46 }
 0x6d6   : > { %8742 = vmatprep.subr.bf16.mxu1 %v17263_v13  ;;  %8730 = vmatmul.mubr.bf16.gmra.mxu0 %v21751_v35 }
 0x6d7   : > { %8826 = vmatpush1.bf16.msra.mxu0 %v17297_v51  ;;  %8845 = vmatprep.mubr.bf16.mxu0 %v21425_v2  ;;  %v17345_v51 = vld [vmem:[%s24346_s13 + $0x2a0] ss:$36 sps:$4 sm:$0xff]  }
 0x6d8   : > { %8827 = vmatprep.subr.bf16.mxu0 %v17305_v45 }
 0x6d9   : > { %8743 = vmatpush1.bf16.msra.mxu1 %v17261_v41 }
 0x6da   : > { %8744 = vmatprep.subr.bf16.mxu1 %v17272_v17 }
 0x6db   : > { %8828 = vmatpush1.bf16.msra.mxu0 %v17303_v30 }
 0x6dc   : > { %8637 = vmatmul.mubr.bf16.gmra.mxu1 %v21684_v54  ;;  %8829 = vmatprep.subr.bf16.mxu0 %v17311_v24 }
 0x6dd   : > { %8745 = vmatpush1.bf16.msra.mxu1 %v17270_v47  ;;  %8646 = vmatprep.mubr.bf16.mxu1 %v21696_v11  ;;  %v17318_v47 = vld [vmem:[%s24346_s13 + $0x400] ss:$36 sps:$4 sm:$0xff]  }
 0x6de   : > { %8746 = vmatprep.subr.bf16.mxu1 %v17278_v19 }
 0x6df   : > { %8830 = vmatpush2.bf16.msra.mxu0 %v17309_v18 }
 0x6e0   : > { %8831 = vmatprep.subr.bf16.mxu0 %v17317_v49  ;;  %v17326_v49 = vld [vmem:[%s24346_s13 + $0x3bc] ss:$36 sps:$4 sm:$0xff]  }
 0x6e1   : > { %8747 = vmatpush1.bf16.msra.mxu1 %v17276_v48  ;;  %v15225_v20 = vpop.f32.mrf.mxu1 }
 0x6e2   : > { %8748 = vmatprep.subr.bf16.mxu1 %v17287_v53 }
 0x6e3   : > { %8832 = vmatpush2.bf16.msra.mxu0 %v17315_v32  ;;  %v15226_v4 = vpop.f32.mrf.mxu1  ;;  %v17351_v32 = vld [vmem:[%s24346_s13 + $0x258] ss:$36 sps:$4 sm:$0xff]  }
 0x6e4   : > { %8647 = vmatmul.mubr.bf16.gmra.mxu1 %v21716_v25  ;;  %v15227_v57 = vadd.f32 %v15226_v4, %v15225_v20  ;;  %8833 = vmatprep.subr.bf16.mxu0 %v17323_v55 }
 0x6e5   : > { %8749 = vmatpush1.bf16.msra.mxu1 %v17285_v26  ;;  %8656 = vmatprep.mubr.bf16.mxu1 %v21728_v23  ;;  %v15228_v63 = vpop.f32.mrf.mxu1 }
 0x6e6   : > { %8750 = vmatprep.subr.bf16.mxu1 %v17293_v43 }
 0x6e7   : > { %8834 = vmatpush2.bf16.msra.mxu0 %v17321_v44  ;;  %v15229_v58 = vpop.f32.mrf.mxu1  ;;  %v17332_v44 = vld [vmem:[%s24346_s13 + $0x374] ss:$36 sps:$4 sm:$0xff]  }
 0x6e8   : > { %8835 = vmatprep.subr.bf16.mxu0 %v17329_v16  ;;  %v15230_v17 = vadd.f32 %v15229_v58, %v15228_v63 }
 0x6e9   : > { %8751 = vmatpush1.bf16.msra.mxu1 %v17291_v42  ;;  %v15231_v14 = vpop.f32.mrf.mxu1 }
 0x6ea   : > { %8752 = vmatprep.subr.bf16.mxu1 %v17302_v15 }
 0x6eb   : > { %8836 = vmatpush2.bf16.msra.mxu0 %v17327_v1  ;;  %v15232_v0 = vpop.f32.mrf.mxu1 }
 0x6ec   : > { %8657 = vmatmul.mubr.bf16.gmra.mxu1 %v21751_v35  ;;  %v15233_v60 = vadd.f32 %v15232_v0, %v15231_v14  ;;  %8837 = vmatprep.subr.bf16.mxu0 %v17335_v39  ;;  %v17330_v39 = vld [vmem:[%s24346_s13 + $0x370] ss:$36 sps:$4 sm:$0xff]  }
 0x6ed   : > { %v15185_v34 = vpop.f32.mrf.mxu0  ;;  %8753 = vmatpush1.bf16.msra.mxu1 %v17300_v9  ;;  %v15234_v52 = vpop.f32.mrf.mxu1  ;;  %8772 = vmatprep.mubr.bf16.mxu1 %v21425_v2  ;;  %v17312_v2 = vld [vmem:[%s24346_s13 + $0x448] ss:$36 sps:$4 sm:$0xff]  }
 0x6ee   : > { %8754 = vmatprep.subr.bf16.mxu1 %v17308_v27  ;;  %v17338_v14 = vld [vmem:[%s24346_s13 + $0x32c] ss:$36 sps:$4 sm:$0xff]  }
 0x6ef   : > { %v15186_v8 = vpop.f32.mrf.mxu0  ;;  %8838 = vmatpush2.bf16.msra.mxu0 %v17333_v61  ;;  %v15235_v62 = vpop.f32.mrf.mxu1 }
 0x6f0   : > { %v15187_v33 = vadd.f32 %v15186_v8, %v15185_v34  ;;  %8839 = vmatprep.subr.bf16.mxu0 %v17341_v59  ;;  %v15236_v15 = vadd.f32 %v15235_v62, %v15234_v52 }
 0x6f1   : > { %v15188_v37 = vpop.f32.mrf.mxu0  ;;  %8755 = vmatpush1.bf16.msra.mxu1 %v17306_v10  ;;  %v15237_v50 = vpop.f32.mrf.mxu1  ;;  %v17344_v10 = vld [vmem:[%s24346_s13 + $0x2e4] ss:$36 sps:$4 sm:$0xff]  }
 0x6f2   : > { %v7351_v40 = vadd.f32 %v15187_v33, %v21560_v28  ;;  %8756 = vmatprep.subr.bf16.mxu1 %v17314_v5  ;;  %v17353_v28 = vld [vmem:[%s24346_s13 + $0x25c] ss:$36 sps:$4 sm:$0xff]  }
 0x6f3   : > { %v15189_v29 = vpop.f32.mrf.mxu0  ;;  %8840 = vmatpush2.bf16.msra.mxu0 %v17339_v31  ;;  %v15238_v13 = vpop.f32.mrf.mxu1  ;;  %v17342_v33 = vld [vmem:[%s24346_s13 + $0x2e0] ss:$36 sps:$4 sm:$0xff]  }
 0x6f4   : > { %v15190_v45 = vadd.f32 %v15189_v29, %v15188_v37  ;;  %v21863_v41 = vadd.f32 %v15227_v57, %v7351_v40  ;;  %v15239_v30 = vadd.f32 %v15238_v13, %v15237_v50  ;;  %8841 = vmatprep.subr.bf16.mxu0 %v17347_v36  ;;  %v17356_v29 = vld [vmem:[%s24346_s13 + $0x254] ss:$36 sps:$4 sm:$0xff]  }
 0x6f5   : > { %v15191_v24 = vpop.f32.mrf.mxu0  ;;  %8757 = vmatpush2.bf16.msra.mxu1 %v17312_v2  ;;  %v15240_v19 = vpop.f32.mrf.mxu1 }
 0x6f6   : > { %v7354_v18 = vadd.f32 %v15190_v45, %v21577_v6  ;;  %8758 = vmatprep.subr.bf16.mxu1 %v17320_v38  ;;  %v17324_v6 = vld [vmem:[%s24346_s13 + $0x3b8] ss:$36 sps:$4 sm:$0xff]  }
 0x6f7   : > { %v15192_v48 = vpop.f32.mrf.mxu0  ;;  %8842 = vmatpush2.bf16.msra.mxu0 %v17345_v51  ;;  %v15241_v53 = vpop.f32.mrf.mxu1  ;;  %v17348_v38 = vld [vmem:[%s24346_s13 + $0x298] ss:$36 sps:$4 sm:$0xff]  }
 0x6f8   : > { %v15193_v55 = vadd.f32 %v15192_v48, %v15191_v24  ;;  %v21878_v26 = vadd.f32 %v15230_v17, %v7354_v18  ;;  %8843 = vmatprep.subr.bf16.mxu0 %v17353_v28  ;;  %v15242_v62 = vadd.f32 %v15241_v53, %v15240_v19  ;;  %v17354_v17 = vld [vmem:[%s24346_s13 + $0x250] ss:$36 sps:$4 sm:$0xff]  }
 0x6f9   : > { %v15194_v20 = vpop.f32.mrf.mxu0  ;;  %8759 = vmatpush2.bf16.msra.mxu1 %v17318_v47  ;;  %v15243_v43 = vpop.f32.mrf.mxu1  ;;  %v17358_v47 = vld [vmem:[%s24346_s13 + $0x218] ss:$36 sps:$4 sm:$0xff]   ;;  %v17359_v18 = vld [vmem:[%s24346_s13 + $0x410] ss:$36 sps:$4 sm:$0xff]  }
 0x6fa   : > { %v7359_v4 = vadd.f32 %v15193_v55, %v21594_v7  ;;  %8760 = vmatprep.subr.bf16.mxu1 %v17326_v49  ;;  %v17361_v55 = vld [vmem:[%s24346_s13 + $0x3c8] ss:$36 sps:$4 sm:$0xff]  }
 0x6fb   : > { %v15195_v57 = vpop.f32.mrf.mxu0  ;;  %8844 = vmatpush2.bf16.msra.mxu0 %v17351_v32  ;;  %v15244_v16 = vpop.f32.mrf.mxu1  ;;  %v17360_v32 = vld [vmem:[%s24346_s13 + $0x1d0] ss:$36 sps:$4 sm:$0xff]  }
 0x6fc   : > { %v15196_v42 = vadd.f32 %v15195_v57, %v15194_v20  ;;  %v21887_v63 = vadd.f32 %v15233_v60, %v7359_v4  ;;  %v15245_v58 = vadd.f32 %v15244_v16, %v15243_v43  ;;  %v17362_v4 = vld [vmem:[%s24346_s13 + $0x188] ss:$36 sps:$4 sm:$0xff]  }
 0x6fd   : > { %v15197_v1 = vpop.f32.mrf.mxu0  ;;  %8761 = vmatpush2.bf16.msra.mxu1 %v17324_v6  ;;  %v15246_v7 = vpop.f32.mrf.mxu1 }
 0x6fe   : > { %v7362_v9 = vadd.f32 %v15196_v42, %v21610_v56  ;;  %8762 = vmatprep.subr.bf16.mxu1 %v17332_v44  ;;  %8846 = vmatmul.mubr.bf16.vlgmr.msra.gmra.mxu0 %v21649_v3  ;;  %v17336_v56 = vld [vmem:[%s24346_s13 + $0x328] ss:$36 sps:$4 sm:$0xff]  }
 0x6ff   : > { %v15198_v27 = vpop.f32.mrf.mxu0  ;;  %8855 = vmatprep.mubr.bf16.mxu0 %v21664_v46  ;;  %v15247_v0 = vpop.f32.mrf.mxu1 }
 0x700   : > { %v15199_v61 = vadd.f32 %v15198_v27, %v15197_v1  ;;  %v21898_v60 = vadd.f32 %v15236_v15, %v7362_v9  ;;  %v17364_v15 = vld [vmem:[%s24346_s13 + $0x140] ss:$36 sps:$4 sm:$0xff]   ;;  %v17366_v9 = vld [vmem:[%s24346_s13 + $0xf8] ss:$36 sps:$4 sm:$0xff]   ;;  %v17367_v27 = vld [vmem:[%s24346_s13 + $0x2f0] ss:$36 sps:$4 sm:$0xff]  }
 0x701   : > { %v15200_v59 = vpop.f32.mrf.mxu0  ;;  %8763 = vmatpush2.bf16.msra.mxu1 %v17330_v39 }
 0x702   : > { %v7367_v34 = vadd.f32 %v15199_v61, %v21625_v21  ;;  %8764 = vmatprep.subr.bf16.mxu1 %v17338_v14  ;;  %v17350_v21 = vld [vmem:[%s24346_s13 + $0x29c] ss:$36 sps:$4 sm:$0xff]  }
 0x703   : > { %v15201_v52 = vpop.f32.mrf.mxu0 }
 0x704   : > { %v15202_v5 = vadd.f32 %v15201_v52, %v15200_v59  ;;  %v21907_v8 = vadd.f32 %v15239_v30, %v7367_v34  ;;  %v17357_v30 = vld [vmem:[%s24346_s13 + $0x458] ss:$36 sps:$4 sm:$0xff]   ;;  %v17368_v59 = vld [vmem:[%s24346_s13 + $0xb0] ss:$36 sps:$4 sm:$0xff]   ;;  %v17369_v34 = vld [vmem:[%s24346_s13 + $0x2a8] ss:$36 sps:$4 sm:$0xff]  }
 0x705   : > { %v15203_v31 = vpop.f32.mrf.mxu0  ;;  %8765 = vmatpush2.bf16.msra.mxu1 %v17336_v56 }
 0x706   : > { %v7370_v36 = vadd.f32 %v15202_v5, %v21640_v22  ;;  %8766 = vmatprep.subr.bf16.mxu1 %v17344_v10  ;;  %8856 = vmatmul.mubr.bf16.gmra.mxu0 %v21684_v54  ;;  %v17370_v5 = vld [vmem:[%s24346_s13 + $0x68] ss:$36 sps:$4 sm:$0xff]  }
 0x707   : > { %v15204_v37 = vpop.f32.mrf.mxu0  ;;  %8865 = vmatprep.mubr.bf16.mxu0 %v21696_v11 }
 0x708   : > { %v15205_v2 = vadd.f32 %v15204_v37, %v15203_v31  ;;  %v21918_v50 = vadd.f32 %v15242_v62, %v7370_v36  ;;  %v17371_v31 = vld [vmem:[%s24346_s13 + $0x260] ss:$36 sps:$4 sm:$0xff]  }
 0x709   : > { %v15206_v40 = vpop.f32.mrf.mxu0  ;;  %8767 = vmatpush2.bf16.msra.mxu1 %v17342_v33  ;;  %v17372_v36 = vld [vmem:[%s24346_s13 + $0x20] ss:$36 sps:$4 sm:$0xff]  }
 0x70a   : > { %v7375_v22 = vadd.f32 %v15205_v2, %v21658_v12  ;;  %8768 = vmatprep.subr.bf16.mxu1 %v17350_v21  ;;  %v17757_v21 = vld [vmem:[%s21354_s23 + $0x4] ss:$8 sps:$4 sm:$0xff]  }
 0x70b   : > { %v15207_v13 = vpop.f32.mrf.mxu0 }
 0x70c   : > { %v21927_v51 = vadd.f32 %v15245_v58, %v7375_v22  ;;  %v17365_v58 = vld [vmem:[%s24346_s13 + $0x338] ss:$36 sps:$4 sm:$0xff]  }
 0x70d   : > { %v15265_v45 = vpop.f32.mrf.mxu0  ;;  %8769 = vmatpush2.bf16.msra.mxu1 %v17348_v38 }
 0x70e   : > { %8770 = vmatprep.subr.bf16.mxu1 %v17356_v29  ;;  %8866 = vmatmul.mubr.bf16.gmra.mxu0 %v21716_v25 }
 0x70f   : > { %v15266_v12 = vpop.f32.mrf.mxu0  ;;  %8875 = vmatprep.mubr.bf16.mxu0 %v21728_v23 }
 0x710   : > { %v15267_v28 = vadd.f32 %v15266_v12, %v15265_v45 }
 0x711   : > { %v15268_v24 = vpop.f32.mrf.mxu0  ;;  %8771 = vmatpush2.bf16.msra.mxu1 %v17354_v17 }
 0x712   : > { %v21941_v19 = vadd.f32 %v15267_v28, %v21863_v41  ;;  %15334 = vmatprep.subr.bf16.mxu1 %v17357_v30 }
 0x713   : > { %v15269_v49 = vpop.f32.mrf.mxu0 }
 0x714   : > { %v15270_v48 = vadd.f32 %v15269_v49, %v15268_v24  ;;  %8773 = vmatmul.mubr.bf16.vlgmr.msra.gmra.mxu1 %v21649_v3 }
 0x715   : > { %v15271_v53 = vpop.f32.mrf.mxu0  ;;  %15335 = vmatpush3.bf16.msra.mxu1 %v17358_v47  ;;  %8782 = vmatprep.mubr.bf16.mxu1 %v21664_v46 }
 0x716   : > { %v21952_v41 = vadd.f32 %v15270_v48, %v21878_v26  ;;  %15336 = vmatprep.subr.bf16.mxu1 %v17359_v18  ;;  %8876 = vmatmul.mubr.bf16.gmra.mxu0 %v21751_v35  ;;  %v17363_v26 = vld [vmem:[%s24346_s13 + $0x380] ss:$36 sps:$4 sm:$0xff]  }
 0x717   : > { %v15272_v20 = vpop.f32.mrf.mxu0 }
 0x718   : > { %v15273_v6 = vadd.f32 %v15272_v20, %v15271_v53 }
 0x719   : > { %v15274_v43 = vpop.f32.mrf.mxu0  ;;  %15337 = vmatpush3.bf16.msra.mxu1 %v17360_v32 }
 0x71a   : > { %v21962_v44 = vadd.f32 %v15273_v6, %v21887_v63  ;;  %15338 = vmatprep.subr.bf16.mxu1 %v17361_v55 }
 0x71b   : > { %v15275_v57 = vpop.f32.mrf.mxu0 }
 0x71c   : > { %v15276_v16 = vadd.f32 %v15275_v57, %v15274_v43  ;;  %8783 = vmatmul.mubr.bf16.gmra.mxu1 %v21684_v54 }
 0x71d   : > { %v15277_v42 = vpop.f32.mrf.mxu0  ;;  %15339 = vmatpush3.bf16.msra.mxu1 %v17362_v4  ;;  %8792 = vmatprep.mubr.bf16.mxu1 %v21696_v11 }
 0x71e   : > { %v21973_v63 = vadd.f32 %v15276_v16, %v21898_v60  ;;  %15340 = vmatprep.subr.bf16.mxu1 %v17363_v26 }
 0x71f   : > { %v15278_v1 = vpop.f32.mrf.mxu0 }
 0x720   : > { %v15279_v39 = vadd.f32 %v15278_v1, %v15277_v42 }
 0x721   : > { %v15280_v7 = vpop.f32.mrf.mxu0  ;;  %15341 = vmatpush3.bf16.msra.mxu1 %v17364_v15 }
 0x722   : > { %v21982_v14 = vadd.f32 %v15279_v39, %v21907_v8  ;;  %15342 = vmatprep.subr.bf16.mxu1 %v17365_v58 }
 0x723   : > { %v15281_v0 = vpop.f32.mrf.mxu0 }
 0x724   : > { %v15282_v61 = vadd.f32 %v15281_v0, %v15280_v7  ;;  %8793 = vmatmul.mubr.bf16.gmra.mxu1 %v21716_v25 }
 0x725   : > { %v15283_v60 = vpop.f32.mrf.mxu0  ;;  %15343 = vmatpush3.bf16.msra.mxu1 %v17366_v9  ;;  %8802 = vmatprep.mubr.bf16.mxu1 %v21728_v23 }
 0x726   : > { %v21993_v56 = vadd.f32 %v15282_v61, %v21918_v50  ;;  %15344 = vmatprep.subr.bf16.mxu1 %v17367_v27 }
 0x727   : > { %v15284_v10 = vpop.f32.mrf.mxu0 }
 0x728   : > { %v15285_v52 = vadd.f32 %v15284_v10, %v15283_v60 }
 0x729   : > { %15345 = vmatpush3.bf16.msra.mxu1 %v17368_v59  ;;  %v15286_v8 = vpop.f32.mrf.mxu0 }
 0x72a   : > { %v22002_v62 = vadd.f32 %v15285_v52, %v21927_v51  ;;  %15346 = vmatprep.subr.bf16.mxu1 %v17369_v34 }
 0x72b   : > { %v15287_v33 = vpop.f32.mrf.mxu0 }
 0x72c   : > { %8803 = vmatmul.mubr.bf16.gmra.mxu1 %v21751_v35 }
 0x72d   : > { %15347 = vmatpush3.bf16.msra.mxu1 %v17370_v5  ;;  %8918 = vmatprep.mubr.bf16.mxu1 %v17757_v21 }
 0x72e   : > { %15348 = vmatprep.subr.bf16.mxu1 %v17371_v31 }
 0x731   : > { %15349 = vmatpush3.bf16.msra.mxu1 %v17372_v36 }
 0x734   : > { %8919 = vmatmul.mubr.bf16.vlgmr.msra.gmra.mxu1 %v21649_v3  ;;  %v17375_v3 = vld [vmem:[%s24345_s12 + $0x4] ss:$20 sps:$4 sm:$0xff]  }
 0x735   : > { %8926 = vmatprep.mubr.bf16.mxu1 %v21664_v46  ;;  %9457 = vmatprep.mubr.bf16.mxu0 %v17375_v3 }
 0x73c   : > { %8927 = vmatmul.mubr.bf16.gmra.mxu1 %v21684_v54  ;;  %v16133_v37 = vpop.f32.mrf.mxu0 }
 0x73d   : > { %8934 = vmatprep.mubr.bf16.mxu1 %v21696_v11 }
 0x73e   : > { %v7606_v2 = vpop.f32.mrf.mxu0 }
 0x740   : > { %v16134_v50 = vpop.f32.mrf.mxu0 }
 0x742   : > { %v7609_v40 = vpop.f32.mrf.mxu0 }
 0x744   : > { %8935 = vmatmul.mubr.bf16.gmra.mxu1 %v21716_v25  ;;  %v16137_v38 = vpop.f32.mrf.mxu0 }
 0x745   : > { %8942 = vmatprep.mubr.bf16.mxu1 %v21728_v23 }
 0x746   : > { %v7622_v22 = vpop.f32.mrf.mxu0 }
 0x748   : > { %v16138_v29 = vpop.f32.mrf.mxu0 }
 0x74a   : > { %v7625_v58 = vpop.f32.mrf.mxu0 }
 0x74c   : > { %8943 = vmatmul.mubr.bf16.gmra.mxu1 %v21751_v35 }
 0x754   : > { %v15305_v46 = vpop.f32.mrf.mxu1 }
 0x756   : > { %v15306_v54 = vpop.f32.mrf.mxu1 }
 0x757   : > { %v15307_v11 = vadd.f32 %v15306_v54, %v15305_v46 }
 0x758   : > { %v15308_v13 = vpop.f32.mrf.mxu1 }
 0x759   : > { %v7543_v51 = vadd.f32 %v15307_v11, %v21941_v19 }
 0x75a   : > { %v15309_v25 = vpop.f32.mrf.mxu1 }
 0x75b   : > { %v15310_v45 = vadd.f32 %v15309_v25, %v15308_v13  ;;  %v7607_v17 = vadd.f32 %v7606_v2, %v7543_v51  ;;  %v17402_v2 = vld [vmem:[%s24345_s12 + $0xc] ss:$20 sps:$4 sm:$0xff]  }
 0x75c   : > { %v15311_v23 = vpop.f32.mrf.mxu1  ;;  %9593 = vmatprep.mubr.bf16.mxu1 %v17402_v2 }
 0x75d   : > { %v7636_v35 = vmax.f32 %v7607_v17, 0.0  ;;  %v7546_v30 = vadd.f32 %v15310_v45, %v21952_v41 }
 0x75e   : > { %v15312_v12 = vpop.f32.mrf.mxu1 }
 0x75f   : > { %7643 = vst [vmem:[%s22027_s4] sm:$0xff] %v7636_v35  ;;  %v15313_v28 = vadd.f32 %v15312_v12, %v15311_v23  ;;  %v7610_v24 = vadd.f32 %v7609_v40, %v7546_v30 }
 0x760   : > { %v15314_v47 = vpop.f32.mrf.mxu1 }
 0x761   : > { %v7551_v19 = vadd.f32 %v15313_v28, %v21962_v44  ;;  %v7637_v18 = vmax.f32 %v7610_v24, 0.0 }
 0x762   : > { %v15315_v49 = vpop.f32.mrf.mxu1 }
 0x763   : > { %v7615_v48 = vadd.f32 %v16133_v37, %v7551_v19  ;;  %7644 = vst [vmem:[%s22027_s4 + $0x8] sm:$0xff] %v7637_v18  ;;  %v15316_v53 = vadd.f32 %v15315_v49, %v15314_v47 }
 0x764   : > { %v15317_v32 = vpop.f32.mrf.mxu1 }
 0x765   : > { %v7638_v55 = vmax.f32 %v7615_v48, 0.0  ;;  %v7554_v20 = vadd.f32 %v15316_v53, %v21973_v63 }
 0x766   : > { %v15318_v6 = vpop.f32.mrf.mxu1 }
 0x767   : > { %7645 = vst [vmem:[%s22027_s4 + $0x10] sm:$0xff] %v7638_v55  ;;  %v7618_v41 = vadd.f32 %v16134_v50, %v7554_v20  ;;  %v15319_v43 = vadd.f32 %v15318_v6, %v15317_v32 }
 0x768   : > { %v15320_v4 = vpop.f32.mrf.mxu1 }
 0x769   : > { %v7639_v26 = vmax.f32 %v7618_v41, 0.0  ;;  %v7559_v57 = vadd.f32 %v15319_v43, %v21982_v14 }
 0x76a   : > { %v15321_v44 = vpop.f32.mrf.mxu1 }
 0x76b   : > { %7646 = vst [vmem:[%s22027_s4 + $0x18] sm:$0xff] %v7639_v26  ;;  %v15322_v16 = vadd.f32 %v15321_v44, %v15320_v4  ;;  %v7623_v42 = vadd.f32 %v7622_v22, %v7559_v57 }
 0x76c   : > { %v15323_v15 = vpop.f32.mrf.mxu1 }
 0x76d   : > { %v7640_v1 = vmax.f32 %v7623_v42, 0.0  ;;  %v7562_v63 = vadd.f32 %v15322_v16, %v21993_v56 }
 0x76e   : > { %v15324_v39 = vpop.f32.mrf.mxu1 }
 0x76f   : > { %7647 = vst [vmem:[%s22027_s4 + $0x20] sm:$0xff] %v7640_v1  ;;  %v15325_v7 = vadd.f32 %v15324_v39, %v15323_v15  ;;  %v7626_v9 = vadd.f32 %v7625_v58, %v7562_v63 }
 0x770   : > { %v15326_v27 = vpop.f32.mrf.mxu1 }
 0x771   : > { %v7567_v0 = vadd.f32 %v15325_v7, %v22002_v62  ;;  %v7641_v61 = vmax.f32 %v7626_v9, 0.0 }
 0x772   : > { %v15327_v14 = vpop.f32.mrf.mxu1 }
 0x773   : > { %v7631_v60 = vadd.f32 %v16137_v38, %v7567_v0  ;;  %7648 = vst [vmem:[%s22027_s4 + $0x28] sm:$0xff] %v7641_v61  ;;  %v17373_v0 = vld [vmem:[%s24345_s12] ss:$20 sps:$4 sm:$0xff]  }
 0x774   : > { %v17378_v14 = vld [vmem:[%s24345_s12 + $0x2c] ss:$20 sps:$4 sm:$0xff]  }
 0x775   : > { %v7642_v59 = vmax.f32 %v7631_v60, 0.0 }
 0x777   : > { %7649 = vst [vmem:[%s22027_s4 + $0x30] sm:$0xff] %v7642_v59  ;;  %v24600_v59 = vmov 0.0   ;;  %s24728_s4 = sld [smem:[#allocation8_spill]] }
 0x77d   : > { %v22042_v34 = vpop.f32.mrf.mxu0  ;;  %s14537_s21 = sshll.u32 %s24728_s4, 8  ;;  %s17823_s4 = smov [#allocation2]  }
 0x77e   : > { %s24291_s5 = scalar_lea.hbm %s24730_s6, %s14537_s21  ;;  %s17762_s2 = sshll.u32 %s17823_s4, 4  ;;  %s17763_s2 = int_to_ptr.vmem [resolvable:$false] %s17762_s2 }
 0x77f   : > { %v8703_v10 = vpop.f32.mrf.mxu0  ;;  %s17764_s0 = scalar_lea.vmem %s17763_s2, 512  ;;  %p17765_p0 = scmp.lt.s32.totalorder %s24286_s1, %s17763_s2 }
 0x780   : > { %p17766_p1 = scmp.lt.s32.totalorder %s17764_s0, %s17758_s27 }
 0x781   : > { %v22044_v52 = vpop.f32.mrf.mxu0 }
 0x782   : > { %v8953_v56 = vpack.c.bf16 %v22044_v52, %v22042_v34  ;;  %p17767_p2 = por %p17766_p1, %p17765_p0 }
 0x783   : > { %v8707_v5 = vpop.f32.mrf.mxu0 }
 0x784   : > { %v8954_v55 = vpack.c.bf16 %v8707_v5, %v8703_v10  ;;  %p17768_p3 = pnand %p17767_p2, %p17761_p13 }
 0x785   : > { %v8711_v8 = vpop.f32.mrf.mxu0 }
 0x787   : > { %v8713_v31 = vpop.f32.mrf.mxu0 }
 0x789   : > { %v8715_v33 = vpop.f32.mrf.mxu0 }
 0x78a   : > { %v8962_v58 = vpack.c.bf16 %v8715_v33, %v8711_v8  ;;  %v17376_v8 = vld [vmem:[%s24345_s12 + $0x28] ss:$20 sps:$4 sm:$0xff]  }
 0x78b   : > { %v8717_v36 = vpop.f32.mrf.mxu0  ;;  %v17381_v33 = vld [vmem:[%s24345_s12 + $0x54] ss:$20 sps:$4 sm:$0xff]  }
 0x78c   : > { %v8963_v53 = vpack.c.bf16 %v8717_v36, %v8713_v31 }
 0x78d   : > { %v8721_v62 = vpop.f32.mrf.mxu0 }
 0x78f   : > { %v8723_v21 = vpop.f32.mrf.mxu0 }
 0x791   : > { %v8725_v37 = vpop.f32.mrf.mxu0 }
 0x792   : > { %v8971_v44 = vpack.c.bf16 %v8725_v37, %v8721_v62 }
 0x793   : > { %v8727_v50 = vpop.f32.mrf.mxu0 }
 0x794   : > { %v22051_v40 = vpop.f32.mrf.mxu1  ;;  %v8972_v49 = vpack.c.bf16 %v8727_v50, %v8723_v21 }
 0x796   : > { %v8630_v38 = vpop.f32.mrf.mxu1  ;;  %v8731_v22 = vpop.f32.mrf.mxu0 }
 0x798   : > { %v8632_v29 = vpop.f32.mrf.mxu1  ;;  %v8733_v3 = vpop.f32.mrf.mxu0 }
 0x799   : > { %v8951_v27 = vpack.c.bf16 %v8632_v29, %v22051_v40 }
 0x79a   : > { %v8634_v46 = vpop.f32.mrf.mxu1  ;;  %v8735_v54 = vpop.f32.mrf.mxu0 }
 0x79b   : > { %v8952_v6 = vpack.c.bf16 %v8634_v46, %v8630_v38  ;;  %v8980_v41 = vpack.c.bf16 %v8735_v54, %v8731_v22  ;;  %v17379_v38 = vld [vmem:[%s24345_s12 + $0x50] ss:$20 sps:$4 sm:$0xff]  }
 0x79c   : > { %v8638_v11 = vpop.f32.mrf.mxu1  ;;  %v8737_v13 = vpop.f32.mrf.mxu0  ;;  %v17384_v22 = vld [vmem:[%s24345_s12 + $0x7c] ss:$20 sps:$4 sm:$0xff]  }
 0x79d   : > { %v8981_v51 = vpack.c.bf16 %v8737_v13, %v8733_v3  ;;  %v17387_v13 = vld [vmem:[%s24345_s12 + $0xa4] ss:$20 sps:$4 sm:$0xff]  }
 0x79e   : > { %v8640_v25 = vpop.f32.mrf.mxu1 }
 0x79f   : > { %15374 = vmatprep.subr.bf16.mxu0 %v8981_v51 }
 0x7a0   : > { %v8642_v45 = vpop.f32.mrf.mxu1 }
 0x7a1   : > { %v8960_v39 = vpack.c.bf16 %v8642_v45, %v8638_v11  ;;  %v17382_v11 = vld [vmem:[%s24345_s12 + $0x78] ss:$20 sps:$4 sm:$0xff]  }
 0x7a2   : > { %v8644_v17 = vpop.f32.mrf.mxu1 }
 0x7a3   : > { %v8961_v32 = vpack.c.bf16 %v8644_v17, %v8640_v25 }
 0x7a4   : > { %v8648_v23 = vpop.f32.mrf.mxu1 }
 0x7a6   : > { %v8650_v35 = vpop.f32.mrf.mxu1 }
 0x7a8   : > { %v8652_v30 = vpop.f32.mrf.mxu1 }
 0x7a9   : > { %v8969_v15 = vpack.c.bf16 %v8652_v30, %v8648_v23  ;;  %v17385_v23 = vld [vmem:[%s24345_s12 + $0xa0] ss:$20 sps:$4 sm:$0xff]  }
 0x7aa   : > { %v8654_v12 = vpop.f32.mrf.mxu1 }
 0x7ab   : > { %v8970_v48 = vpack.c.bf16 %v8654_v12, %v8650_v35  ;;  %v17390_v35 = vld [vmem:[%s24345_s12 + $0xcc] ss:$20 sps:$4 sm:$0xff]  }
 0x7ac   : > { %v8658_v28 = vpop.f32.mrf.mxu1 }
 0x7ae   : > { %v8660_v24 = vpop.f32.mrf.mxu1 }
 0x7b0   : > { %v8662_v47 = vpop.f32.mrf.mxu1 }
 0x7b1   : > { %v8978_v26 = vpack.c.bf16 %v8662_v47, %v8658_v28 }
 0x7b2   : > { %v8664_v19 = vpop.f32.mrf.mxu1 }
 0x7b3   : > { %v8979_v18 = vpack.c.bf16 %v8664_v19, %v8660_v24 }
 0x7b5   : > { %15375 = vmatpush3.bf16.msra.mxu0 %v8979_v18 }
 0x7b6   : > { %15376 = vmatprep.subr.bf16.mxu0 %v8972_v49 }
 0x7b9   : > { %15377 = vmatpush3.bf16.msra.mxu0 %v8970_v48  ;;  %v17388_v48 = vld [vmem:[%s24345_s12 + $0xc8] ss:$20 sps:$4 sm:$0xff]  }
 0x7ba   : > { %15378 = vmatprep.subr.bf16.mxu0 %v8963_v53  ;;  %v17393_v53 = vld [vmem:[%s24345_s12 + $0xf4] ss:$20 sps:$4 sm:$0xff]  }
 0x7bd   : > { %15379 = vmatpush3.bf16.msra.mxu0 %v8961_v32 }
 0x7be   : > { %15380 = vmatprep.subr.bf16.mxu0 %v8954_v55  ;;  %v22053_v20 = vpop.f32.mrf.mxu0 }
 0x7c0   : > { %v22055_v43 = vpop.f32.mrf.mxu0 }
 0x7c1   : > { %15381 = vmatpush3.bf16.msra.mxu0 %v8952_v6 }
 0x7c2   : > { %15382 = vmatprep.subr.bf16.mxu0 %v8980_v41  ;;  %v22057_v4 = vpop.f32.mrf.mxu0 }
 0x7c3   : > { %v8957_v57 = vpack.c.bf16 %v22057_v4, %v22053_v20  ;;  %v17408_v20 = vld [vmem:[%s24345_s12 + $0x34] ss:$20 sps:$4 sm:$0xff]  }
 0x7c4   : > { %v22061_v16 = vpop.f32.mrf.mxu0 }
 0x7c5   : > { %15383 = vmatpush3.bf16.msra.mxu0 %v8978_v26  ;;  %v8958_v6 = vpack.c.bf16 %v22061_v16, %v22055_v43  ;;  %v17396_v43 = vld [vmem:[%s24345_s12 + $0x11c] ss:$20 sps:$4 sm:$0xff]  }
 0x7c6   : > { %15384 = vmatprep.subr.bf16.mxu0 %v8971_v44  ;;  %v22063_v42 = vpop.f32.mrf.mxu0 }
 0x7c8   : > { %v22065_v1 = vpop.f32.mrf.mxu0 }
 0x7c9   : > { %15385 = vmatpush3.bf16.msra.mxu0 %v8969_v15 }
 0x7ca   : > { %15386 = vmatprep.subr.bf16.mxu0 %v8962_v58  ;;  %v22067_v63 = vpop.f32.mrf.mxu0 }
 0x7cc   : > { %v22069_v7 = vpop.f32.mrf.mxu0 }
 0x7cd   : > { %15387 = vmatpush3.bf16.msra.mxu0 %v8960_v39  ;;  %v8967_v19 = vpack.c.bf16 %v22069_v7, %v22065_v1  ;;  %v17391_v1 = vld [vmem:[%s24345_s12 + $0xf0] ss:$20 sps:$4 sm:$0xff]  }
 0x7ce   : > { %15388 = vmatprep.subr.bf16.mxu0 %v8953_v56  ;;  %v22074_v9 = vpop.f32.mrf.mxu0 }
 0x7d0   : > { %v8869_v61 = vpop.f32.mrf.mxu0 }
 0x7d1   : > { %15389 = vmatpush3.bf16.msra.mxu0 %v8951_v27 }
 0x7d2   : > { %v22083_v60 = vpop.f32.mrf.mxu0  ;;  %16139 = vmatprep.subr.bf16.mxu0 %v24600_v59 }
 0x7d3   : > { %v8975_v16 = vpack.c.bf16 %v22083_v60, %v22074_v9  ;;  %v17399_v9 = vld [vmem:[%s24345_s12 + $0x144] ss:$20 sps:$4 sm:$0xff]  }
 0x7d4   : > { %v22086_v34 = vpop.f32.mrf.mxu1  ;;  %9458 = vmatmul.mubr.bf16.vlgmr.msra.gmra.mxu0 %v17373_v0  ;;  %v8873_v10 = vpop.f32.mrf.mxu0 }
 0x7d5   : > { %9465 = vmatprep.mubr.bf16.mxu0 %v17378_v14  ;;  %v8976_v30 = vpack.c.bf16 %v8873_v10, %v8869_v61  ;;  %v8966_v14 = vpack.c.bf16 %v22067_v63, %v22063_v42 }
 0x7d6   : > { %v22088_v52 = vpop.f32.mrf.mxu1  ;;  %v22090_v56 = vpop.f32.mrf.mxu0 }
 0x7d8   : > { %v22092_v5 = vpop.f32.mrf.mxu1  ;;  %v8879_v31 = vpop.f32.mrf.mxu0 }
 0x7d9   : > { %v8955_v63 = vpack.c.bf16 %v22092_v5, %v22086_v34 }
 0x7da   : > { %v8780_v36 = vpop.f32.mrf.mxu1  ;;  %v8881_v62 = vpop.f32.mrf.mxu0 }
 0x7db   : > { %v8984_v26 = vpack.c.bf16 %v8881_v62, %v22090_v56  ;;  %v8956_v15 = vpack.c.bf16 %v8780_v36, %v22088_v52  ;;  %v17394_v52 = vld [vmem:[%s24345_s12 + $0x118] ss:$20 sps:$4 sm:$0xff]   ;;  %v17400_v36 = vld [vmem:[%s24345_s12 + $0x8] ss:$20 sps:$4 sm:$0xff]  }
 0x7dc   : > { %v22100_v21 = vpop.f32.mrf.mxu1  ;;  %9466 = vmatmul.mubr.bf16.gmra.mxu0 %v17376_v8  ;;  %v8883_v37 = vpop.f32.mrf.mxu0 }
 0x7dd   : > { %9473 = vmatprep.mubr.bf16.mxu0 %v17381_v33  ;;  %v8985_v2 = vpack.c.bf16 %v8883_v37, %v8879_v31  ;;  %v17397_v33 = vld [vmem:[%s24345_s12 + $0x140] ss:$20 sps:$4 sm:$0xff]  }
 0x7de   : > { %v8786_v50 = vpop.f32.mrf.mxu1 }
 0x7df   : > { %15468 = vmatprep.subr.bf16.mxu1 %v8985_v2 }
 0x7e0   : > { %v22102_v40 = vpop.f32.mrf.mxu1 }
 0x7e1   : > { %v8964_v56 = vpack.c.bf16 %v22102_v40, %v22100_v21  ;;  %v17405_v21 = vld [vmem:[%s24345_s12 + $0x16c] ss:$20 sps:$4 sm:$0xff]   ;;  %v17406_v40 = vld [vmem:[%s24345_s12 + $0x30] ss:$20 sps:$4 sm:$0xff]  }
 0x7e2   : > { %v8790_v29 = vpop.f32.mrf.mxu1 }
 0x7e3   : > { %v8965_v55 = vpack.c.bf16 %v8790_v29, %v8786_v50  ;;  %v17403_v50 = vld [vmem:[%s24345_s12 + $0x168] ss:$20 sps:$4 sm:$0xff]  }
 0x7e4   : > { %v8794_v3 = vpop.f32.mrf.mxu1  ;;  %9474 = vmatmul.mubr.bf16.gmra.mxu0 %v17379_v38  ;;  %v17411_v29 = vld [vmem:[%s24345_s12 + $0x194] ss:$20 sps:$4 sm:$0xff]  }
 0x7e5   : > { %9481 = vmatprep.mubr.bf16.mxu0 %v17384_v22 }
 0x7e6   : > { %v8796_v46 = vpop.f32.mrf.mxu1 }
 0x7e8   : > { %v8798_v54 = vpop.f32.mrf.mxu1 }
 0x7e9   : > { %v8973_v61 = vpack.c.bf16 %v8798_v54, %v8794_v3  ;;  %v17414_v3 = vld [vmem:[%s24345_s12 + $0x5c] ss:$20 sps:$4 sm:$0xff]  }
 0x7ea   : > { %v8800_v51 = vpop.f32.mrf.mxu1 }
 0x7eb   : > { %v8974_v47 = vpack.c.bf16 %v8800_v51, %v8796_v46  ;;  %v17412_v51 = vld [vmem:[%s24345_s12 + $0x58] ss:$20 sps:$4 sm:$0xff]  }
 0x7ec   : > { %v8804_v25 = vpop.f32.mrf.mxu1  ;;  %9482 = vmatmul.mubr.bf16.gmra.mxu0 %v17382_v11 }
 0x7ed   : > { %9489 = vmatprep.mubr.bf16.mxu0 %v17387_v13  ;;  %v17409_v13 = vld [vmem:[%s24345_s12 + $0x190] ss:$20 sps:$4 sm:$0xff]  }
 0x7ee   : > { %v8806_v45 = vpop.f32.mrf.mxu1 }
 0x7f0   : > { %v8808_v17 = vpop.f32.mrf.mxu1 }
 0x7f1   : > { %v8982_v39 = vpack.c.bf16 %v8808_v17, %v8804_v25  ;;  %v17420_v17 = vld [vmem:[%s24345_s12 + $0x84] ss:$20 sps:$4 sm:$0xff]  }
 0x7f2   : > { %v8810_v12 = vpop.f32.mrf.mxu1 }
 0x7f3   : > { %v8983_v28 = vpack.c.bf16 %v8810_v12, %v8806_v45  ;;  %v17417_v45 = vld [vmem:[%s24345_s12 + $0x1bc] ss:$20 sps:$4 sm:$0xff]  }
 0x7f4   : > { %v22122_v24 = vpop.f32.mrf.mxu1  ;;  %9490 = vmatmul.mubr.bf16.gmra.mxu0 %v17385_v23  ;;  %v9059_v23 = vld [vmem:[%s24345_s12 + $0x1e0] sm:$0xff] }
 0x7f5   : > { %15469 = vmatpush3.bf16.msra.mxu1 %v8983_v28  ;;  %9497 = vmatprep.mubr.bf16.mxu0 %v17390_v35  ;;  %v17415_v35 = vld [vmem:[%s24345_s12 + $0x1b8] ss:$20 sps:$4 sm:$0xff]   ;;  %v14297_v12 = vcombine.high %v9059_v23, %v9059_v23 }
 0x7f6   : > { %v22126_v18 = vpop.f32.mrf.mxu1  ;;  %15470 = vmatprep.subr.bf16.mxu1 %v8976_v30  ;;  %v17418_v30 = vld [vmem:[%s24345_s12 + $0x80] ss:$20 sps:$4 sm:$0xff]  }
 0x7f7   : > { %v15352_v46 = vadd.f32 %v22126_v18, %v22122_v24  ;;  %v17425_v28 = vld [vmem:[%s24345_s12 + $0xac] ss:$20 sps:$4 sm:$0xff]   ;;  %v14296_v24 = vcombine.low %v9059_v23, %v9059_v23  ;;  %v17426_v18 = vld [vmem:[%s24345_s12 + $0xd0] ss:$20 sps:$4 sm:$0xff]  }
 0x7f8   : > { %v22128_v49 = vpop.f32.mrf.mxu1  ;;  %v17506_v23 = vld [vmem:[%s24349_s16 + $0x4] ss:$36 sps:$4 sm:$0xff]  }
 0x7f9   : > { %15471 = vmatpush3.bf16.msra.mxu1 %v8974_v47  ;;  %v17423_v47 = vld [vmem:[%s24345_s12 + $0xa8] ss:$20 sps:$4 sm:$0xff]  }
 0x7fa   : > { %v22136_v32 = vpop.f32.mrf.mxu1  ;;  %15472 = vmatprep.subr.bf16.mxu1 %v8967_v19  ;;  %v17428_v19 = vld [vmem:[%s24345_s12 + $0xd4] ss:$20 sps:$4 sm:$0xff]  }
 0x7fb   : > { %v15355_v54 = vadd.f32 %v22136_v32, %v22128_v49  ;;  %v17429_v49 = vld [vmem:[%s24345_s12 + $0x10] ss:$20 sps:$4 sm:$0xff]   ;;  %v17433_v32 = vld [vmem:[%s24345_s12 + $0x38] ss:$20 sps:$4 sm:$0xff]  }
 0x7fc   : > { %v15356_v41 = vpop.f32.mrf.mxu1  ;;  %9498 = vmatmul.mubr.bf16.gmra.mxu0 %v17388_v48  ;;  %v17432_v48 = vld [vmem:[%s24345_s12 + $0xfc] ss:$20 sps:$4 sm:$0xff]  }
 0x7fd   : > { %15473 = vmatpush3.bf16.msra.mxu1 %v8965_v55  ;;  %9505 = vmatprep.mubr.bf16.mxu0 %v17393_v53  ;;  %v8959_v25 = vpack.c.bf16 %v15355_v54, %v15352_v46  ;;  %v17430_v53 = vld [vmem:[%s24345_s12 + $0xf8] ss:$20 sps:$4 sm:$0xff]   ;;  %v17497_v46 = vld [vmem:[%s24349_s16 + $0x9c] ss:$36 sps:$4 sm:$0xff]   ;;  %v17492_v54 = vld [vmem:[%s24349_s16 + $0x90] ss:$36 sps:$4 sm:$0xff]  }
 0x7fe   : > { %v15357_v44 = vpop.f32.mrf.mxu1  ;;  %15474 = vmatprep.subr.bf16.mxu1 %v8958_v6  ;;  %v17436_v55 = vld [vmem:[%s24345_s12 + $0x124] ss:$20 sps:$4 sm:$0xff]   ;;  %v17434_v6 = vld [vmem:[%s24345_s12 + $0x120] ss:$20 sps:$4 sm:$0xff]  }
 0x7ff   : > { %v15358_v38 = vadd.f32 %v15357_v44, %v15356_v41  ;;  %v17437_v41 = vld [vmem:[%s24345_s12 + $0x60] ss:$20 sps:$4 sm:$0xff]   ;;  %v17438_v44 = vld [vmem:[%s24345_s12 + $0x148] ss:$20 sps:$4 sm:$0xff]  }
 0x800   : > { %v15359_v58 = vpop.f32.mrf.mxu1 }
 0x801   : > { %15475 = vmatpush3.bf16.msra.mxu1 %v8956_v15  ;;  %v17441_v15 = vld [vmem:[%s24345_s12 + $0x88] ss:$20 sps:$4 sm:$0xff]  }
 0x802   : > { %v15360_v7 = vpop.f32.mrf.mxu1  ;;  %15476 = vmatprep.subr.bf16.mxu1 %v8984_v26  ;;  %v17440_v26 = vld [vmem:[%s24345_s12 + $0x14c] ss:$20 sps:$4 sm:$0xff]  }
 0x803   : > { %v15361_v22 = vadd.f32 %v15360_v7, %v15359_v58  ;;  %v17444_v58 = vld [vmem:[%s24345_s12 + $0x174] ss:$20 sps:$4 sm:$0xff]   ;;  %v17449_v7 = vld [vmem:[%s24345_s12 + $0xd8] ss:$20 sps:$4 sm:$0xff]  }
 0x804   : > { %v15362_v27 = vpop.f32.mrf.mxu1  ;;  %9506 = vmatmul.mubr.bf16.gmra.mxu0 %v17391_v1  ;;  %v17442_v1 = vld [vmem:[%s24345_s12 + $0x170] ss:$20 sps:$4 sm:$0xff]  }
 0x805   : > { %15477 = vmatpush3.bf16.msra.mxu1 %v8982_v39  ;;  %9513 = vmatprep.mubr.bf16.mxu0 %v17396_v43  ;;  %v8968_v11 = vpack.c.bf16 %v15361_v22, %v15358_v38  ;;  %v17445_v39 = vld [vmem:[%s24345_s12 + $0xb0] ss:$20 sps:$4 sm:$0xff]   ;;  %v24601_v22 = vmov 0  }
 0x806   : > { %v15363_v0 = vpop.f32.mrf.mxu1  ;;  %15478 = vmatprep.subr.bf16.mxu1 %v8975_v16  ;;  %v17448_v43 = vld [vmem:[%s24345_s12 + $0x19c] ss:$20 sps:$4 sm:$0xff]   ;;  %v17446_v16 = vld [vmem:[%s24345_s12 + $0x198] ss:$20 sps:$4 sm:$0xff]   ;;  %v17489_v38 = vld [vmem:[%s24349_s16 + $0xe0] ss:$36 sps:$4 sm:$0xff]  }
 0x808   : > { %v15365_v10 = vpop.f32.mrf.mxu1 }
 0x809   : > { %15479 = vmatpush3.bf16.msra.mxu1 %v8973_v61  ;;  %v17462_v61 = vld [vmem:[%s24349_s16 + $0x1f8] ss:$36 sps:$4 sm:$0xff]  }
 0x80a   : > { %v15366_v60 = vpop.f32.mrf.mxu1  ;;  %15480 = vmatprep.subr.bf16.mxu1 %v8966_v14  ;;  %v17467_v14 = vld [vmem:[%s24349_s16 + $0x204] ss:$36 sps:$4 sm:$0xff]  }
 0x80b   : > { %v15367_v34 = vadd.f32 %v15366_v60, %v15365_v10  ;;  %v17465_v10 = vld [vmem:[%s24349_s16 + $0x200] ss:$36 sps:$4 sm:$0xff]  }
 0x80c   : > { %v15368_v8 = vpop.f32.mrf.mxu1  ;;  %9514 = vmatmul.mubr.bf16.gmra.mxu0 %v17394_v52  ;;  %v9060_v52 = vld [vmem:[%s24345_s12 + $0x1e8] sm:$0xff]  ;;  %v17453_v60 = vld [vmem:[%s24345_s12 + $0x100] ss:$20 sps:$4 sm:$0xff]  }
 0x80d   : > { %15481 = vmatpush3.bf16.msra.mxu1 %v8964_v56  ;;  %9521 = vmatprep.mubr.bf16.mxu0 %v17399_v9  ;;  %v17450_v9 = vld [vmem:[%s24345_s12 + $0x1c0] ss:$20 sps:$4 sm:$0xff]  }
 0x80e   : > { %v15369_v42 = vpop.f32.mrf.mxu1  ;;  %15482 = vmatprep.subr.bf16.mxu1 %v8957_v57  ;;  %v15364_v57 = vadd.f32 %v15363_v0, %v15362_v27  ;;  %v17452_v27 = vld [vmem:[%s24345_s12 + $0x1c4] ss:$20 sps:$4 sm:$0xff]   ;;  %v17464_v0 = vld [vmem:[%s24349_s16 + $0x1fc] ss:$36 sps:$4 sm:$0xff]  }
 0x80f   : > { %v15370_v62 = vadd.f32 %v15369_v42, %v15368_v8  ;;  %v17470_v56 = vld [vmem:[%s24349_s16 + $0x1b4] ss:$36 sps:$4 sm:$0xff]   ;;  %v17473_v8 = vld [vmem:[%s24349_s16 + $0x1bc] ss:$36 sps:$4 sm:$0xff]   ;;  %v14299_v42 = vcombine.high %v9060_v52, %v9060_v52 }
 0x810   : > { %v15371_v31 = vpop.f32.mrf.mxu1  ;;  %v8977_v2 = vpack.c.bf16 %v15367_v34, %v15364_v57  ;;  %v17482_v57 = vld [vmem:[%s24349_s16 + $0x124] ss:$36 sps:$4 sm:$0xff]   ;;  %v17485_v34 = vld [vmem:[%s24349_s16 + $0x12c] ss:$36 sps:$4 sm:$0xff]  }
 0x811   : > { %15483 = vmatpush3.bf16.msra.mxu1 %v8955_v63  ;;  %v17468_v63 = vld [vmem:[%s24349_s16 + $0x1b0] ss:$36 sps:$4 sm:$0xff]  }
 0x812   : > { %v15372_v4 = vpop.f32.mrf.mxu1  ;;  %10294 = vmatprep.subr.bf16.mxu1 %v17464_v0 }
 0x813   : > { %v15373_v5 = vadd.f32 %v15372_v4, %v15371_v31  ;;  %v17471_v31 = vld [vmem:[%s24349_s16 + $0x1b8] ss:$36 sps:$4 sm:$0xff]   ;;  %v14298_v4 = vcombine.low %v9060_v52, %v9060_v52 }
 0x814   : > { %9522 = vmatmul.mubr.bf16.gmra.mxu0 %v17397_v33  ;;  %9594 = vmatmul.mubr.bf16.vlgmr.msra.gmra.mxu1 %v17400_v36  ;;  %v17476_v33 = vld [vmem:[%s24349_s16 + $0x16c] ss:$36 sps:$4 sm:$0xff]   ;;  %v17479_v36 = vld [vmem:[%s24349_s16 + $0x174] ss:$36 sps:$4 sm:$0xff]  }
 0x815   : > { %v8986_v37 = vpack.c.bf16 %v15373_v5, %v15370_v62  ;;  %9529 = vmatprep.mubr.bf16.mxu0 %v17405_v21  ;;  %9601 = vmatprep.mubr.bf16.mxu1 %v17408_v20  ;;  %v17474_v62 = vld [vmem:[%s24349_s16 + $0x168] ss:$36 sps:$4 sm:$0xff]   ;;  %v17477_v21 = vld [vmem:[%s24349_s16 + $0x170] ss:$36 sps:$4 sm:$0xff]   ;;  %v17480_v5 = vld [vmem:[%s24349_s16 + $0x120] ss:$36 sps:$4 sm:$0xff]  }
 0x816   : > { %10295 = vmatpush1.bf16.msra.mxu1 %v17462_v61  ;;  %v17454_v20 = vld [vmem:[%s24345_s12 + $0x128] ss:$20 sps:$4 sm:$0xff]  }
 0x817   : > { %16140 = vmatpush3.bf16.msra.mxu0 %v8986_v37  ;;  %10296 = vmatprep.subr.bf16.mxu1 %v17470_v56  ;;  %v17483_v37 = vld [vmem:[%s24349_s16 + $0x128] ss:$36 sps:$4 sm:$0xff]  }
 0x818   : > { %16141 = vmatprep.subr.bf16.mxu0 %v24600_v59 }
 0x81a   : > { %10297 = vmatpush1.bf16.msra.mxu1 %v17468_v63 }
 0x81b   : > { %16142 = vmatpush3.bf16.msra.mxu0 %v8977_v2  ;;  %10298 = vmatprep.subr.bf16.mxu1 %v17476_v33  ;;  %v17488_v2 = vld [vmem:[%s24349_s16 + $0xdc] ss:$36 sps:$4 sm:$0xff]  }
 0x81c   : > { %9530 = vmatmul.mubr.bf16.gmra.mxu0 %v17403_v50  ;;  %9602 = vmatmul.mubr.bf16.gmra.mxu1 %v17406_v40  ;;  %v17491_v50 = vld [vmem:[%s24349_s16 + $0xe4] ss:$36 sps:$4 sm:$0xff]   ;;  %v17486_v40 = vld [vmem:[%s24349_s16 + $0xd8] ss:$36 sps:$4 sm:$0xff]  }
 0x81d   : > { %16143 = vmatprep.subr.bf16.mxu0 %v24600_v59  ;;  %9537 = vmatprep.mubr.bf16.mxu0 %v17411_v29  ;;  %v17457_v29 = vld [vmem:[%s24345_s12 + $0x150] ss:$20 sps:$4 sm:$0xff]  }
 0x81e   : > { %9609 = vmatprep.mubr.bf16.mxu1 %v17414_v3  ;;  %10299 = vmatpush1.bf16.msra.mxu1 %v17474_v62  ;;  %v17494_v3 = vld [vmem:[%s24349_s16 + $0x94] ss:$36 sps:$4 sm:$0xff]  }
 0x81f   : > { %16144 = vmatpush3.bf16.msra.mxu0 %v8968_v11  ;;  %10300 = vmatprep.subr.bf16.mxu1 %v17482_v57  ;;  %v17495_v11 = vld [vmem:[%s24349_s16 + $0x98] ss:$36 sps:$4 sm:$0xff]  }
 0x820   : > { %16145 = vmatprep.subr.bf16.mxu0 %v24600_v59  ;;  %v17515_v57 = vld [vmem:[%s24349_s16 + $0x214] ss:$36 sps:$4 sm:$0xff]  }
 0x822   : > { %10301 = vmatpush1.bf16.msra.mxu1 %v17480_v5 }
 0x823   : > { %16146 = vmatpush3.bf16.msra.mxu0 %v8959_v25  ;;  %10302 = vmatprep.subr.bf16.mxu1 %v17488_v2  ;;  %v17498_v25 = vld [vmem:[%s24349_s16 + $0x48] ss:$36 sps:$4 sm:$0xff]  }
 0x824   : > { %9538 = vmatmul.mubr.bf16.gmra.mxu0 %v17409_v13  ;;  %9610 = vmatmul.mubr.bf16.gmra.mxu1 %v17412_v51  ;;  %v17500_v13 = vld [vmem:[%s24349_s16 + $0x4c] ss:$36 sps:$4 sm:$0xff]   ;;  %v17503_v51 = vld [vmem:[%s24349_s16 + $0x54] ss:$36 sps:$4 sm:$0xff]  }
 0x825   : > { %9545 = vmatprep.mubr.bf16.mxu0 %v17417_v45  ;;  %9617 = vmatprep.mubr.bf16.mxu1 %v17420_v17  ;;  %v17501_v45 = vld [vmem:[%s24349_s16 + $0x50] ss:$36 sps:$4 sm:$0xff]   ;;  %v17458_v17 = vld [vmem:[%s24345_s12 + $0x178] ss:$20 sps:$4 sm:$0xff]  }
 0x826   : > { %10455 = vmatprep.subr.bf16.mxu0 %v17467_v14  ;;  %10303 = vmatpush1.bf16.msra.mxu1 %v17486_v40 }
 0x827   : > { %10304 = vmatprep.subr.bf16.mxu1 %v17494_v3 }
 0x82a   : > { %10305 = vmatpush1.bf16.msra.mxu1 %v17492_v54 }
 0x82b   : > { %10306 = vmatprep.subr.bf16.mxu1 %v17500_v13 }
 0x82c   : > { %9546 = vmatmul.mubr.bf16.gmra.mxu0 %v17415_v35  ;;  %9618 = vmatmul.mubr.bf16.gmra.mxu1 %v17418_v30  ;;  %v17509_v35 = vld [vmem:[%s24349_s16 + $0xc] ss:$36 sps:$4 sm:$0xff]   ;;  %v17504_v30 = vld [vmem:[%s24349_s16] ss:$36 sps:$4 sm:$0xff]  }
 0x82d   : > { %9553 = vmatprep.mubr.bf16.mxu0 %v14297_v12  ;;  %9625 = vmatprep.mubr.bf16.mxu1 %v17425_v28  ;;  %v17507_v12 = vld [vmem:[%s24349_s16 + $0x8] ss:$36 sps:$4 sm:$0xff]   ;;  %v17459_v28 = vld [vmem:[%s24345_s12 + $0x1a0] ss:$20 sps:$4 sm:$0xff]  }
 0x82e   : > { %10307 = vmatpush1.bf16.msra.mxu1 %v17498_v25 }
 0x82f   : > { %10308 = vmatprep.subr.bf16.mxu1 %v17506_v23 }
 0x832   : > { %10309 = vmatpush1.bf16.msra.mxu1 %v17504_v30 }
 0x834   : > { %9554 = vmatmul.mubr.bf16.gmra.mxu0 %v14296_v24  ;;  %9626 = vmatmul.mubr.bf16.gmra.mxu1 %v17423_v47  ;;  %v17460_v24 = vld [vmem:[%s24345_s12 + $0x1c8] ss:$20 sps:$4 sm:$0xff]  }
 0x835   : > { %9633 = vmatprep.mubr.bf16.mxu1 %v17428_v19  ;;  %16147 = vmatprep.mubr.msk.bf16.mxu0 %vm17821_vm0, %v24600_v59 }
 0x83c   : > { %9634 = vmatmul.mubr.bf16.gmra.mxu1 %v17426_v18  ;;  %16148 = vmatmul.mubr.msk.bf16.vlgmr.msra.gmra.mxu0 %vm2511_vm1, %v17429_v49 }
 0x83d   : > { %9641 = vmatprep.mubr.bf16.mxu1 %v17432_v48  ;;  %16151 = vmatprep.mubr.msk.bf16.mxu0 %vm17821_vm0, %v24600_v59  ;;  %v17461_v48 = vld [vmem:[%s24345_s12 + $0x1f0] ss:$0 sps:$4 sm:$0xff]  }
 0x83e   : > { %10456 = vmatpush1.bf16.msra.mxu0 %v17465_v10 }
 0x83f   : > { %10457 = vmatprep.subr.bf16.mxu0 %v17473_v8 }
 0x842   : > { %10458 = vmatpush1.bf16.msra.mxu0 %v17471_v31 }
 0x843   : > { %10459 = vmatprep.subr.bf16.mxu0 %v17479_v36  ;;  %v17512_v36 = vld [vmem:[%s24349_s16 + $0x20c] ss:$36 sps:$4 sm:$0xff]  }
 0x844   : > { %9642 = vmatmul.mubr.bf16.gmra.mxu1 %v17430_v53  ;;  %16152 = vmatmul.mubr.msk.bf16.gmra.mxu0 %vm2511_vm1, %v17433_v32 }
 0x845   : > { %9649 = vmatprep.mubr.bf16.mxu1 %v17436_v55  ;;  %16155 = vmatprep.mubr.msk.bf16.mxu0 %vm17821_vm0, %v24600_v59 }
 0x846   : > { %10460 = vmatpush1.bf16.msra.mxu0 %v17477_v21  ;;  %10616 = vmatprep.subr.bf16.mxu1 %v17512_v36 }
 0x847   : > { %10461 = vmatprep.subr.bf16.mxu0 %v17485_v34 }
 0x84a   : > { %10462 = vmatpush1.bf16.msra.mxu0 %v17483_v37 }
 0x84b   : > { %10463 = vmatprep.subr.bf16.mxu0 %v17491_v50 }
 0x84c   : > { %9650 = vmatmul.mubr.bf16.gmra.mxu1 %v17434_v6  ;;  %16156 = vmatmul.mubr.msk.bf16.gmra.mxu0 %vm2511_vm1, %v17437_v41 }
 0x84d   : > { %9657 = vmatprep.mubr.bf16.mxu1 %v17440_v26  ;;  %16159 = vmatprep.mubr.msk.bf16.mxu0 %vm17821_vm0, %v24600_v59 }
 0x84e   : > { %10464 = vmatpush1.bf16.msra.mxu0 %v17489_v38 }
 0x84f   : > { %10465 = vmatprep.subr.bf16.mxu0 %v17497_v46 }
 0x852   : > { %10466 = vmatpush1.bf16.msra.mxu0 %v17495_v11 }
 0x853   : > { %10467 = vmatprep.subr.bf16.mxu0 %v17503_v51 }
 0x854   : > { %9658 = vmatmul.mubr.bf16.gmra.mxu1 %v17438_v44  ;;  %16160 = vmatmul.mubr.msk.bf16.gmra.mxu0 %vm2511_vm1, %v17441_v15 }
 0x855   : > { %9665 = vmatprep.mubr.bf16.mxu1 %v17444_v58  ;;  %16163 = vmatprep.mubr.msk.bf16.mxu0 %vm17821_vm0, %v24600_v59 }
 0x856   : > { %10468 = vmatpush1.bf16.msra.mxu0 %v17501_v45 }
 0x857   : > { %10469 = vmatprep.subr.bf16.mxu0 %v17509_v35 }
 0x85a   : > { %10470 = vmatpush1.bf16.msra.mxu0 %v17507_v12 }
 0x85b   : > { %10777 = vmatprep.subr.bf16.mxu0 %v17515_v57 }
 0x85c   : > { %9666 = vmatmul.mubr.bf16.gmra.mxu1 %v17442_v1  ;;  %16164 = vmatmul.mubr.msk.bf16.gmra.mxu0 %vm2511_vm1, %v17445_v39 }
 0x85d   : > { %9673 = vmatprep.mubr.bf16.mxu1 %v17448_v43  ;;  %16167 = vmatprep.mubr.msk.bf16.mxu0 %vm17821_vm0, %v24600_v59 }
 0x864   : > { %9674 = vmatmul.mubr.bf16.gmra.mxu1 %v17446_v16  ;;  %16168 = vmatmul.mubr.msk.bf16.gmra.mxu0 %vm2511_vm1, %v17449_v7 }
 0x865   : > { %9681 = vmatprep.mubr.bf16.mxu1 %v17452_v27  ;;  %16171 = vmatprep.mubr.msk.bf16.mxu0 %vm17821_vm0, %v24600_v59 }
 0x86c   : > { %9682 = vmatmul.mubr.bf16.gmra.mxu1 %v17450_v9  ;;  %16172 = vmatmul.mubr.msk.bf16.gmra.mxu0 %vm2511_vm1, %v17453_v60 }
 0x86d   : > { %16175 = vmatprep.mubr.msk.bf16.mxu0 %vm17821_vm0, %v24600_v59  ;;  %9689 = vmatprep.mubr.bf16.mxu1 %v14299_v42 }
 0x874   : > { %16176 = vmatmul.mubr.msk.bf16.gmra.mxu0 %vm2511_vm1, %v17454_v20  ;;  %9690 = vmatmul.mubr.bf16.gmra.mxu1 %v14298_v4 }
 0x875   : > { %16179 = vmatprep.mubr.msk.bf16.mxu0 %vm17821_vm0, %v24600_v59  ;;  %10326 = vmatprep.mubr.bf16.mxu1 %v24601_v22 }
 0x87c   : > { %16180 = vmatmul.mubr.msk.bf16.gmra.mxu0 %vm2511_vm1, %v17457_v29 }
 0x87d   : > { %16183 = vmatprep.mubr.msk.bf16.mxu0 %vm17821_vm0, %v24600_v59 }
 0x884   : > { %16184 = vmatmul.mubr.msk.bf16.gmra.mxu0 %vm2511_vm1, %v17458_v17 }
 0x885   : > { %16187 = vmatprep.mubr.msk.bf16.mxu0 %vm17821_vm0, %v24600_v59 }
 0x88c   : > { %16188 = vmatmul.mubr.msk.bf16.gmra.mxu0 %vm2511_vm1, %v17459_v28 }
 0x88d   : > { %16191 = vmatprep.mubr.msk.bf16.mxu0 %vm17821_vm0, %v24600_v59 }
 0x894   : > { %v15390_v47 = vpop.f32.mrf.mxu0  ;;  %16192 = vmatmul.mubr.msk.bf16.gmra.mxu0 %vm2511_vm1, %v17460_v24 }
 0x895   : > { %16195 = vmatprep.mubr.msk.bf16.mxu0 %vm17821_vm0, %v24600_v59 }
 0x896   : > { %v15391_v19 = vpop.f32.mrf.mxu0 }
 0x897   : > { %v22439_v18 = vadd.f32 %v15391_v19, %v15390_v47 }
 0x898   : > { %v22441_v49 = vpop.f32.mrf.mxu0 }
 0x89a   : > { %v22446_v53 = vpop.f32.mrf.mxu0 }
 0x89c   : > { %v15396_v32 = vpop.f32.mrf.mxu0  ;;  %16196 = vmatmul.mubr.msk.bf16.gmra.mxu0 %vm2511_vm1, %v17461_v48 }
 0x89d   : > { %10487 = vmatprep.mubr.bf16.mxu0 %v24601_v22 }
 0x89e   : > { %v15397_v55 = vpop.f32.mrf.mxu0 }
 0x89f   : > { %v22450_v6 = vadd.f32 %v15397_v55, %v15396_v32 }
 0x8a0   : > { %v22452_v41 = vpop.f32.mrf.mxu0 }
 0x8a2   : > { %v22454_v26 = vpop.f32.mrf.mxu0 }
 0x8a4   : > { %v15402_v44 = vpop.f32.mrf.mxu0 }
 0x8a6   : > { %v15403_v15 = vpop.f32.mrf.mxu0 }
 0x8a7   : > { %v22456_v58 = vadd.f32 %v15403_v15, %v15402_v44 }
 0x8a8   : > { %v22458_v1 = vpop.f32.mrf.mxu0 }
 0x8aa   : > { %v22460_v39 = vpop.f32.mrf.mxu0 }
 0x8ac   : > { %v15408_v43 = vpop.f32.mrf.mxu0 }
 0x8ae   : > { %v15409_v16 = vpop.f32.mrf.mxu0 }
 0x8af   : > { %v22462_v7 = vadd.f32 %v15409_v16, %v15408_v43 }
 0x8b0   : > { %v22464_v27 = vpop.f32.mrf.mxu0 }
 0x8b2   : > { %v22466_v0 = vpop.f32.mrf.mxu0 }
 0x8b4   : > { %v15414_v61 = vpop.f32.mrf.mxu0 }
 0x8b6   : > { %v15415_v14 = vpop.f32.mrf.mxu0 }
 0x8b7   : > { %v22468_v10 = vadd.f32 %v15415_v14, %v15414_v61 }
 0x8b8   : > { %v22470_v52 = vpop.f32.mrf.mxu0 }
 0x8ba   : > { %v22472_v9 = vpop.f32.mrf.mxu0 }
 0x8bc   : > { %v15420_v60 = vpop.f32.mrf.mxu0 }
 0x8be   : > { %v15421_v56 = vpop.f32.mrf.mxu0 }
 0x8bf   : > { %v22474_v8 = vadd.f32 %v15421_v56, %v15420_v60 }
 0x8c0   : > { %v22476_v42 = vpop.f32.mrf.mxu0 }
 0x8c2   : > { %v22478_v63 = vpop.f32.mrf.mxu0 }
 0x8c4   : > { %v15426_v31 = vpop.f32.mrf.mxu0 }
 0x8c6   : > { %v15427_v33 = vpop.f32.mrf.mxu0 }
 0x8c7   : > { %v22483_v62 = vadd.f32 %v15427_v33, %v15426_v31 }
 0x8c8   : > { %v22485_v21 = vpop.f32.mrf.mxu0 }
 0x8ca   : > { %v22487_v20 = vpop.f32.mrf.mxu0 }
 0x8cc   : > { %v15432_v4 = vpop.f32.mrf.mxu0 }
 0x8ce   : > { %v15433_v34 = vpop.f32.mrf.mxu0 }
 0x8cf   : > { %v22492_v5 = vadd.f32 %v15433_v34, %v15432_v4 }
 0x8d0   : > { %v22494_v37 = vpop.f32.mrf.mxu0 }
 0x8d2   : > { %v22496_v2 = vpop.f32.mrf.mxu0 }
 0x8d4   : > { %v15438_v50 = vpop.f32.mrf.mxu0  ;;  %v15484_v40 = vpop.f32.mrf.mxu1 }
 0x8d6   : > { %v15439_v38 = vpop.f32.mrf.mxu0  ;;  %v15485_v29 = vpop.f32.mrf.mxu1 }
 0x8d7   : > { %v22498_v3 = vadd.f32 %v15439_v38, %v15438_v50 }
 0x8d8   : > { %v22500_v46 = vpop.f32.mrf.mxu0  ;;  %v15487_v54 = vpop.f32.mrf.mxu1 }
 0x8da   : > { %v22502_v11 = vpop.f32.mrf.mxu0  ;;  %v15488_v13 = vpop.f32.mrf.mxu1 }
 0x8dc   : > { %v15444_v51 = vpop.f32.mrf.mxu0  ;;  %v15490_v25 = vpop.f32.mrf.mxu1 }
 0x8de   : > { %v15445_v45 = vpop.f32.mrf.mxu0  ;;  %v15491_v17 = vpop.f32.mrf.mxu1 }
 0x8df   : > { %v22504_v23 = vadd.f32 %v15445_v45, %v15444_v51 }
 0x8e0   : > { %v22506_v35 = vpop.f32.mrf.mxu0  ;;  %v15493_v30 = vpop.f32.mrf.mxu1 }
 0x8e1   : > { %24602 = vst [vmem:[#allocation33_spill] sm:$0xff] %v22504_v23  ;;  %24603 = vst [vmem:[#allocation22_spill] sm:$0xff] %v22506_v35 }
 0x8e2   : > { %v22508_v12 = vpop.f32.mrf.mxu0  ;;  %v15494_v28 = vpop.f32.mrf.mxu1 }
 0x8e3   : > { %24604 = vst [vmem:[#allocation31_spill] sm:$0xff] %v22508_v12  ;;  %v15492_v12 = vadd.f32 %v15491_v17, %v15490_v25  ;;  %v17521_v25 = vld [vmem:[%s24349_s16 + $0x1cc] ss:$36 sps:$4 sm:$0xff]  }
 0x8e4   : > { %v15450_v24 = vpop.f32.mrf.mxu0  ;;  %v22510_v47 = vpop.f32.mrf.mxu1 }
 0x8e6   : > { %v15451_v19 = vpop.f32.mrf.mxu0  ;;  %v22512_v48 = vpop.f32.mrf.mxu1 }
 0x8e7   : > { %v22514_v32 = vadd.f32 %v15451_v19, %v15450_v24  ;;  %v15395_v19 = vadd.f32 %v22446_v53, %v22441_v49 }
 0x8e8   : > { %v22516_v55 = vpop.f32.mrf.mxu0  ;;  %v22518_v44 = vpop.f32.mrf.mxu1 }
 0x8e9   : > { %24605 = vst [vmem:[#allocation30_spill] sm:$0xff] %v22514_v32  ;;  %24606 = vst [vmem:[#allocation18_spill] sm:$0xff] %v22516_v55 }
 0x8ea   : > { %v22520_v15 = vpop.f32.mrf.mxu0  ;;  %v22522_v43 = vpop.f32.mrf.mxu1 }
 0x8eb   : > { %24607 = vst [vmem:[#allocation29_spill] sm:$0xff] %v22520_v15 }
 0x8ec   : > { %v15456_v16 = vpop.f32.mrf.mxu0  ;;  %v22524_v61 = vpop.f32.mrf.mxu1 }
 0x8ee   : > { %v15457_v14 = vpop.f32.mrf.mxu0  ;;  %v22526_v60 = vpop.f32.mrf.mxu1 }
 0x8ef   : > { %v22528_v56 = vadd.f32 %v15457_v14, %v15456_v16  ;;  %v22551_v16 = vld [vmem:[%s24347_s14] ss:$0 sm:$0xff] }
 0x8f0   : > { %v22530_v31 = vpop.f32.mrf.mxu0  ;;  %v22532_v33 = vpop.f32.mrf.mxu1  ;;  %v9468_v17 = vadd.f32 %v22450_v6, %v22551_v16  ;;  %v17516_v6 = vld [vmem:[%s24349_s16 + $0x1c0] ss:$36 sps:$4 sm:$0xff]  }
 0x8f1   : > { %24608 = vst [vmem:[#allocation26_spill] sm:$0xff] %v22528_v56  ;;  %24609 = vst [vmem:[#allocation27_spill] sm:$0xff] %v22530_v31  ;;  %v15489_v31 = vadd.f32 %v15488_v13, %v15487_v54 }
 0x8f2   : > { %v22534_v36 = vpop.f32.mrf.mxu0  ;;  %v22536_v4 = vpop.f32.mrf.mxu1 }
 0x8f3   : > { %24610 = vst [vmem:[#allocation36_spill] sm:$0xff] %v22534_v36  ;;  %v15486_v36 = vadd.f32 %v15485_v29, %v15484_v40  ;;  %v15401_v40 = vadd.f32 %v22454_v26, %v22452_v41  ;;  %v17518_v26 = vld [vmem:[%s24349_s16 + $0x1c4] ss:$36 sps:$4 sm:$0xff]  }
 0x8f4   : > { %v15462_v57 = vpop.f32.mrf.mxu0  ;;  %v22538_v34 = vpop.f32.mrf.mxu1 }
 0x8f6   : > { %v15463_v50 = vpop.f32.mrf.mxu0  ;;  %v22540_v38 = vpop.f32.mrf.mxu1 }
 0x8f7   : > { %v22542_v51 = vadd.f32 %v15463_v50, %v15462_v57  ;;  %v9460_v50 = vadd.f32 %v22439_v18, %v22551_v16  ;;  %v15495_v18 = vadd.f32 %v15494_v28, %v15493_v30 }
 0x8f8   : > { %v15465_v45 = vpop.f32.mrf.mxu0  ;;  %v22544_v24 = vpop.f32.mrf.mxu1 }
 0x8f9   : > { %24611 = vst [vmem:[#allocation19_spill] sm:$0xff] %v22542_v51  ;;  %v9463_v45 = vadd.f32 %v15395_v19, %v22551_v16  ;;  %v9596_v53 = vadd.f32 %v15486_v36, %v9460_v50  ;;  %v17510_v36 = vld [vmem:[%s24349_s16 + $0x208] ss:$36 sps:$4 sm:$0xff]  }
 0x8fa   : > { %v15466_v14 = vpop.f32.mrf.mxu0  ;;  %v22553_v56 = vpop.f32.mrf.mxu1  ;;  %v17519_v50 = vld [vmem:[%s24349_s16 + $0x1c8] ss:$36 sps:$4 sm:$0xff]  }
 0x8fb   : > { %v9599_v15 = vadd.f32 %v15489_v31, %v9463_v45  ;;  %v17513_v31 = vld [vmem:[%s24349_s16 + $0x210] ss:$36 sps:$4 sm:$0xff]  }
 0x8fc   : > { %v22555_v32 = vpop.f32.mrf.mxu1  ;;  %v9731_v57 = vpop.f32.mrf.mxu0 }
 0x8fd   : > { %v9732_v29 = vadd.f32 %v9731_v57, %v9596_v53  ;;  %v17527_v53 = vld [vmem:[%s24349_s16 + $0x184] ss:$36 sps:$4 sm:$0xff]  }
 0x8fe   : > { %v22560_v51 = vpop.f32.mrf.mxu1  ;;  %v16149_v49 = vpop.f32.mrf.mxu0 }
 0x900   : > { %v22562_v55 = vpop.f32.mrf.mxu1  ;;  %v9734_v14 = vpop.f32.mrf.mxu0 }
 0x901   : > { %v9735_v54 = vadd.f32 %v9734_v14, %v9599_v15  ;;  %v9604_v15 = vadd.f32 %v15492_v12, %v9468_v17  ;;  %v17524_v12 = vld [vmem:[%s24349_s16 + $0x17c] ss:$36 sps:$4 sm:$0xff]   ;;  %v15407_v14 = vadd.f32 %v22460_v39, %v22458_v1 }
 0x902   : > { %v22566_v13 = vpop.f32.mrf.mxu1  ;;  %v16150_v23 = vpop.f32.mrf.mxu0  ;;  %v17525_v1 = vld [vmem:[%s24349_s16 + $0x180] ss:$36 sps:$4 sm:$0xff]  }
 0x903   : > { %v22568_v35 = vpack.c.bf16 %v9735_v54, %v9732_v29  ;;  %v9471_v23 = vadd.f32 %v15401_v40, %v22551_v16 }
 0x904   : > { %v22576_v19 = vpop.f32.mrf.mxu1  ;;  %v9739_v41 = vpop.f32.mrf.mxu0 }
 0x905   : > { %10327 = vmatmul.mubr.bf16.vlgmr.msra.gmra.mxu1 %v22568_v35  ;;  %10488 = vmatmul.mubr.bf16.vlgmr.msra.gmra.mxu0 %v22568_v35  ;;  %v9607_v57 = vadd.f32 %v15495_v18, %v9471_v23  ;;  %v9740_v40 = vadd.f32 %v9739_v41, %v9604_v15 }
 0x906   : > { %v22589_v30 = vpop.f32.mrf.mxu1  ;;  %v16153_v28 = vpop.f32.mrf.mxu0  ;;  %10336 = vmatprep.mubr.bf16.mxu1 %v24601_v22  ;;  %10497 = vmatprep.mubr.bf16.mxu0 %v24601_v22 }
 0x907   : > { %10617 = vmatpush1.bf16.msra.mxu1 %v17510_v36  ;;  %10778 = vmatpush1.bf16.msra.mxu0 %v17513_v31  ;;  %v15498_v36 = vadd.f32 %v22512_v48, %v22510_v47  ;;  %v15501_v31 = vadd.f32 %v22522_v43, %v22518_v44  ;;  %v17530_v47 = vld [vmem:[%s24349_s16 + $0x134] ss:$36 sps:$4 sm:$0xff]   ;;  %v17533_v48 = vld [vmem:[%s24349_s16 + $0x13c] ss:$36 sps:$4 sm:$0xff]   ;;  %v9476_v44 = vadd.f32 %v22456_v58, %v22551_v16 }
 0x908   : > { %v22599_v45 = vpop.f32.mrf.mxu1  ;;  %v9742_v49 = vpop.f32.mrf.mxu0  ;;  %10618 = vmatprep.subr.bf16.mxu1 %v17518_v26  ;;  %10779 = vmatprep.subr.bf16.mxu0 %v17521_v25  ;;  %v17522_v25 = vld [vmem:[%s24349_s16 + $0x178] ss:$36 sps:$4 sm:$0xff]   ;;  %v9479_v43 = vadd.f32 %v15407_v14, %v22551_v16  ;;  %v17528_v58 = vld [vmem:[%s24349_s16 + $0x130] ss:$36 sps:$4 sm:$0xff]  }
 0x909   : > { %v9743_v29 = vadd.f32 %v9742_v49, %v9607_v57  ;;  %v9612_v28 = vadd.f32 %v15498_v36, %v9476_v44  ;;  %v17531_v57 = vld [vmem:[%s24349_s16 + $0x138] ss:$36 sps:$4 sm:$0xff]   ;;  %v17536_v49 = vld [vmem:[%s24349_s16 + $0xec] ss:$36 sps:$4 sm:$0xff]   ;;  %v15504_v36 = vadd.f32 %v22526_v60, %v22524_v61  ;;  %v17542_v61 = vld [vmem:[%s24349_s16 + $0xa4] ss:$36 sps:$4 sm:$0xff]  }
 0x90a   : > { %v22609_v54 = vpop.f32.mrf.mxu1  ;;  %v16154_v18 = vpop.f32.mrf.mxu0  ;;  %v9615_v15 = vadd.f32 %v15501_v31, %v9479_v43  ;;  %v15507_v31 = vadd.f32 %v22536_v4, %v22532_v33  ;;  %v17545_v60 = vld [vmem:[%s24349_s16 + $0xac] ss:$36 sps:$4 sm:$0xff]   ;;  %v9484_v33 = vadd.f32 %v22462_v7, %v22551_v16  ;;  %v17540_v7 = vld [vmem:[%s24349_s16 + $0xa0] ss:$36 sps:$4 sm:$0xff]  }
 0x90b   : > { %v22615_v26 = vpack.c.bf16 %v9743_v29, %v9740_v40  ;;  %10619 = vmatpush1.bf16.msra.mxu1 %v17516_v6  ;;  %10780 = vmatpush1.bf16.msra.mxu0 %v17519_v50 }
 0x90c   : > { %v22623_v39 = vpop.f32.mrf.mxu1  ;;  %v9747_v41 = vpop.f32.mrf.mxu0  ;;  %10620 = vmatprep.subr.bf16.mxu1 %v17524_v12  ;;  %10781 = vmatprep.subr.bf16.mxu0 %v17527_v53  ;;  %v17539_v12 = vld [vmem:[%s24349_s16 + $0xf4] ss:$36 sps:$4 sm:$0xff]   ;;  %v15413_v53 = vadd.f32 %v22466_v0, %v22464_v27  ;;  %v9620_v44 = vadd.f32 %v15504_v36, %v9484_v33 }
 0x90d   : > { %10337 = vmatmul.mubr.bf16.gmra.mxu1 %v22615_v26  ;;  %10498 = vmatmul.mubr.bf16.gmra.mxu0 %v22615_v26  ;;  %v9748_v14 = vadd.f32 %v9747_v41, %v9612_v28  ;;  %v17537_v27 = vld [vmem:[%s24349_s16 + $0xf0] ss:$36 sps:$4 sm:$0xff]   ;;  %v17555_v33 = vld [vmem:[%s24349_s16 + $0x18] ss:$36 sps:$4 sm:$0xff]  }
 0x90e   : > { %v22636_v17 = vpop.f32.mrf.mxu1  ;;  %v16157_v23 = vpop.f32.mrf.mxu0  ;;  %10346 = vmatprep.mubr.bf16.mxu1 %v24601_v22  ;;  %10507 = vmatprep.mubr.bf16.mxu0 %v24601_v22  ;;  %v9487_v4 = vadd.f32 %v15413_v53, %v22551_v16 }
 0x90f   : > { %10621 = vmatpush1.bf16.msra.mxu1 %v17522_v25  ;;  %10782 = vmatpush1.bf16.msra.mxu0 %v17525_v1  ;;  %v17534_v1 = vld [vmem:[%s24349_s16 + $0xe8] ss:$36 sps:$4 sm:$0xff]  }
 0x910   : > { %v22646_v6 = vpop.f32.mrf.mxu1  ;;  %v9750_v50 = vpop.f32.mrf.mxu0  ;;  %10622 = vmatprep.subr.bf16.mxu1 %v17530_v47  ;;  %10783 = vmatprep.subr.bf16.mxu0 %v17533_v48  ;;  %v9623_v43 = vadd.f32 %v15507_v31, %v9487_v4  ;;  %v17543_v23 = vld [vmem:[%s24349_s16 + $0xa8] ss:$36 sps:$4 sm:$0xff]   ;;  %v17546_v31 = vld [vmem:[%s24349_s16 + $0x58] ss:$36 sps:$4 sm:$0xff]  }
 0x911   : > { %v9751_v40 = vadd.f32 %v9750_v50, %v9615_v15  ;;  %v15419_v50 = vadd.f32 %v22472_v9, %v22470_v52  ;;  %v17549_v52 = vld [vmem:[%s24349_s16 + $0x60] ss:$36 sps:$4 sm:$0xff]  }
 0x912   : > { %v22656_v29 = vpop.f32.mrf.mxu1  ;;  %v16158_v18 = vpop.f32.mrf.mxu0 }
 0x913   : > { %v22662_v25 = vpack.c.bf16 %v9751_v40, %v9748_v14  ;;  %10623 = vmatpush1.bf16.msra.mxu1 %v17528_v58  ;;  %10784 = vmatpush1.bf16.msra.mxu0 %v17531_v57  ;;  %v17548_v58 = vld [vmem:[%s24349_s16 + $0x5c] ss:$36 sps:$4 sm:$0xff]   ;;  %v17551_v57 = vld [vmem:[%s24349_s16 + $0x64] ss:$36 sps:$4 sm:$0xff]   ;;  %v15510_v40 = vadd.f32 %v22540_v38, %v22538_v34  ;;  %v15513_v18 = vadd.f32 %v22553_v56, %v22544_v24  ;;  %v17554_v56 = vld [vmem:[%s24349_s16 + $0x14] ss:$36 sps:$4 sm:$0xff]  }
 0x914   : > { %v22670_v0 = vpop.f32.mrf.mxu1  ;;  %v9755_v41 = vpop.f32.mrf.mxu0  ;;  %10624 = vmatprep.subr.bf16.mxu1 %v17536_v49  ;;  %10785 = vmatprep.subr.bf16.mxu0 %v17539_v12  ;;  %v17557_v34 = vld [vmem:[%s24349_s16 + $0x1c] ss:$36 sps:$4 sm:$0xff]   ;;  %v9492_v38 = vadd.f32 %v22468_v10, %v22551_v16  ;;  %v9495_v24 = vadd.f32 %v15419_v50, %v22551_v16  ;;  %v17552_v10 = vld [vmem:[%s24349_s16 + $0x10] ss:$36 sps:$4 sm:$0xff]  }
 0x915   : > { %10347 = vmatmul.mubr.bf16.gmra.mxu1 %v22662_v25  ;;  %10508 = vmatmul.mubr.bf16.gmra.mxu0 %v22662_v25  ;;  %v9756_v49 = vadd.f32 %v9755_v41, %v9620_v44  ;;  %v15425_v44 = vadd.f32 %v22478_v63, %v22476_v42  ;;  %v9500_v42 = vadd.f32 %v22474_v8, %v22551_v16 }
 0x916   : > { %v22683_v47 = vpop.f32.mrf.mxu1  ;;  %v16161_v48 = vpop.f32.mrf.mxu0  ;;  %10356 = vmatprep.mubr.bf16.mxu1 %v24601_v22  ;;  %10517 = vmatprep.mubr.bf16.mxu0 %v24601_v22  ;;  %v15431_v8 = vadd.f32 %v22487_v20, %v22485_v21 }
 0x917   : > { %10625 = vmatpush1.bf16.msra.mxu1 %v17534_v1  ;;  %10786 = vmatpush1.bf16.msra.mxu0 %v17537_v27  ;;  %v9503_v63 = vadd.f32 %v15425_v44, %v22551_v16 }
 0x918   : > { %v22693_v28 = vpop.f32.mrf.mxu1  ;;  %v9758_v15 = vpop.f32.mrf.mxu0  ;;  %10626 = vmatprep.subr.bf16.mxu1 %v17542_v61  ;;  %10787 = vmatprep.subr.bf16.mxu0 %v17545_v60  ;;  %v9628_v61 = vadd.f32 %v15510_v40, %v9492_v38  ;;  %v9631_v60 = vadd.f32 %v15513_v18, %v9495_v24  ;;  %v9511_v21 = vadd.f32 %v15431_v8, %v22551_v16 }
 0x919   : > { %v9759_v12 = vadd.f32 %v9758_v15, %v9623_v43 }
 0x91a   : > { %v22703_v53 = vpop.f32.mrf.mxu1  ;;  %v16162_v14 = vpop.f32.mrf.mxu0 }
 0x91b   : > { %v22709_v36 = vpack.c.bf16 %v9759_v12, %v9756_v49  ;;  %10627 = vmatpush1.bf16.msra.mxu1 %v17540_v7  ;;  %10788 = vmatpush1.bf16.msra.mxu0 %v17543_v23  ;;  %v15537_v8 = vadd.f32 %v22703_v53, %v22693_v28  ;;  %v24612_v28 = vld [vmem:[#allocation22_spill] sm:$0xff]  ;;  %v24613_v53 = vld [vmem:[#allocation31_spill] sm:$0xff] }
 0x91c   : > { %v22717_v9 = vpop.f32.mrf.mxu1  ;;  %v9763_v1 = vpop.f32.mrf.mxu0  ;;  %10628 = vmatprep.subr.bf16.mxu1 %v17548_v58  ;;  %10789 = vmatprep.subr.bf16.mxu0 %v17551_v57  ;;  %v15516_v58 = vadd.f32 %v22560_v51, %v22555_v32  ;;  %v15519_v57 = vadd.f32 %v22566_v13, %v22562_v55 }
 0x91d   : > { %10357 = vmatmul.mubr.bf16.gmra.mxu1 %v22709_v36  ;;  %10518 = vmatmul.mubr.bf16.gmra.mxu0 %v22709_v36  ;;  %v9764_v43 = vadd.f32 %v9763_v1, %v9628_v61  ;;  %v9508_v61 = vadd.f32 %v22483_v62, %v22551_v16  ;;  %v15437_v62 = vadd.f32 %v22496_v2, %v22494_v37 }
 0x91e   : > { %v22730_v27 = vpop.f32.mrf.mxu1  ;;  %v16165_v41 = vpop.f32.mrf.mxu0  ;;  %10366 = vmatprep.mubr.bf16.mxu1 %v24601_v22  ;;  %10527 = vmatprep.mubr.bf16.mxu0 %v24601_v22  ;;  %v9636_v51 = vadd.f32 %v15516_v58, %v9500_v42  ;;  %v9639_v13 = vadd.f32 %v15519_v57, %v9503_v63 }
 0x91f   : > { %10629 = vmatpush1.bf16.msra.mxu1 %v17546_v31  ;;  %10790 = vmatpush1.bf16.msra.mxu0 %v17549_v52  ;;  %v9519_v37 = vadd.f32 %v15437_v62, %v22551_v16 }
 0x920   : > { %v22740_v4 = vpop.f32.mrf.mxu1  ;;  %v9766_v48 = vpop.f32.mrf.mxu0  ;;  %10630 = vmatprep.subr.bf16.mxu1 %v17554_v56  ;;  %10791 = vmatprep.subr.bf16.mxu0 %v17557_v34  ;;  %v15522_v56 = vadd.f32 %v22589_v30, %v22576_v19  ;;  %v15525_v34 = vadd.f32 %v22609_v54, %v22599_v45 }
 0x921   : > { %v9767_v7 = vadd.f32 %v9766_v48, %v9631_v60 }
 0x922   : > { %v22744_v23 = vpop.f32.mrf.mxu1  ;;  %v16166_v15 = vpop.f32.mrf.mxu0  ;;  %v9644_v30 = vadd.f32 %v15522_v56, %v9508_v61  ;;  %v9647_v45 = vadd.f32 %v15525_v34, %v9511_v21  ;;  %v15449_v34 = vadd.f32 %v24613_v53, %v24612_v28  ;;  %v15540_v21 = vadd.f32 %v22730_v27, %v22717_v9 }
 0x923   : > { %v22750_v50 = vpack.c.bf16 %v9767_v7, %v9764_v43  ;;  %10631 = vmatpush1.bf16.msra.mxu1 %v17552_v10  ;;  %10792 = vmatpush1.bf16.msra.mxu0 %v17555_v33  ;;  %v15528_v43 = vadd.f32 %v22636_v17, %v22623_v39  ;;  %v15531_v7 = vadd.f32 %v22656_v29, %v22646_v6 }
 0x924   : > { %v22752_v49 = vpop.f32.mrf.mxu1  ;;  %v9771_v12 = vpop.f32.mrf.mxu0  ;;  %16199 = vmatprep.subr.bf16.mxu1 %v24600_v59 }
 0x925   : > { %10367 = vmatmul.mubr.bf16.gmra.mxu1 %v22750_v50  ;;  %10528 = vmatmul.mubr.bf16.gmra.mxu0 %v22750_v50  ;;  %v9772_v18 = vadd.f32 %v9771_v12, %v9636_v51  ;;  %v9516_v12 = vadd.f32 %v22492_v5, %v22551_v16  ;;  %v9655_v17 = vadd.f32 %v15531_v7, %v9519_v37 }
 0x926   : > { %v22760_v32 = vpop.f32.mrf.mxu1  ;;  %v16169_v55 = vpop.f32.mrf.mxu0  ;;  %10376 = vmatprep.mubr.bf16.mxu1 %v24601_v22  ;;  %10537 = vmatprep.mubr.bf16.mxu0 %v24601_v22  ;;  %v15443_v5 = vadd.f32 %v22502_v11, %v22500_v46 }
 0x927   : > { %v9652_v39 = vadd.f32 %v15528_v43, %v9516_v12  ;;  %v15546_v37 = vadd.f32 %v22760_v32, %v22752_v49 }
 0x928   : > { %v22764_v14 = vpop.f32.mrf.mxu1  ;;  %v9774_v40 = vpop.f32.mrf.mxu0  ;;  %v9527_v56 = vadd.f32 %v15443_v5, %v22551_v16 }
 0x929   : > { %v9775_v31 = vadd.f32 %v9774_v40, %v9639_v13  ;;  %v15534_v40 = vadd.f32 %v22683_v47, %v22670_v0 }
 0x92a   : > { %v22768_v52 = vpop.f32.mrf.mxu1  ;;  %v16170_v1 = vpop.f32.mrf.mxu0  ;;  %v9663_v0 = vadd.f32 %v15537_v8, %v9527_v56 }
 0x92b   : > { %v22774_v38 = vpack.c.bf16 %v9775_v31, %v9772_v18  ;;  %v9524_v1 = vadd.f32 %v22498_v3, %v22551_v16 }
 0x92c   : > { %v22776_v24 = vpop.f32.mrf.mxu1  ;;  %v9779_v41 = vpop.f32.mrf.mxu0 }
 0x92d   : > { %10377 = vmatmul.mubr.bf16.gmra.mxu1 %v22774_v38  ;;  %10538 = vmatmul.mubr.bf16.gmra.mxu0 %v22774_v38  ;;  %v9780_v10 = vadd.f32 %v9779_v41, %v9644_v30  ;;  %v9660_v11 = vadd.f32 %v15534_v40, %v9524_v1 }
 0x92e   : > { %v22783_v20 = vpop.f32.mrf.mxu1  ;;  %v16173_v19 = vpop.f32.mrf.mxu0  ;;  %10386 = vmatprep.mubr.bf16.mxu1 %v24601_v22  ;;  %10547 = vmatprep.mubr.bf16.mxu0 %v24601_v22 }
 0x92f   : > { %v15543_v19 = vadd.f32 %v22744_v23, %v22740_v4  ;;  %v24615_v23 = vld [vmem:[#allocation18_spill] sm:$0xff] }
 0x930   : > { %v22787_v54 = vpop.f32.mrf.mxu1  ;;  %v9782_v60 = vpop.f32.mrf.mxu0 }
 0x931   : > { %v9783_v33 = vadd.f32 %v9782_v60, %v9647_v45  ;;  %v24614_v60 = vld [vmem:[#allocation33_spill] sm:$0xff] }
 0x932   : > { %v22791_v48 = vpop.f32.mrf.mxu1  ;;  %v16174_v44 = vpop.f32.mrf.mxu0  ;;  %v9532_v62 = vadd.f32 %v24614_v60, %v22551_v16 }
 0x933   : > { %v22797_v15 = vpack.c.bf16 %v9783_v33, %v9780_v10  ;;  %v9535_v10 = vadd.f32 %v15449_v34, %v22551_v16  ;;  %v24616_v44 = vld [vmem:[#allocation29_spill] sm:$0xff]  ;;  %v15555_v1 = vadd.f32 %v22791_v48, %v22787_v54 }
 0x934   : > { %v9787_v58 = vpop.f32.mrf.mxu0  ;;  %v22799_v57 = vpop.f32.mrf.mxu1  ;;  %v9668_v9 = vadd.f32 %v15540_v21, %v9532_v62  ;;  %v15455_v43 = vadd.f32 %v24616_v44, %v24615_v23  ;;  %v17563_v23 = vld [vmem:[%s24349_s16 + $0xb0] ss:$36 sps:$4 sm:$0xff]   ;;  %v17564_v44 = vld [vmem:[%s24349_s16 + $0x68] ss:$36 sps:$4 sm:$0xff]  }
 0x935   : > { %10387 = vmatmul.mubr.bf16.gmra.mxu1 %v22797_v15  ;;  %10548 = vmatmul.mubr.bf16.gmra.mxu0 %v22797_v15  ;;  %v9788_v63 = vadd.f32 %v9787_v58, %v9652_v39  ;;  %v9671_v27 = vadd.f32 %v15543_v19, %v9535_v10 }
 0x936   : > { %v16177_v2 = vpop.f32.mrf.mxu0  ;;  %v22806_v42 = vpop.f32.mrf.mxu1  ;;  %10396 = vmatprep.mubr.bf16.mxu1 %v24601_v22  ;;  %10557 = vmatprep.mubr.bf16.mxu0 %v24601_v22  ;;  %v9543_v5 = vadd.f32 %v15455_v43, %v22551_v16  ;;  %v17565_v43 = vld [vmem:[%s24349_s16 + $0x20] ss:$36 sps:$4 sm:$0xff]  }
 0x937   : > { %v15549_v2 = vadd.f32 %v22768_v52, %v22764_v14  ;;  %v24618_v52 = vld [vmem:[#allocation27_spill] sm:$0xff]  ;;  %v15558_v48 = vadd.f32 %v22806_v42, %v22799_v57 }
 0x938   : > { %v9790_v6 = vpop.f32.mrf.mxu0  ;;  %v15559_v29 = vpop.f32.mrf.mxu1 }
 0x939   : > { %v9791_v55 = vadd.f32 %v9790_v6, %v9655_v17  ;;  %v24617_v6 = vld [vmem:[#allocation30_spill] sm:$0xff]  ;;  %v9679_v32 = vadd.f32 %v15549_v2, %v9543_v5  ;;  %v17568_v5 = vld [vmem:[%s24348_s15 + $0x4] ss:$60 sps:$4 sm:$0xff]  }
 0x93a   : > { %v16178_v51 = vpop.f32.mrf.mxu0  ;;  %v15560_v13 = vpop.f32.mrf.mxu1  ;;  %v9540_v29 = vadd.f32 %v24617_v6, %v22551_v16 }
 0x93b   : > { %v22816_v18 = vpack.c.bf16 %v9791_v55, %v9788_v63  ;;  %v24619_v55 = vld [vmem:[#allocation36_spill] sm:$0xff] }
 0x93c   : > { %v9795_v31 = vpop.f32.mrf.mxu0  ;;  %v9676_v49 = vadd.f32 %v15546_v37, %v9540_v29  ;;  %v15461_v51 = vadd.f32 %v24619_v55, %v24618_v52 }
 0x93d   : > { %10397 = vmatmul.mubr.bf16.gmra.mxu1 %v22816_v18  ;;  %10558 = vmatmul.mubr.bf16.gmra.mxu0 %v22816_v18  ;;  %v9796_v41 = vadd.f32 %v9795_v31, %v9660_v11  ;;  %v15552_v31 = vadd.f32 %v22783_v20, %v22776_v24  ;;  %v24620_v11 = vld [vmem:[#allocation26_spill] sm:$0xff] }
 0x93e   : > { %v16181_v46 = vpop.f32.mrf.mxu0  ;;  %10406 = vmatprep.mubr.bf16.mxu1 %v24601_v22  ;;  %10567 = vmatprep.mubr.bf16.mxu0 %v24601_v22 }
 0x940   : > { %v9798_v47 = vpop.f32.mrf.mxu0 }
 0x941   : > { %v9799_v61 = vadd.f32 %v9798_v47, %v9663_v0  ;;  %v9548_v0 = vadd.f32 %v24620_v11, %v22551_v16  ;;  %v9551_v47 = vadd.f32 %v15461_v51, %v22551_v16 }
 0x942   : > { %v16182_v3 = vpop.f32.mrf.mxu0 }
 0x943   : > { %v22831_v30 = vpack.c.bf16 %v9799_v61, %v9796_v41  ;;  %v9684_v24 = vadd.f32 %v15552_v31, %v9548_v0  ;;  %v9687_v20 = vadd.f32 %v15555_v1, %v9551_v47  ;;  %v24621_v61 = vld [vmem:[#allocation19_spill] sm:$0xff] }
 0x944   : > { %v9803_v45 = vpop.f32.mrf.mxu0  ;;  %v9556_v3 = vadd.f32 %v24621_v61, %v22551_v16  ;;  %v17558_v16 = vld [vmem:[%s24349_s16 + $0x218] ss:$36 sps:$4 sm:$0xff]  }
 0x945   : > { %10407 = vmatmul.mubr.bf16.gmra.mxu1 %v22831_v30  ;;  %10568 = vmatmul.mubr.bf16.gmra.mxu0 %v22831_v30  ;;  %v9804_v7 = vadd.f32 %v9803_v45, %v9668_v9  ;;  %v17560_v9 = vld [vmem:[%s24349_s16 + $0x188] ss:$36 sps:$4 sm:$0xff]  }
 0x946   : > { %v16185_v33 = vpop.f32.mrf.mxu0  ;;  %10416 = vmatprep.mubr.bf16.mxu1 %v24601_v22  ;;  %10577 = vmatprep.mubr.bf16.mxu0 %v24601_v22  ;;  %v9692_v45 = vadd.f32 %v15558_v48, %v9556_v3 }
 0x947   : > { %v17559_v33 = vld [vmem:[%s24349_s16 + $0x1d0] ss:$36 sps:$4 sm:$0xff]  }
 0x948   : > { %v9806_v4 = vpop.f32.mrf.mxu0 }
 0x949   : > { %v9807_v58 = vadd.f32 %v9806_v4, %v9671_v27  ;;  %v17561_v27 = vld [vmem:[%s24349_s16 + $0x140] ss:$36 sps:$4 sm:$0xff]   ;;  %v17562_v4 = vld [vmem:[%s24349_s16 + $0xf8] ss:$36 sps:$4 sm:$0xff]  }
 0x94a   : > { %v16186_v12 = vpop.f32.mrf.mxu0 }
 0x94b   : > { %v22846_v39 = vpack.c.bf16 %v9807_v58, %v9804_v7 }
 0x94c   : > { %v9811_v17 = vpop.f32.mrf.mxu0 }
 0x94d   : > { %10417 = vmatmul.mubr.bf16.gmra.mxu1 %v22846_v39  ;;  %10578 = vmatmul.mubr.bf16.gmra.mxu0 %v22846_v39  ;;  %v9812_v13 = vadd.f32 %v9811_v17, %v9676_v49 }
 0x94e   : > { %v16189_v63 = vpop.f32.mrf.mxu0  ;;  %10426 = vmatprep.mubr.bf16.mxu1 %v24601_v22  ;;  %10587 = vmatprep.mubr.bf16.mxu0 %v24601_v22 }
 0x950   : > { %v9814_v14 = vpop.f32.mrf.mxu0 }
 0x951   : > { %v9815_v40 = vadd.f32 %v9814_v14, %v9679_v32 }
 0x952   : > { %v16190_v8 = vpop.f32.mrf.mxu0 }
 0x953   : > { %v22861_v56 = vpack.c.bf16 %v9815_v40, %v9812_v13 }
 0x954   : > { %v9819_v46 = vpop.f32.mrf.mxu0 }
 0x955   : > { %10427 = vmatmul.mubr.bf16.gmra.mxu1 %v22861_v56  ;;  %10588 = vmatmul.mubr.bf16.gmra.mxu0 %v22861_v56  ;;  %v9820_v53 = vadd.f32 %v9819_v46, %v9684_v24 }
 0x956   : > { %v16193_v28 = vpop.f32.mrf.mxu0  ;;  %10436 = vmatprep.mubr.bf16.mxu1 %v24601_v22  ;;  %10597 = vmatprep.mubr.bf16.mxu0 %v24601_v22 }
 0x958   : > { %v9822_v54 = vpop.f32.mrf.mxu0 }
 0x959   : > { %v9823_v34 = vadd.f32 %v9822_v54, %v9687_v20 }
 0x95a   : > { %v16194_v41 = vpop.f32.mrf.mxu0 }
 0x95b   : > { %v22874_v21 = vpack.c.bf16 %v9823_v34, %v9820_v53 }
 0x95c   : > { %v9827_v19 = vpop.f32.mrf.mxu0 }
 0x95d   : > { %10437 = vmatmul.mubr.bf16.gmra.mxu1 %v22874_v21  ;;  %10598 = vmatmul.mubr.bf16.gmra.mxu0 %v22874_v21  ;;  %v9828_v57 = vadd.f32 %v9827_v19, %v9692_v45 }
 0x95e   : > { %10446 = vmatprep.mubr.bf16.mxu1 %v24601_v22  ;;  %10607 = vmatprep.mubr.bf16.mxu0 %v24601_v22  ;;  %v16197_v60 = vpop.f32.mrf.mxu0 }
 0x95f   : > { %v22880_v10 = vpack.c.bf16 %v9828_v57, %v9828_v57 }
 0x960   : > { %v9830_v42 = vpop.f32.mrf.mxu0 }
 0x962   : > { %v16198_v62 = vpop.f32.mrf.mxu0 }
 0x965   : > { %10447 = vmatmul.mubr.bf16.gmra.mxu1 %v22880_v10  ;;  %10608 = vmatmul.mubr.bf16.gmra.mxu0 %v22880_v10 }
 0x966   : > { %10648 = vmatprep.mubr.bf16.mxu1 %v24601_v22  ;;  %10809 = vmatprep.mubr.bf16.mxu0 %v24601_v22 }
 0x96d   : > { %10649 = vmatmul.mubr.bf16.vlgmr.msra.gmra.mxu1 %v22568_v35  ;;  %10810 = vmatmul.mubr.bf16.vlgmr.msra.gmra.mxu0 %v22568_v35 }
 0x96e   : > { %10658 = vmatprep.mubr.bf16.mxu1 %v24601_v22  ;;  %10819 = vmatprep.mubr.bf16.mxu0 %v24601_v22 }
 0x96f   : > { %16200 = vmatpush3.bf16.msra.mxu1 %v17558_v16 }
 0x970   : > { %16201 = vmatprep.subr.bf16.mxu1 %v24600_v59 }
 0x973   : > { %16202 = vmatpush3.bf16.msra.mxu1 %v17559_v33 }
 0x974   : > { %16203 = vmatprep.subr.bf16.mxu1 %v24600_v59 }
 0x975   : > { %10659 = vmatmul.mubr.bf16.gmra.mxu1 %v22615_v26  ;;  %10820 = vmatmul.mubr.bf16.gmra.mxu0 %v22615_v26 }
 0x976   : > { %10668 = vmatprep.mubr.bf16.mxu1 %v24601_v22  ;;  %10829 = vmatprep.mubr.bf16.mxu0 %v24601_v22 }
 0x977   : > { %16204 = vmatpush3.bf16.msra.mxu1 %v17560_v9 }
 0x978   : > { %16205 = vmatprep.subr.bf16.mxu1 %v24600_v59 }
 0x97b   : > { %16206 = vmatpush3.bf16.msra.mxu1 %v17561_v27 }
 0x97c   : > { %16207 = vmatprep.subr.bf16.mxu1 %v24600_v59 }
 0x97d   : > { %10669 = vmatmul.mubr.bf16.gmra.mxu1 %v22662_v25  ;;  %10830 = vmatmul.mubr.bf16.gmra.mxu0 %v22662_v25 }
 0x97e   : > { %10678 = vmatprep.mubr.bf16.mxu1 %v24601_v22  ;;  %10839 = vmatprep.mubr.bf16.mxu0 %v24601_v22 }
 0x97f   : > { %16208 = vmatpush3.bf16.msra.mxu1 %v17562_v4 }
 0x980   : > { %16209 = vmatprep.subr.bf16.mxu1 %v24600_v59 }
 0x983   : > { %16210 = vmatpush3.bf16.msra.mxu1 %v17563_v23 }
 0x984   : > { %16211 = vmatprep.subr.bf16.mxu1 %v24600_v59 }
 0x985   : > { %10679 = vmatmul.mubr.bf16.gmra.mxu1 %v22709_v36  ;;  %10840 = vmatmul.mubr.bf16.gmra.mxu0 %v22709_v36 }
 0x986   : > { %10688 = vmatprep.mubr.bf16.mxu1 %v24601_v22  ;;  %10849 = vmatprep.mubr.bf16.mxu0 %v24601_v22 }
 0x987   : > { %16212 = vmatpush3.bf16.msra.mxu1 %v17564_v44 }
 0x988   : > { %16213 = vmatprep.subr.bf16.mxu1 %v24600_v59 }
 0x98b   : > { %16214 = vmatpush3.bf16.msra.mxu1 %v17565_v43 }
 0x98d   : > { %10689 = vmatmul.mubr.bf16.gmra.mxu1 %v22750_v50  ;;  %10850 = vmatmul.mubr.bf16.gmra.mxu0 %v22750_v50 }
 0x98e   : > { %10698 = vmatprep.mubr.bf16.mxu1 %v24601_v22  ;;  %10859 = vmatprep.mubr.bf16.mxu0 %v24601_v22 }
 0x995   : > { %10699 = vmatmul.mubr.bf16.gmra.mxu1 %v22774_v38  ;;  %10860 = vmatmul.mubr.bf16.gmra.mxu0 %v22774_v38 }
 0x996   : > { %10708 = vmatprep.mubr.bf16.mxu1 %v24601_v22  ;;  %10869 = vmatprep.mubr.bf16.mxu0 %v24601_v22 }
 0x99d   : > { %10709 = vmatmul.mubr.bf16.gmra.mxu1 %v22797_v15  ;;  %10870 = vmatmul.mubr.bf16.gmra.mxu0 %v22797_v15 }
 0x99e   : > { %10718 = vmatprep.mubr.bf16.mxu1 %v24601_v22  ;;  %10879 = vmatprep.mubr.bf16.mxu0 %v24601_v22 }
 0x9a5   : > { %10719 = vmatmul.mubr.bf16.gmra.mxu1 %v22816_v18  ;;  %10880 = vmatmul.mubr.bf16.gmra.mxu0 %v22816_v18 }
 0x9a6   : > { %10728 = vmatprep.mubr.bf16.mxu1 %v24601_v22  ;;  %10889 = vmatprep.mubr.bf16.mxu0 %v24601_v22 }
 0x9ad   : > { %10729 = vmatmul.mubr.bf16.gmra.mxu1 %v22831_v30  ;;  %10890 = vmatmul.mubr.bf16.gmra.mxu0 %v22831_v30 }
 0x9ae   : > { %10738 = vmatprep.mubr.bf16.mxu1 %v24601_v22  ;;  %10899 = vmatprep.mubr.bf16.mxu0 %v24601_v22 }
 0x9b5   : > { %10739 = vmatmul.mubr.bf16.gmra.mxu1 %v22846_v39  ;;  %10900 = vmatmul.mubr.bf16.gmra.mxu0 %v22846_v39 }
 0x9b6   : > { %10748 = vmatprep.mubr.bf16.mxu1 %v24601_v22  ;;  %10909 = vmatprep.mubr.bf16.mxu0 %v24601_v22 }
 0x9bd   : > { %10749 = vmatmul.mubr.bf16.gmra.mxu1 %v22861_v56  ;;  %10910 = vmatmul.mubr.bf16.gmra.mxu0 %v22861_v56 }
 0x9be   : > { %10758 = vmatprep.mubr.bf16.mxu1 %v24601_v22  ;;  %10919 = vmatprep.mubr.bf16.mxu0 %v24601_v22 }
 0x9c5   : > { %v22961_v7 = vpop.f32.mrf.mxu1  ;;  %v22963_v58 = vpop.f32.mrf.mxu0  ;;  %10759 = vmatmul.mubr.bf16.gmra.mxu1 %v22874_v21  ;;  %10920 = vmatmul.mubr.bf16.gmra.mxu0 %v22874_v21 }
 0x9c6   : > { %24622 = vst [vmem:[#allocation25_spill] sm:$0xff] %v22963_v58  ;;  %10768 = vmatprep.mubr.bf16.mxu1 %v24601_v22  ;;  %10929 = vmatprep.mubr.bf16.mxu0 %v24601_v22 }
 0x9c7   : > { %v22969_v12 = vpop.f32.mrf.mxu1  ;;  %v10491_v37 = vpop.f32.mrf.mxu0 }
 0x9c9   : > { %v22971_v2 = vpop.f32.mrf.mxu1  ;;  %v22973_v17 = vpop.f32.mrf.mxu0 }
 0x9ca   : > { %24623 = vst [vmem:[#allocation32_spill] sm:$0xff] %v22973_v17 }
 0x9cb   : > { %v22982_v63 = vpop.f32.mrf.mxu1  ;;  %v10495_v49 = vpop.f32.mrf.mxu0 }
 0x9cc   : > { %v11077_v40 = vpack.c.bf16 %v10495_v49, %v10491_v37 }
 0x9cd   : > { %v22984_v32 = vpop.f32.mrf.mxu1  ;;  %v22986_v14 = vpop.f32.mrf.mxu0  ;;  %10769 = vmatmul.mubr.bf16.gmra.mxu1 %v22880_v10  ;;  %10930 = vmatmul.mubr.bf16.gmra.mxu0 %v22880_v10 }
 0x9ce   : > { %24624 = vst [vmem:[#allocation16_spill] sm:$0xff] %v22986_v14  ;;  %16215 = vmatprep.mubr.msk.bf16.mxu1 %vm17821_vm0, %v24600_v59  ;;  %11794 = vmatprep.mubr.bf16.mxu0 %v17568_v5  ;;  %v23009_v28 = vrot.slane %v11077_v40, 4 }
 0x9cf   : > { %v22992_v52 = vpop.f32.mrf.mxu1  ;;  %v10501_v55 = vpop.f32.mrf.mxu0 }
 0x9d0   : > { %24626 = vst [vmem:[#allocation34_spill] sm:$0xff] %v23009_v28 }
 0x9d1   : > { %v22994_v51 = vpop.f32.mrf.mxu1  ;;  %v22996_v13 = vpop.f32.mrf.mxu0 }
 0x9d2   : > { %24625 = vst [vmem:[#allocation35_spill] sm:$0xff] %v22996_v13 }
 0x9d3   : > { %v23002_v1 = vpop.f32.mrf.mxu1  ;;  %v10505_v46 = vpop.f32.mrf.mxu0 }
 0x9d4   : > { %v11086_v11 = vpack.c.bf16 %v10505_v46, %v10501_v55 }
 0x9d5   : > { %v23004_v0 = vpop.f32.mrf.mxu1  ;;  %v23006_v47 = vpop.f32.mrf.mxu0  ;;  %16216 = vmatmul.mubr.bf16.vlgmr.msra.gmra.mxu1 %v22568_v35 }
 0x9d6   : > { %v11255_v24 = vrot.slane %v11086_v11, 4  ;;  %16219 = vmatprep.mubr.msk.bf16.mxu1 %vm17821_vm0, %v24600_v59 }
 0x9d7   : > { %v10350_v20 = vpop.f32.mrf.mxu1  ;;  %v10511_v54 = vpop.f32.mrf.mxu0 }
 0x9d8   : > { %v23015_v48 = vsel %vm6563_vm2, %v23009_v28, %v11255_v24 }
 0x9d9   : > { %24627 = vst [vmem:[#allocation23_spill] sm:$0xff] %v23015_v48  ;;  %v23017_v53 = vpop.f32.mrf.mxu1  ;;  %v23019_v34 = vpop.f32.mrf.mxu0 }
 0x9db   : > { %v10354_v61 = vpop.f32.mrf.mxu1  ;;  %v10515_v3 = vpop.f32.mrf.mxu0 }
 0x9dc   : > { %v11095_v19 = vpack.c.bf16 %v10515_v3, %v10511_v54  ;;  %v11093_v27 = vpack.c.bf16 %v10354_v61, %v10350_v20 }
 0x9dd   : > { %v23025_v45 = vpop.f32.mrf.mxu1  ;;  %v23027_v60 = vpop.f32.mrf.mxu0  ;;  %16220 = vmatmul.mubr.bf16.gmra.mxu1 %v22615_v26 }
 0x9de   : > { %v11257_v57 = vrot.slane %v11095_v19, 4  ;;  %16223 = vmatprep.mubr.msk.bf16.mxu1 %vm17821_vm0, %v24600_v59  ;;  %v23048_v55 = vrot.slane %v11093_v27, 4 }
 0x9df   : > { %v10360_v42 = vpop.f32.mrf.mxu1  ;;  %v10521_v62 = vpop.f32.mrf.mxu0 }
 0x9e0   : > { %v23033_v16 = vsel %vm6563_vm2, %v11255_v24, %v11257_v57 }
 0x9e1   : > { %24628 = vst [vmem:[#allocation28_spill] sm:$0xff] %v23033_v16  ;;  %v23035_v33 = vpop.f32.mrf.mxu1  ;;  %v23037_v9 = vpop.f32.mrf.mxu0 }
 0x9e3   : > { %v10364_v23 = vpop.f32.mrf.mxu1  ;;  %v10525_v44 = vpop.f32.mrf.mxu0 }
 0x9e4   : > { %v11102_v43 = vpack.c.bf16 %v10364_v23, %v10360_v42  ;;  %v11104_v37 = vpack.c.bf16 %v10525_v44, %v10521_v62 }
 0x9e5   : > { %v23043_v5 = vpop.f32.mrf.mxu1  ;;  %v23045_v49 = vpop.f32.mrf.mxu0  ;;  %16224 = vmatmul.mubr.bf16.gmra.mxu1 %v22662_v25 }
 0x9e6   : > { %v11209_v40 = vrot.slane %v11102_v43, 4  ;;  %v11259_v46 = vrot.slane %v11104_v37, 4  ;;  %16227 = vmatprep.mubr.msk.bf16.mxu1 %vm17821_vm0, %v24600_v59 }
 0x9e7   : > { %v10370_v11 = vpop.f32.mrf.mxu1  ;;  %v10531_v24 = vpop.f32.mrf.mxu0 }
 0x9e8   : > { %v11210_v20 = vsel %vm6563_vm2, %v23048_v55, %v11209_v40  ;;  %v23055_v54 = vsel %vm6563_vm2, %v11257_v57, %v11259_v46 }
 0x9e9   : > { %24629 = vst [vmem:[#allocation21_spill] sm:$0xff] %v23055_v54  ;;  %v23057_v61 = vpop.f32.mrf.mxu1  ;;  %v23059_v3 = vpop.f32.mrf.mxu0  ;;  %15600 = vmatprep.subr.bf16.mxu0 %v11210_v20 }
 0x9eb   : > { %v10374_v19 = vpop.f32.mrf.mxu1  ;;  %v10535_v42 = vpop.f32.mrf.mxu0 }
 0x9ec   : > { %v11111_v62 = vpack.c.bf16 %v10374_v19, %v10370_v11  ;;  %v11113_v27 = vpack.c.bf16 %v10535_v42, %v10531_v24 }
 0x9ed   : > { %v23063_v23 = vpop.f32.mrf.mxu1  ;;  %v23065_v44 = vpop.f32.mrf.mxu0  ;;  %16228 = vmatmul.mubr.bf16.gmra.mxu1 %v22709_v36 }
 0x9ee   : > { %v11211_v57 = vrot.slane %v11111_v62, 4  ;;  %v11261_v43 = vrot.slane %v11113_v27, 4  ;;  %16231 = vmatprep.mubr.msk.bf16.mxu1 %vm17821_vm0, %v24600_v59 }
 0x9ef   : > { %v10380_v37 = vpop.f32.mrf.mxu1  ;;  %v10541_v20 = vpop.f32.mrf.mxu0 }
 0x9f0   : > { %v23071_v29 = vsel %vm6563_vm2, %v11209_v40, %v11211_v57  ;;  %v23074_v31 = vsel %vm6563_vm2, %v11259_v46, %v11261_v43 }
 0x9f1   : > { %24630 = vst [vmem:[#allocation13_spill] sm:$0xff] %v23071_v29  ;;  %24631 = vst [vmem:[#allocation14_spill] sm:$0xff] %v23074_v31  ;;  %v10382_v11 = vpop.f32.mrf.mxu1  ;;  %v23076_v24 = vpop.f32.mrf.mxu0 }
 0x9f3   : > { %v10384_v19 = vpop.f32.mrf.mxu1  ;;  %v10545_v42 = vpop.f32.mrf.mxu0 }
 0x9f4   : > { %v11120_v6 = vpack.c.bf16 %v10384_v19, %v10380_v37  ;;  %v11122_v36 = vpack.c.bf16 %v10545_v42, %v10541_v20 }
 0x9f5   : > { %v10388_v62 = vpop.f32.mrf.mxu1  ;;  %v10549_v27 = vpop.f32.mrf.mxu0  ;;  %16232 = vmatmul.mubr.bf16.gmra.mxu1 %v22750_v50 }
 0x9f6   : > { %v23079_v35 = vrot.slane %v11120_v6, 4  ;;  %v11263_v8 = vrot.slane %v11122_v36, 4  ;;  %16235 = vmatprep.mubr.msk.bf16.mxu1 %vm17821_vm0, %v24600_v59 }
 0x9f7   : > { %v23083_v40 = vpop.f32.mrf.mxu1  ;;  %v10551_v46 = vpop.f32.mrf.mxu0 }
 0x9f8   : > { %24632 = vst [vmem:[#allocation24_spill] sm:$0xff] %v23079_v35  ;;  %v23087_v26 = vsel %vm6563_vm2, %v11211_v57, %v23079_v35  ;;  %v23090_v37 = vsel %vm6563_vm2, %v11261_v43, %v11263_v8  ;;  %v11084_v57 = vpack.c.bf16 %v23002_v1, %v22992_v52 }
 0x9f9   : > { %24633 = vst [vmem:[#allocation17_spill] sm:$0xff] %v23087_v26  ;;  %24634 = vst [vmem:[#allocation15_spill] sm:$0xff] %v23090_v37  ;;  %v10392_v20 = vpop.f32.mrf.mxu1  ;;  %v10553_v19 = vpop.f32.mrf.mxu0 }
 0x9fa   : > { %v11130_v42 = vpack.c.bf16 %v10553_v19, %v10549_v27  ;;  %v11205_v52 = vrot.slane %v11084_v57, 4 }
 0x9fb   : > { %v23092_v50 = vpop.f32.mrf.mxu1  ;;  %v10555_v6 = vpop.f32.mrf.mxu0 }
 0x9fc   : > { %v11131_v36 = vpack.c.bf16 %v10555_v6, %v10551_v46  ;;  %15640 = vmatprep.subr.bf16.mxu1 %v11130_v42 }
 0x9fd   : > { %v10398_v41 = vpop.f32.mrf.mxu1  ;;  %v23094_v25 = vpop.f32.mrf.mxu0  ;;  %16236 = vmatmul.mubr.bf16.gmra.mxu1 %v22774_v38  ;;  %v11075_v38 = vpack.c.bf16 %v22982_v63, %v22969_v12  ;;  %v11128_v63 = vpack.c.bf16 %v10392_v20, %v10388_v62 }
 0x9fe   : > { %24635 = vst [vmem:[#allocation20_spill] sm:$0xff] %v23094_v25  ;;  %v23099_v4 = vrot.slane %v11131_v36, 4  ;;  %16239 = vmatprep.mubr.msk.bf16.mxu1 %vm17821_vm0, %v24600_v59 }
 0x9ff   : > { %v23103_v43 = vpop.f32.mrf.mxu1  ;;  %v23105_v27 = vpop.f32.mrf.mxu0  ;;  %v23128_v12 = vrot.slane %v11075_v38, 4 }
 0xa00   : > { %24636 = vst [vmem:[#allocation22_spill] sm:$0xff] %v23099_v4  ;;  %v23109_v46 = vsel %vm6563_vm2, %v11263_v8, %v23099_v4  ;;  %v11208_v8 = vsel %vm6563_vm2, %v11205_v52, %v23048_v55 }
 0xa01   : > { %24637 = vst [vmem:[#allocation31_spill] sm:$0xff] %v23109_v46  ;;  %v10402_v19 = vpop.f32.mrf.mxu1  ;;  %v23111_v42 = vpop.f32.mrf.mxu0  ;;  %v11206_v55 = vsel %vm6563_vm2, %v23128_v12, %v11205_v52 }
 0xa02   : > { %24638 = vst [vmem:[#allocation33_spill] sm:$0xff] %v23111_v42  ;;  %v11137_v1 = vpack.c.bf16 %v10402_v19, %v10398_v41 }
 0xa03   : > { %v23117_v36 = vpop.f32.mrf.mxu1  ;;  %v23119_v22 = vpop.f32.mrf.mxu0 }
 0xa04   : > { %15601 = vmatpush3.bf16.msra.mxu0 %v11137_v1 }
 0xa05   : > { %v23123_v54 = vpop.f32.mrf.mxu1  ;;  %v23125_v31 = vpop.f32.mrf.mxu0  ;;  %16240 = vmatmul.mubr.bf16.gmra.mxu1 %v22797_v15  ;;  %15602 = vmatprep.subr.bf16.mxu0 %v11208_v8  ;;  %v11119_v15 = vpack.c.bf16 %v10382_v11, %v23063_v23 }
 0xa06   : > { %24639 = vst [vmem:[#allocation18_spill] sm:$0xff] %v23125_v31  ;;  %16243 = vmatprep.mubr.msk.bf16.mxu1 %vm17821_vm0, %v24600_v59 }
 0xa07   : > { %v23132_v41 = vpop.f32.mrf.mxu1  ;;  %v23134_v57 = vpop.f32.mrf.mxu0 }
 0xa08   : > { %15603 = vmatpush3.bf16.msra.mxu0 %v11128_v63 }
 0xa09   : > { %v23138_v19 = vpop.f32.mrf.mxu1  ;;  %v23140_v1 = vpop.f32.mrf.mxu0  ;;  %15604 = vmatprep.subr.bf16.mxu0 %v11206_v55 }
 0xa0a   : > { %24640 = vst [vmem:[#allocation29_spill] sm:$0xff] %v23140_v1 }
 0xa0b   : > { %v23145_v20 = vpop.f32.mrf.mxu1  ;;  %v23147_v38 = vpop.f32.mrf.mxu0 }
 0xa0c   : > { %15605 = vmatpush3.bf16.msra.mxu0 %v11119_v15 }
 0xa0d   : > { %v23149_v8 = vpop.f32.mrf.mxu1  ;;  %v23151_v63 = vpop.f32.mrf.mxu0  ;;  %16244 = vmatmul.mubr.bf16.gmra.mxu1 %v22816_v18 }
 0xa0e   : > { %24641 = vst [vmem:[#allocation30_spill] sm:$0xff] %v23151_v63  ;;  %16247 = vmatprep.mubr.msk.bf16.mxu1 %vm17821_vm0, %v24600_v59 }
 0xa0f   : > { %v10420_v52 = vpop.f32.mrf.mxu1  ;;  %v23156_v55 = vpop.f32.mrf.mxu0 }
 0xa11   : > { %v23158_v23 = vpop.f32.mrf.mxu1  ;;  %v23160_v11 = vpop.f32.mrf.mxu0 }
 0xa12   : > { %24642 = vst [vmem:[#allocation27_spill] sm:$0xff] %v23160_v11 }
 0xa13   : > { %v10424_v6 = vpop.f32.mrf.mxu1  ;;  %v23162_v62 = vpop.f32.mrf.mxu0 }
 0xa15   : > { %v23164_v15 = vpop.f32.mrf.mxu1  ;;  %v23166_v25 = vpop.f32.mrf.mxu0  ;;  %16248 = vmatmul.mubr.bf16.gmra.mxu1 %v22831_v30 }
 0xa16   : > { %24643 = vst [vmem:[#allocation36_spill] sm:$0xff] %v23166_v25  ;;  %16251 = vmatprep.mubr.msk.bf16.mxu1 %vm17821_vm0, %v24600_v59 }
 0xa17   : > { %v10430_v18 = vpop.f32.mrf.mxu1  ;;  %v10591_v42 = vpop.f32.mrf.mxu0 }
 0xa19   : > { %v10432_v31 = vpop.f32.mrf.mxu1  ;;  %v23171_v1 = vpop.f32.mrf.mxu0 }
 0xa1a   : > { %24644 = vst [vmem:[#allocation26_spill] sm:$0xff] %v23171_v1 }
 0xa1b   : > { %v10434_v63 = vpop.f32.mrf.mxu1  ;;  %v10595_v37 = vpop.f32.mrf.mxu0 }
 0xa1c   : > { %v11165_v28 = vpack.c.bf16 %v10434_v63, %v10430_v18  ;;  %v11167_v48 = vpack.c.bf16 %v10595_v37, %v10591_v42  ;;  %v11110_v37 = vpack.c.bf16 %v23057_v61, %v23043_v5  ;;  %v11156_v42 = vpack.c.bf16 %v10424_v6, %v10420_v52 }
 0xa1d   : > { %v10438_v11 = vpop.f32.mrf.mxu1  ;;  %v23173_v46 = vpop.f32.mrf.mxu0  ;;  %16252 = vmatmul.mubr.bf16.gmra.mxu1 %v22846_v39  ;;  %v11147_v61 = vpack.c.bf16 %v23145_v20, %v23132_v41  ;;  %v11164_v6 = vpack.c.bf16 %v10432_v31, %v23164_v15  ;;  %v24646_v41 = vpack.c.bf16 %v23035_v33, %v23025_v45  ;;  %v11138_v20 = vpack.c.bf16 %v23117_v36, %v23103_v43 }
 0xa1e   : > { %24645 = vst [vmem:[#allocation19_spill] sm:$0xff] %v23173_v46  ;;  %16255 = vmatprep.mubr.msk.bf16.mxu1 %vm17821_vm0, %v24600_v59  ;;  %v11223_v39 = vrot.slane %v11165_v28, 4  ;;  %v23189_v63 = vrot.slane %v11167_v48, 4  ;;  %v24647_v31 = vpack.c.bf16 %v23059_v3, %v23045_v49  ;;  %v24648_v36 = vpack.c.bf16 %v23017_v53, %v23004_v0  ;;  %v17571_v0 = vld [vmem:[%s24348_s15 + $0xc] ss:$60 sps:$4 sm:$0xff]  }
 0xa1f   : > { %v10440_v25 = vpop.f32.mrf.mxu1  ;;  %v10601_v30 = vpop.f32.mrf.mxu0  ;;  %v11146_v53 = vpack.c.bf16 %v23138_v19, %v23123_v54  ;;  %v24651_v54 = vpack.c.bf16 %v23019_v34, %v23006_v47  ;;  %v17566_v47 = vld [vmem:[%s24348_s15] ss:$60 sps:$4 sm:$0xff]  }
 0xa21   : > { %v10442_v4 = vpop.f32.mrf.mxu1  ;;  %v23178_v29 = vpop.f32.mrf.mxu0 }
 0xa23   : > { %v10444_v26 = vpop.f32.mrf.mxu1  ;;  %v10605_v58 = vpop.f32.mrf.mxu0 }
 0xa24   : > { %v11174_v1 = vpack.c.bf16 %v10444_v26, %v10440_v25  ;;  %v11176_v17 = vpack.c.bf16 %v10605_v58, %v10601_v30  ;;  %v11173_v25 = vpack.c.bf16 %v10442_v4, %v10438_v11 }
 0xa25   : > { %v10448_v16 = vpop.f32.mrf.mxu1  ;;  %v23180_v35 = vpop.f32.mrf.mxu0  ;;  %16256 = vmatmul.mubr.bf16.gmra.mxu1 %v22861_v56  ;;  %v11121_v56 = vpack.c.bf16 %v23076_v24, %v23065_v44  ;;  %v11221_v44 = vrot.slane %v11156_v42, 4 }
 0xa26   : > { %v23183_v46 = vrot.slane %v11174_v1, 4  ;;  %v11275_v14 = vrot.slane %v11176_v17, 4  ;;  %v11182_v13 = vpack.c.bf16 %v10448_v16, %v10448_v16  ;;  %16259 = vmatprep.mubr.msk.bf16.mxu1 %vm17821_vm0, %v24600_v59 }
 0xa27   : > { %v23191_v58 = vpop.f32.mrf.mxu1  ;;  %v10611_v26 = vpop.f32.mrf.mxu0  ;;  %v11224_v11 = vsel %vm6563_vm2, %v11221_v44, %v11223_v39 }
 0xa28   : > { %v11185_v28 = vpack.c.bf16 %v10611_v26, %v10611_v26  ;;  %v11393_v17 = vsel %vm6563_vm2, %v11182_v13, %v23128_v12  ;;  %v11226_v16 = vsel %vm6563_vm2, %v11223_v39, %v23183_v46  ;;  %v23201_v48 = vsel %vm6563_vm2, %v23189_v63, %v11275_v14 }
 0xa29   : > { %v10452_v1 = vpop.f32.mrf.mxu1  ;;  %v10613_v18 = vpop.f32.mrf.mxu0  ;;  %15606 = vmatprep.subr.bf16.mxu0 %v11393_v17  ;;  %15641 = vmatpush3.bf16.msra.mxu1 %v11226_v16  ;;  %v24649_v39 = vpack.c.bf16 %v23037_v9, %v23027_v60  ;;  %v24650_v9 = vpack.c.bf16 %v22994_v51, %v22984_v32  ;;  %v24652_v17 = vpack.c.bf16 %v22971_v2, %v22961_v7  ;;  %v24656_v2 = vld [vmem:[#allocation24_spill] sm:$0xff] }
 0xa2a   : > { %v11277_v5 = vrot.slane %v11185_v28, 4  ;;  %15607 = vmatpush3.bf16.msra.mxu0 %v11110_v37  ;;  %15642 = vmatprep.subr.bf16.mxu1 %v11121_v56  ;;  %v11140_v16 = vpack.c.bf16 %v23119_v22, %v23105_v27  ;;  %v24654_v1 = vld [vmem:[#allocation16_spill] sm:$0xff] }
 0xa2b   : > { %v10453_v13 = vpop.f32.mrf.mxu1  ;;  %v10614_v24 = vpop.f32.mrf.mxu0  ;;  %15608 = vmatprep.subr.bf16.mxu0 %v11173_v25  ;;  %v24653_v25 = vld [vmem:[#allocation35_spill] sm:$0xff] }
 0xa2c   : > { %v23206_v4 = vsel %vm6563_vm2, %v11275_v14, %v11277_v5  ;;  %v11219_v14 = vrot.slane %v11147_v61, 4  ;;  %v24655_v18 = vpack.c.bf16 %v24653_v25, %v24654_v1  ;;  %v17574_v13 = vld [vmem:[%s24348_s15 + $0x7c] ss:$60 sps:$4 sm:$0xff]   ;;  %v24665_v25 = vld [vmem:[#allocation13_spill] sm:$0xff] }
 0xa2d   : > { %v23209_v12 = vpop.f32.mrf.mxu1  ;;  %v23211_v52 = vpop.f32.mrf.mxu0  ;;  %16260 = vmatmul.mubr.bf16.gmra.mxu1 %v22874_v21  ;;  %v11155_v21 = vpack.c.bf16 %v23158_v23, %v23149_v8  ;;  %v11217_v8 = vrot.slane %v11138_v20, 4  ;;  %v11158_v23 = vpack.c.bf16 %v23162_v62, %v23156_v55  ;;  %v11149_v55 = vpack.c.bf16 %v23147_v38, %v23134_v57 }
 0xa2e   : > { %15643 = vmatpush3.bf16.msra.mxu1 %v11224_v11  ;;  %15609 = vmatpush3.bf16.msra.mxu0 %v24646_v41  ;;  %v11222_v43 = vsel %vm6563_vm2, %v11219_v14, %v11221_v44 }
 0xa2f   : > { %15644 = vmatprep.subr.bf16.mxu1 %v24647_v31  ;;  %v23223_v15 = vpop.f32.mrf.mxu1  ;;  %v10813_v30 = vpop.f32.mrf.mxu0  ;;  %15610 = vmatprep.subr.bf16.mxu0 %v11164_v6  ;;  %v11220_v60 = vsel %vm6563_vm2, %v11217_v8, %v11219_v14  ;;  %v11271_v26 = vrot.slane %v11158_v23, 4  ;;  %v24657_v14 = vld [vmem:[#allocation28_spill] sm:$0xff]  ;;  %v11267_v31 = vrot.slane %v11140_v16, 4 }
 0xa30   : > { %16263 = vmatprep.mubr.msk.bf16.mxu1 %vm17821_vm0, %v24600_v59  ;;  %v11129_v59 = vpack.c.bf16 %v23092_v50, %v23083_v40 }
 0xa31   : > { %v23229_v45 = vpop.f32.mrf.mxu1  ;;  %v23231_v33 = vpop.f32.mrf.mxu0  ;;  %v11274_v57 = vsel %vm6563_vm2, %v11271_v26, %v23189_v63  ;;  %v11269_v63 = vrot.slane %v11149_v55, 4  ;;  %v24663_v55 = vld [vmem:[#allocation23_spill] sm:$0xff] }
 0xa32   : > { %15645 = vmatpush3.bf16.msra.mxu1 %v11222_v43  ;;  %15611 = vmatpush3.bf16.msra.mxu0 %v24648_v36  ;;  %v11215_v62 = vrot.slane %v11129_v59, 4 }
 0xa33   : > { %15646 = vmatprep.subr.bf16.mxu1 %v24649_v39  ;;  %v23248_v37 = vpop.f32.mrf.mxu1  ;;  %v10817_v42 = vpop.f32.mrf.mxu0  ;;  %15612 = vmatprep.subr.bf16.mxu0 %v11155_v21  ;;  %v11272_v27 = vsel %vm6563_vm2, %v11269_v63, %v11271_v26  ;;  %v24659_v21 = vld [vmem:[#allocation25_spill] sm:$0xff]  ;;  %v11184_v39 = vpack.c.bf16 %v23180_v35, %v23180_v35 }
 0xa34   : > { %v11218_v51 = vsel %vm6563_vm2, %v11215_v62, %v11217_v8  ;;  %v11081_v34 = vpack.c.bf16 %v10817_v42, %v10813_v30  ;;  %v11216_v22 = vsel %vm6563_vm2, %v24656_v2, %v11215_v62  ;;  %v24658_v30 = vld [vmem:[#allocation32_spill] sm:$0xff]  ;;  %v11079_v8 = vpack.c.bf16 %v23248_v37, %v23223_v15  ;;  %v24662_v62 = vld [vmem:[#allocation17_spill] sm:$0xff]  ;;  %v11455_v2 = vld [vmem:[%s24348_s15 + $0x168] sm:$0xff] }
 0xa35   : > { %v23255_v40 = vpop.f32.mrf.mxu1  ;;  %v23257_v50 = vpop.f32.mrf.mxu0  ;;  %16264 = vmatmul.mubr.bf16.gmra.mxu1 %v22880_v10  ;;  %v11183_v10 = vpack.c.bf16 %v23191_v58, %v23191_v58  ;;  %v24660_v43 = vpack.c.bf16 %v24658_v30, %v24659_v21  ;;  %v17575_v30 = vld [vmem:[%s24348_s15 + $0xf0] ss:$60 sps:$4 sm:$0xff]   ;;  %v17612_v37 = vld [vmem:[%s24348_s15 + $0x24] ss:$60 sps:$4 sm:$0xff]  }
 0xa36   : > { %15647 = vmatpush3.bf16.msra.mxu1 %v11220_v60  ;;  %15613 = vmatpush3.bf16.msra.mxu0 %v24650_v9  ;;  %v23303_v11 = vrot.slane %v11081_v34, 4  ;;  %v17572_v60 = vld [vmem:[%s24348_s15 + $0x78] ss:$60 sps:$4 sm:$0xff]   ;;  %v24664_v34 = vld [vmem:[#allocation34_spill] sm:$0xff] }
 0xa37   : > { %15648 = vmatprep.subr.bf16.mxu1 %v24651_v54  ;;  %v10662_v19 = vpop.f32.mrf.mxu1  ;;  %v10823_v56 = vpop.f32.mrf.mxu0  ;;  %15614 = vmatprep.subr.bf16.mxu0 %v11146_v53  ;;  %v11227_v6 = vrot.slane %v11183_v10, 4  ;;  %v11270_v53 = vsel %vm6563_vm2, %v11267_v31, %v11269_v63 }
 0xa38   : > { %11858 = vmatprep.mubr.bf16.mxu1 %v17571_v0 }
 0xa39   : > { %v23271_v28 = vpop.f32.mrf.mxu1  ;;  %v23273_v32 = vpop.f32.mrf.mxu0  ;;  %v11228_v35 = vsel %vm6563_vm2, %v23183_v46, %v11227_v6  ;;  %v11397_v46 = vsel %vm6563_vm2, %v11184_v39, %v24664_v34  ;;  %v24673_v34 = vld [vmem:[#allocation30_spill] sm:$0xff] }
 0xa3a   : > { %15649 = vmatpush3.bf16.msra.mxu1 %v11218_v51  ;;  %15615 = vmatpush3.bf16.msra.mxu0 %v24652_v17  ;;  %v17577_v51 = vld [vmem:[%s24348_s15 + $0xf4] ss:$60 sps:$4 sm:$0xff]   ;;  %v17569_v17 = vld [vmem:[%s24348_s15 + $0x8] ss:$60 sps:$4 sm:$0xff]  }
 0xa3b   : > { %15650 = vmatprep.subr.bf16.mxu1 %v24655_v18  ;;  %v10666_v5 = vpop.f32.mrf.mxu1  ;;  %v10827_v61 = vpop.f32.mrf.mxu0  ;;  %15680 = vmatprep.subr.bf16.mxu0 %v11274_v57  ;;  %v24666_v18 = vld [vmem:[#allocation22_spill] sm:$0xff] }
 0xa3c   : > { %v11090_v44 = vpack.c.bf16 %v10827_v61, %v10823_v56  ;;  %v11088_v41 = vpack.c.bf16 %v10666_v5, %v10662_v19  ;;  %v23333_v19 = vrot.slane %v11079_v8, 4  ;;  %v11268_v5 = vsel %vm6563_vm2, %v24666_v18, %v11267_v31  ;;  %v17585_v61 = vld [vmem:[%s24348_s15 + $0x84] ss:$60 sps:$4 sm:$0xff]   ;;  %v24671_v8 = vld [vmem:[#allocation26_spill] sm:$0xff] }
 0xa3d   : > { %v23296_v24 = vpop.f32.mrf.mxu1  ;;  %v23298_v7 = vpop.f32.mrf.mxu0  ;;  %11795 = vmatmul.mubr.bf16.vlgmr.msra.gmra.mxu0 %v17566_v47 }
 0xa3e   : > { %v11355_v20 = vrot.slane %v11090_v44, 4  ;;  %15651 = vmatpush3.bf16.msra.mxu1 %v11216_v22  ;;  %15681 = vmatpush3.bf16.msra.mxu0 %v24657_v14  ;;  %v11305_v9 = vrot.slane %v11088_v41, 4  ;;  %v24667_v22 = vld [vmem:[#allocation19_spill] sm:$0xff] }
 0xa3f   : > { %15652 = vmatprep.subr.bf16.mxu1 %v24660_v43  ;;  %v10672_v36 = vpop.f32.mrf.mxu1  ;;  %v10833_v59 = vpop.f32.mrf.mxu0  ;;  %15682 = vmatprep.subr.bf16.mxu0 %v11272_v27  ;;  %v11175_v27 = vpack.c.bf16 %v23178_v29, %v24667_v22  ;;  %v14433_v29 = vcombine.high %v11455_v2, %v11455_v2 }
 0xa40   : > { %11802 = vmatprep.mubr.bf16.mxu0 %v17574_v13  ;;  %v23313_v23 = vsel %vm6563_vm2, %v23303_v11, %v11355_v20  ;;  %v11306_v1 = vsel %vm6563_vm2, %v23333_v19, %v11305_v9 }
 0xa41   : > { %24661 = vst [vmem:[#allocation35_spill] sm:$0xff] %v23313_v23  ;;  %v23317_v42 = vpop.f32.mrf.mxu1  ;;  %v23319_v0 = vpop.f32.mrf.mxu0 }
 0xa42   : > { %15653 = vmatpush3.bf16.msra.mxu1 %v24662_v62  ;;  %15683 = vmatpush3.bf16.msra.mxu0 %v24663_v55 }
 0xa43   : > { %15654 = vmatprep.subr.bf16.mxu1 %v11228_v35  ;;  %v10676_v26 = vpop.f32.mrf.mxu1  ;;  %v10837_v54 = vpop.f32.mrf.mxu0  ;;  %15684 = vmatprep.subr.bf16.mxu0 %v11270_v53  ;;  %v17583_v35 = vld [vmem:[%s24348_s15 + $0x80] ss:$60 sps:$4 sm:$0xff]  }
 0xa44   : > { %v11097_v56 = vpack.c.bf16 %v10676_v26, %v10672_v36  ;;  %v11099_v10 = vpack.c.bf16 %v10837_v54, %v10833_v59  ;;  %v24669_v59 = vld [vmem:[#allocation31_spill] sm:$0xff]  ;;  %v17588_v54 = vld [vmem:[%s24348_s15 + $0xfc] ss:$60 sps:$4 sm:$0xff]  }
 0xa45   : > { %v23338_v57 = vpop.f32.mrf.mxu1  ;;  %v23340_v47 = vpop.f32.mrf.mxu0  ;;  %11803 = vmatmul.mubr.bf16.gmra.mxu0 %v17572_v60 }
 0xa46   : > { %v11307_v16 = vrot.slane %v11097_v56, 4  ;;  %v11357_v63 = vrot.slane %v11099_v10, 4  ;;  %15655 = vmatpush3.bf16.msra.mxu1 %v24665_v25  ;;  %15685 = vmatpush3.bf16.msra.mxu0 %v11397_v46  ;;  %v24674_v46 = vld [vmem:[#allocation27_spill] sm:$0xff] }
 0xa47   : > { %15720 = vmatprep.subr.bf16.mxu1 %v11306_v1  ;;  %v10682_v44 = vpop.f32.mrf.mxu1  ;;  %v10843_v13 = vpop.f32.mrf.mxu0  ;;  %15686 = vmatprep.subr.bf16.mxu0 %v11268_v5 }
 0xa48   : > { %11810 = vmatprep.mubr.bf16.mxu0 %v17577_v51  ;;  %v23361_v6 = vsel %vm6563_vm2, %v11305_v9, %v11307_v16  ;;  %v23364_v41 = vsel %vm6563_vm2, %v11355_v20, %v11357_v63  ;;  %v24670_v20 = vld [vmem:[#allocation36_spill] sm:$0xff]  ;;  %v24672_v51 = vld [vmem:[#allocation15_spill] sm:$0xff] }
 0xa49   : > { %24668 = vst [vmem:[#allocation16_spill] sm:$0xff] %v23364_v41  ;;  %v23366_v14 = vpop.f32.mrf.mxu1  ;;  %v23368_v31 = vpop.f32.mrf.mxu0  ;;  %11859 = vmatmul.mubr.bf16.vlgmr.msra.gmra.mxu1 %v17569_v17  ;;  %v11166_v39 = vpack.c.bf16 %v24671_v8, %v24670_v20  ;;  %v11157_v17 = vpack.c.bf16 %v24674_v46, %v24673_v34  ;;  %v17580_v34 = vld [vmem:[%s24348_s15 + $0x10] ss:$60 sps:$4 sm:$0xff]  }
 0xa4a   : > { %15687 = vmatpush3.bf16.msra.mxu0 %v11175_v27  ;;  %11866 = vmatprep.mubr.bf16.mxu1 %v17585_v61  ;;  %v14432_v61 = vcombine.low %v11455_v2, %v11455_v2  ;;  %v24676_v27 = vld [vmem:[#allocation14_spill] sm:$0xff]  ;;  %v17586_v2 = vld [vmem:[%s24348_s15 + $0xf8] ss:$60 sps:$4 sm:$0xff]  }
 0xa4b   : > { %v10686_v43 = vpop.f32.mrf.mxu1  ;;  %v10847_v36 = vpop.f32.mrf.mxu0  ;;  %15688 = vmatprep.subr.bf16.mxu0 %v24669_v59  ;;  %v24679_v59 = vld [vmem:[#allocation18_spill] sm:$0xff] }
 0xa4c   : > { %v11106_v53 = vpack.c.bf16 %v10686_v43, %v10682_v44  ;;  %v11108_v60 = vpack.c.bf16 %v10847_v36, %v10843_v13  ;;  %v17582_v44 = vld [vmem:[%s24348_s15 + $0x14] ss:$60 sps:$4 sm:$0xff]   ;;  %v24678_v36 = vld [vmem:[#allocation29_spill] sm:$0xff] }
 0xa4d   : > { %v23378_v9 = vpop.f32.mrf.mxu1  ;;  %v10851_v62 = vpop.f32.mrf.mxu0  ;;  %11811 = vmatmul.mubr.bf16.gmra.mxu0 %v17575_v30  ;;  %v24680_v20 = vpack.c.bf16 %v24678_v36, %v24679_v59  ;;  %v17593_v59 = vld [vmem:[%s24348_s15 + $0x1c] ss:$60 sps:$4 sm:$0xff]  }
 0xa4e   : > { %v23383_v55 = vrot.slane %v11106_v53, 4  ;;  %v11359_v26 = vrot.slane %v11108_v60, 4  ;;  %15689 = vmatpush3.bf16.msra.mxu0 %v11166_v39  ;;  %11818 = vmatprep.mubr.bf16.mxu0 %v14433_v29  ;;  %v24681_v60 = vld [vmem:[#allocation21_spill] sm:$0xff] }
 0xa4f   : > { %v23388_v56 = vpop.f32.mrf.mxu1  ;;  %v10853_v10 = vpop.f32.mrf.mxu0  ;;  %15690 = vmatprep.subr.bf16.mxu0 %v24672_v51 }
 0xa50   : > { %v23395_v25 = vsel %vm6563_vm2, %v11307_v16, %v23383_v55  ;;  %v23398_v1 = vsel %vm6563_vm2, %v11357_v63, %v11359_v26  ;;  %v11456_v16 = vld [vmem:[%s24348_s15 + $0x170] sm:$0xff] }
 0xa51   : > { %24675 = vst [vmem:[#allocation24_spill] sm:$0xff] %v23398_v1  ;;  %v23400_v18 = vpop.f32.mrf.mxu1  ;;  %v10855_v5 = vpop.f32.mrf.mxu0  ;;  %11867 = vmatmul.mubr.bf16.gmra.mxu1 %v17583_v35  ;;  %v14435_v8 = vcombine.high %v11456_v16, %v11456_v16 }
 0xa52   : > { %15691 = vmatpush3.bf16.msra.mxu0 %v11157_v17  ;;  %11874 = vmatprep.mubr.bf16.mxu1 %v17588_v54  ;;  %v11116_v54 = vpack.c.bf16 %v10855_v5, %v10851_v62  ;;  %v17596_v62 = vld [vmem:[%s24348_s15 + $0x8c] ss:$60 sps:$4 sm:$0xff]  }
 0xa53   : > { %v23405_v13 = vpop.f32.mrf.mxu1  ;;  %v10857_v22 = vpop.f32.mrf.mxu0  ;;  %15692 = vmatprep.subr.bf16.mxu0 %v24676_v27 }
 0xa54   : > { %v11117_v63 = vpack.c.bf16 %v10857_v22, %v10853_v10 }
 0xa55   : > { %v10700_v30 = vpop.f32.mrf.mxu1  ;;  %v23411_v29 = vpop.f32.mrf.mxu0  ;;  %11819 = vmatmul.mubr.bf16.gmra.mxu0 %v14432_v61  ;;  %v24684_v61 = vld [vmem:[#allocation33_spill] sm:$0xff] }
 0xa56   : > { %24677 = vst [vmem:[#allocation28_spill] sm:$0xff] %v23411_v29  ;;  %v11361_v43 = vrot.slane %v11117_v63, 4  ;;  %15693 = vmatpush3.bf16.msra.mxu0 %v24680_v20  ;;  %11922 = vmatprep.mubr.bf16.mxu0 %v17582_v44  ;;  %v24685_v44 = vld [vmem:[#allocation20_spill] sm:$0xff] }
 0xa57   : > { %v23419_v39 = vpop.f32.mrf.mxu1  ;;  %v10863_v53 = vpop.f32.mrf.mxu0  ;;  %15694 = vmatprep.subr.bf16.mxu0 %v24681_v60  ;;  %v24686_v22 = vpack.c.bf16 %v24684_v61, %v24685_v44 }
 0xa58   : > { %v23423_v35 = vsel %vm6563_vm2, %v11359_v26, %v11361_v43 }
 0xa59   : > { %24682 = vst [vmem:[#allocation32_spill] sm:$0xff] %v23423_v35  ;;  %v10704_v10 = vpop.f32.mrf.mxu1  ;;  %v23425_v51 = vpop.f32.mrf.mxu0  ;;  %11875 = vmatmul.mubr.bf16.gmra.mxu1 %v17586_v2  ;;  %v14434_v2 = vcombine.low %v11456_v16, %v11456_v16  ;;  %v17594_v16 = vld [vmem:[%s24348_s15 + $0x88] ss:$60 sps:$4 sm:$0xff]  }
 0xa5a   : > { %24683 = vst [vmem:[#allocation25_spill] sm:$0xff] %v23425_v51  ;;  %v11123_v46 = vpack.c.bf16 %v10704_v10, %v10700_v30  ;;  %15695 = vmatpush3.bf16.msra.mxu0 %v24686_v22  ;;  %11882 = vmatprep.mubr.bf16.mxu1 %v14435_v8 }
 0xa5b   : > { %v23438_v26 = vpop.f32.mrf.mxu1  ;;  %v10867_v5 = vpop.f32.mrf.mxu0  ;;  %15760 = vmatprep.subr.bf16.mxu0 %v11116_v54 }
 0xa5c   : > { %v11126_v27 = vpack.c.bf16 %v10867_v5, %v10863_v53  ;;  %15721 = vmatpush3.bf16.msra.mxu1 %v11123_v46 }
 0xa5d   : > { %v23440_v63 = vpop.f32.mrf.mxu1  ;;  %v23442_v30 = vpop.f32.mrf.mxu0  ;;  %11923 = vmatmul.mubr.bf16.vlgmr.msra.gmra.mxu0 %v17580_v34 }
 0xa5e   : > { %24687 = vst [vmem:[#allocation17_spill] sm:$0xff] %v23442_v30  ;;  %v11363_v36 = vrot.slane %v11126_v27, 4  ;;  %11930 = vmatprep.mubr.bf16.mxu0 %v17596_v62 }
 0xa5f   : > { %v23447_v20 = vpop.f32.mrf.mxu1  ;;  %v10873_v8 = vpop.f32.mrf.mxu0 }
 0xa60   : > { %v23450_v60 = vsel %vm6563_vm2, %v11361_v43, %v11363_v36  ;;  %v17602_v43 = vld [vmem:[%s24348_s15 + $0x104] ss:$60 sps:$4 sm:$0xff]  }
 0xa61   : > { %24688 = vst [vmem:[#allocation23_spill] sm:$0xff] %v23450_v60  ;;  %v23452_v53 = vpop.f32.mrf.mxu1  ;;  %v23454_v54 = vpop.f32.mrf.mxu0  ;;  %11883 = vmatmul.mubr.bf16.gmra.mxu1 %v14434_v2 }
 0xa62   : > { %24689 = vst [vmem:[#allocation34_spill] sm:$0xff] %v23454_v54  ;;  %11986 = vmatprep.mubr.bf16.mxu1 %v17593_v59  ;;  %v11457_v59 = vld [vmem:[%s24348_s15 + $0x178] sm:$0xff] }
 0xa63   : > { %v23466_v46 = vpop.f32.mrf.mxu1  ;;  %v10877_v61 = vpop.f32.mrf.mxu0  ;;  %v14436_v58 = vcombine.low %v11457_v59, %v11457_v59 }
 0xa64   : > { %v11135_v44 = vpack.c.bf16 %v10877_v61, %v10873_v8 }
 0xa65   : > { %v23468_v22 = vpop.f32.mrf.mxu1  ;;  %v23470_v62 = vpop.f32.mrf.mxu0  ;;  %11931 = vmatmul.mubr.bf16.gmra.mxu0 %v17594_v16  ;;  %v17600_v16 = vld [vmem:[%s24348_s15 + $0x100] ss:$60 sps:$4 sm:$0xff]  }
 0xa66   : > { %24690 = vst [vmem:[#allocation13_spill] sm:$0xff] %v23470_v62  ;;  %v23472_v5 = vrot.slane %v11135_v44, 4  ;;  %11938 = vmatprep.mubr.bf16.mxu0 %v17602_v43  ;;  %v14437_v44 = vcombine.high %v11457_v59, %v11457_v59 }
 0xa67   : > { %v10722_v27 = vpop.f32.mrf.mxu1  ;;  %v23474_v2 = vpop.f32.mrf.mxu0 }
 0xa68   : > { %24691 = vst [vmem:[#allocation22_spill] sm:$0xff] %v23472_v5  ;;  %v23481_v17 = vsel %vm6563_vm2, %v11363_v36, %v23472_v5 }
 0xa69   : > { %24692 = vst [vmem:[#allocation19_spill] sm:$0xff] %v23481_v17  ;;  %v23483_v8 = vpop.f32.mrf.mxu1  ;;  %v23485_v61 = vpop.f32.mrf.mxu0 }
 0xa6a   : > { %24693 = vst [vmem:[#allocation31_spill] sm:$0xff] %v23485_v61 }
 0xa6b   : > { %v10726_v34 = vpop.f32.mrf.mxu1  ;;  %v23492_v10 = vpop.f32.mrf.mxu0 }
 0xa6d   : > { %v23494_v49 = vpop.f32.mrf.mxu1  ;;  %v23496_v38 = vpop.f32.mrf.mxu0  ;;  %11939 = vmatmul.mubr.bf16.gmra.mxu0 %v17600_v16 }
 0xa6e   : > { %24694 = vst [vmem:[#allocation36_spill] sm:$0xff] %v23496_v38  ;;  %11946 = vmatprep.mubr.bf16.mxu0 %v14437_v44 }
 0xa6f   : > { %v10732_v36 = vpop.f32.mrf.mxu1  ;;  %v10893_v15 = vpop.f32.mrf.mxu0 }
 0xa71   : > { %v23498_v21 = vpop.f32.mrf.mxu1  ;;  %v23500_v3 = vpop.f32.mrf.mxu0 }
 0xa72   : > { %24695 = vst [vmem:[#allocation26_spill] sm:$0xff] %v23500_v3  ;;  %v11142_v3 = vpack.c.bf16 %v10726_v34, %v10722_v27 }
 0xa73   : > { %v10736_v29 = vpop.f32.mrf.mxu1  ;;  %v10897_v51 = vpop.f32.mrf.mxu0 }
 0xa74   : > { %v11151_v41 = vpack.c.bf16 %v10736_v29, %v10732_v36  ;;  %v11153_v43 = vpack.c.bf16 %v10897_v51, %v10893_v15  ;;  %v11107_v15 = vpack.c.bf16 %v23368_v31, %v23340_v47 }
 0xa75   : > { %v23507_v23 = vpop.f32.mrf.mxu1  ;;  %v23509_v16 = vpop.f32.mrf.mxu0  ;;  %11947 = vmatmul.mubr.bf16.gmra.mxu0 %v14436_v58 }
 0xa76   : > { %24696 = vst [vmem:[#allocation15_spill] sm:$0xff] %v23509_v16  ;;  %12050 = vmatprep.mubr.bf16.mxu0 %v17612_v37  ;;  %v11319_v16 = vrot.slane %v11151_v41, 4  ;;  %v23519_v58 = vrot.slane %v11153_v43, 4  ;;  %v11124_v43 = vpack.c.bf16 %v23438_v26, %v23419_v39  ;;  %v24699_v26 = vpack.c.bf16 %v23273_v32, %v23257_v50 }
 0xa77   : > { %v10742_v44 = vpop.f32.mrf.mxu1  ;;  %v10903_v30 = vpop.f32.mrf.mxu0  ;;  %v11114_v50 = vpack.c.bf16 %v23400_v18, %v23378_v9 }
 0xa78   : > { %v11313_v39 = vrot.slane %v11124_v43, 4  ;;  %v24700_v43 = vpack.c.bf16 %v23231_v33, %v23211_v52 }
 0xa79   : > { %v23511_v54 = vpop.f32.mrf.mxu1  ;;  %v23513_v59 = vpop.f32.mrf.mxu0 }
 0xa7a   : > { %24697 = vst [vmem:[#allocation30_spill] sm:$0xff] %v23513_v59 }
 0xa7b   : > { %v10746_v62 = vpop.f32.mrf.mxu1  ;;  %v10907_v61 = vpop.f32.mrf.mxu0 }
 0xa7c   : > { %v11160_v1 = vpack.c.bf16 %v10746_v62, %v10742_v44  ;;  %v11162_v38 = vpack.c.bf16 %v10907_v61, %v10903_v30 }
 0xa7d   : > { %v23515_v35 = vpop.f32.mrf.mxu1  ;;  %v23517_v60 = vpop.f32.mrf.mxu0 }
 0xa7e   : > { %v23521_v37 = vrot.slane %v11160_v1, 4  ;;  %v11371_v17 = vrot.slane %v11162_v38, 4  ;;  %v11133_v38 = vpack.c.bf16 %v23466_v46, %v23447_v20  ;;  %v11317_v1 = vrot.slane %v11142_v3, 4 }
 0xa7f   : > { %v23523_v5 = vpop.f32.mrf.mxu1  ;;  %v10913_v59 = vpop.f32.mrf.mxu0 }
 0xa80   : > { %v11322_v29 = vsel %vm6563_vm2, %v11319_v16, %v23521_v37  ;;  %v23531_v51 = vsel %vm6563_vm2, %v23519_v58, %v11371_v17  ;;  %v11320_v31 = vsel %vm6563_vm2, %v11317_v1, %v11319_v16  ;;  %v11315_v36 = vrot.slane %v11133_v38, 4 }
 0xa81   : > { %v23533_v30 = vpop.f32.mrf.mxu1  ;;  %v23535_v41 = vpop.f32.mrf.mxu0  ;;  %15761 = vmatpush3.bf16.msra.mxu0 %v11322_v29  ;;  %v24698_v29 = vpack.c.bf16 %v23319_v0, %v23298_v7  ;;  %v11115_v16 = vpack.c.bf16 %v23405_v13, %v23388_v56 }
 0xa82   : > { %15762 = vmatprep.subr.bf16.mxu0 %v11107_v15  ;;  %v11318_v46 = vsel %vm6563_vm2, %v11315_v36, %v11317_v1  ;;  %v11316_v1 = vsel %vm6563_vm2, %v11313_v39, %v11315_v36 }
 0xa83   : > { %v10756_v34 = vpop.f32.mrf.mxu1  ;;  %v10917_v62 = vpop.f32.mrf.mxu0 }
 0xa84   : > { %v11171_v47 = vpack.c.bf16 %v10917_v62, %v10913_v59  ;;  %v11169_v36 = vpack.c.bf16 %v10756_v34, %v23523_v5 }
 0xa85   : > { %v10760_v27 = vpop.f32.mrf.mxu1  ;;  %v23540_v61 = vpop.f32.mrf.mxu0  ;;  %15763 = vmatpush3.bf16.msra.mxu0 %v11320_v31 }
 0xa86   : > { %v11373_v44 = vrot.slane %v11171_v47, 4  ;;  %15764 = vmatprep.subr.bf16.mxu0 %v24698_v29  ;;  %v11311_v47 = vrot.slane %v11115_v16, 4  ;;  %v11323_v5 = vrot.slane %v11169_v36, 4  ;;  %v24706_v36 = vld [vmem:[#allocation22_spill] sm:$0xff] }
 0xa87   : > { %v10762_v3 = vpop.f32.mrf.mxu1  ;;  %v10923_v20 = vpop.f32.mrf.mxu0 }
 0xa88   : > { %v23549_v59 = vsel %vm6563_vm2, %v11371_v17, %v11373_v44 }
 0xa89   : > { %v10764_v15 = vpop.f32.mrf.mxu1  ;;  %v23553_v62 = vpop.f32.mrf.mxu0  ;;  %15765 = vmatpush3.bf16.msra.mxu0 %v11318_v46 }
 0xa8a   : > { %15766 = vmatprep.subr.bf16.mxu0 %v24699_v26 }
 0xa8b   : > { %v10766_v7 = vpop.f32.mrf.mxu1  ;;  %v10927_v0 = vpop.f32.mrf.mxu0 }
 0xa8c   : > { %v11180_v38 = vpack.c.bf16 %v10927_v0, %v10923_v20  ;;  %v11178_v56 = vpack.c.bf16 %v10766_v7, %v10762_v3  ;;  %v11314_v20 = vsel %vm6563_vm2, %v11311_v47, %v11313_v39  ;;  %v11177_v7 = vpack.c.bf16 %v10764_v15, %v10760_v27 }
 0xa8d   : > { %v10770_v17 = vpop.f32.mrf.mxu1  ;;  %v23559_v31 = vpop.f32.mrf.mxu0  ;;  %15767 = vmatpush3.bf16.msra.mxu0 %v11316_v1  ;;  %v11168_v27 = vpack.c.bf16 %v23533_v30, %v23515_v35 }
 0xa8e   : > { %v11375_v13 = vrot.slane %v11180_v38, 4  ;;  %v11186_v29 = vpack.c.bf16 %v10770_v17, %v10770_v17  ;;  %15768 = vmatprep.subr.bf16.mxu0 %v24700_v43  ;;  %v11325_v33 = vrot.slane %v11178_v56, 4  ;;  %v24701_v17 = vpack.c.bf16 %v23366_v14, %v23338_v57 }
 0xa8f   : > { %v10772_v32 = vpop.f32.mrf.mxu1  ;;  %v10933_v46 = vpop.f32.mrf.mxu0  ;;  %v11324_v57 = vsel %vm6563_vm2, %v23521_v37, %v11323_v5 }
 0xa90   : > { %v11187_v16 = vpack.c.bf16 %v10772_v32, %v10772_v32  ;;  %v11189_v26 = vpack.c.bf16 %v10933_v46, %v10933_v46  ;;  %v11401_v3 = vsel %vm6563_vm2, %v11186_v29, %v23333_v19  ;;  %v23571_v52 = vsel %vm6563_vm2, %v11373_v44, %v11375_v13  ;;  %v17591_v32 = vld [vmem:[%s24348_s15 + $0x18] ss:$60 sps:$4 sm:$0xff]   ;;  %v11459_v46 = vld [vmem:[%s24348_s15 + $0x188] sm:$0xff] }
 0xa91   : > { %v10774_v0 = vpop.f32.mrf.mxu1  ;;  %v10935_v38 = vpop.f32.mrf.mxu0  ;;  %15722 = vmatprep.subr.bf16.mxu1 %v11401_v3  ;;  %15769 = vmatpush3.bf16.msra.mxu0 %v11314_v20  ;;  %v11312_v44 = vsel %vm6563_vm2, %v23383_v55, %v11311_v47  ;;  %v11326_v56 = vsel %vm6563_vm2, %v11323_v5, %v11325_v33  ;;  %v24702_v55 = vpack.c.bf16 %v23317_v42, %v23296_v24  ;;  %v17610_v47 = vld [vmem:[%s24348_s15 + $0x20] ss:$60 sps:$4 sm:$0xff]  }
 0xa92   : > { %v11327_v9 = vrot.slane %v11187_v16, 4  ;;  %v11377_v18 = vrot.slane %v11189_v26, 4  ;;  %15723 = vmatpush3.bf16.msra.mxu1 %v11114_v50  ;;  %v24703_v24 = vpack.c.bf16 %v23271_v28, %v23255_v40  ;;  %v17618_v42 = vld [vmem:[%s24348_s15 + $0x9c] ss:$60 sps:$4 sm:$0xff]   ;;  %v24704_v40 = vpack.c.bf16 %v23229_v45, %v23209_v12 }
 0xa93   : > { %v10775_v39 = vpop.f32.mrf.mxu1  ;;  %v10936_v1 = vpop.f32.mrf.mxu0  ;;  %15724 = vmatprep.subr.bf16.mxu1 %v11177_v7  ;;  %v24705_v45 = vpack.c.bf16 %v23452_v53, %v23440_v63  ;;  %v17599_v53 = vld [vmem:[%s24348_s15 + $0x94] ss:$60 sps:$4 sm:$0xff]   ;;  %v14441_v26 = vcombine.high %v11459_v46, %v11459_v46  ;;  %v11179_v7 = vpack.c.bf16 %v23553_v62, %v23540_v61  ;;  %v11170_v61 = vpack.c.bf16 %v23535_v41, %v23517_v60 }
 0xa94   : > { %v11328_v34 = vsel %vm6563_vm2, %v11325_v33, %v11327_v9  ;;  %v23575_v19 = vsel %vm6563_vm2, %v11375_v13, %v11377_v18  ;;  %v11159_v13 = vpack.c.bf16 %v23511_v54, %v23507_v23  ;;  %v11150_v23 = vpack.c.bf16 %v23498_v21, %v23494_v49  ;;  %v17605_v33 = vld [vmem:[%s24348_s15 + $0x10c] ss:$60 sps:$4 sm:$0xff]   ;;  %v24707_v18 = vld [vmem:[#allocation19_spill] sm:$0xff] }
 0xa95   : > { %v23579_v15 = vpop.f32.mrf.mxu1  ;;  %15770 = vmatprep.subr.bf16.mxu0 %v11328_v34  ;;  %v11141_v49 = vpack.c.bf16 %v23483_v8, %v23468_v22  ;;  %v17616_v22 = vld [vmem:[%s24348_s15 + $0x98] ss:$60 sps:$4 sm:$0xff]   ;;  %v14440_v39 = vcombine.low %v11459_v46, %v11459_v46 }
 0xa96   : > { %15725 = vmatpush3.bf16.msra.mxu1 %v24701_v17  ;;  %15771 = vmatpush3.bf16.msra.mxu0 %v11312_v44  ;;  %v17624_v8 = vld [vmem:[%s24348_s15 + $0x114] ss:$60 sps:$4 sm:$0xff]   ;;  %v24710_v17 = vld [vmem:[#allocation30_spill] sm:$0xff] }
 0xa97   : > { %v16217_v29 = vpop.f32.mrf.mxu1  ;;  %15726 = vmatprep.subr.bf16.mxu1 %v11168_v27  ;;  %15772 = vmatprep.subr.bf16.mxu0 %v11326_v56  ;;  %v17634_v1 = vld [vmem:[%s24348_s15 + $0x34] ss:$60 sps:$4 sm:$0xff]   ;;  %v11458_v27 = vld [vmem:[%s24348_s15 + $0x180] sm:$0xff] }
 0xa98   : > { %v24708_v34 = vld [vmem:[#allocation23_spill] sm:$0xff]  ;;  %v17603_v56 = vld [vmem:[%s24348_s15 + $0x108] ss:$60 sps:$4 sm:$0xff]  }
 0xa99   : > { %v23589_v35 = vpop.f32.mrf.mxu1  ;;  %v24709_v44 = vld [vmem:[#allocation15_spill] sm:$0xff] }
 0xa9a   : > { %v11082_v30 = vpack.c.bf16 %v23589_v35, %v23579_v15  ;;  %15727 = vmatpush3.bf16.msra.mxu1 %v24702_v55  ;;  %15773 = vmatpush3.bf16.msra.mxu0 %v23395_v25  ;;  %v11161_v60 = vpack.c.bf16 %v24710_v17, %v24709_v44  ;;  %v24723_v46 = vld [vmem:[#allocation35_spill] sm:$0xff]  ;;  %v23783_v15 = vld [vmem:[%s24350_s17] ss:$0 sm:$0xff] }
 0xa9b   : > { %v16218_v14 = vpop.f32.mrf.mxu1  ;;  %15728 = vmatprep.subr.bf16.mxu1 %v11159_v13  ;;  %15774 = vmatprep.subr.bf16.mxu0 %v11324_v57  ;;  %v14439_v13 = vcombine.high %v11458_v27, %v11458_v27  ;;  %v24711_v57 = vld [vmem:[#allocation32_spill] sm:$0xff] }
 0xa9c   : > { %v17625_v44 = vld [vmem:[%s24348_s15 + $0x118] ss:$60 sps:$4 sm:$0xff]  }
 0xa9d   : > { %v23601_v54 = vpop.f32.mrf.mxu1 }
 0xa9e   : > { %15729 = vmatpush3.bf16.msra.mxu1 %v24703_v24  ;;  %15775 = vmatpush3.bf16.msra.mxu0 %v23361_v6  ;;  %v11144_v6 = vpack.c.bf16 %v23492_v10, %v23474_v2  ;;  %v11188_v10 = vpack.c.bf16 %v23559_v31, %v23559_v31 }
 0xa9f   : > { %v16221_v25 = vpop.f32.mrf.mxu1  ;;  %15730 = vmatprep.subr.bf16.mxu1 %v11150_v23  ;;  %v24712_v23 = vld [vmem:[#allocation26_spill] sm:$0xff] }
 0xaa0   : > { %v11367_v50 = vrot.slane %v11144_v6, 4  ;;  %v24715_v25 = vld [vmem:[#allocation24_spill] sm:$0xff]  ;;  %v24716_v6 = vld [vmem:[#allocation31_spill] sm:$0xff] }
 0xaa1   : > { %v23615_v21 = vpop.f32.mrf.mxu1  ;;  %12051 = vmatmul.mubr.bf16.vlgmr.msra.gmra.mxu0 %v17610_v47  ;;  %v24713_v47 = vld [vmem:[#allocation36_spill] sm:$0xff] }
 0xaa2   : > { %v11091_v37 = vpack.c.bf16 %v23615_v21, %v23601_v54  ;;  %15731 = vmatpush3.bf16.msra.mxu1 %v24704_v40  ;;  %12058 = vmatprep.mubr.bf16.mxu0 %v17618_v42  ;;  %v11370_v63 = vsel %vm6563_vm2, %v11367_v50, %v23519_v58  ;;  %v17622_v58 = vld [vmem:[%s24348_s15 + $0x110] ss:$60 sps:$4 sm:$0xff]   ;;  %v11368_v16 = vsel %vm6563_vm2, %v24706_v36, %v11367_v50  ;;  %v24719_v50 = vld [vmem:[#allocation16_spill] sm:$0xff]  ;;  %v24724_v36 = vld [vmem:[#allocation25_spill] sm:$0xff] }
 0xaa3   : > { %v16222_v28 = vpop.f32.mrf.mxu1  ;;  %15732 = vmatprep.subr.bf16.mxu1 %v11141_v49  ;;  %v24714_v24 = vpack.c.bf16 %v24712_v23, %v24713_v47  ;;  %v14438_v40 = vcombine.low %v11458_v27, %v11458_v27  ;;  %v17635_v23 = vld [vmem:[%s24348_s15 + $0x38] ss:$60 sps:$4 sm:$0xff]  }
 0xaa5   : > { %v23624_v43 = vpop.f32.mrf.mxu1 }
 0xaa6   : > { %15733 = vmatpush3.bf16.msra.mxu1 %v23206_v4 }
 0xaa7   : > { %v16225_v12 = vpop.f32.mrf.mxu1  ;;  %15734 = vmatprep.subr.bf16.mxu1 %v24705_v45 }
 0xaa8   : > { %v17615_v12 = vld [vmem:[%s24348_s15 + $0x2c] ss:$60 sps:$4 sm:$0xff]  }
 0xaa9   : > { %v23638_v2 = vpop.f32.mrf.mxu1  ;;  %12059 = vmatmul.mubr.bf16.gmra.mxu0 %v17616_v22  ;;  %v24717_v22 = vld [vmem:[#allocation13_spill] sm:$0xff] }
 0xaaa   : > { %v11100_v4 = vpack.c.bf16 %v23638_v2, %v23624_v43  ;;  %15735 = vmatpush3.bf16.msra.mxu1 %v23201_v48  ;;  %12066 = vmatprep.mubr.bf16.mxu0 %v17624_v8  ;;  %v11405_v48 = vsel %vm6563_vm2, %v11188_v10, %v23303_v11  ;;  %v17597_v11 = vld [vmem:[%s24348_s15 + $0x90] ss:$60 sps:$4 sm:$0xff]   ;;  %v24718_v8 = vpack.c.bf16 %v24716_v6, %v24717_v22 }
 0xaab   : > { %v16226_v31 = vpop.f32.mrf.mxu1  ;;  %15800 = vmatprep.subr.bf16.mxu1 %v11370_v63  ;;  %v24721_v63 = vld [vmem:[#allocation17_spill] sm:$0xff] }
 0xaad   : > { %v23654_v20 = vpop.f32.mrf.mxu1  ;;  %11987 = vmatmul.mubr.bf16.vlgmr.msra.gmra.mxu1 %v17591_v32  ;;  %v24720_v32 = vld [vmem:[#allocation34_spill] sm:$0xff] }
 0xaae   : > { %15801 = vmatpush3.bf16.msra.mxu1 %v11405_v48  ;;  %11994 = vmatprep.mubr.bf16.mxu1 %v17599_v53  ;;  %v24722_v53 = vpack.c.bf16 %v24720_v32, %v24721_v63 }
 0xaaf   : > { %v16229_v3 = vpop.f32.mrf.mxu1  ;;  %15802 = vmatprep.subr.bf16.mxu1 %v11368_v16  ;;  %v24725_v16 = vld [vmem:[#allocation28_spill] sm:$0xff] }
 0xab0   : > { %v17621_v3 = vld [vmem:[%s24348_s15 + $0xa4] ss:$60 sps:$4 sm:$0xff]  }
 0xab1   : > { %v23665_v0 = vpop.f32.mrf.mxu1  ;;  %12067 = vmatmul.mubr.bf16.gmra.mxu0 %v17622_v58  ;;  %v17613_v58 = vld [vmem:[%s24348_s15 + $0x28] ss:$60 sps:$4 sm:$0xff]  }
 0xab2   : > { %v11109_v38 = vpack.c.bf16 %v23665_v0, %v23654_v20  ;;  %15803 = vmatpush3.bf16.msra.mxu1 %v11179_v7  ;;  %12074 = vmatprep.mubr.bf16.mxu0 %v14441_v26  ;;  %v24726_v26 = vpack.c.bf16 %v24724_v36, %v24725_v16  ;;  %v17643_v20 = vld [vmem:[%s24348_s15 + $0x128] ss:$60 sps:$4 sm:$0xff]  }
 0xab3   : > { %v16230_v9 = vpop.f32.mrf.mxu1  ;;  %15804 = vmatprep.subr.bf16.mxu1 %v24707_v18  ;;  %v17619_v18 = vld [vmem:[%s24348_s15 + $0xa0] ss:$60 sps:$4 sm:$0xff]  }
 0xab5   : > { %v23678_v62 = vpop.f32.mrf.mxu1  ;;  %11995 = vmatmul.mubr.bf16.gmra.mxu1 %v17597_v11 }
 0xab6   : > { %15805 = vmatpush3.bf16.msra.mxu1 %v11170_v61  ;;  %12002 = vmatprep.mubr.bf16.mxu1 %v17605_v33  ;;  %v17627_v61 = vld [vmem:[%s24348_s15 + $0x11c] ss:$60 sps:$4 sm:$0xff]  }
 0xab7   : > { %v16233_v5 = vpop.f32.mrf.mxu1  ;;  %15806 = vmatprep.subr.bf16.mxu1 %v24708_v34  ;;  %v11460_v34 = vld [vmem:[%s24348_s15 + $0x190] sm:$0xff] }
 0xab8   : > { %v14443_v17 = vcombine.high %v11460_v34, %v11460_v34 }
 0xab9   : > { %v23689_v41 = vpop.f32.mrf.mxu1  ;;  %12075 = vmatmul.mubr.bf16.gmra.mxu0 %v14440_v39 }
 0xaba   : > { %v11118_v29 = vpack.c.bf16 %v23689_v41, %v23678_v62  ;;  %15807 = vmatpush3.bf16.msra.mxu1 %v11161_v60  ;;  %12178 = vmatprep.mubr.bf16.mxu0 %v17634_v1 }
 0xabb   : > { %v16234_v55 = vpop.f32.mrf.mxu1  ;;  %15808 = vmatprep.subr.bf16.mxu1 %v24711_v57  ;;  %v14442_v57 = vcombine.low %v11460_v34, %v11460_v34 }
 0xabd   : > { %v23697_v14 = vpop.f32.mrf.mxu1  ;;  %12003 = vmatmul.mubr.bf16.gmra.mxu1 %v17603_v56 }
 0xabe   : > { %15809 = vmatpush3.bf16.msra.mxu1 %v24714_v24  ;;  %12010 = vmatprep.mubr.bf16.mxu1 %v14439_v13 }
 0xabf   : > { %v16237_v42 = vpop.f32.mrf.mxu1  ;;  %15810 = vmatprep.subr.bf16.mxu1 %v24715_v25 }
 0xac1   : > { %v23703_v49 = vpop.f32.mrf.mxu1 }
 0xac2   : > { %v11127_v28 = vpack.c.bf16 %v23703_v49, %v23697_v14  ;;  %15811 = vmatpush3.bf16.msra.mxu1 %v24718_v8 }
 0xac3   : > { %v16238_v45 = vpop.f32.mrf.mxu1  ;;  %15812 = vmatprep.subr.bf16.mxu1 %v24719_v50 }
 0xac5   : > { %v23714_v10 = vpop.f32.mrf.mxu1  ;;  %12011 = vmatmul.mubr.bf16.gmra.mxu1 %v14438_v40 }
 0xac6   : > { %15813 = vmatpush3.bf16.msra.mxu1 %v24722_v53  ;;  %12114 = vmatprep.mubr.bf16.mxu1 %v17615_v12 }
 0xac7   : > { %v16241_v31 = vpop.f32.mrf.mxu1  ;;  %15814 = vmatprep.subr.bf16.mxu1 %v24723_v46 }
 0xac9   : > { %v23720_v48 = vpop.f32.mrf.mxu1 }
 0xaca   : > { %15815 = vmatpush3.bf16.msra.mxu1 %v24726_v26  ;;  %v11136_v21 = vpack.c.bf16 %v23720_v48, %v23714_v10 }
 0xacb   : > { %v16242_v7 = vpop.f32.mrf.mxu1 }
 0xacd   : > { %v23731_v11 = vpop.f32.mrf.mxu1  ;;  %12115 = vmatmul.mubr.bf16.vlgmr.msra.gmra.mxu1 %v17613_v58  ;;  %v17636_v58 = vld [vmem:[%s24348_s15 + $0xb0] ss:$60 sps:$4 sm:$0xff]  }
 0xace   : > { %12122 = vmatprep.mubr.bf16.mxu1 %v17621_v3 }
 0xacf   : > { %v16245_v33 = vpop.f32.mrf.mxu1 }
 0xad1   : > { %v11031_v9 = vpop.f32.mrf.mxu1 }
 0xad2   : > { %v11145_v2 = vpack.c.bf16 %v11031_v9, %v23731_v11  ;;  %v24727_v11 = vmov 0  }
 0xad3   : > { %v16246_v39 = vpop.f32.mrf.mxu1 }
 0xad5   : > { %v11036_v1 = vpop.f32.mrf.mxu1  ;;  %12123 = vmatmul.mubr.bf16.gmra.mxu1 %v17619_v18 }
 0xad6   : > { %12130 = vmatprep.mubr.bf16.mxu1 %v17627_v61 }
 0xad7   : > { %v16249_v5 = vpop.f32.mrf.mxu1 }
 0xad9   : > { %v11039_v27 = vpop.f32.mrf.mxu1 }
 0xadb   : > { %v16250_v60 = vpop.f32.mrf.mxu1 }
 0xadd   : > { %v11044_v56 = vpop.f32.mrf.mxu1  ;;  %12131 = vmatmul.mubr.bf16.gmra.mxu1 %v17625_v44 }
 0xade   : > { %12138 = vmatprep.mubr.bf16.mxu1 %v14443_v17 }
 0xadf   : > { %v16253_v13 = vpop.f32.mrf.mxu1 }
 0xae1   : > { %v11047_v55 = vpop.f32.mrf.mxu1 }
 0xae2   : > { %v11163_v31 = vpack.c.bf16 %v11047_v55, %v11044_v56 }
 0xae3   : > { %v16254_v47 = vpop.f32.mrf.mxu1 }
 0xae5   : > { %v11052_v24 = vpop.f32.mrf.mxu1  ;;  %12139 = vmatmul.mubr.bf16.gmra.mxu1 %v14442_v57 }
 0xae6   : > { %16269 = vmatprep.mubr.msk.bf16.mxu1 %vm7108_vm3, %v17635_v23 }
 0xae7   : > { %v16257_v42 = vpop.f32.mrf.mxu1 }
 0xae8   : > { %v17637_v42 = vld [vmem:[%s24348_s15 + $0xa8] ss:$60 sps:$4 sm:$0xff]  }
 0xae9   : > { %v11055_v25 = vpop.f32.mrf.mxu1 }
 0xaea   : > { %v11172_v50 = vpack.c.bf16 %v11055_v25, %v11052_v24 }
 0xaeb   : > { %v16258_v40 = vpop.f32.mrf.mxu1 }
 0xaed   : > { %v11060_v6 = vpop.f32.mrf.mxu1 }
 0xaef   : > { %v16261_v22 = vpop.f32.mrf.mxu1 }
 0xaf1   : > { %v11063_v8 = vpop.f32.mrf.mxu1 }
 0xaf2   : > { %v11181_v12 = vpack.c.bf16 %v11063_v8, %v11060_v6  ;;  %v17642_v6 = vld [vmem:[%s24348_s15 + $0x124] ss:$60 sps:$4 sm:$0xff]  }
 0xaf3   : > { %v16262_v45 = vpop.f32.mrf.mxu1 }
 0xaf4   : > { %15840 = vmatprep.subr.bf16.mxu0 %v11181_v12 }
 0xaf5   : > { %v11068_v32 = vpop.f32.mrf.mxu1  ;;  %15841 = vmatpush3.bf16.msra.mxu0 %v11109_v38  ;;  %v11154_v38 = vpack.c.bf16 %v11039_v27, %v11036_v1 }
 0xaf6   : > { %v11190_v63 = vpack.c.bf16 %v11068_v32, %v11068_v32  ;;  %15842 = vmatprep.subr.bf16.mxu0 %v11172_v50  ;;  %v17647_v50 = vld [vmem:[%s24352_s19 + $0x1f8] ss:$36 sps:$4 sm:$0xff]  }
 0xaf7   : > { %v16265_v53 = vpop.f32.mrf.mxu1  ;;  %v17649_v32 = vld [vmem:[%s24352_s19 + $0x1fc] ss:$36 sps:$4 sm:$0xff]  }
 0xaf8   : > { %v11760_v46 = vsel %vm6563_vm2, %v11190_v63, 0  ;;  %16302 = vmatprep.subr.msk.bf16.mxu1 %vm6563_vm2, %v11190_v63  ;;  %v17650_v63 = vld [vmem:[%s24352_s19 + $0x200] ss:$36 sps:$4 sm:$0xff]  }
 0xaf9   : > { %v11071_v36 = vpop.f32.mrf.mxu1  ;;  %15843 = vmatpush3.bf16.msra.mxu0 %v11100_v4  ;;  %16268 = vmatpush3.bf16.msra.mxu1 %v11760_v46  ;;  %v17644_v4 = vld [vmem:[%s24348_s15 + $0x1a0] ss:$0 sps:$4 sm:$0xff]   ;;  %v17652_v46 = vld [vmem:[%s24352_s19 + $0x204] ss:$36 sps:$4 sm:$0xff]  }
 0xafa   : > { %15844 = vmatprep.subr.bf16.mxu0 %v11163_v31  ;;  %v23834_v36 = vld [vmem:[%s24348_s15 + $0x198] sm:$0xff]  ;;  %12797 = vmatprep.subr.bf16.mxu1 %v17652_v46 }
 0xafb   : > { %v16266_v0 = vpop.f32.mrf.mxu1 }
 0xafc   : > { %16270 = vmatmul.mubr.msk.bf16.vlgmr.msra.gmra.mxu1 %vm7108_vm3, %v17636_v58 }
 0xafd   : > { %15845 = vmatpush3.bf16.msra.mxu0 %v11091_v37  ;;  %16273 = vmatprep.mubr.msk.bf16.mxu1 %vm7108_vm3, %v17643_v20  ;;  %v15616_v16 = vpop.f32.mrf.mxu0 }
 0xafe   : > { %15846 = vmatprep.subr.bf16.mxu0 %v11154_v38  ;;  %12798 = vmatpush1.bf16.msra.mxu1 %v17650_v63 }
 0xaff   : > { %v15617_v43 = vpop.f32.mrf.mxu0 }
 0xb00   : > { %v15618_v26 = vadd.f32 %v15617_v43, %v15616_v16  ;;  %v17653_v43 = vld [vmem:[%s24352_s19 + $0x1b0] ss:$36 sps:$4 sm:$0xff]  }
 0xb01   : > { %15847 = vmatpush3.bf16.msra.mxu0 %v11082_v30  ;;  %v15619_v3 = vpop.f32.mrf.mxu0 }
 0xb02   : > { %15848 = vmatprep.subr.bf16.mxu0 %v11145_v2  ;;  %v17655_v2 = vld [vmem:[%s24352_s19 + $0x1b4] ss:$36 sps:$4 sm:$0xff]  }
 0xb03   : > { %v15620_v54 = vpop.f32.mrf.mxu0 }
 0xb04   : > { %16274 = vmatmul.mubr.msk.bf16.gmra.mxu1 %vm7108_vm3, %v17644_v4  ;;  %v15621_v37 = vadd.f32 %v15620_v54, %v15619_v3  ;;  %v17656_v4 = vld [vmem:[%s24352_s19 + $0x1b8] ss:$36 sps:$4 sm:$0xff]  }
 0xb05   : > { %15849 = vmatpush3.bf16.msra.mxu0 %v23575_v19  ;;  %v15622_v7 = vpop.f32.mrf.mxu0  ;;  %12829 = vmatprep.mubr.bf16.mxu1 %v24727_v11  ;;  %v11797_v19 = vadd.f32 %v15618_v26, %v23783_v15  ;;  %v17658_v54 = vld [vmem:[%s24352_s19 + $0x1bc] ss:$36 sps:$4 sm:$0xff]  }
 0xb06   : > { %15850 = vmatprep.subr.bf16.mxu0 %v11136_v21  ;;  %v17640_v21 = vld [vmem:[%s24348_s15 + $0x120] ss:$60 sps:$4 sm:$0xff]   ;;  %12799 = vmatprep.subr.bf16.mxu1 %v17658_v54 }
 0xb07   : > { %v15623_v35 = vpop.f32.mrf.mxu0  ;;  %12800 = vmatpush1.bf16.msra.mxu1 %v17656_v4  ;;  %v17686_v4 = vld [vmem:[%s24352_s19 + $0x50] ss:$36 sps:$4 sm:$0xff]   ;;  %v17689_v54 = vld [vmem:[%s24352_s19] ss:$36 sps:$4 sm:$0xff]  }
 0xb08   : > { %v15624_v30 = vadd.f32 %v15623_v35, %v15622_v7  ;;  %v14445_v35 = vcombine.high %v23834_v36, %v23834_v36 }
 0xb09   : > { %15851 = vmatpush3.bf16.msra.mxu0 %v23571_v52  ;;  %v15656_v33 = vpop.f32.mrf.mxu1  ;;  %v15625_v10 = vpop.f32.mrf.mxu0  ;;  %v11800_v52 = vadd.f32 %v15621_v37, %v23783_v15 }
 0xb0a   : > { %15852 = vmatprep.subr.bf16.mxu0 %v11127_v28  ;;  %v17632_v28 = vld [vmem:[%s24348_s15 + $0x30] ss:$60 sps:$4 sm:$0xff]  }
 0xb0b   : > { %v15657_v48 = vpop.f32.mrf.mxu1  ;;  %v15626_v9 = vpop.f32.mrf.mxu0 }
 0xb0c   : > { %v15658_v18 = vadd.f32 %v15657_v48, %v15656_v33  ;;  %v15627_v61 = vadd.f32 %v15626_v9, %v15625_v10  ;;  %v17659_v9 = vld [vmem:[%s24352_s19 + $0x168] ss:$36 sps:$4 sm:$0xff]  }
 0xb0d   : > { %15853 = vmatpush3.bf16.msra.mxu0 %v23549_v59  ;;  %v15659_v39 = vpop.f32.mrf.mxu1  ;;  %v15628_v1 = vpop.f32.mrf.mxu0  ;;  %v17639_v59 = vld [vmem:[%s24348_s15 + $0xac] ss:$60 sps:$4 sm:$0xff]  }
 0xb0e   : > { %15854 = vmatprep.subr.bf16.mxu0 %v11118_v29  ;;  %v23795_v5 = vadd.f32 %v15658_v18, %v11797_v19  ;;  %v11805_v29 = vadd.f32 %v15624_v30, %v23783_v15  ;;  %v17661_v18 = vld [vmem:[%s24352_s19 + $0x16c] ss:$36 sps:$4 sm:$0xff]  }
 0xb0f   : > { %v15660_v14 = vpop.f32.mrf.mxu1  ;;  %v15629_v49 = vpop.f32.mrf.mxu0 }
 0xb10   : > { %v15661_v34 = vadd.f32 %v15660_v14, %v15659_v39  ;;  %v15630_v27 = vadd.f32 %v15629_v49, %v15628_v1  ;;  %v17664_v1 = vld [vmem:[%s24352_s19 + $0x174] ss:$36 sps:$4 sm:$0xff]  }
 0xb11   : > { %15855 = vmatpush3.bf16.msra.mxu0 %v23531_v51  ;;  %v15662_v62 = vpop.f32.mrf.mxu1  ;;  %v15631_v41 = vpop.f32.mrf.mxu0  ;;  %v11808_v51 = vadd.f32 %v15627_v61, %v23783_v15  ;;  %v17662_v61 = vld [vmem:[%s24352_s19 + $0x170] ss:$36 sps:$4 sm:$0xff]   ;;  %12801 = vmatprep.subr.bf16.mxu1 %v17664_v1 }
 0xb12   : > { %v23805_v44 = vadd.f32 %v15661_v34, %v11800_v52  ;;  %v11813_v12 = vadd.f32 %v15630_v27, %v23783_v15  ;;  %12726 = vmatprep.subr.bf16.mxu0 %v17649_v32  ;;  %12802 = vmatpush1.bf16.msra.mxu1 %v17662_v61  ;;  %v17665_v27 = vld [vmem:[%s24352_s19 + $0x120] ss:$36 sps:$4 sm:$0xff]  }
 0xb13   : > { %v15663_v17 = vpop.f32.mrf.mxu1  ;;  %v15632_v60 = vpop.f32.mrf.mxu0 }
 0xb14   : > { %12179 = vmatmul.mubr.bf16.vlgmr.msra.gmra.mxu0 %v17632_v28  ;;  %v15664_v56 = vadd.f32 %v15663_v17, %v15662_v62  ;;  %v15633_v13 = vadd.f32 %v15632_v60, %v15631_v41  ;;  %v17668_v62 = vld [vmem:[%s24352_s19 + $0x128] ss:$36 sps:$4 sm:$0xff]   ;;  %v14444_v17 = vcombine.low %v23834_v36, %v23834_v36  ;;  %v17679_v36 = vld [vmem:[%s24352_s19 + $0x94] ss:$36 sps:$4 sm:$0xff]  }
 0xb15   : > { %12186 = vmatprep.mubr.bf16.mxu0 %v17639_v59  ;;  %v15665_v55 = vpop.f32.mrf.mxu1  ;;  %v15634_v57 = vpop.f32.mrf.mxu0  ;;  %12727 = vmatpush1.bf16.msra.mxu0 %v17647_v50  ;;  %v17667_v59 = vld [vmem:[%s24352_s19 + $0x124] ss:$36 sps:$4 sm:$0xff]  }
 0xb16   : > { %v23808_v23 = vadd.f32 %v15664_v56, %v11805_v29  ;;  %v11816_v38 = vadd.f32 %v15633_v13, %v23783_v15  ;;  %12728 = vmatprep.subr.bf16.mxu0 %v17655_v2  ;;  %v17683_v2 = vld [vmem:[%s24352_s19 + $0x48] ss:$36 sps:$4 sm:$0xff]  }
 0xb17   : > { %v15666_v47 = vpop.f32.mrf.mxu1  ;;  %v15635_v24 = vpop.f32.mrf.mxu0 }
 0xb18   : > { %v15667_v25 = vadd.f32 %v15666_v47, %v15665_v55  ;;  %v15636_v40 = vadd.f32 %v15635_v24, %v15634_v57  ;;  %v17671_v55 = vld [vmem:[%s24352_s19 + $0xd8] ss:$36 sps:$4 sm:$0xff]  }
 0xb19   : > { %v15668_v22 = vpop.f32.mrf.mxu1  ;;  %v15637_v8 = vpop.f32.mrf.mxu0  ;;  %12729 = vmatpush1.bf16.msra.mxu0 %v17653_v43  ;;  %v17673_v57 = vld [vmem:[%s24352_s19 + $0xdc] ss:$36 sps:$4 sm:$0xff]   ;;  %v17688_v43 = vld [vmem:[%s24352_s19 + $0x54] ss:$36 sps:$4 sm:$0xff]  }
 0xb1a   : > { %v23817_v45 = vadd.f32 %v15667_v25, %v11808_v51  ;;  %v11821_v10 = vadd.f32 %v15636_v40, %v23783_v15  ;;  %12730 = vmatprep.subr.bf16.mxu0 %v17661_v18  ;;  %v17674_v51 = vld [vmem:[%s24352_s19 + $0xe0] ss:$36 sps:$4 sm:$0xff]  }
 0xb1b   : > { %v15669_v53 = vpop.f32.mrf.mxu1  ;;  %v15638_v31 = vpop.f32.mrf.mxu0 }
 0xb1c   : > { %12187 = vmatmul.mubr.bf16.gmra.mxu0 %v17637_v42  ;;  %v15670_v58 = vadd.f32 %v15669_v53, %v15668_v22 }
 0xb1d   : > { %12194 = vmatprep.mubr.bf16.mxu0 %v17642_v6  ;;  %v15671_v20 = vpop.f32.mrf.mxu1  ;;  %v15696_v0 = vpop.f32.mrf.mxu0  ;;  %12731 = vmatpush1.bf16.msra.mxu0 %v17659_v9 }
 0xb1e   : > { %v23837_v16 = vadd.f32 %v15670_v58, %v11813_v12  ;;  %12732 = vmatprep.subr.bf16.mxu0 %v17667_v59 }
 0xb1f   : > { %v15672_v26 = vpop.f32.mrf.mxu1  ;;  %v15697_v3 = vpop.f32.mrf.mxu0 }
 0xb20   : > { %v15673_v37 = vadd.f32 %v15672_v26, %v15671_v20  ;;  %v15698_v7 = vadd.f32 %v15697_v3, %v15696_v0  ;;  %v17682_v20 = vld [vmem:[%s24352_s19 + $0x9c] ss:$36 sps:$4 sm:$0xff]   ;;  %v17677_v0 = vld [vmem:[%s24352_s19 + $0x90] ss:$36 sps:$4 sm:$0xff]   ;;  %v17691_v26 = vld [vmem:[%s24352_s19 + $0x4] ss:$36 sps:$4 sm:$0xff]  }
 0xb21   : > { %v15674_v30 = vpop.f32.mrf.mxu1  ;;  %v15699_v33 = vpop.f32.mrf.mxu0  ;;  %12733 = vmatpush1.bf16.msra.mxu0 %v17665_v27  ;;  %v17694_v3 = vld [vmem:[%s24352_s19 + $0xc] ss:$36 sps:$4 sm:$0xff]  }
 0xb22   : > { %v11880_v19 = vadd.f32 %v15673_v37, %v11816_v38  ;;  %v23858_v48 = vadd.f32 %v15698_v7, %v23795_v5  ;;  %12734 = vmatprep.subr.bf16.mxu0 %v17673_v57  ;;  %v17680_v38 = vld [vmem:[%s24352_s19 + $0x98] ss:$36 sps:$4 sm:$0xff]   ;;  %v17697_v7 = vld [vmem:[%s24352_s19 + $0x20c] ss:$36 sps:$4 sm:$0xff]  }
 0xb23   : > { %v15675_v39 = vpop.f32.mrf.mxu1  ;;  %v15700_v15 = vpop.f32.mrf.mxu0 }
 0xb24   : > { %12195 = vmatmul.mubr.bf16.gmra.mxu0 %v17640_v21  ;;  %v15676_v52 = vadd.f32 %v15675_v39, %v15674_v30  ;;  %v15701_v5 = vadd.f32 %v15700_v15, %v15699_v33  ;;  %v17692_v21 = vld [vmem:[%s24352_s19 + $0x8] ss:$36 sps:$4 sm:$0xff]  }
 0xb25   : > { %12202 = vmatprep.mubr.bf16.mxu0 %v14445_v35  ;;  %v15677_v14 = vpop.f32.mrf.mxu1  ;;  %v15702_v49 = vpop.f32.mrf.mxu0  ;;  %12735 = vmatpush1.bf16.msra.mxu0 %v17671_v55  ;;  %v17700_v35 = vld [vmem:[%s24352_s19 + $0x214] ss:$36 sps:$4 sm:$0xff]  }
 0xb26   : > { %v11885_v28 = vadd.f32 %v15676_v52, %v11821_v10  ;;  %v23873_v34 = vadd.f32 %v15701_v5, %v23805_v44  ;;  %v17670_v44 = vld [vmem:[%s24352_s19 + $0x12c] ss:$36 sps:$4 sm:$0xff]   ;;  %12736 = vmatprep.subr.bf16.mxu0 %v17679_v36 }
 0xb27   : > { %v15678_v41 = vpop.f32.mrf.mxu1  ;;  %v15703_v29 = vpop.f32.mrf.mxu0  ;;  %12803 = vmatprep.subr.bf16.mxu1 %v17670_v44 }
 0xb28   : > { %v15704_v60 = vadd.f32 %v15703_v29, %v15702_v49  ;;  %12804 = vmatpush1.bf16.msra.mxu1 %v17668_v62 }
 0xb29   : > { %v15705_v56 = vpop.f32.mrf.mxu0  ;;  %12737 = vmatpush1.bf16.msra.mxu0 %v17677_v0 }
 0xb2a   : > { %v23890_v13 = vadd.f32 %v15704_v60, %v23808_v23  ;;  %v17676_v23 = vld [vmem:[%s24352_s19 + $0xe4] ss:$36 sps:$4 sm:$0xff]  }
 0xb2b   : > { %v15706_v47 = vpop.f32.mrf.mxu0  ;;  %12805 = vmatprep.subr.bf16.mxu1 %v17676_v23 }
 0xb2c   : > { %12203 = vmatmul.mubr.bf16.gmra.mxu0 %v14444_v17  ;;  %v15707_v24 = vadd.f32 %v15706_v47, %v15705_v56  ;;  %12806 = vmatpush1.bf16.msra.mxu1 %v17674_v51 }
 0xb2d   : > { %v15708_v42 = vpop.f32.mrf.mxu0  ;;  %12758 = vmatprep.mubr.bf16.mxu0 %v24727_v11  ;;  %12807 = vmatprep.subr.bf16.mxu1 %v17682_v20 }
 0xb2e   : > { %v23906_v25 = vadd.f32 %v15707_v24, %v23817_v45 }
 0xb2f   : > { %v15709_v40 = vpop.f32.mrf.mxu0 }
 0xb30   : > { %v15710_v6 = vadd.f32 %v15709_v40, %v15708_v42  ;;  %12808 = vmatpush1.bf16.msra.mxu1 %v17680_v38 }
 0xb31   : > { %v15711_v22 = vpop.f32.mrf.mxu0  ;;  %12809 = vmatprep.subr.bf16.mxu1 %v17688_v43 }
 0xb32   : > { %v23909_v8 = vadd.f32 %v15710_v6, %v23837_v16  ;;  %v17685_v16 = vld [vmem:[%s24352_s19 + $0x4c] ss:$36 sps:$4 sm:$0xff]  }
 0xb33   : > { %v15712_v12 = vpop.f32.mrf.mxu0  ;;  %12738 = vmatprep.subr.bf16.mxu0 %v17685_v16 }
 0xb34   : > { %v15713_v50 = vadd.f32 %v15712_v12, %v15711_v22  ;;  %12739 = vmatpush1.bf16.msra.mxu0 %v17683_v2  ;;  %12810 = vmatpush1.bf16.msra.mxu1 %v17686_v4 }
 0xb35   : > { %v15714_v32 = vpop.f32.mrf.mxu0  ;;  %12740 = vmatprep.subr.bf16.mxu0 %v17691_v26  ;;  %12811 = vmatprep.subr.bf16.mxu1 %v17694_v3 }
 0xb36   : > { %v23911_v63 = vadd.f32 %v15713_v50, %v11880_v19 }
 0xb37   : > { %v15715_v53 = vpop.f32.mrf.mxu0 }
 0xb38   : > { %v15716_v31 = vadd.f32 %v15715_v53, %v15714_v32  ;;  %12741 = vmatpush1.bf16.msra.mxu0 %v17689_v54  ;;  %12812 = vmatpush1.bf16.msra.mxu1 %v17692_v21 }
 0xb39   : > { %v15717_v46 = vpop.f32.mrf.mxu0  ;;  %12868 = vmatprep.subr.bf16.mxu0 %v17697_v7  ;;  %12939 = vmatprep.subr.bf16.mxu1 %v17700_v35 }
 0xb3a   : > { %v23913_v58 = vadd.f32 %v15716_v31, %v11885_v28 }
 0xb3b   : > { %v15718_v45 = vpop.f32.mrf.mxu0 }
 0xb61   : > { %v15776_v37 = vpop.f32.mrf.mxu0 }
 0xb63   : > { %v15777_v30 = vpop.f32.mrf.mxu0 }
 0xb64   : > { %v15778_v33 = vadd.f32 %v15777_v30, %v15776_v37 }
 0xb65   : > { %v15779_v10 = vpop.f32.mrf.mxu0 }
 0xb67   : > { %v15780_v19 = vpop.f32.mrf.mxu0 }
 0xb68   : > { %v15781_v9 = vadd.f32 %v15780_v19, %v15779_v10 }
 0xb69   : > { %v15782_v18 = vpop.f32.mrf.mxu0 }
 0xb6b   : > { %v15783_v61 = vpop.f32.mrf.mxu0 }
 0xb6c   : > { %v15784_v39 = vadd.f32 %v15783_v61, %v15782_v18 }
 0xb6d   : > { %v15736_v15 = vpop.f32.mrf.mxu1  ;;  %v15785_v1 = vpop.f32.mrf.mxu0 }
 0xb6f   : > { %v15737_v52 = vpop.f32.mrf.mxu1  ;;  %v15786_v5 = vpop.f32.mrf.mxu0 }
 0xb70   : > { %v15738_v14 = vadd.f32 %v15737_v52, %v15736_v15  ;;  %v15787_v49 = vadd.f32 %v15786_v5, %v15785_v1 }
 0xb71   : > { %v15739_v28 = vpop.f32.mrf.mxu1  ;;  %v15788_v27 = vpop.f32.mrf.mxu0 }
 0xb72   : > { %v11989_v59 = vadd.f32 %v15738_v14, %v23858_v48 }
 0xb73   : > { %v15740_v62 = vpop.f32.mrf.mxu1  ;;  %v15789_v41 = vpop.f32.mrf.mxu0 }
 0xb74   : > { %v15741_v29 = vadd.f32 %v15740_v62, %v15739_v28  ;;  %v12053_v44 = vadd.f32 %v15778_v33, %v11989_v59  ;;  %v15790_v17 = vadd.f32 %v15789_v41, %v15788_v27 }
 0xb75   : > { %v15742_v60 = vpop.f32.mrf.mxu1  ;;  %v15791_v56 = vpop.f32.mrf.mxu0 }
 0xb76   : > { %v11992_v55 = vadd.f32 %v15741_v29, %v23873_v34 }
 0xb77   : > { %v15743_v57 = vpop.f32.mrf.mxu1  ;;  %v15792_v51 = vpop.f32.mrf.mxu0 }
 0xb78   : > { %v15744_v47 = vadd.f32 %v15743_v57, %v15742_v60  ;;  %v12056_v23 = vadd.f32 %v15781_v9, %v11992_v55  ;;  %v15793_v24 = vadd.f32 %v15792_v51, %v15791_v56 }
 0xb79   : > { %v15745_v42 = vpop.f32.mrf.mxu1  ;;  %v15794_v40 = vpop.f32.mrf.mxu0 }
 0xb7a   : > { %v11997_v6 = vadd.f32 %v15744_v47, %v23890_v13 }
 0xb7b   : > { %v15746_v22 = vpop.f32.mrf.mxu1  ;;  %v15795_v48 = vpop.f32.mrf.mxu0 }
 0xb7c   : > { %v15747_v12 = vadd.f32 %v15746_v22, %v15745_v42  ;;  %v12061_v50 = vadd.f32 %v15784_v39, %v11997_v6  ;;  %v15796_v32 = vadd.f32 %v15795_v48, %v15794_v40 }
 0xb7d   : > { %v15748_v53 = vpop.f32.mrf.mxu1  ;;  %v15797_v31 = vpop.f32.mrf.mxu0 }
 0xb7e   : > { %v12000_v46 = vadd.f32 %v15747_v12, %v23906_v25 }
 0xb7f   : > { %v15749_v45 = vpop.f32.mrf.mxu1  ;;  %v15798_v34 = vpop.f32.mrf.mxu0 }
 0xb80   : > { %v15750_v36 = vadd.f32 %v15749_v45, %v15748_v53  ;;  %v12064_v20 = vadd.f32 %v15787_v49, %v12000_v46 }
 0xb81   : > { %v15751_v0 = vpop.f32.mrf.mxu1 }
 0xb82   : > { %v12005_v38 = vadd.f32 %v15750_v36, %v23909_v8 }
 0xb83   : > { %v15752_v16 = vpop.f32.mrf.mxu1 }
 0xb84   : > { %v15753_v43 = vadd.f32 %v15752_v16, %v15751_v0  ;;  %v12069_v2 = vadd.f32 %v15790_v17, %v12005_v38  ;;  %v17695_v16 = vld [vmem:[%s24352_s19 + $0x208] ss:$36 sps:$4 sm:$0xff]  }
 0xb85   : > { %v15754_v13 = vpop.f32.mrf.mxu1 }
 0xb86   : > { %v12008_v4 = vadd.f32 %v15753_v43, %v23911_v63  ;;  %v17698_v43 = vld [vmem:[%s24352_s19 + $0x210] ss:$36 sps:$4 sm:$0xff]  }
 0xb87   : > { %v15755_v26 = vpop.f32.mrf.mxu1 }
 0xb88   : > { %v15756_v3 = vadd.f32 %v15755_v26, %v15754_v13  ;;  %v12072_v54 = vadd.f32 %v15793_v24, %v12008_v4  ;;  %v17703_v13 = vld [vmem:[%s24352_s19 + $0x1c4] ss:$36 sps:$4 sm:$0xff]   ;;  %v17706_v4 = vld [vmem:[%s24352_s19 + $0x1cc] ss:$36 sps:$4 sm:$0xff]  }
 0xb89   : > { %v15757_v21 = vpop.f32.mrf.mxu1 }
 0xb8a   : > { %v12013_v37 = vadd.f32 %v15756_v3, %v23913_v58 }
 0xb8b   : > { %v15758_v25 = vpop.f32.mrf.mxu1 }
 0xb8c   : > { %v12077_v7 = vadd.f32 %v15796_v32, %v12013_v37  ;;  %v17701_v37 = vld [vmem:[%s24352_s19 + $0x1c0] ss:$36 sps:$4 sm:$0xff]   ;;  %v17704_v25 = vld [vmem:[%s24352_s19 + $0x1c8] ss:$36 sps:$4 sm:$0xff]  }
 0xb8d   : > { %v15816_v35 = vpop.f32.mrf.mxu1 }
 0xb8f   : > { %v15817_v30 = vpop.f32.mrf.mxu1 }
 0xb90   : > { %v15818_v33 = vadd.f32 %v15817_v30, %v15816_v35  ;;  %v17709_v35 = vld [vmem:[%s24352_s19 + $0x17c] ss:$36 sps:$4 sm:$0xff]   ;;  %v17712_v30 = vld [vmem:[%s24352_s19 + $0x184] ss:$36 sps:$4 sm:$0xff]  }
 0xb91   : > { %v15819_v10 = vpop.f32.mrf.mxu1 }
 0xb92   : > { %v12117_v19 = vadd.f32 %v15818_v33, %v12053_v44 }
 0xb93   : > { %v15820_v8 = vpop.f32.mrf.mxu1 }
 0xb94   : > { %v15821_v9 = vadd.f32 %v15820_v8, %v15819_v10 }
 0xb95   : > { %v15822_v18 = vpop.f32.mrf.mxu1 }
 0xb96   : > { %v12120_v61 = vadd.f32 %v15821_v9, %v12056_v23 }
 0xb97   : > { %v15823_v39 = vpop.f32.mrf.mxu1 }
 0xb98   : > { %v15824_v15 = vadd.f32 %v15823_v39, %v15822_v18  ;;  %v17707_v18 = vld [vmem:[%s24352_s19 + $0x178] ss:$36 sps:$4 sm:$0xff]  }
 0xb99   : > { %v15825_v63 = vpop.f32.mrf.mxu1 }
 0xb9a   : > { %v12125_v1 = vadd.f32 %v15824_v15, %v12061_v50  ;;  %v17715_v15 = vld [vmem:[%s24352_s19 + $0x134] ss:$36 sps:$4 sm:$0xff]  }
 0xb9b   : > { %v15826_v52 = vpop.f32.mrf.mxu1 }
 0xb9c   : > { %v15827_v5 = vadd.f32 %v15826_v52, %v15825_v63  ;;  %v17718_v63 = vld [vmem:[%s24352_s19 + $0x13c] ss:$36 sps:$4 sm:$0xff]  }
 0xb9d   : > { %v15828_v14 = vpop.f32.mrf.mxu1 }
 0xb9e   : > { %v12128_v49 = vadd.f32 %v15827_v5, %v12064_v20 }
 0xb9f   : > { %v15829_v58 = vpop.f32.mrf.mxu1 }
 0xba0   : > { %v15830_v28 = vadd.f32 %v15829_v58, %v15828_v14  ;;  %v17716_v58 = vld [vmem:[%s24352_s19 + $0x138] ss:$36 sps:$4 sm:$0xff]  }
 0xba1   : > { %v15831_v27 = vpop.f32.mrf.mxu1 }
 0xba2   : > { %v23964_v59 = vadd.f32 %v15830_v28, %v12069_v2 }
 0xba3   : > { %v15832_v62 = vpop.f32.mrf.mxu1 }
 0xba4   : > { %v15833_v41 = vadd.f32 %v15832_v62, %v15831_v27  ;;  %v17721_v27 = vld [vmem:[%s24352_s19 + $0xec] ss:$36 sps:$4 sm:$0xff]  }
 0xba5   : > { %v15834_v29 = vpop.f32.mrf.mxu1 }
 0xba6   : > { %v23966_v44 = vadd.f32 %v15833_v41, %v12072_v54 }
 0xba7   : > { %v15835_v17 = vpop.f32.mrf.mxu1 }
 0xba8   : > { %v15836_v60 = vadd.f32 %v15835_v17, %v15834_v29 }
 0xba9   : > { %v15837_v56 = vpop.f32.mrf.mxu1 }
 0xbaa   : > { %v23968_v55 = vadd.f32 %v15836_v60, %v12077_v7  ;;  %v17719_v60 = vld [vmem:[%s24352_s19 + $0xe8] ss:$36 sps:$4 sm:$0xff]   ;;  %v17722_v56 = vld [vmem:[%s24352_s19 + $0xf0] ss:$36 sps:$4 sm:$0xff]  }
 0xbab   : > { %v15838_v57 = vpop.f32.mrf.mxu1 }
 0xbbc   : > { %v16271_v51 = vpop.f32.mrf.mxu1 }
 0xbbe   : > { %v12244_v47 = vpop.f32.mrf.mxu1 }
 0xbc0   : > { %v16272_v23 = vpop.f32.mrf.mxu1 }
 0xbc2   : > { %v12247_v24 = vpop.f32.mrf.mxu1 }
 0xbc4   : > { %v23970_v42 = vpop.f32.mrf.mxu1 }
 0xbc6   : > { %v23972_v40 = vpop.f32.mrf.mxu1 }
 0xbc8   : > { %v16276_v6 = vpop.f32.mrf.mxu1 }
 0xbc9   : > { %v17728_v6 = vld [vmem:[%s24352_s19 + $0xa8] ss:$36 sps:$4 sm:$0xff]  }
 0xbca   : > { %v12263_v41 = vpop.f32.mrf.mxu1 }
 0xbd4   : > { %v15856_v22 = vpop.f32.mrf.mxu0 }
 0xbd6   : > { %v15857_v48 = vpop.f32.mrf.mxu0 }
 0xbd7   : > { %v15858_v12 = vadd.f32 %v15857_v48, %v15856_v22  ;;  %v17733_v48 = vld [vmem:[%s24352_s19 + $0x5c] ss:$36 sps:$4 sm:$0xff]  }
 0xbd8   : > { %v15859_v50 = vpop.f32.mrf.mxu0 }
 0xbd9   : > { %v12181_v31 = vadd.f32 %v15858_v12, %v12117_v19  ;;  %v17736_v12 = vld [vmem:[%s24352_s19 + $0x64] ss:$36 sps:$4 sm:$0xff]  }
 0xbda   : > { %v15860_v32 = vpop.f32.mrf.mxu0 }
 0xbdb   : > { %v15861_v53 = vadd.f32 %v15860_v32, %v15859_v50  ;;  %v12245_v36 = vadd.f32 %v12244_v47, %v12181_v31  ;;  %v17734_v50 = vld [vmem:[%s24352_s19 + $0x60] ss:$36 sps:$4 sm:$0xff]  }
 0xbdc   : > { %v15862_v46 = vpop.f32.mrf.mxu0  ;;  %v17742_v31 = vld [vmem:[%s24352_s19 + $0x1c] ss:$36 sps:$4 sm:$0xff]  }
 0xbdd   : > { %v12184_v45 = vadd.f32 %v15861_v53, %v12120_v61  ;;  %v17710_v61 = vld [vmem:[%s24352_s19 + $0x180] ss:$36 sps:$4 sm:$0xff]   ;;  %v17739_v53 = vld [vmem:[%s24352_s19 + $0x14] ss:$36 sps:$4 sm:$0xff]  }
 0xbde   : > { %v15863_v34 = vpop.f32.mrf.mxu0 }
 0xbdf   : > { %v15864_v20 = vadd.f32 %v15863_v34, %v15862_v46  ;;  %v12248_v0 = vadd.f32 %v12247_v24, %v12184_v45  ;;  %v17730_v24 = vld [vmem:[%s24352_s19 + $0xac] ss:$36 sps:$4 sm:$0xff]   ;;  %v17740_v45 = vld [vmem:[%s24352_s19 + $0x18] ss:$36 sps:$4 sm:$0xff]  }
 0xbe0   : > { %v15865_v38 = vpop.f32.mrf.mxu0  ;;  %v17737_v46 = vld [vmem:[%s24352_s19 + $0x10] ss:$36 sps:$4 sm:$0xff]   ;;  %v17743_v34 = vld [vmem:[%s24352_s19 + $0x218] ss:$36 sps:$4 sm:$0xff]  }
 0xbe1   : > { %v23980_v2 = vpack.c.bf16 %v12248_v0, %v12245_v36  ;;  %v12189_v3 = vadd.f32 %v15864_v20, %v12125_v1  ;;  %v17744_v36 = vld [vmem:[%s24352_s19 + $0x1d0] ss:$36 sps:$4 sm:$0xff]   ;;  %v17745_v20 = vld [vmem:[%s24352_s19 + $0x188] ss:$36 sps:$4 sm:$0xff]   ;;  %v17746_v0 = vld [vmem:[%s24352_s19 + $0x140] ss:$36 sps:$4 sm:$0xff]  }
 0xbe2   : > { %v15866_v26 = vpop.f32.mrf.mxu0 }
 0xbe3   : > { %v15867_v54 = vadd.f32 %v15866_v26, %v15865_v38  ;;  %12759 = vmatmul.mubr.bf16.vlgmr.msra.gmra.mxu0 %v23980_v2  ;;  %12830 = vmatmul.mubr.bf16.vlgmr.msra.gmra.mxu1 %v23980_v2  ;;  %v12253_v10 = vadd.f32 %v16271_v51, %v12189_v3  ;;  %v17747_v38 = vld [vmem:[%s24352_s19 + $0xf8] ss:$36 sps:$4 sm:$0xff]  }
 0xbe4   : > { %v15868_v21 = vpop.f32.mrf.mxu0  ;;  %12869 = vmatpush1.bf16.msra.mxu0 %v17695_v16  ;;  %12940 = vmatpush1.bf16.msra.mxu1 %v17698_v43  ;;  %v17748_v16 = vld [vmem:[%s24352_s19 + $0xb0] ss:$36 sps:$4 sm:$0xff]   ;;  %v17749_v43 = vld [vmem:[%s24352_s19 + $0x68] ss:$36 sps:$4 sm:$0xff]  }
 0xbe5   : > { %v12192_v7 = vadd.f32 %v15867_v54, %v12128_v49  ;;  %12870 = vmatprep.subr.bf16.mxu0 %v17703_v13  ;;  %12941 = vmatprep.subr.bf16.mxu1 %v17706_v4  ;;  %v17713_v49 = vld [vmem:[%s24352_s19 + $0x130] ss:$36 sps:$4 sm:$0xff]   ;;  %v17750_v13 = vld [vmem:[%s24352_s19 + $0x20] ss:$36 sps:$4 sm:$0xff]   ;;  %v17756_v4 = vld [vmem:[%s24351_s18 + $0xc] ss:$16 sps:$4 sm:$0xff]  }
 0xbe6   : > { %v15869_v33 = vpop.f32.mrf.mxu0  ;;  %12768 = vmatprep.mubr.bf16.mxu0 %v24727_v11  ;;  %12839 = vmatprep.mubr.bf16.mxu1 %v24727_v11 }
 0xbe7   : > { %v12256_v19 = vadd.f32 %v16272_v23, %v12192_v7  ;;  %v15870_v8 = vadd.f32 %v15869_v33, %v15868_v21  ;;  %v17727_v23 = vld [vmem:[%s24352_s19 + $0xa4] ss:$36 sps:$4 sm:$0xff]  }
 0xbe8   : > { %v15871_v9 = vpop.f32.mrf.mxu0  ;;  %12871 = vmatpush1.bf16.msra.mxu0 %v17701_v37  ;;  %12942 = vmatpush1.bf16.msra.mxu1 %v17704_v25 }
 0xbe9   : > { %v24010_v39 = vpack.c.bf16 %v12256_v19, %v12253_v10  ;;  %12872 = vmatprep.subr.bf16.mxu0 %v17709_v35  ;;  %12943 = vmatprep.subr.bf16.mxu1 %v17712_v30  ;;  %v12197_v5 = vadd.f32 %v15870_v8, %v23964_v59  ;;  %v17724_v59 = vld [vmem:[%s24352_s19 + $0xf4] ss:$36 sps:$4 sm:$0xff]  }
 0xbea   : > { %v15872_v1 = vpop.f32.mrf.mxu0 }
 0xbeb   : > { %v15873_v52 = vadd.f32 %v15872_v1, %v15871_v9  ;;  %12769 = vmatmul.mubr.bf16.gmra.mxu0 %v24010_v39  ;;  %12840 = vmatmul.mubr.bf16.gmra.mxu1 %v24010_v39  ;;  %v12261_v29 = vadd.f32 %v23972_v40, %v12197_v5 }
 0xbec   : > { %v15874_v14 = vpop.f32.mrf.mxu0  ;;  %12873 = vmatpush1.bf16.msra.mxu0 %v17707_v18  ;;  %12944 = vmatpush1.bf16.msra.mxu1 %v17710_v61 }
 0xbed   : > { %v12200_v28 = vadd.f32 %v15873_v52, %v23966_v44  ;;  %12874 = vmatprep.subr.bf16.mxu0 %v17715_v15  ;;  %12945 = vmatprep.subr.bf16.mxu1 %v17718_v63 }
 0xbee   : > { %v15875_v62 = vpop.f32.mrf.mxu0  ;;  %12778 = vmatprep.mubr.bf16.mxu0 %v24727_v11  ;;  %12849 = vmatprep.mubr.bf16.mxu1 %v24727_v11 }
 0xbef   : > { %v15876_v17 = vadd.f32 %v15875_v62, %v15874_v14  ;;  %v12264_v44 = vadd.f32 %v12263_v41, %v12200_v28 }
 0xbf0   : > { %12875 = vmatpush1.bf16.msra.mxu0 %v17713_v49  ;;  %12946 = vmatpush1.bf16.msra.mxu1 %v17716_v58  ;;  %v15877_v57 = vpop.f32.mrf.mxu0 }
 0xbf1   : > { %v12205_v51 = vadd.f32 %v15876_v17, %v23968_v55  ;;  %v24044_v47 = vpack.c.bf16 %v12264_v44, %v12261_v29  ;;  %12876 = vmatprep.subr.bf16.mxu0 %v17721_v27  ;;  %12947 = vmatprep.subr.bf16.mxu1 %v17724_v59  ;;  %v17725_v55 = vld [vmem:[%s24352_s19 + $0xa0] ss:$36 sps:$4 sm:$0xff]  }
 0xbf2   : > { %v15878_v40 = vpop.f32.mrf.mxu0 }
 0xbf3   : > { %12779 = vmatmul.mubr.bf16.gmra.mxu0 %v24044_v47  ;;  %12850 = vmatmul.mubr.bf16.gmra.mxu1 %v24044_v47  ;;  %v12269_v22 = vadd.f32 %v23970_v42, %v12205_v51  ;;  %v17731_v42 = vld [vmem:[%s24352_s19 + $0x58] ss:$36 sps:$4 sm:$0xff]  }
 0xbf4   : > { %12877 = vmatpush1.bf16.msra.mxu0 %v17719_v60  ;;  %12948 = vmatpush1.bf16.msra.mxu1 %v17722_v56 }
 0xbf5   : > { %12878 = vmatprep.subr.bf16.mxu0 %v17727_v23  ;;  %12949 = vmatprep.subr.bf16.mxu1 %v17730_v24  ;;  %v12277_v32 = vpack.c.bf16 %v12269_v22, %v12269_v22 }
 0xbf6   : > { %12788 = vmatprep.mubr.bf16.mxu0 %v24727_v11  ;;  %12859 = vmatprep.mubr.bf16.mxu1 %v24727_v11 }
 0xbf8   : > { %12879 = vmatpush1.bf16.msra.mxu0 %v17725_v55  ;;  %12950 = vmatpush1.bf16.msra.mxu1 %v17728_v6 }
 0xbf9   : > { %12880 = vmatprep.subr.bf16.mxu0 %v17733_v48  ;;  %12951 = vmatprep.subr.bf16.mxu1 %v17736_v12 }
 0xbfb   : > { %12789 = vmatmul.mubr.bf16.gmra.mxu0 %v12277_v32  ;;  %12860 = vmatmul.mubr.bf16.gmra.mxu1 %v12277_v32 }
 0xbfc   : > { %12881 = vmatpush1.bf16.msra.mxu0 %v17731_v42  ;;  %12952 = vmatpush1.bf16.msra.mxu1 %v17734_v50 }
 0xbfd   : > { %12882 = vmatprep.subr.bf16.mxu0 %v17739_v53  ;;  %12953 = vmatprep.subr.bf16.mxu1 %v17742_v31 }
 0xbfe   : > { %12900 = vmatprep.mubr.bf16.mxu0 %v24727_v11  ;;  %12971 = vmatprep.mubr.bf16.mxu1 %v24727_v11 }
 0xc00   : > { %12883 = vmatpush1.bf16.msra.mxu0 %v17737_v46  ;;  %12954 = vmatpush1.bf16.msra.mxu1 %v17740_v45 }
 0xc01   : > { %16277 = vmatprep.subr.bf16.mxu0 %v17743_v34 }
 0xc03   : > { %12901 = vmatmul.mubr.bf16.vlgmr.msra.gmra.mxu0 %v23980_v2  ;;  %12972 = vmatmul.mubr.bf16.vlgmr.msra.gmra.mxu1 %v23980_v2 }
 0xc04   : > { %16278 = vmatpush3.bf16.msra.mxu0 %v17743_v34  ;;  %12910 = vmatprep.mubr.bf16.mxu0 %v24727_v11 }
 0xc05   : > { %16279 = vmatprep.subr.bf16.mxu0 %v17744_v36  ;;  %12981 = vmatprep.mubr.bf16.mxu1 %v24727_v11 }
 0xc08   : > { %16280 = vmatpush3.bf16.msra.mxu0 %v17744_v36 }
 0xc09   : > { %16281 = vmatprep.subr.bf16.mxu0 %v17745_v20 }
 0xc0b   : > { %12911 = vmatmul.mubr.bf16.gmra.mxu0 %v24010_v39  ;;  %12982 = vmatmul.mubr.bf16.gmra.mxu1 %v24010_v39 }
 0xc0c   : > { %16282 = vmatpush3.bf16.msra.mxu0 %v17745_v20  ;;  %12920 = vmatprep.mubr.bf16.mxu0 %v24727_v11 }
 0xc0d   : > { %16283 = vmatprep.subr.bf16.mxu0 %v17746_v0  ;;  %12991 = vmatprep.mubr.bf16.mxu1 %v24727_v11 }
 0xc10   : > { %16284 = vmatpush3.bf16.msra.mxu0 %v17746_v0 }
 0xc11   : > { %16285 = vmatprep.subr.bf16.mxu0 %v17747_v38 }
 0xc13   : > { %12921 = vmatmul.mubr.bf16.gmra.mxu0 %v24044_v47  ;;  %12992 = vmatmul.mubr.bf16.gmra.mxu1 %v24044_v47 }
 0xc14   : > { %16286 = vmatpush3.bf16.msra.mxu0 %v17747_v38  ;;  %12930 = vmatprep.mubr.bf16.mxu0 %v24727_v11 }
 0xc15   : > { %16287 = vmatprep.subr.bf16.mxu0 %v17748_v16  ;;  %13001 = vmatprep.mubr.bf16.mxu1 %v24727_v11  ;;  %v17753_v11 = vld [vmem:[%s24351_s18 + $0x4] ss:$16 sps:$4 sm:$0xff]  }
 0xc18   : > { %16288 = vmatpush3.bf16.msra.mxu0 %v17748_v16 }
 0xc19   : > { %16289 = vmatprep.subr.bf16.mxu0 %v17749_v43 }
 0xc1b   : > { %12931 = vmatmul.mubr.bf16.gmra.mxu0 %v12277_v32  ;;  %13002 = vmatmul.mubr.bf16.gmra.mxu1 %v12277_v32 }
 0xc1c   : > { %16290 = vmatpush3.bf16.msra.mxu0 %v17749_v43  ;;  %16293 = vmatprep.mubr.bf16.mxu0 %v23980_v2 }
 0xc1d   : > { %16291 = vmatprep.subr.bf16.mxu0 %v17750_v13  ;;  %13251 = vmatprep.mubr.bf16.mxu1 %v17753_v11 }
 0xc20   : > { %16292 = vmatpush3.bf16.msra.mxu0 %v17750_v13 }
 0xc23   : > { %16294 = vmatmul.mubr.bf16.vlgmr.msra.gmra.mxu0 %v24010_v39 }
 0xc24   : > { %16297 = vmatprep.mubr.bf16.mxu0 %v24044_v47 }
 0xc2b   : > { %16298 = vmatmul.mubr.bf16.gmra.mxu0 %v12277_v32 }
 0xc2c   : > { %14528 = vmatprep.mubr.msk.bf16.mxu0 %vm13212_vm4, %v17756_v4 }
 0xca3   : > { %v24134_v26 = vpop.f32.mrf.mxu0  ;;  %v12831_v2 = vpop.f32.mrf.mxu1 }
 0xca5   : > { %v24136_v3 = vpop.f32.mrf.mxu0  ;;  %v24138_v54 = vpop.f32.mrf.mxu1 }
 0xca7   : > { %v24140_v21 = vpop.f32.mrf.mxu0  ;;  %v12835_v37 = vpop.f32.mrf.mxu1 }
 0xca8   : > { %v13074_v25 = vpack.c.bf16 %v24140_v21, %v24134_v26  ;;  %v13076_v31 = vpack.c.bf16 %v12835_v37, %v12831_v2 }
 0xca9   : > { %v24144_v7 = vpop.f32.mrf.mxu0  ;;  %v24146_v35 = vpop.f32.mrf.mxu1 }
 0xcab   : > { %v24148_v30 = vpop.f32.mrf.mxu0  ;;  %v24150_v33 = vpop.f32.mrf.mxu1 }
 0xcad   : > { %v24152_v10 = vpop.f32.mrf.mxu0  ;;  %v24154_v19 = vpop.f32.mrf.mxu1 }
 0xcaf   : > { %v24156_v8 = vpop.f32.mrf.mxu0  ;;  %v24158_v9 = vpop.f32.mrf.mxu1 }
 0xcb1   : > { %v12776_v18 = vpop.f32.mrf.mxu0  ;;  %v12847_v61 = vpop.f32.mrf.mxu1 }
 0xcb2   : > { %v13084_v43 = vpack.c.bf16 %v12776_v18, %v24152_v10  ;;  %v13086_v11 = vpack.c.bf16 %v12847_v61, %v24154_v19  ;;  %v13075_v10 = vpack.c.bf16 %v24144_v7, %v24136_v3  ;;  %v13077_v19 = vpack.c.bf16 %v24146_v35, %v24138_v54 }
 0xcb3   : > { %v24160_v39 = vpop.f32.mrf.mxu0  ;;  %v24162_v15 = vpop.f32.mrf.mxu1 }
 0xcb4   : > { %v13115_v18 = vrot.slane %v13084_v43, 4  ;;  %v13129_v61 = vrot.slane %v13086_v11, 4  ;;  %v13114_v3 = vrot.slane %v13075_v10, 4  ;;  %v13128_v7 = vrot.slane %v13077_v19, 4 }
 0xcb5   : > { %v12782_v63 = vpop.f32.mrf.mxu0  ;;  %v12853_v1 = vpop.f32.mrf.mxu1  ;;  %v13083_v43 = vpack.c.bf16 %v24156_v8, %v24148_v30  ;;  %v13085_v11 = vpack.c.bf16 %v24158_v9, %v24150_v33 }
 0xcb6   : > { %v13116_v35 = vsel %vm6563_vm2, %v13114_v3, %v13115_v18 }
 0xcb7   : > { %v24164_v52 = vpop.f32.mrf.mxu0  ;;  %v24166_v5 = vpop.f32.mrf.mxu1 }
 0xcb9   : > { %v12786_v14 = vpop.f32.mrf.mxu0  ;;  %v12857_v49 = vpop.f32.mrf.mxu1 }
 0xcba   : > { %v13093_v32 = vpack.c.bf16 %v12786_v14, %v12782_v63  ;;  %v13095_v46 = vpack.c.bf16 %v12857_v49, %v12853_v1 }
 0xcbb   : > { %v24168_v58 = vpop.f32.mrf.mxu0  ;;  %v24170_v28 = vpop.f32.mrf.mxu1 }
 0xcbc   : > { %v13117_v13 = vrot.slane %v13093_v32, 4  ;;  %v13131_v4 = vrot.slane %v13095_v46, 4  ;;  %v13101_v54 = vpack.c.bf16 %v24168_v58, %v24168_v58  ;;  %v13092_v58 = vpack.c.bf16 %v24164_v52, %v24160_v39 }
 0xcbd   : > { %v12792_v27 = vpop.f32.mrf.mxu0  ;;  %v12863_v59 = vpop.f32.mrf.mxu1 }
 0xcbe   : > { %v13102_v48 = vpack.c.bf16 %v12792_v27, %v12792_v27  ;;  %v13104_v12 = vpack.c.bf16 %v12863_v59, %v12863_v59 }
 0xcbf   : > { %v12794_v62 = vpop.f32.mrf.mxu0  ;;  %v12865_v41 = vpop.f32.mrf.mxu1 }
 0xcc0   : > { %v13119_v36 = vrot.slane %v13102_v48, 4  ;;  %v13133_v0 = vrot.slane %v13104_v12, 4  ;;  %v13118_v62 = vsel %vm6563_vm2, %v13115_v18, %v13117_v13 }
 0xcc1   : > { %v12795_v29 = vpop.f32.mrf.mxu0  ;;  %v12866_v17 = vpop.f32.mrf.mxu1 }
 0xcc2   : > { %v13120_v63 = vsel %vm6563_vm2, %v13117_v13, %v13119_v36  ;;  %v13134_v49 = vsel %vm6563_vm2, %v13131_v4, %v13133_v0  ;;  %v13132_v17 = vsel %vm6563_vm2, %v13129_v61, %v13131_v4 }
 0xcc3   : > { %v12902_v44 = vpop.f32.mrf.mxu0  ;;  %v24172_v60 = vpop.f32.mrf.mxu1 }
 0xcc5   : > { %v24174_v56 = vpop.f32.mrf.mxu0  ;;  %v24176_v57 = vpop.f32.mrf.mxu1 }
 0xcc7   : > { %v12906_v51 = vpop.f32.mrf.mxu0  ;;  %v24178_v47 = vpop.f32.mrf.mxu1 }
 0xcc8   : > { %v13078_v20 = vpack.c.bf16 %v12906_v51, %v12902_v44  ;;  %v13080_v26 = vpack.c.bf16 %v24178_v47, %v24172_v60 }
 0xcc9   : > { %v24180_v23 = vpop.f32.mrf.mxu0  ;;  %v24182_v24 = vpop.f32.mrf.mxu1 }
 0xcca   : > { %v13079_v47 = vpack.c.bf16 %v24180_v23, %v24174_v56 }
 0xccb   : > { %v12912_v40 = vpop.f32.mrf.mxu0  ;;  %v24184_v55 = vpop.f32.mrf.mxu1 }
 0xccd   : > { %v24186_v6 = vpop.f32.mrf.mxu0  ;;  %v24188_v22 = vpop.f32.mrf.mxu1 }
 0xccf   : > { %v12916_v42 = vpop.f32.mrf.mxu0  ;;  %v24190_v50 = vpop.f32.mrf.mxu1 }
 0xcd0   : > { %v13087_v53 = vpack.c.bf16 %v12916_v42, %v12912_v40  ;;  %v13103_v40 = vpack.c.bf16 %v24170_v28, %v24170_v28  ;;  %v13130_v42 = vsel %vm6563_vm2, %v13128_v7, %v13129_v61  ;;  %v13094_v28 = vpack.c.bf16 %v24166_v5, %v24162_v15  ;;  %v17751_v15 = vld [vmem:[%s24351_s18] ss:$16 sps:$4 sm:$0xff]  }
 0xcd1   : > { %v24192_v45 = vpop.f32.mrf.mxu0  ;;  %v24194_v34 = vpop.f32.mrf.mxu1  ;;  %v13089_v8 = vpack.c.bf16 %v24190_v50, %v24184_v55 }
 0xcd2   : > { %15897 = vmatprep.subr.bf16.mxu1 %v13087_v53  ;;  %v13172_v36 = vsel %vm6563_vm2, %v13103_v40, %v13128_v7  ;;  %v13088_v55 = vpack.c.bf16 %v24192_v45, %v24186_v6  ;;  %v13090_v19 = vpack.c.bf16 %v24194_v34, %v24188_v22  ;;  %v13142_v34 = vrot.slane %v13079_v47, 4 }
 0xcd3   : > { %v24196_v38 = vpop.f32.mrf.mxu0  ;;  %v24198_v16 = vpop.f32.mrf.mxu1  ;;  %15898 = vmatpush3.bf16.msra.mxu1 %v13076_v31  ;;  %v13168_v31 = vsel %vm6563_vm2, %v13101_v54, %v13114_v3  ;;  %v14523_v54 = vld [vmem:[%s24353_s20] ss:$0 sm:$0xff] }
 0xcd4   : > { %15899 = vmatprep.subr.bf16.mxu1 %v13078_v20  ;;  %v13157_v6 = vrot.slane %v13090_v19, 4 }
 0xcd5   : > { %v24202_v2 = vpop.f32.mrf.mxu0  ;;  %v24204_v37 = vpop.f32.mrf.mxu1 }
 0xcd7   : > { %v24207_v1 = vpop.f32.mrf.mxu0  ;;  %v12997_v14 = vpop.f32.mrf.mxu1  ;;  %15900 = vmatpush3.bf16.msra.mxu1 %v13120_v63 }
 0xcd8   : > { %15901 = vmatprep.subr.bf16.mxu1 %v13134_v49  ;;  %v13098_v39 = vpack.c.bf16 %v12997_v14, %v24198_v16  ;;  %v13096_v3 = vpack.c.bf16 %v24207_v1, %v24196_v38 }
 0xcd9   : > { %v24214_v27 = vpop.f32.mrf.mxu0  ;;  %v24216_v59 = vpop.f32.mrf.mxu1 }
 0xcda   : > { %v13097_v49 = vpack.c.bf16 %v24214_v27, %v24202_v2  ;;  %v13099_v21 = vpack.c.bf16 %v24216_v59, %v24204_v37  ;;  %v13143_v37 = vrot.slane %v13088_v55, 4  ;;  %v13081_v27 = vpack.c.bf16 %v24182_v24, %v24176_v57 }
 0xcdb   : > { %v24219_v41 = vpop.f32.mrf.mxu0  ;;  %v24221_v29 = vpop.f32.mrf.mxu1  ;;  %15902 = vmatpush3.bf16.msra.mxu1 %v13118_v62 }
 0xcdc   : > { %15903 = vmatprep.subr.bf16.mxu1 %v13132_v17  ;;  %v13145_v50 = vrot.slane %v13097_v49, 4  ;;  %v13159_v2 = vrot.slane %v13099_v21, 4  ;;  %v13156_v59 = vrot.slane %v13081_v27, 4  ;;  %v13105_v62 = vpack.c.bf16 %v24219_v41, %v24219_v41  ;;  %v17754_v41 = vld [vmem:[%s24351_s18 + $0x8] ss:$16 sps:$4 sm:$0xff]  }
 0xcdd   : > { %v12934_v44 = vpop.f32.mrf.mxu0  ;;  %v13005_v51 = vpop.f32.mrf.mxu1  ;;  %v13144_v17 = vsel %vm6563_vm2, %v13142_v34, %v13143_v37  ;;  %v13107_v56 = vpack.c.bf16 %v24221_v29, %v24221_v29 }
 0xcde   : > { %v13106_v9 = vpack.c.bf16 %v12934_v44, %v12934_v44  ;;  %v13108_v14 = vpack.c.bf16 %v13005_v51, %v13005_v51  ;;  %v13146_v45 = vsel %vm6563_vm2, %v13143_v37, %v13145_v50  ;;  %v13160_v22 = vsel %vm6563_vm2, %v13157_v6, %v13159_v2 }
 0xcdf   : > { %v12936_v48 = vpop.f32.mrf.mxu0  ;;  %v13007_v12 = vpop.f32.mrf.mxu1  ;;  %15904 = vmatpush3.bf16.msra.mxu1 %v13116_v35  ;;  %v13158_v57 = vsel %vm6563_vm2, %v13156_v59, %v13157_v6  ;;  %v13176_v23 = vsel %vm6563_vm2, %v13105_v62, %v13142_v34  ;;  %v13180_v24 = vsel %vm6563_vm2, %v13107_v56, %v13156_v59 }
 0xce0   : > { %15905 = vmatprep.subr.bf16.mxu1 %v13130_v42  ;;  %v13161_v18 = vrot.slane %v13108_v14, 4 }
 0xce1   : > { %v12937_v32 = vpop.f32.mrf.mxu0  ;;  %v13008_v53 = vpop.f32.mrf.mxu1 }
 0xce2   : > { %v13162_v60 = vsel %vm6563_vm2, %v13159_v2, %v13161_v18 }
 0xce3   : > { %v16295_v46 = vpop.f32.mrf.mxu0  ;;  %15906 = vmatpush3.bf16.msra.mxu1 %v13168_v31 }
 0xce4   : > { %15907 = vmatprep.subr.bf16.mxu1 %v13172_v36 }
 0xce5   : > { %v13044_v20 = vpop.f32.mrf.mxu0 }
 0xce7   : > { %v16296_v0 = vpop.f32.mrf.mxu0  ;;  %15908 = vmatpush3.bf16.msra.mxu1 %v13092_v58 }
 0xce8   : > { %15909 = vmatprep.subr.bf16.mxu1 %v13094_v28  ;;  %v13091_v16 = vpack.c.bf16 %v16296_v0, %v16295_v46 }
 0xce9   : > { %v13047_v13 = vpop.f32.mrf.mxu0 }
 0xcea   : > { %v13082_v10 = vpack.c.bf16 %v13047_v13, %v13044_v20 }
 0xceb   : > { %v16299_v4 = vpop.f32.mrf.mxu0  ;;  %15910 = vmatpush3.bf16.msra.mxu1 %v13083_v43 }
 0xcec   : > { %v13109_v63 = vpack.c.bf16 %v16299_v4, %v16299_v4  ;;  %15911 = vmatprep.subr.bf16.mxu1 %v13085_v11 }
 0xced   : > { %v13060_v52 = vpop.f32.mrf.mxu0 }
 0xcee   : > { %16303 = vmatprep.subr.msk.bf16.mxu0 %vm6563_vm2, %v13109_v63 }
 0xcef   : > { %v16300_v5 = vpop.f32.mrf.mxu0  ;;  %15912 = vmatpush3.bf16.msra.mxu1 %v13074_v25  ;;  %15920 = vmatpush3.bf16.msra.mxu0 %v13098_v39  ;;  %v13147_v25 = vrot.slane %v13106_v9, 4 }
 0xcf1   : > { %v13063_v30 = vpop.f32.mrf.mxu0  ;;  %v13148_v61 = vsel %vm6563_vm2, %v13145_v50, %v13147_v25 }
 0xcf2   : > { %v13100_v33 = vpack.c.bf16 %v13063_v30, %v13060_v52  ;;  %13252 = vmatmul.mubr.bf16.vlgmr.msra.gmra.mxu1 %v17751_v15 }
 0xcf4   : > { %15921 = vmatprep.subr.bf16.mxu0 %v13100_v33 }
 0xcf5   : > { %15922 = vmatpush3.bf16.msra.mxu0 %v13089_v8 }
 0xcf6   : > { %15923 = vmatprep.subr.bf16.mxu0 %v13091_v16 }
 0xcf9   : > { %15924 = vmatpush3.bf16.msra.mxu0 %v13080_v26 }
 0xcfa   : > { %15925 = vmatprep.subr.bf16.mxu0 %v13082_v10 }
 0xcfd   : > { %15926 = vmatpush3.bf16.msra.mxu0 %v13148_v61 }
 0xcfe   : > { %15927 = vmatprep.subr.bf16.mxu0 %v13162_v60 }
 0xd01   : > { %15928 = vmatpush3.bf16.msra.mxu0 %v13146_v45 }
 0xd02   : > { %15929 = vmatprep.subr.bf16.mxu0 %v13160_v22 }
 0xd05   : > { %15930 = vmatpush3.bf16.msra.mxu0 %v13144_v17 }
 0xd06   : > { %15931 = vmatprep.subr.bf16.mxu0 %v13158_v57 }
 0xd09   : > { %15932 = vmatpush3.bf16.msra.mxu0 %v13176_v23 }
 0xd0a   : > { %15933 = vmatprep.subr.bf16.mxu0 %v13180_v24 }
 0xd0d   : > { %15934 = vmatpush3.bf16.msra.mxu0 %v13096_v3 }
 0xd10   : > { %13293 = vmatmul.mubr.bf16.vlgmr.msra.gmra.mxu0 %v17754_v41 }
 0xdb2   : > { %v15913_v29 = vpop.f32.mrf.mxu1 }
 0xdb4   : > { %v15914_v7 = vpop.f32.mrf.mxu1 }
 0xdb5   : > { %v15915_v51 = vadd.f32 %v15914_v7, %v15913_v29 }
 0xdb6   : > { %v15916_v44 = vpop.f32.mrf.mxu1 }
 0xdb7   : > { %v13254_v38 = vadd.f32 %v15915_v51, %v14523_v54 }
 0xdb8   : > { %v15917_v40 = vpop.f32.mrf.mxu1 }
 0xdb9   : > { %v15918_v12 = vadd.f32 %v15917_v40, %v15916_v44 }
 0xdbb   : > { %v13257_v46 = vadd.f32 %v15918_v12, %v14523_v54 }
 0xdd0   : > { %v15935_v35 = vpop.f32.mrf.mxu0 }
 0xdd2   : > { %v15936_v48 = vpop.f32.mrf.mxu0 }
 0xdd3   : > { %v15937_v1 = vadd.f32 %v15936_v48, %v15935_v35 }
 0xdd4   : > { %v15938_v42 = vpop.f32.mrf.mxu0 }
 0xdd5   : > { %v13295_v32 = vadd.f32 %v15937_v1, %v13254_v38 }
 0xdd6   : > { %v15939_v53 = vpop.f32.mrf.mxu0 }
 0xdd7   : > { %v13301_v31 = vmax.f32 %v13295_v32, 0.0  ;;  %v15940_v36 = vadd.f32 %v15939_v53, %v15938_v42 }
 0xdd9   : > { %13303 = vst [vmem:[%s748_s29] sm:$0xff] %v13301_v31  ;;  %v13298_v58 = vadd.f32 %v15940_v36, %v13257_v46 }
 0xddb   : > { %v13302_v20 = vmax.f32 %v13298_v58, 0.0 }
 0xddd   : > { %13304 = vst [vmem:[%s748_s29 + $0x8] sm:$0xff] %v13302_v20 }
 0xdde   : > { %17771 = shalt.err (!%p17768_p3)
}
 0xddf   : > { %s17772_s24 = scalar_lea.hbm %s24291_s5, 256  ;;  %s17776_s3 = scalar_lea.hbm %s24730_s6, 512 }
 0xde0   : > { %p17773_p4 = scmp.ne.s32.totalorder %s24291_s5, %s17772_s24  ;;  %p17777_p9 = scmp.lt.s32.totalorder %s24291_s5, %s24730_s6 }
 0xde1   : > { %p17778_p10 = scmp.lt.s32.totalorder %s17776_s3, %s17772_s24 }
 0xde2   : > { %p17774_p7 = pnand %p17773_p4, %p17984_p5 }
 0xde3   : > { %p17779_p11 = por %p17778_p10, %p17777_p9 }
 0xde4   : > { %p17775_p8 = pneg %p17774_p7 }
 0xde6   : > { %p17780_p12 = pnand %p17779_p11, %p17775_p8 }
 0xde8   : > { %17783 = shalt.err (!%p17780_p12)
}
 0xde9   : > { %s17824_s0 = smov 128   ;;  %s17825_s27 = smov 8  }
 0xdea   : > { %16306 = dma.vmem_to_hbm [thread:$0]  (%p17984_p5), %s24286_s1, 256, %s24291_s5, %s24293_s7, %s17824_s0, %s17824_s0, %s17825_s27  }
 0xdeb PF: > { %s24731_s2 = sld [smem:[#allocation7_spill]] }
 0xdec   : > { %s24732_s29 = sld [smem:[#allocation5_spill]] }
 0xdf1   : > { %p16312_p13 = scmp.ge.s32.totalorder %s24731_s2, 2 }
 0xdf2   : > { %s13366_s8 = sand.u32 1, %s24732_s29  }
 0xdf3   : > { %p16309_p0 = pnand %p16312_p13, %p17988_p6  ;;  %s13367_s24 = scalar_lea.sflag [#allocation3], %s13366_s8 }
 0xdf5   : > { %p16310_p1 = pneg %p16309_p0 }
 0xdf7   : > { %17801 = dma.done.wait (%p16310_p1), %s13367_s24, 256  }
 0xdf8   : > { %17803 = vsyncadd (%p16310_p1), %s13367_s24, 4294967040  ;;  %s24734_s25 = sld [smem:[#allocation9_spill]]  ;;  %s24737_s4 = smov %s17810_s30 }
 0xdf9   : > { %s24735_s3 = sld [smem:[#allocation6_spill]] }
 0xdfa   : > { %s24736_s24 = sld [smem:[#allocation10_spill]] }
 0xdfe   : > { %p34_p2 = scmp.ge.s32.totalorder %s24734_s25, 4  }
 0xdff   : > { %s24738_s30 = smov %s24735_s3 }
 0xe00   :  { %36 = sbr.rel (!%p34_p2) target bundleno = 15 (0xf), region = 169 }
 0xe05   :  { %13372 = vsyncpa [#allocation3], 1 }
 0xe06   :  { %13374 = vsyncpa [#allocation3 + $0x1], 1 }

</bundles_post_ra>
